<compile_context>
chip_gen: v7x
topology: tpu7x:2x2x1
jax: 0.10.0
libtpu: 0.0.40
codegen_flags: <defaults>
</compile_context>

<pallas_src>
import functools

import jax
import jax.numpy as jnp
from jax import lax
from jax.experimental import pallas as pl
from jax.experimental.pallas import tpu as pltpu


# ---------------------------------------------------------------------------
# Fused Conv(k x k, stride 1, "same" padding) + bias + ReLU.
# Whole padded input, weights and output live in VMEM (single invocation).
# ---------------------------------------------------------------------------
def _conv_relu_kernel(x_ref, w_ref, b_ref, o_ref, *, ksz):
    nbatch, hout, wout, cout = o_ref.shape
    cin = w_ref.shape[1]
    bias = b_ref[...]                                   # (1, cout) f32

    def row_body(r, carry):
        for n in range(nbatch):                         # small static batch
            acc = jnp.zeros((wout, cout), jnp.float32)
            for kh in range(ksz):                       # 5x5 taps, unrolled
                for kw in range(ksz):
                    xw = x_ref[n, r + kh, kw:kw + wout, :]   # (wout, cin) bf16
                    wk = w_ref[kh * ksz + kw]                # (cin, cout) bf16
                    if cin == 1:
                        # Degenerate K=1 contraction -> VPU outer product.
                        acc = acc + xw.astype(jnp.float32) * wk.astype(jnp.float32)
                    else:
                        acc = acc + jnp.dot(
                            xw, wk, preferred_element_type=jnp.float32
                        )
            y = jnp.maximum(acc + bias, 0.0)
            o_ref[n, r, :, :] = y.astype(o_ref.dtype)
        return carry

    lax.fori_loop(0, hout, row_body, 0)


def conv_relu(x_nhwc, w_taps, b):
    """x: (N,H,W,Cin) NHWC; w_taps: (k*k, Cin, Cout) bf16; b: (1, Cout) f32."""
    N, H, W, Cin = x_nhwc.shape
    ntaps, Cin2, Cout = w_taps.shape
    ksz = int(round(ntaps ** 0.5))
    assert Cin == Cin2 and ksz * ksz == ntaps
    pad = ksz // 2
    xp = jnp.pad(x_nhwc.astype(jnp.bfloat16),
                 ((0, 0), (pad, pad), (pad, pad), (0, 0)))
    flops = 2 * N * H * W * ntaps * Cin * Cout
    bytes_accessed = xp.size * 2 + w_taps.size * 2 + b.size * 4 + N * H * W * Cout * 2
    return pl.pallas_call(
        functools.partial(_conv_relu_kernel, ksz=ksz),
        out_shape=jax.ShapeDtypeStruct((N, H, W, Cout), jnp.bfloat16),
        cost_estimate=pl.CostEstimate(
            flops=flops, transcendentals=0, bytes_accessed=int(bytes_accessed)
        ),
    )(xp, w_taps.astype(jnp.bfloat16), b.astype(jnp.float32))


# ---------------------------------------------------------------------------
# 2x2 max-pool (stride 2), single full-block pass.
#   Outside the kernel (free reshapes):  (N,H,W,C) -> (N,Ho,2,Wo,2C)
#   Inside: max over the H-pair axis and the two lane halves (W-pair).
# ---------------------------------------------------------------------------
def _maxpool_kernel(x_ref, o_ref, *, c):
    a = x_ref[:, :, 0, :, :]                            # (N, Ho, Wo, 2C)
    b = x_ref[:, :, 1, :, :]
    m = jnp.maximum(a, b)                               # max over H pair
    o_ref[...] = jnp.maximum(m[..., :c], m[..., c:])    # max over W pair


def maxpool2x2(y):
    N, H, W, C = y.shape
    Ho, Wo = H // 2, W // 2
    z = y.reshape(N, Ho, 2, Wo, 2 * C)
    return pl.pallas_call(
        functools.partial(_maxpool_kernel, c=C),
        out_shape=jax.ShapeDtypeStruct((N, Ho, Wo, C), y.dtype),
        cost_estimate=pl.CostEstimate(
            flops=3 * N * Ho * Wo * C, transcendentals=0,
            bytes_accessed=int(y.size * 2 + N * Ho * Wo * C * 2),
        ),
    )(z)


# ---------------------------------------------------------------------------
# Fully-connected layer: out = x @ w + b (optional ReLU), bf16 MXU, f32 acc.
# Single full-K step; grid only over N tiles (>=2 parallel blocks when wide).
# ---------------------------------------------------------------------------
def _fc_kernel(x_ref, w_ref, b_ref, o_ref, *, relu):
    acc = jnp.dot(x_ref[...], w_ref[...], preferred_element_type=jnp.float32)
    acc = acc + b_ref[...]
    if relu:
        acc = jnp.maximum(acc, 0.0)
    o_ref[...] = acc.astype(o_ref.dtype)


def fc(x, w, b, *, relu=False, out_dtype=jnp.float32):
    M, K = x.shape
    Kw, N = w.shape
    assert K == Kw and b.shape == (1, N)
    x = x.astype(jnp.bfloat16)
    w = w.astype(jnp.bfloat16)
    b = b.astype(jnp.float32)
    # tn=512 keeps the double-buffered weight tile at ~6.4 MB (safe on v5e's
    # 16 MiB scoped VMEM) and gives 2 parallel N blocks for v7x's two TCs.
    tn = 512 if (N % 512 == 0 and N > 512) else N
    flops = 2 * M * K * N
    bytes_accessed = M * K * 2 + K * N * 2 + N * 4 + M * N * jnp.dtype(out_dtype).itemsize
    return pl.pallas_call(
        functools.partial(_fc_kernel, relu=relu),
        out_shape=jax.ShapeDtypeStruct((M, N), out_dtype),
        grid=(N // tn,),
        in_specs=[
            pl.BlockSpec((M, K), lambda j: (0, 0)),      # activations stay resident
            pl.BlockSpec((K, tn), lambda j: (0, j)),
            pl.BlockSpec((1, tn), lambda j: (0, j)),
        ],
        out_specs=pl.BlockSpec((M, tn), lambda j: (0, j)),
        compiler_params=pltpu.CompilerParams(dimension_semantics=("parallel",)),
        cost_estimate=pl.CostEstimate(
            flops=flops, transcendentals=0, bytes_accessed=int(bytes_accessed)
        ),
    )(x, w, b)


# ---------------------------------------------------------------------------
# Parameters: PyTorch-shaped init + one-time matmul/tap-loop-ready re-layout.
# ---------------------------------------------------------------------------
def init_params(key):
    ks = jax.random.split(key, 8)

    def nrm(k, shape, scale):
        return scale * jax.random.normal(k, shape, dtype=jnp.float32)

    # shapes match the PyTorch module's parameters (OIHW convs, (out,in) Linear)
    return {
        "w1": nrm(ks[0], (32, 1, 5, 5), 0.1),
        "b1": nrm(ks[1], (32,), 0.1),
        "w2": nrm(ks[2], (64, 32, 5, 5), 0.05),
        "b2": nrm(ks[3], (64,), 0.05),
        "wfc1": nrm(ks[4], (1000, 7 * 7 * 64), 0.02),
        "bfc1": nrm(ks[5], (1000,), 0.02),
        "wfc2": nrm(ks[6], (10, 1000), 0.05),
        "bfc2": nrm(ks[7], (10,), 0.05),
    }


def prepare_params(params):
    """One-time offline weight re-layout: bf16, tap-ordered convs, NHWC fc1."""
    # convs: OIHW -> (kh*kw, Cin, Cout)
    w1 = jnp.transpose(params["w1"], (2, 3, 1, 0)).reshape(25, 1, 32).astype(jnp.bfloat16)
    w2 = jnp.transpose(params["w2"], (2, 3, 1, 0)).reshape(25, 32, 64).astype(jnp.bfloat16)

    # fc1: PyTorch flattens (C,H,W); we flatten NHWC, so permute the input axis
    # to (h,w,c) order.  Output dim padded 1000 -> 1024 with exact zeros.
    wfc1 = params["wfc1"].reshape(1000, 64, 7, 7)                   # (out, c, h, w)
    wfc1 = jnp.transpose(wfc1, (2, 3, 1, 0)).reshape(7 * 7 * 64, 1000)
    wfc1 = jnp.pad(wfc1, ((0, 0), (0, 1024 - 1000))).astype(jnp.bfloat16)
    bfc1 = jnp.pad(params["bfc1"], (0, 1024 - 1000)).astype(jnp.float32).reshape(1, 1024)

    # fc2: (10, 1000) -> (1000, 10); pad K 1000 -> 1024 with zero rows so it can
    # consume fc1's (exactly zero) padded output columns without any slicing.
    wfc2 = jnp.pad(params["wfc2"].T, ((0, 1024 - 1000), (0, 0))).astype(jnp.bfloat16)

    return {
        "w1": w1, "b1": params["b1"].reshape(1, 32).astype(jnp.float32),
        "w2": w2, "b2": params["b2"].reshape(1, 64).astype(jnp.float32),
        "wfc1": wfc1, "bfc1": bfc1,
        "wfc2": wfc2, "bfc2": params["bfc2"].reshape(1, 10).astype(jnp.float32),
    }


# ---------------------------------------------------------------------------
# Full forward pass (matches PyTorch ConvNet.forward, eval mode).
# ---------------------------------------------------------------------------
def convnet_forward(x_nchw, p):
    N = x_nchw.shape[0]
    x = jnp.transpose(x_nchw, (0, 2, 3, 1)).astype(jnp.bfloat16)    # NCHW -> NHWC
    # layer1: Conv(1->32, 5, pad=2) + ReLU + MaxPool2
    y = conv_relu(x, p["w1"], p["b1"])          # (N, 28, 28, 32)
    y = maxpool2x2(y)                           # (N, 14, 14, 32)
    # layer2: Conv(32->64, 5, pad=2) + ReLU + MaxPool2
    y = conv_relu(y, p["w2"], p["b2"])          # (N, 14, 14, 64)
    y = maxpool2x2(y)                           # (N, 7, 7, 64)
    # flatten in native NHWC order (fc1 weights were pre-permuted to match)
    flat = y.reshape(N, 7 * 7 * 64)             # (N, 3136), no K padding
    # TODO(synk): nn.Dropout() is identity at inference; training-mode random mask not implemented.
    h = fc(flat, p["wfc1"], p["bfc1"], relu=False, out_dtype=jnp.bfloat16)  # (N, 1024)
    out = fc(h, p["wfc2"], p["bfc2"], relu=False, out_dtype=jnp.float32)    # (N, 10)
    return out


if __name__ == "__main__":
    key = jax.random.PRNGKey(0)
    pkey, xkey = jax.random.split(key)
    params = prepare_params(init_params(pkey))   # one-time weight re-layout

    # fc1 in_features = 7*7*64 forces a 28x28 single-channel input (MNIST-style).
    x = jax.random.normal(xkey, (2, 1, 28, 28), dtype=jnp.float32)

    out = jax.jit(convnet_forward)(x, params)
    out = jax.block_until_ready(out)

    assert out.shape == (2, 10), out.shape
    assert bool(jnp.all(jnp.isfinite(out)))
    print("KERNEL_OK")
</pallas_src>

<mosaic_0001>
module attributes {stable_mosaic.version = 11 : i64} {
  func.func @_conv_relu_kernel(%arg0: memref<2x32x32x1xbf16, #tpu.memory_space<vmem>>, %arg1: memref<25x1x32xbf16, #tpu.memory_space<vmem>>, %arg2: memref<1x32xf32, #tpu.memory_space<vmem>>, %arg3: memref<2x28x28x32xbf16, #tpu.memory_space<vmem>>) attributes {dimension_semantics = [], scalar_prefetch = 0 : i64, scratch_operands = 0 : i64, tpu.core_type = #tpu.core_type<tc>} {
    %c0 = arith.constant 0 : index
    %c0_0 = arith.constant 0 : index
    %0 = vector.load %arg2[%c0, %c0_0] : memref<1x32xf32, #tpu.memory_space<vmem>>, vector<1x32xf32>
    %c0_i32 = arith.constant 0 : i32
    %c28_i32 = arith.constant 28 : i32
    %1 = arith.addi %c0_i32, %c28_i32 : i32
    %c1_i32 = arith.constant 1 : i32
    scf.for %arg4 = %c0_i32 to %1 step %c1_i32  : i32 {
      %cst = arith.constant 0.000000e+00 : f32
      %2 = vector.broadcast %cst : f32 to vector<28x32xf32>
      %c0_i32_2 = arith.constant 0 : i32
      %3 = arith.addi %arg4, %c0_i32_2 : i32
      %c0_3 = arith.constant 0 : index
      %4 = arith.index_cast %3 : i32 to index
      %c0_4 = arith.constant 0 : index
      %c0_5 = arith.constant 0 : index
      %5 = vector.load %arg0[%c0_3, %4, %c0_4, %c0_5] : memref<2x32x32x1xbf16, #tpu.memory_space<vmem>>, vector<1x1x28x1xbf16>
      %6 = vector.shape_cast %5 : vector<1x1x28x1xbf16> to vector<28x1xbf16>
      %c0_6 = arith.constant 0 : index
      %c0_7 = arith.constant 0 : index
      %c0_8 = arith.constant 0 : index
      %7 = vector.load %arg1[%c0_6, %c0_7, %c0_8] : memref<25x1x32xbf16, #tpu.memory_space<vmem>>, vector<1x1x32xbf16>
      %8 = vector.shape_cast %7 : vector<1x1x32xbf16> to vector<1x32xbf16>
      %9 = arith.extf %6 : vector<28x1xbf16> to vector<28x1xf32>
      %10 = arith.extf %8 : vector<1x32xbf16> to vector<1x32xf32>
      %11 = vector.broadcast %9 : vector<28x1xf32> to vector<28x32xf32>
      %12 = vector.broadcast %10 : vector<1x32xf32> to vector<28x32xf32>
      %13 = arith.mulf %11, %12 : vector<28x32xf32>
      %14 = arith.addf %2, %13 : vector<28x32xf32>
      %c0_i32_9 = arith.constant 0 : i32
      %15 = arith.addi %arg4, %c0_i32_9 : i32
      %c0_10 = arith.constant 0 : index
      %16 = arith.index_cast %15 : i32 to index
      %c1 = arith.constant 1 : index
      %c0_11 = arith.constant 0 : index
      %17 = vector.load %arg0[%c0_10, %16, %c1, %c0_11] : memref<2x32x32x1xbf16, #tpu.memory_space<vmem>>, vector<1x1x28x1xbf16>
      %18 = vector.shape_cast %17 : vector<1x1x28x1xbf16> to vector<28x1xbf16>
      %c1_12 = arith.constant 1 : index
      %c0_13 = arith.constant 0 : index
      %c0_14 = arith.constant 0 : index
      %19 = vector.load %arg1[%c1_12, %c0_13, %c0_14] : memref<25x1x32xbf16, #tpu.memory_space<vmem>>, vector<1x1x32xbf16>
      %20 = vector.shape_cast %19 : vector<1x1x32xbf16> to vector<1x32xbf16>
      %21 = arith.extf %18 : vector<28x1xbf16> to vector<28x1xf32>
      %22 = arith.extf %20 : vector<1x32xbf16> to vector<1x32xf32>
      %23 = vector.broadcast %21 : vector<28x1xf32> to vector<28x32xf32>
      %24 = vector.broadcast %22 : vector<1x32xf32> to vector<28x32xf32>
      %25 = arith.mulf %23, %24 : vector<28x32xf32>
      %26 = arith.addf %14, %25 : vector<28x32xf32>
      %c0_i32_15 = arith.constant 0 : i32
      %27 = arith.addi %arg4, %c0_i32_15 : i32
      %c0_16 = arith.constant 0 : index
      %28 = arith.index_cast %27 : i32 to index
      %c2 = arith.constant 2 : index
      %c0_17 = arith.constant 0 : index
      %29 = vector.load %arg0[%c0_16, %28, %c2, %c0_17] : memref<2x32x32x1xbf16, #tpu.memory_space<vmem>>, vector<1x1x28x1xbf16>
      %30 = vector.shape_cast %29 : vector<1x1x28x1xbf16> to vector<28x1xbf16>
      %c2_18 = arith.constant 2 : index
      %c0_19 = arith.constant 0 : index
      %c0_20 = arith.constant 0 : index
      %31 = vector.load %arg1[%c2_18, %c0_19, %c0_20] : memref<25x1x32xbf16, #tpu.memory_space<vmem>>, vector<1x1x32xbf16>
      %32 = vector.shape_cast %31 : vector<1x1x32xbf16> to vector<1x32xbf16>
      %33 = arith.extf %30 : vector<28x1xbf16> to vector<28x1xf32>
      %34 = arith.extf %32 : vector<1x32xbf16> to vector<1x32xf32>
      %35 = vector.broadcast %33 : vector<28x1xf32> to vector<28x32xf32>
      %36 = vector.broadcast %34 : vector<1x32xf32> to vector<28x32xf32>
      %37 = arith.mulf %35, %36 : vector<28x32xf32>
      %38 = arith.addf %26, %37 : vector<28x32xf32>
      %c0_i32_21 = arith.constant 0 : i32
      %39 = arith.addi %arg4, %c0_i32_21 : i32
      %c0_22 = arith.constant 0 : index
      %40 = arith.index_cast %39 : i32 to index
      %c3 = arith.constant 3 : index
      %c0_23 = arith.constant 0 : index
      %41 = vector.load %arg0[%c0_22, %40, %c3, %c0_23] : memref<2x32x32x1xbf16, #tpu.memory_space<vmem>>, vector<1x1x28x1xbf16>
      %42 = vector.shape_cast %41 : vector<1x1x28x1xbf16> to vector<28x1xbf16>
      %c3_24 = arith.constant 3 : index
      %c0_25 = arith.constant 0 : index
      %c0_26 = arith.constant 0 : index
      %43 = vector.load %arg1[%c3_24, %c0_25, %c0_26] : memref<25x1x32xbf16, #tpu.memory_space<vmem>>, vector<1x1x32xbf16>
      %44 = vector.shape_cast %43 : vector<1x1x32xbf16> to vector<1x32xbf16>
      %45 = arith.extf %42 : vector<28x1xbf16> to vector<28x1xf32>
      %46 = arith.extf %44 : vector<1x32xbf16> to vector<1x32xf32>
      %47 = vector.broadcast %45 : vector<28x1xf32> to vector<28x32xf32>
      %48 = vector.broadcast %46 : vector<1x32xf32> to vector<28x32xf32>
      %49 = arith.mulf %47, %48 : vector<28x32xf32>
      %50 = arith.addf %38, %49 : vector<28x32xf32>
      %c0_i32_27 = arith.constant 0 : i32
      %51 = arith.addi %arg4, %c0_i32_27 : i32
      %c0_28 = arith.constant 0 : index
      %52 = arith.index_cast %51 : i32 to index
      %c4 = arith.constant 4 : index
      %c0_29 = arith.constant 0 : index
      %53 = vector.load %arg0[%c0_28, %52, %c4, %c0_29] : memref<2x32x32x1xbf16, #tpu.memory_space<vmem>>, vector<1x1x28x1xbf16>
      %54 = vector.shape_cast %53 : vector<1x1x28x1xbf16> to vector<28x1xbf16>
      %c4_30 = arith.constant 4 : index
      %c0_31 = arith.constant 0 : index
      %c0_32 = arith.constant 0 : index
      %55 = vector.load %arg1[%c4_30, %c0_31, %c0_32] : memref<25x1x32xbf16, #tpu.memory_space<vmem>>, vector<1x1x32xbf16>
      %56 = vector.shape_cast %55 : vector<1x1x32xbf16> to vector<1x32xbf16>
      %57 = arith.extf %54 : vector<28x1xbf16> to vector<28x1xf32>
      %58 = arith.extf %56 : vector<1x32xbf16> to vector<1x32xf32>
      %59 = vector.broadcast %57 : vector<28x1xf32> to vector<28x32xf32>
      %60 = vector.broadcast %58 : vector<1x32xf32> to vector<28x32xf32>
      %61 = arith.mulf %59, %60 : vector<28x32xf32>
      %62 = arith.addf %50, %61 : vector<28x32xf32>
      %c1_i32_33 = arith.constant 1 : i32
      %63 = arith.addi %arg4, %c1_i32_33 : i32
      %c0_34 = arith.constant 0 : index
      %64 = arith.index_cast %63 : i32 to index
      %c0_35 = arith.constant 0 : index
      %c0_36 = arith.constant 0 : index
      %65 = vector.load %arg0[%c0_34, %64, %c0_35, %c0_36] : memref<2x32x32x1xbf16, #tpu.memory_space<vmem>>, vector<1x1x28x1xbf16>
      %66 = vector.shape_cast %65 : vector<1x1x28x1xbf16> to vector<28x1xbf16>
      %c5 = arith.constant 5 : index
      %c0_37 = arith.constant 0 : index
      %c0_38 = arith.constant 0 : index
      %67 = vector.load %arg1[%c5, %c0_37, %c0_38] : memref<25x1x32xbf16, #tpu.memory_space<vmem>>, vector<1x1x32xbf16>
      %68 = vector.shape_cast %67 : vector<1x1x32xbf16> to vector<1x32xbf16>
      %69 = arith.extf %66 : vector<28x1xbf16> to vector<28x1xf32>
      %70 = arith.extf %68 : vector<1x32xbf16> to vector<1x32xf32>
      %71 = vector.broadcast %69 : vector<28x1xf32> to vector<28x32xf32>
      %72 = vector.broadcast %70 : vector<1x32xf32> to vector<28x32xf32>
      %73 = arith.mulf %71, %72 : vector<28x32xf32>
      %74 = arith.addf %62, %73 : vector<28x32xf32>
      %c1_i32_39 = arith.constant 1 : i32
      %75 = arith.addi %arg4, %c1_i32_39 : i32
      %c0_40 = arith.constant 0 : index
      %76 = arith.index_cast %75 : i32 to index
      %c1_41 = arith.constant 1 : index
      %c0_42 = arith.constant 0 : index
      %77 = vector.load %arg0[%c0_40, %76, %c1_41, %c0_42] : memref<2x32x32x1xbf16, #tpu.memory_space<vmem>>, vector<1x1x28x1xbf16>
      %78 = vector.shape_cast %77 : vector<1x1x28x1xbf16> to vector<28x1xbf16>
      %c6 = arith.constant 6 : index
      %c0_43 = arith.constant 0 : index
      %c0_44 = arith.constant 0 : index
      %79 = vector.load %arg1[%c6, %c0_43, %c0_44] : memref<25x1x32xbf16, #tpu.memory_space<vmem>>, vector<1x1x32xbf16>
      %80 = vector.shape_cast %79 : vector<1x1x32xbf16> to vector<1x32xbf16>
      %81 = arith.extf %78 : vector<28x1xbf16> to vector<28x1xf32>
      %82 = arith.extf %80 : vector<1x32xbf16> to vector<1x32xf32>
      %83 = vector.broadcast %81 : vector<28x1xf32> to vector<28x32xf32>
      %84 = vector.broadcast %82 : vector<1x32xf32> to vector<28x32xf32>
      %85 = arith.mulf %83, %84 : vector<28x32xf32>
      %86 = arith.addf %74, %85 : vector<28x32xf32>
      %c1_i32_45 = arith.constant 1 : i32
      %87 = arith.addi %arg4, %c1_i32_45 : i32
      %c0_46 = arith.constant 0 : index
      %88 = arith.index_cast %87 : i32 to index
      %c2_47 = arith.constant 2 : index
      %c0_48 = arith.constant 0 : index
      %89 = vector.load %arg0[%c0_46, %88, %c2_47, %c0_48] : memref<2x32x32x1xbf16, #tpu.memory_space<vmem>>, vector<1x1x28x1xbf16>
      %90 = vector.shape_cast %89 : vector<1x1x28x1xbf16> to vector<28x1xbf16>
      %c7 = arith.constant 7 : index
      %c0_49 = arith.constant 0 : index
      %c0_50 = arith.constant 0 : index
      %91 = vector.load %arg1[%c7, %c0_49, %c0_50] : memref<25x1x32xbf16, #tpu.memory_space<vmem>>, vector<1x1x32xbf16>
      %92 = vector.shape_cast %91 : vector<1x1x32xbf16> to vector<1x32xbf16>
      %93 = arith.extf %90 : vector<28x1xbf16> to vector<28x1xf32>
      %94 = arith.extf %92 : vector<1x32xbf16> to vector<1x32xf32>
      %95 = vector.broadcast %93 : vector<28x1xf32> to vector<28x32xf32>
      %96 = vector.broadcast %94 : vector<1x32xf32> to vector<28x32xf32>
      %97 = arith.mulf %95, %96 : vector<28x32xf32>
      %98 = arith.addf %86, %97 : vector<28x32xf32>
      %c1_i32_51 = arith.constant 1 : i32
      %99 = arith.addi %arg4, %c1_i32_51 : i32
      %c0_52 = arith.constant 0 : index
      %100 = arith.index_cast %99 : i32 to index
      %c3_53 = arith.constant 3 : index
      %c0_54 = arith.constant 0 : index
      %101 = vector.load %arg0[%c0_52, %100, %c3_53, %c0_54] : memref<2x32x32x1xbf16, #tpu.memory_space<vmem>>, vector<1x1x28x1xbf16>
      %102 = vector.shape_cast %101 : vector<1x1x28x1xbf16> to vector<28x1xbf16>
      %c8 = arith.constant 8 : index
      %c0_55 = arith.constant 0 : index
      %c0_56 = arith.constant 0 : index
      %103 = vector.load %arg1[%c8, %c0_55, %c0_56] : memref<25x1x32xbf16, #tpu.memory_space<vmem>>, vector<1x1x32xbf16>
      %104 = vector.shape_cast %103 : vector<1x1x32xbf16> to vector<1x32xbf16>
      %105 = arith.extf %102 : vector<28x1xbf16> to vector<28x1xf32>
      %106 = arith.extf %104 : vector<1x32xbf16> to vector<1x32xf32>
      %107 = vector.broadcast %105 : vector<28x1xf32> to vector<28x32xf32>
      %108 = vector.broadcast %106 : vector<1x32xf32> to vector<28x32xf32>
      %109 = arith.mulf %107, %108 : vector<28x32xf32>
      %110 = arith.addf %98, %109 : vector<28x32xf32>
      %c1_i32_57 = arith.constant 1 : i32
      %111 = arith.addi %arg4, %c1_i32_57 : i32
      %c0_58 = arith.constant 0 : index
      %112 = arith.index_cast %111 : i32 to index
      %c4_59 = arith.constant 4 : index
      %c0_60 = arith.constant 0 : index
      %113 = vector.load %arg0[%c0_58, %112, %c4_59, %c0_60] : memref<2x32x32x1xbf16, #tpu.memory_space<vmem>>, vector<1x1x28x1xbf16>
      %114 = vector.shape_cast %113 : vector<1x1x28x1xbf16> to vector<28x1xbf16>
      %c9 = arith.constant 9 : index
      %c0_61 = arith.constant 0 : index
      %c0_62 = arith.constant 0 : index
      %115 = vector.load %arg1[%c9, %c0_61, %c0_62] : memref<25x1x32xbf16, #tpu.memory_space<vmem>>, vector<1x1x32xbf16>
      %116 = vector.shape_cast %115 : vector<1x1x32xbf16> to vector<1x32xbf16>
      %117 = arith.extf %114 : vector<28x1xbf16> to vector<28x1xf32>
      %118 = arith.extf %116 : vector<1x32xbf16> to vector<1x32xf32>
      %119 = vector.broadcast %117 : vector<28x1xf32> to vector<28x32xf32>
      %120 = vector.broadcast %118 : vector<1x32xf32> to vector<28x32xf32>
      %121 = arith.mulf %119, %120 : vector<28x32xf32>
      %122 = arith.addf %110, %121 : vector<28x32xf32>
      %c2_i32 = arith.constant 2 : i32
      %123 = arith.addi %arg4, %c2_i32 : i32
      %c0_63 = arith.constant 0 : index
      %124 = arith.index_cast %123 : i32 to index
      %c0_64 = arith.constant 0 : index
      %c0_65 = arith.constant 0 : index
      %125 = vector.load %arg0[%c0_63, %124, %c0_64, %c0_65] : memref<2x32x32x1xbf16, #tpu.memory_space<vmem>>, vector<1x1x28x1xbf16>
      %126 = vector.shape_cast %125 : vector<1x1x28x1xbf16> to vector<28x1xbf16>
      %c10 = arith.constant 10 : index
      %c0_66 = arith.constant 0 : index
      %c0_67 = arith.constant 0 : index
      %127 = vector.load %arg1[%c10, %c0_66, %c0_67] : memref<25x1x32xbf16, #tpu.memory_space<vmem>>, vector<1x1x32xbf16>
      %128 = vector.shape_cast %127 : vector<1x1x32xbf16> to vector<1x32xbf16>
      %129 = arith.extf %126 : vector<28x1xbf16> to vector<28x1xf32>
      %130 = arith.extf %128 : vector<1x32xbf16> to vector<1x32xf32>
      %131 = vector.broadcast %129 : vector<28x1xf32> to vector<28x32xf32>
      %132 = vector.broadcast %130 : vector<1x32xf32> to vector<28x32xf32>
      %133 = arith.mulf %131, %132 : vector<28x32xf32>
      %134 = arith.addf %122, %133 : vector<28x32xf32>
      %c2_i32_68 = arith.constant 2 : i32
      %135 = arith.addi %arg4, %c2_i32_68 : i32
      %c0_69 = arith.constant 0 : index
      %136 = arith.index_cast %135 : i32 to index
      %c1_70 = arith.constant 1 : index
      %c0_71 = arith.constant 0 : index
      %137 = vector.load %arg0[%c0_69, %136, %c1_70, %c0_71] : memref<2x32x32x1xbf16, #tpu.memory_space<vmem>>, vector<1x1x28x1xbf16>
      %138 = vector.shape_cast %137 : vector<1x1x28x1xbf16> to vector<28x1xbf16>
      %c11 = arith.constant 11 : index
      %c0_72 = arith.constant 0 : index
      %c0_73 = arith.constant 0 : index
      %139 = vector.load %arg1[%c11, %c0_72, %c0_73] : memref<25x1x32xbf16, #tpu.memory_space<vmem>>, vector<1x1x32xbf16>
      %140 = vector.shape_cast %139 : vector<1x1x32xbf16> to vector<1x32xbf16>
      %141 = arith.extf %138 : vector<28x1xbf16> to vector<28x1xf32>
      %142 = arith.extf %140 : vector<1x32xbf16> to vector<1x32xf32>
      %143 = vector.broadcast %141 : vector<28x1xf32> to vector<28x32xf32>
      %144 = vector.broadcast %142 : vector<1x32xf32> to vector<28x32xf32>
      %145 = arith.mulf %143, %144 : vector<28x32xf32>
      %146 = arith.addf %134, %145 : vector<28x32xf32>
      %c2_i32_74 = arith.constant 2 : i32
      %147 = arith.addi %arg4, %c2_i32_74 : i32
      %c0_75 = arith.constant 0 : index
      %148 = arith.index_cast %147 : i32 to index
      %c2_76 = arith.constant 2 : index
      %c0_77 = arith.constant 0 : index
      %149 = vector.load %arg0[%c0_75, %148, %c2_76, %c0_77] : memref<2x32x32x1xbf16, #tpu.memory_space<vmem>>, vector<1x1x28x1xbf16>
      %150 = vector.shape_cast %149 : vector<1x1x28x1xbf16> to vector<28x1xbf16>
      %c12 = arith.constant 12 : index
      %c0_78 = arith.constant 0 : index
      %c0_79 = arith.constant 0 : index
      %151 = vector.load %arg1[%c12, %c0_78, %c0_79] : memref<25x1x32xbf16, #tpu.memory_space<vmem>>, vector<1x1x32xbf16>
      %152 = vector.shape_cast %151 : vector<1x1x32xbf16> to vector<1x32xbf16>
      %153 = arith.extf %150 : vector<28x1xbf16> to vector<28x1xf32>
      %154 = arith.extf %152 : vector<1x32xbf16> to vector<1x32xf32>
      %155 = vector.broadcast %153 : vector<28x1xf32> to vector<28x32xf32>
      %156 = vector.broadcast %154 : vector<1x32xf32> to vector<28x32xf32>
      %157 = arith.mulf %155, %156 : vector<28x32xf32>
      %158 = arith.addf %146, %157 : vector<28x32xf32>
      %c2_i32_80 = arith.constant 2 : i32
      %159 = arith.addi %arg4, %c2_i32_80 : i32
      %c0_81 = arith.constant 0 : index
      %160 = arith.index_cast %159 : i32 to index
      %c3_82 = arith.constant 3 : index
      %c0_83 = arith.constant 0 : index
      %161 = vector.load %arg0[%c0_81, %160, %c3_82, %c0_83] : memref<2x32x32x1xbf16, #tpu.memory_space<vmem>>, vector<1x1x28x1xbf16>
      %162 = vector.shape_cast %161 : vector<1x1x28x1xbf16> to vector<28x1xbf16>
      %c13 = arith.constant 13 : index
      %c0_84 = arith.constant 0 : index
      %c0_85 = arith.constant 0 : index
      %163 = vector.load %arg1[%c13, %c0_84, %c0_85] : memref<25x1x32xbf16, #tpu.memory_space<vmem>>, vector<1x1x32xbf16>
      %164 = vector.shape_cast %163 : vector<1x1x32xbf16> to vector<1x32xbf16>
      %165 = arith.extf %162 : vector<28x1xbf16> to vector<28x1xf32>
      %166 = arith.extf %164 : vector<1x32xbf16> to vector<1x32xf32>
      %167 = vector.broadcast %165 : vector<28x1xf32> to vector<28x32xf32>
      %168 = vector.broadcast %166 : vector<1x32xf32> to vector<28x32xf32>
      %169 = arith.mulf %167, %168 : vector<28x32xf32>
      %170 = arith.addf %158, %169 : vector<28x32xf32>
      %c2_i32_86 = arith.constant 2 : i32
      %171 = arith.addi %arg4, %c2_i32_86 : i32
      %c0_87 = arith.constant 0 : index
      %172 = arith.index_cast %171 : i32 to index
      %c4_88 = arith.constant 4 : index
      %c0_89 = arith.constant 0 : index
      %173 = vector.load %arg0[%c0_87, %172, %c4_88, %c0_89] : memref<2x32x32x1xbf16, #tpu.memory_space<vmem>>, vector<1x1x28x1xbf16>
      %174 = vector.shape_cast %173 : vector<1x1x28x1xbf16> to vector<28x1xbf16>
      %c14 = arith.constant 14 : index
      %c0_90 = arith.constant 0 : index
      %c0_91 = arith.constant 0 : index
      %175 = vector.load %arg1[%c14, %c0_90, %c0_91] : memref<25x1x32xbf16, #tpu.memory_space<vmem>>, vector<1x1x32xbf16>
      %176 = vector.shape_cast %175 : vector<1x1x32xbf16> to vector<1x32xbf16>
      %177 = arith.extf %174 : vector<28x1xbf16> to vector<28x1xf32>
      %178 = arith.extf %176 : vector<1x32xbf16> to vector<1x32xf32>
      %179 = vector.broadcast %177 : vector<28x1xf32> to vector<28x32xf32>
      %180 = vector.broadcast %178 : vector<1x32xf32> to vector<28x32xf32>
      %181 = arith.mulf %179, %180 : vector<28x32xf32>
      %182 = arith.addf %170, %181 : vector<28x32xf32>
      %c3_i32 = arith.constant 3 : i32
      %183 = arith.addi %arg4, %c3_i32 : i32
      %c0_92 = arith.constant 0 : index
      %184 = arith.index_cast %183 : i32 to index
      %c0_93 = arith.constant 0 : index
      %c0_94 = arith.constant 0 : index
      %185 = vector.load %arg0[%c0_92, %184, %c0_93, %c0_94] : memref<2x32x32x1xbf16, #tpu.memory_space<vmem>>, vector<1x1x28x1xbf16>
      %186 = vector.shape_cast %185 : vector<1x1x28x1xbf16> to vector<28x1xbf16>
      %c15 = arith.constant 15 : index
      %c0_95 = arith.constant 0 : index
      %c0_96 = arith.constant 0 : index
      %187 = vector.load %arg1[%c15, %c0_95, %c0_96] : memref<25x1x32xbf16, #tpu.memory_space<vmem>>, vector<1x1x32xbf16>
      %188 = vector.shape_cast %187 : vector<1x1x32xbf16> to vector<1x32xbf16>
      %189 = arith.extf %186 : vector<28x1xbf16> to vector<28x1xf32>
      %190 = arith.extf %188 : vector<1x32xbf16> to vector<1x32xf32>
      %191 = vector.broadcast %189 : vector<28x1xf32> to vector<28x32xf32>
      %192 = vector.broadcast %190 : vector<1x32xf32> to vector<28x32xf32>
      %193 = arith.mulf %191, %192 : vector<28x32xf32>
      %194 = arith.addf %182, %193 : vector<28x32xf32>
      %c3_i32_97 = arith.constant 3 : i32
      %195 = arith.addi %arg4, %c3_i32_97 : i32
      %c0_98 = arith.constant 0 : index
      %196 = arith.index_cast %195 : i32 to index
      %c1_99 = arith.constant 1 : index
      %c0_100 = arith.constant 0 : index
      %197 = vector.load %arg0[%c0_98, %196, %c1_99, %c0_100] : memref<2x32x32x1xbf16, #tpu.memory_space<vmem>>, vector<1x1x28x1xbf16>
      %198 = vector.shape_cast %197 : vector<1x1x28x1xbf16> to vector<28x1xbf16>
      %c16 = arith.constant 16 : index
      %c0_101 = arith.constant 0 : index
      %c0_102 = arith.constant 0 : index
      %199 = vector.load %arg1[%c16, %c0_101, %c0_102] : memref<25x1x32xbf16, #tpu.memory_space<vmem>>, vector<1x1x32xbf16>
      %200 = vector.shape_cast %199 : vector<1x1x32xbf16> to vector<1x32xbf16>
      %201 = arith.extf %198 : vector<28x1xbf16> to vector<28x1xf32>
      %202 = arith.extf %200 : vector<1x32xbf16> to vector<1x32xf32>
      %203 = vector.broadcast %201 : vector<28x1xf32> to vector<28x32xf32>
      %204 = vector.broadcast %202 : vector<1x32xf32> to vector<28x32xf32>
      %205 = arith.mulf %203, %204 : vector<28x32xf32>
      %206 = arith.addf %194, %205 : vector<28x32xf32>
      %c3_i32_103 = arith.constant 3 : i32
      %207 = arith.addi %arg4, %c3_i32_103 : i32
      %c0_104 = arith.constant 0 : index
      %208 = arith.index_cast %207 : i32 to index
      %c2_105 = arith.constant 2 : index
      %c0_106 = arith.constant 0 : index
      %209 = vector.load %arg0[%c0_104, %208, %c2_105, %c0_106] : memref<2x32x32x1xbf16, #tpu.memory_space<vmem>>, vector<1x1x28x1xbf16>
      %210 = vector.shape_cast %209 : vector<1x1x28x1xbf16> to vector<28x1xbf16>
      %c17 = arith.constant 17 : index
      %c0_107 = arith.constant 0 : index
      %c0_108 = arith.constant 0 : index
      %211 = vector.load %arg1[%c17, %c0_107, %c0_108] : memref<25x1x32xbf16, #tpu.memory_space<vmem>>, vector<1x1x32xbf16>
      %212 = vector.shape_cast %211 : vector<1x1x32xbf16> to vector<1x32xbf16>
      %213 = arith.extf %210 : vector<28x1xbf16> to vector<28x1xf32>
      %214 = arith.extf %212 : vector<1x32xbf16> to vector<1x32xf32>
      %215 = vector.broadcast %213 : vector<28x1xf32> to vector<28x32xf32>
      %216 = vector.broadcast %214 : vector<1x32xf32> to vector<28x32xf32>
      %217 = arith.mulf %215, %216 : vector<28x32xf32>
      %218 = arith.addf %206, %217 : vector<28x32xf32>
      %c3_i32_109 = arith.constant 3 : i32
      %219 = arith.addi %arg4, %c3_i32_109 : i32
      %c0_110 = arith.constant 0 : index
      %220 = arith.index_cast %219 : i32 to index
      %c3_111 = arith.constant 3 : index
      %c0_112 = arith.constant 0 : index
      %221 = vector.load %arg0[%c0_110, %220, %c3_111, %c0_112] : memref<2x32x32x1xbf16, #tpu.memory_space<vmem>>, vector<1x1x28x1xbf16>
      %222 = vector.shape_cast %221 : vector<1x1x28x1xbf16> to vector<28x1xbf16>
      %c18 = arith.constant 18 : index
      %c0_113 = arith.constant 0 : index
      %c0_114 = arith.constant 0 : index
      %223 = vector.load %arg1[%c18, %c0_113, %c0_114] : memref<25x1x32xbf16, #tpu.memory_space<vmem>>, vector<1x1x32xbf16>
      %224 = vector.shape_cast %223 : vector<1x1x32xbf16> to vector<1x32xbf16>
      %225 = arith.extf %222 : vector<28x1xbf16> to vector<28x1xf32>
      %226 = arith.extf %224 : vector<1x32xbf16> to vector<1x32xf32>
      %227 = vector.broadcast %225 : vector<28x1xf32> to vector<28x32xf32>
      %228 = vector.broadcast %226 : vector<1x32xf32> to vector<28x32xf32>
      %229 = arith.mulf %227, %228 : vector<28x32xf32>
      %230 = arith.addf %218, %229 : vector<28x32xf32>
      %c3_i32_115 = arith.constant 3 : i32
      %231 = arith.addi %arg4, %c3_i32_115 : i32
      %c0_116 = arith.constant 0 : index
      %232 = arith.index_cast %231 : i32 to index
      %c4_117 = arith.constant 4 : index
      %c0_118 = arith.constant 0 : index
      %233 = vector.load %arg0[%c0_116, %232, %c4_117, %c0_118] : memref<2x32x32x1xbf16, #tpu.memory_space<vmem>>, vector<1x1x28x1xbf16>
      %234 = vector.shape_cast %233 : vector<1x1x28x1xbf16> to vector<28x1xbf16>
      %c19 = arith.constant 19 : index
      %c0_119 = arith.constant 0 : index
      %c0_120 = arith.constant 0 : index
      %235 = vector.load %arg1[%c19, %c0_119, %c0_120] : memref<25x1x32xbf16, #tpu.memory_space<vmem>>, vector<1x1x32xbf16>
      %236 = vector.shape_cast %235 : vector<1x1x32xbf16> to vector<1x32xbf16>
      %237 = arith.extf %234 : vector<28x1xbf16> to vector<28x1xf32>
      %238 = arith.extf %236 : vector<1x32xbf16> to vector<1x32xf32>
      %239 = vector.broadcast %237 : vector<28x1xf32> to vector<28x32xf32>
      %240 = vector.broadcast %238 : vector<1x32xf32> to vector<28x32xf32>
      %241 = arith.mulf %239, %240 : vector<28x32xf32>
      %242 = arith.addf %230, %241 : vector<28x32xf32>
      %c4_i32 = arith.constant 4 : i32
      %243 = arith.addi %arg4, %c4_i32 : i32
      %c0_121 = arith.constant 0 : index
      %244 = arith.index_cast %243 : i32 to index
      %c0_122 = arith.constant 0 : index
      %c0_123 = arith.constant 0 : index
      %245 = vector.load %arg0[%c0_121, %244, %c0_122, %c0_123] : memref<2x32x32x1xbf16, #tpu.memory_space<vmem>>, vector<1x1x28x1xbf16>
      %246 = vector.shape_cast %245 : vector<1x1x28x1xbf16> to vector<28x1xbf16>
      %c20 = arith.constant 20 : index
      %c0_124 = arith.constant 0 : index
      %c0_125 = arith.constant 0 : index
      %247 = vector.load %arg1[%c20, %c0_124, %c0_125] : memref<25x1x32xbf16, #tpu.memory_space<vmem>>, vector<1x1x32xbf16>
      %248 = vector.shape_cast %247 : vector<1x1x32xbf16> to vector<1x32xbf16>
      %249 = arith.extf %246 : vector<28x1xbf16> to vector<28x1xf32>
      %250 = arith.extf %248 : vector<1x32xbf16> to vector<1x32xf32>
      %251 = vector.broadcast %249 : vector<28x1xf32> to vector<28x32xf32>
      %252 = vector.broadcast %250 : vector<1x32xf32> to vector<28x32xf32>
      %253 = arith.mulf %251, %252 : vector<28x32xf32>
      %254 = arith.addf %242, %253 : vector<28x32xf32>
      %c4_i32_126 = arith.constant 4 : i32
      %255 = arith.addi %arg4, %c4_i32_126 : i32
      %c0_127 = arith.constant 0 : index
      %256 = arith.index_cast %255 : i32 to index
      %c1_128 = arith.constant 1 : index
      %c0_129 = arith.constant 0 : index
      %257 = vector.load %arg0[%c0_127, %256, %c1_128, %c0_129] : memref<2x32x32x1xbf16, #tpu.memory_space<vmem>>, vector<1x1x28x1xbf16>
      %258 = vector.shape_cast %257 : vector<1x1x28x1xbf16> to vector<28x1xbf16>
      %c21 = arith.constant 21 : index
      %c0_130 = arith.constant 0 : index
      %c0_131 = arith.constant 0 : index
      %259 = vector.load %arg1[%c21, %c0_130, %c0_131] : memref<25x1x32xbf16, #tpu.memory_space<vmem>>, vector<1x1x32xbf16>
      %260 = vector.shape_cast %259 : vector<1x1x32xbf16> to vector<1x32xbf16>
      %261 = arith.extf %258 : vector<28x1xbf16> to vector<28x1xf32>
      %262 = arith.extf %260 : vector<1x32xbf16> to vector<1x32xf32>
      %263 = vector.broadcast %261 : vector<28x1xf32> to vector<28x32xf32>
      %264 = vector.broadcast %262 : vector<1x32xf32> to vector<28x32xf32>
      %265 = arith.mulf %263, %264 : vector<28x32xf32>
      %266 = arith.addf %254, %265 : vector<28x32xf32>
      %c4_i32_132 = arith.constant 4 : i32
      %267 = arith.addi %arg4, %c4_i32_132 : i32
      %c0_133 = arith.constant 0 : index
      %268 = arith.index_cast %267 : i32 to index
      %c2_134 = arith.constant 2 : index
      %c0_135 = arith.constant 0 : index
      %269 = vector.load %arg0[%c0_133, %268, %c2_134, %c0_135] : memref<2x32x32x1xbf16, #tpu.memory_space<vmem>>, vector<1x1x28x1xbf16>
      %270 = vector.shape_cast %269 : vector<1x1x28x1xbf16> to vector<28x1xbf16>
      %c22 = arith.constant 22 : index
      %c0_136 = arith.constant 0 : index
      %c0_137 = arith.constant 0 : index
      %271 = vector.load %arg1[%c22, %c0_136, %c0_137] : memref<25x1x32xbf16, #tpu.memory_space<vmem>>, vector<1x1x32xbf16>
      %272 = vector.shape_cast %271 : vector<1x1x32xbf16> to vector<1x32xbf16>
      %273 = arith.extf %270 : vector<28x1xbf16> to vector<28x1xf32>
      %274 = arith.extf %272 : vector<1x32xbf16> to vector<1x32xf32>
      %275 = vector.broadcast %273 : vector<28x1xf32> to vector<28x32xf32>
      %276 = vector.broadcast %274 : vector<1x32xf32> to vector<28x32xf32>
      %277 = arith.mulf %275, %276 : vector<28x32xf32>
      %278 = arith.addf %266, %277 : vector<28x32xf32>
      %c4_i32_138 = arith.constant 4 : i32
      %279 = arith.addi %arg4, %c4_i32_138 : i32
      %c0_139 = arith.constant 0 : index
      %280 = arith.index_cast %279 : i32 to index
      %c3_140 = arith.constant 3 : index
      %c0_141 = arith.constant 0 : index
      %281 = vector.load %arg0[%c0_139, %280, %c3_140, %c0_141] : memref<2x32x32x1xbf16, #tpu.memory_space<vmem>>, vector<1x1x28x1xbf16>
      %282 = vector.shape_cast %281 : vector<1x1x28x1xbf16> to vector<28x1xbf16>
      %c23 = arith.constant 23 : index
      %c0_142 = arith.constant 0 : index
      %c0_143 = arith.constant 0 : index
      %283 = vector.load %arg1[%c23, %c0_142, %c0_143] : memref<25x1x32xbf16, #tpu.memory_space<vmem>>, vector<1x1x32xbf16>
      %284 = vector.shape_cast %283 : vector<1x1x32xbf16> to vector<1x32xbf16>
      %285 = arith.extf %282 : vector<28x1xbf16> to vector<28x1xf32>
      %286 = arith.extf %284 : vector<1x32xbf16> to vector<1x32xf32>
      %287 = vector.broadcast %285 : vector<28x1xf32> to vector<28x32xf32>
      %288 = vector.broadcast %286 : vector<1x32xf32> to vector<28x32xf32>
      %289 = arith.mulf %287, %288 : vector<28x32xf32>
      %290 = arith.addf %278, %289 : vector<28x32xf32>
      %c4_i32_144 = arith.constant 4 : i32
      %291 = arith.addi %arg4, %c4_i32_144 : i32
      %c0_145 = arith.constant 0 : index
      %292 = arith.index_cast %291 : i32 to index
      %c4_146 = arith.constant 4 : index
      %c0_147 = arith.constant 0 : index
      %293 = vector.load %arg0[%c0_145, %292, %c4_146, %c0_147] : memref<2x32x32x1xbf16, #tpu.memory_space<vmem>>, vector<1x1x28x1xbf16>
      %294 = vector.shape_cast %293 : vector<1x1x28x1xbf16> to vector<28x1xbf16>
      %c24 = arith.constant 24 : index
      %c0_148 = arith.constant 0 : index
      %c0_149 = arith.constant 0 : index
      %295 = vector.load %arg1[%c24, %c0_148, %c0_149] : memref<25x1x32xbf16, #tpu.memory_space<vmem>>, vector<1x1x32xbf16>
      %296 = vector.shape_cast %295 : vector<1x1x32xbf16> to vector<1x32xbf16>
      %297 = arith.extf %294 : vector<28x1xbf16> to vector<28x1xf32>
      %298 = arith.extf %296 : vector<1x32xbf16> to vector<1x32xf32>
      %299 = vector.broadcast %297 : vector<28x1xf32> to vector<28x32xf32>
      %300 = vector.broadcast %298 : vector<1x32xf32> to vector<28x32xf32>
      %301 = arith.mulf %299, %300 : vector<28x32xf32>
      %302 = arith.addf %290, %301 : vector<28x32xf32>
      %303 = vector.broadcast %0 : vector<1x32xf32> to vector<28x32xf32>
      %304 = arith.addf %302, %303 : vector<28x32xf32>
      %cst_150 = arith.constant 0.000000e+00 : f32
      %305 = vector.broadcast %cst_150 : f32 to vector<28x32xf32>
      %306 = arith.maximumf %304, %305 : vector<28x32xf32>
      %307 = arith.truncf %306 : vector<28x32xf32> to vector<28x32xbf16>
      %c0_151 = arith.constant 0 : index
      %308 = arith.index_cast %arg4 : i32 to index
      %c0_152 = arith.constant 0 : index
      %c0_153 = arith.constant 0 : index
      %309 = vector.load %arg3[%c0_151, %308, %c0_152, %c0_153] : memref<2x28x28x32xbf16, #tpu.memory_space<vmem>>, vector<1x1x28x32xbf16>
      %310 = vector.shape_cast %309 : vector<1x1x28x32xbf16> to vector<28x32xbf16>
      %311 = vector.shape_cast %307 : vector<28x32xbf16> to vector<1x1x28x32xbf16>
      tpu.vector_store %arg3[%c0_151, %308, %c0_152, %c0_153], %311 {strides = array<i32>} : memref<2x28x28x32xbf16, #tpu.memory_space<vmem>>, vector<1x1x28x32xbf16>,
      %cst_154 = arith.constant 0.000000e+00 : f32
      %312 = vector.broadcast %cst_154 : f32 to vector<28x32xf32>
      %c0_i32_155 = arith.constant 0 : i32
      %313 = arith.addi %arg4, %c0_i32_155 : i32
      %c1_156 = arith.constant 1 : index
      %314 = arith.index_cast %313 : i32 to index
      %c0_157 = arith.constant 0 : index
      %c0_158 = arith.constant 0 : index
      %315 = vector.load %arg0[%c1_156, %314, %c0_157, %c0_158] : memref<2x32x32x1xbf16, #tpu.memory_space<vmem>>, vector<1x1x28x1xbf16>
      %316 = vector.shape_cast %315 : vector<1x1x28x1xbf16> to vector<28x1xbf16>
      %c0_159 = arith.constant 0 : index
      %c0_160 = arith.constant 0 : index
      %c0_161 = arith.constant 0 : index
      %317 = vector.load %arg1[%c0_159, %c0_160, %c0_161] : memref<25x1x32xbf16, #tpu.memory_space<vmem>>, vector<1x1x32xbf16>
      %318 = vector.shape_cast %317 : vector<1x1x32xbf16> to vector<1x32xbf16>
      %319 = arith.extf %316 : vector<28x1xbf16> to vector<28x1xf32>
      %320 = arith.extf %318 : vector<1x32xbf16> to vector<1x32xf32>
      %321 = vector.broadcast %319 : vector<28x1xf32> to vector<28x32xf32>
      %322 = vector.broadcast %320 : vector<1x32xf32> to vector<28x32xf32>
      %323 = arith.mulf %321, %322 : vector<28x32xf32>
      %324 = arith.addf %312, %323 : vector<28x32xf32>
      %c0_i32_162 = arith.constant 0 : i32
      %325 = arith.addi %arg4, %c0_i32_162 : i32
      %c1_163 = arith.constant 1 : index
      %326 = arith.index_cast %325 : i32 to index
      %c1_164 = arith.constant 1 : index
      %c0_165 = arith.constant 0 : index
      %327 = vector.load %arg0[%c1_163, %326, %c1_164, %c0_165] : memref<2x32x32x1xbf16, #tpu.memory_space<vmem>>, vector<1x1x28x1xbf16>
      %328 = vector.shape_cast %327 : vector<1x1x28x1xbf16> to vector<28x1xbf16>
      %c1_166 = arith.constant 1 : index
      %c0_167 = arith.constant 0 : index
      %c0_168 = arith.constant 0 : index
      %329 = vector.load %arg1[%c1_166, %c0_167, %c0_168] : memref<25x1x32xbf16, #tpu.memory_space<vmem>>, vector<1x1x32xbf16>
      %330 = vector.shape_cast %329 : vector<1x1x32xbf16> to vector<1x32xbf16>
      %331 = arith.extf %328 : vector<28x1xbf16> to vector<28x1xf32>
      %332 = arith.extf %330 : vector<1x32xbf16> to vector<1x32xf32>
      %333 = vector.broadcast %331 : vector<28x1xf32> to vector<28x32xf32>
      %334 = vector.broadcast %332 : vector<1x32xf32> to vector<28x32xf32>
      %335 = arith.mulf %333, %334 : vector<28x32xf32>
      %336 = arith.addf %324, %335 : vector<28x32xf32>
      %c0_i32_169 = arith.constant 0 : i32
      %337 = arith.addi %arg4, %c0_i32_169 : i32
      %c1_170 = arith.constant 1 : index
      %338 = arith.index_cast %337 : i32 to index
      %c2_171 = arith.constant 2 : index
      %c0_172 = arith.constant 0 : index
      %339 = vector.load %arg0[%c1_170, %338, %c2_171, %c0_172] : memref<2x32x32x1xbf16, #tpu.memory_space<vmem>>, vector<1x1x28x1xbf16>
      %340 = vector.shape_cast %339 : vector<1x1x28x1xbf16> to vector<28x1xbf16>
      %c2_173 = arith.constant 2 : index
      %c0_174 = arith.constant 0 : index
      %c0_175 = arith.constant 0 : index
      %341 = vector.load %arg1[%c2_173, %c0_174, %c0_175] : memref<25x1x32xbf16, #tpu.memory_space<vmem>>, vector<1x1x32xbf16>
      %342 = vector.shape_cast %341 : vector<1x1x32xbf16> to vector<1x32xbf16>
      %343 = arith.extf %340 : vector<28x1xbf16> to vector<28x1xf32>
      %344 = arith.extf %342 : vector<1x32xbf16> to vector<1x32xf32>
      %345 = vector.broadcast %343 : vector<28x1xf32> to vector<28x32xf32>
      %346 = vector.broadcast %344 : vector<1x32xf32> to vector<28x32xf32>
      %347 = arith.mulf %345, %346 : vector<28x32xf32>
      %348 = arith.addf %336, %347 : vector<28x32xf32>
      %c0_i32_176 = arith.constant 0 : i32
      %349 = arith.addi %arg4, %c0_i32_176 : i32
      %c1_177 = arith.constant 1 : index
      %350 = arith.index_cast %349 : i32 to index
      %c3_178 = arith.constant 3 : index
      %c0_179 = arith.constant 0 : index
      %351 = vector.load %arg0[%c1_177, %350, %c3_178, %c0_179] : memref<2x32x32x1xbf16, #tpu.memory_space<vmem>>, vector<1x1x28x1xbf16>
      %352 = vector.shape_cast %351 : vector<1x1x28x1xbf16> to vector<28x1xbf16>
      %c3_180 = arith.constant 3 : index
      %c0_181 = arith.constant 0 : index
      %c0_182 = arith.constant 0 : index
      %353 = vector.load %arg1[%c3_180, %c0_181, %c0_182] : memref<25x1x32xbf16, #tpu.memory_space<vmem>>, vector<1x1x32xbf16>
      %354 = vector.shape_cast %353 : vector<1x1x32xbf16> to vector<1x32xbf16>
      %355 = arith.extf %352 : vector<28x1xbf16> to vector<28x1xf32>
      %356 = arith.extf %354 : vector<1x32xbf16> to vector<1x32xf32>
      %357 = vector.broadcast %355 : vector<28x1xf32> to vector<28x32xf32>
      %358 = vector.broadcast %356 : vector<1x32xf32> to vector<28x32xf32>
      %359 = arith.mulf %357, %358 : vector<28x32xf32>
      %360 = arith.addf %348, %359 : vector<28x32xf32>
      %c0_i32_183 = arith.constant 0 : i32
      %361 = arith.addi %arg4, %c0_i32_183 : i32
      %c1_184 = arith.constant 1 : index
      %362 = arith.index_cast %361 : i32 to index
      %c4_185 = arith.constant 4 : index
      %c0_186 = arith.constant 0 : index
      %363 = vector.load %arg0[%c1_184, %362, %c4_185, %c0_186] : memref<2x32x32x1xbf16, #tpu.memory_space<vmem>>, vector<1x1x28x1xbf16>
      %364 = vector.shape_cast %363 : vector<1x1x28x1xbf16> to vector<28x1xbf16>
      %c4_187 = arith.constant 4 : index
      %c0_188 = arith.constant 0 : index
      %c0_189 = arith.constant 0 : index
      %365 = vector.load %arg1[%c4_187, %c0_188, %c0_189] : memref<25x1x32xbf16, #tpu.memory_space<vmem>>, vector<1x1x32xbf16>
      %366 = vector.shape_cast %365 : vector<1x1x32xbf16> to vector<1x32xbf16>
      %367 = arith.extf %364 : vector<28x1xbf16> to vector<28x1xf32>
      %368 = arith.extf %366 : vector<1x32xbf16> to vector<1x32xf32>
      %369 = vector.broadcast %367 : vector<28x1xf32> to vector<28x32xf32>
      %370 = vector.broadcast %368 : vector<1x32xf32> to vector<28x32xf32>
      %371 = arith.mulf %369, %370 : vector<28x32xf32>
      %372 = arith.addf %360, %371 : vector<28x32xf32>
      %c1_i32_190 = arith.constant 1 : i32
      %373 = arith.addi %arg4, %c1_i32_190 : i32
      %c1_191 = arith.constant 1 : index
      %374 = arith.index_cast %373 : i32 to index
      %c0_192 = arith.constant 0 : index
      %c0_193 = arith.constant 0 : index
      %375 = vector.load %arg0[%c1_191, %374, %c0_192, %c0_193] : memref<2x32x32x1xbf16, #tpu.memory_space<vmem>>, vector<1x1x28x1xbf16>
      %376 = vector.shape_cast %375 : vector<1x1x28x1xbf16> to vector<28x1xbf16>
      %c5_194 = arith.constant 5 : index
      %c0_195 = arith.constant 0 : index
      %c0_196 = arith.constant 0 : index
      %377 = vector.load %arg1[%c5_194, %c0_195, %c0_196] : memref<25x1x32xbf16, #tpu.memory_space<vmem>>, vector<1x1x32xbf16>
      %378 = vector.shape_cast %377 : vector<1x1x32xbf16> to vector<1x32xbf16>
      %379 = arith.extf %376 : vector<28x1xbf16> to vector<28x1xf32>
      %380 = arith.extf %378 : vector<1x32xbf16> to vector<1x32xf32>
      %381 = vector.broadcast %379 : vector<28x1xf32> to vector<28x32xf32>
      %382 = vector.broadcast %380 : vector<1x32xf32> to vector<28x32xf32>
      %383 = arith.mulf %381, %382 : vector<28x32xf32>
      %384 = arith.addf %372, %383 : vector<28x32xf32>
      %c1_i32_197 = arith.constant 1 : i32
      %385 = arith.addi %arg4, %c1_i32_197 : i32
      %c1_198 = arith.constant 1 : index
      %386 = arith.index_cast %385 : i32 to index
      %c1_199 = arith.constant 1 : index
      %c0_200 = arith.constant 0 : index
      %387 = vector.load %arg0[%c1_198, %386, %c1_199, %c0_200] : memref<2x32x32x1xbf16, #tpu.memory_space<vmem>>, vector<1x1x28x1xbf16>
      %388 = vector.shape_cast %387 : vector<1x1x28x1xbf16> to vector<28x1xbf16>
      %c6_201 = arith.constant 6 : index
      %c0_202 = arith.constant 0 : index
      %c0_203 = arith.constant 0 : index
      %389 = vector.load %arg1[%c6_201, %c0_202, %c0_203] : memref<25x1x32xbf16, #tpu.memory_space<vmem>>, vector<1x1x32xbf16>
      %390 = vector.shape_cast %389 : vector<1x1x32xbf16> to vector<1x32xbf16>
      %391 = arith.extf %388 : vector<28x1xbf16> to vector<28x1xf32>
      %392 = arith.extf %390 : vector<1x32xbf16> to vector<1x32xf32>
      %393 = vector.broadcast %391 : vector<28x1xf32> to vector<28x32xf32>
      %394 = vector.broadcast %392 : vector<1x32xf32> to vector<28x32xf32>
      %395 = arith.mulf %393, %394 : vector<28x32xf32>
      %396 = arith.addf %384, %395 : vector<28x32xf32>
      %c1_i32_204 = arith.constant 1 : i32
      %397 = arith.addi %arg4, %c1_i32_204 : i32
      %c1_205 = arith.constant 1 : index
      %398 = arith.index_cast %397 : i32 to index
      %c2_206 = arith.constant 2 : index
      %c0_207 = arith.constant 0 : index
      %399 = vector.load %arg0[%c1_205, %398, %c2_206, %c0_207] : memref<2x32x32x1xbf16, #tpu.memory_space<vmem>>, vector<1x1x28x1xbf16>
      %400 = vector.shape_cast %399 : vector<1x1x28x1xbf16> to vector<28x1xbf16>
      %c7_208 = arith.constant 7 : index
      %c0_209 = arith.constant 0 : index
      %c0_210 = arith.constant 0 : index
      %401 = vector.load %arg1[%c7_208, %c0_209, %c0_210] : memref<25x1x32xbf16, #tpu.memory_space<vmem>>, vector<1x1x32xbf16>
      %402 = vector.shape_cast %401 : vector<1x1x32xbf16> to vector<1x32xbf16>
      %403 = arith.extf %400 : vector<28x1xbf16> to vector<28x1xf32>
      %404 = arith.extf %402 : vector<1x32xbf16> to vector<1x32xf32>
      %405 = vector.broadcast %403 : vector<28x1xf32> to vector<28x32xf32>
      %406 = vector.broadcast %404 : vector<1x32xf32> to vector<28x32xf32>
      %407 = arith.mulf %405, %406 : vector<28x32xf32>
      %408 = arith.addf %396, %407 : vector<28x32xf32>
      %c1_i32_211 = arith.constant 1 : i32
      %409 = arith.addi %arg4, %c1_i32_211 : i32
      %c1_212 = arith.constant 1 : index
      %410 = arith.index_cast %409 : i32 to index
      %c3_213 = arith.constant 3 : index
      %c0_214 = arith.constant 0 : index
      %411 = vector.load %arg0[%c1_212, %410, %c3_213, %c0_214] : memref<2x32x32x1xbf16, #tpu.memory_space<vmem>>, vector<1x1x28x1xbf16>
      %412 = vector.shape_cast %411 : vector<1x1x28x1xbf16> to vector<28x1xbf16>
      %c8_215 = arith.constant 8 : index
      %c0_216 = arith.constant 0 : index
      %c0_217 = arith.constant 0 : index
      %413 = vector.load %arg1[%c8_215, %c0_216, %c0_217] : memref<25x1x32xbf16, #tpu.memory_space<vmem>>, vector<1x1x32xbf16>
      %414 = vector.shape_cast %413 : vector<1x1x32xbf16> to vector<1x32xbf16>
      %415 = arith.extf %412 : vector<28x1xbf16> to vector<28x1xf32>
      %416 = arith.extf %414 : vector<1x32xbf16> to vector<1x32xf32>
      %417 = vector.broadcast %415 : vector<28x1xf32> to vector<28x32xf32>
      %418 = vector.broadcast %416 : vector<1x32xf32> to vector<28x32xf32>
      %419 = arith.mulf %417, %418 : vector<28x32xf32>
      %420 = arith.addf %408, %419 : vector<28x32xf32>
      %c1_i32_218 = arith.constant 1 : i32
      %421 = arith.addi %arg4, %c1_i32_218 : i32
      %c1_219 = arith.constant 1 : index
      %422 = arith.index_cast %421 : i32 to index
      %c4_220 = arith.constant 4 : index
      %c0_221 = arith.constant 0 : index
      %423 = vector.load %arg0[%c1_219, %422, %c4_220, %c0_221] : memref<2x32x32x1xbf16, #tpu.memory_space<vmem>>, vector<1x1x28x1xbf16>
      %424 = vector.shape_cast %423 : vector<1x1x28x1xbf16> to vector<28x1xbf16>
      %c9_222 = arith.constant 9 : index
      %c0_223 = arith.constant 0 : index
      %c0_224 = arith.constant 0 : index
      %425 = vector.load %arg1[%c9_222, %c0_223, %c0_224] : memref<25x1x32xbf16, #tpu.memory_space<vmem>>, vector<1x1x32xbf16>
      %426 = vector.shape_cast %425 : vector<1x1x32xbf16> to vector<1x32xbf16>
      %427 = arith.extf %424 : vector<28x1xbf16> to vector<28x1xf32>
      %428 = arith.extf %426 : vector<1x32xbf16> to vector<1x32xf32>
      %429 = vector.broadcast %427 : vector<28x1xf32> to vector<28x32xf32>
      %430 = vector.broadcast %428 : vector<1x32xf32> to vector<28x32xf32>
      %431 = arith.mulf %429, %430 : vector<28x32xf32>
      %432 = arith.addf %420, %431 : vector<28x32xf32>
      %c2_i32_225 = arith.constant 2 : i32
      %433 = arith.addi %arg4, %c2_i32_225 : i32
      %c1_226 = arith.constant 1 : index
      %434 = arith.index_cast %433 : i32 to index
      %c0_227 = arith.constant 0 : index
      %c0_228 = arith.constant 0 : index
      %435 = vector.load %arg0[%c1_226, %434, %c0_227, %c0_228] : memref<2x32x32x1xbf16, #tpu.memory_space<vmem>>, vector<1x1x28x1xbf16>
      %436 = vector.shape_cast %435 : vector<1x1x28x1xbf16> to vector<28x1xbf16>
      %c10_229 = arith.constant 10 : index
      %c0_230 = arith.constant 0 : index
      %c0_231 = arith.constant 0 : index
      %437 = vector.load %arg1[%c10_229, %c0_230, %c0_231] : memref<25x1x32xbf16, #tpu.memory_space<vmem>>, vector<1x1x32xbf16>
      %438 = vector.shape_cast %437 : vector<1x1x32xbf16> to vector<1x32xbf16>
      %439 = arith.extf %436 : vector<28x1xbf16> to vector<28x1xf32>
      %440 = arith.extf %438 : vector<1x32xbf16> to vector<1x32xf32>
      %441 = vector.broadcast %439 : vector<28x1xf32> to vector<28x32xf32>
      %442 = vector.broadcast %440 : vector<1x32xf32> to vector<28x32xf32>
      %443 = arith.mulf %441, %442 : vector<28x32xf32>
      %444 = arith.addf %432, %443 : vector<28x32xf32>
      %c2_i32_232 = arith.constant 2 : i32
      %445 = arith.addi %arg4, %c2_i32_232 : i32
      %c1_233 = arith.constant 1 : index
      %446 = arith.index_cast %445 : i32 to index
      %c1_234 = arith.constant 1 : index
      %c0_235 = arith.constant 0 : index
      %447 = vector.load %arg0[%c1_233, %446, %c1_234, %c0_235] : memref<2x32x32x1xbf16, #tpu.memory_space<vmem>>, vector<1x1x28x1xbf16>
      %448 = vector.shape_cast %447 : vector<1x1x28x1xbf16> to vector<28x1xbf16>
      %c11_236 = arith.constant 11 : index
      %c0_237 = arith.constant 0 : index
      %c0_238 = arith.constant 0 : index
      %449 = vector.load %arg1[%c11_236, %c0_237, %c0_238] : memref<25x1x32xbf16, #tpu.memory_space<vmem>>, vector<1x1x32xbf16>
      %450 = vector.shape_cast %449 : vector<1x1x32xbf16> to vector<1x32xbf16>
      %451 = arith.extf %448 : vector<28x1xbf16> to vector<28x1xf32>
      %452 = arith.extf %450 : vector<1x32xbf16> to vector<1x32xf32>
      %453 = vector.broadcast %451 : vector<28x1xf32> to vector<28x32xf32>
      %454 = vector.broadcast %452 : vector<1x32xf32> to vector<28x32xf32>
      %455 = arith.mulf %453, %454 : vector<28x32xf32>
      %456 = arith.addf %444, %455 : vector<28x32xf32>
      %c2_i32_239 = arith.constant 2 : i32
      %457 = arith.addi %arg4, %c2_i32_239 : i32
      %c1_240 = arith.constant 1 : index
      %458 = arith.index_cast %457 : i32 to index
      %c2_241 = arith.constant 2 : index
      %c0_242 = arith.constant 0 : index
      %459 = vector.load %arg0[%c1_240, %458, %c2_241, %c0_242] : memref<2x32x32x1xbf16, #tpu.memory_space<vmem>>, vector<1x1x28x1xbf16>
      %460 = vector.shape_cast %459 : vector<1x1x28x1xbf16> to vector<28x1xbf16>
      %c12_243 = arith.constant 12 : index
      %c0_244 = arith.constant 0 : index
      %c0_245 = arith.constant 0 : index
      %461 = vector.load %arg1[%c12_243, %c0_244, %c0_245] : memref<25x1x32xbf16, #tpu.memory_space<vmem>>, vector<1x1x32xbf16>
      %462 = vector.shape_cast %461 : vector<1x1x32xbf16> to vector<1x32xbf16>
      %463 = arith.extf %460 : vector<28x1xbf16> to vector<28x1xf32>
      %464 = arith.extf %462 : vector<1x32xbf16> to vector<1x32xf32>
      %465 = vector.broadcast %463 : vector<28x1xf32> to vector<28x32xf32>
      %466 = vector.broadcast %464 : vector<1x32xf32> to vector<28x32xf32>
      %467 = arith.mulf %465, %466 : vector<28x32xf32>
      %468 = arith.addf %456, %467 : vector<28x32xf32>
      %c2_i32_246 = arith.constant 2 : i32
      %469 = arith.addi %arg4, %c2_i32_246 : i32
      %c1_247 = arith.constant 1 : index
      %470 = arith.index_cast %469 : i32 to index
      %c3_248 = arith.constant 3 : index
      %c0_249 = arith.constant 0 : index
      %471 = vector.load %arg0[%c1_247, %470, %c3_248, %c0_249] : memref<2x32x32x1xbf16, #tpu.memory_space<vmem>>, vector<1x1x28x1xbf16>
      %472 = vector.shape_cast %471 : vector<1x1x28x1xbf16> to vector<28x1xbf16>
      %c13_250 = arith.constant 13 : index
      %c0_251 = arith.constant 0 : index
      %c0_252 = arith.constant 0 : index
      %473 = vector.load %arg1[%c13_250, %c0_251, %c0_252] : memref<25x1x32xbf16, #tpu.memory_space<vmem>>, vector<1x1x32xbf16>
      %474 = vector.shape_cast %473 : vector<1x1x32xbf16> to vector<1x32xbf16>
      %475 = arith.extf %472 : vector<28x1xbf16> to vector<28x1xf32>
      %476 = arith.extf %474 : vector<1x32xbf16> to vector<1x32xf32>
      %477 = vector.broadcast %475 : vector<28x1xf32> to vector<28x32xf32>
      %478 = vector.broadcast %476 : vector<1x32xf32> to vector<28x32xf32>
      %479 = arith.mulf %477, %478 : vector<28x32xf32>
      %480 = arith.addf %468, %479 : vector<28x32xf32>
      %c2_i32_253 = arith.constant 2 : i32
      %481 = arith.addi %arg4, %c2_i32_253 : i32
      %c1_254 = arith.constant 1 : index
      %482 = arith.index_cast %481 : i32 to index
      %c4_255 = arith.constant 4 : index
      %c0_256 = arith.constant 0 : index
      %483 = vector.load %arg0[%c1_254, %482, %c4_255, %c0_256] : memref<2x32x32x1xbf16, #tpu.memory_space<vmem>>, vector<1x1x28x1xbf16>
      %484 = vector.shape_cast %483 : vector<1x1x28x1xbf16> to vector<28x1xbf16>
      %c14_257 = arith.constant 14 : index
      %c0_258 = arith.constant 0 : index
      %c0_259 = arith.constant 0 : index
      %485 = vector.load %arg1[%c14_257, %c0_258, %c0_259] : memref<25x1x32xbf16, #tpu.memory_space<vmem>>, vector<1x1x32xbf16>
      %486 = vector.shape_cast %485 : vector<1x1x32xbf16> to vector<1x32xbf16>
      %487 = arith.extf %484 : vector<28x1xbf16> to vector<28x1xf32>
      %488 = arith.extf %486 : vector<1x32xbf16> to vector<1x32xf32>
      %489 = vector.broadcast %487 : vector<28x1xf32> to vector<28x32xf32>
      %490 = vector.broadcast %488 : vector<1x32xf32> to vector<28x32xf32>
      %491 = arith.mulf %489, %490 : vector<28x32xf32>
      %492 = arith.addf %480, %491 : vector<28x32xf32>
      %c3_i32_260 = arith.constant 3 : i32
      %493 = arith.addi %arg4, %c3_i32_260 : i32
      %c1_261 = arith.constant 1 : index
      %494 = arith.index_cast %493 : i32 to index
      %c0_262 = arith.constant 0 : index
      %c0_263 = arith.constant 0 : index
      %495 = vector.load %arg0[%c1_261, %494, %c0_262, %c0_263] : memref<2x32x32x1xbf16, #tpu.memory_space<vmem>>, vector<1x1x28x1xbf16>
      %496 = vector.shape_cast %495 : vector<1x1x28x1xbf16> to vector<28x1xbf16>
      %c15_264 = arith.constant 15 : index
      %c0_265 = arith.constant 0 : index
      %c0_266 = arith.constant 0 : index
      %497 = vector.load %arg1[%c15_264, %c0_265, %c0_266] : memref<25x1x32xbf16, #tpu.memory_space<vmem>>, vector<1x1x32xbf16>
      %498 = vector.shape_cast %497 : vector<1x1x32xbf16> to vector<1x32xbf16>
      %499 = arith.extf %496 : vector<28x1xbf16> to vector<28x1xf32>
      %500 = arith.extf %498 : vector<1x32xbf16> to vector<1x32xf32>
      %501 = vector.broadcast %499 : vector<28x1xf32> to vector<28x32xf32>
      %502 = vector.broadcast %500 : vector<1x32xf32> to vector<28x32xf32>
      %503 = arith.mulf %501, %502 : vector<28x32xf32>
      %504 = arith.addf %492, %503 : vector<28x32xf32>
      %c3_i32_267 = arith.constant 3 : i32
      %505 = arith.addi %arg4, %c3_i32_267 : i32
      %c1_268 = arith.constant 1 : index
      %506 = arith.index_cast %505 : i32 to index
      %c1_269 = arith.constant 1 : index
      %c0_270 = arith.constant 0 : index
      %507 = vector.load %arg0[%c1_268, %506, %c1_269, %c0_270] : memref<2x32x32x1xbf16, #tpu.memory_space<vmem>>, vector<1x1x28x1xbf16>
      %508 = vector.shape_cast %507 : vector<1x1x28x1xbf16> to vector<28x1xbf16>
      %c16_271 = arith.constant 16 : index
      %c0_272 = arith.constant 0 : index
      %c0_273 = arith.constant 0 : index
      %509 = vector.load %arg1[%c16_271, %c0_272, %c0_273] : memref<25x1x32xbf16, #tpu.memory_space<vmem>>, vector<1x1x32xbf16>
      %510 = vector.shape_cast %509 : vector<1x1x32xbf16> to vector<1x32xbf16>
      %511 = arith.extf %508 : vector<28x1xbf16> to vector<28x1xf32>
      %512 = arith.extf %510 : vector<1x32xbf16> to vector<1x32xf32>
      %513 = vector.broadcast %511 : vector<28x1xf32> to vector<28x32xf32>
      %514 = vector.broadcast %512 : vector<1x32xf32> to vector<28x32xf32>
      %515 = arith.mulf %513, %514 : vector<28x32xf32>
      %516 = arith.addf %504, %515 : vector<28x32xf32>
      %c3_i32_274 = arith.constant 3 : i32
      %517 = arith.addi %arg4, %c3_i32_274 : i32
      %c1_275 = arith.constant 1 : index
      %518 = arith.index_cast %517 : i32 to index
      %c2_276 = arith.constant 2 : index
      %c0_277 = arith.constant 0 : index
      %519 = vector.load %arg0[%c1_275, %518, %c2_276, %c0_277] : memref<2x32x32x1xbf16, #tpu.memory_space<vmem>>, vector<1x1x28x1xbf16>
      %520 = vector.shape_cast %519 : vector<1x1x28x1xbf16> to vector<28x1xbf16>
      %c17_278 = arith.constant 17 : index
      %c0_279 = arith.constant 0 : index
      %c0_280 = arith.constant 0 : index
      %521 = vector.load %arg1[%c17_278, %c0_279, %c0_280] : memref<25x1x32xbf16, #tpu.memory_space<vmem>>, vector<1x1x32xbf16>
      %522 = vector.shape_cast %521 : vector<1x1x32xbf16> to vector<1x32xbf16>
      %523 = arith.extf %520 : vector<28x1xbf16> to vector<28x1xf32>
      %524 = arith.extf %522 : vector<1x32xbf16> to vector<1x32xf32>
      %525 = vector.broadcast %523 : vector<28x1xf32> to vector<28x32xf32>
      %526 = vector.broadcast %524 : vector<1x32xf32> to vector<28x32xf32>
      %527 = arith.mulf %525, %526 : vector<28x32xf32>
      %528 = arith.addf %516, %527 : vector<28x32xf32>
      %c3_i32_281 = arith.constant 3 : i32
      %529 = arith.addi %arg4, %c3_i32_281 : i32
      %c1_282 = arith.constant 1 : index
      %530 = arith.index_cast %529 : i32 to index
      %c3_283 = arith.constant 3 : index
      %c0_284 = arith.constant 0 : index
      %531 = vector.load %arg0[%c1_282, %530, %c3_283, %c0_284] : memref<2x32x32x1xbf16, #tpu.memory_space<vmem>>, vector<1x1x28x1xbf16>
      %532 = vector.shape_cast %531 : vector<1x1x28x1xbf16> to vector<28x1xbf16>
      %c18_285 = arith.constant 18 : index
      %c0_286 = arith.constant 0 : index
      %c0_287 = arith.constant 0 : index
      %533 = vector.load %arg1[%c18_285, %c0_286, %c0_287] : memref<25x1x32xbf16, #tpu.memory_space<vmem>>, vector<1x1x32xbf16>
      %534 = vector.shape_cast %533 : vector<1x1x32xbf16> to vector<1x32xbf16>
      %535 = arith.extf %532 : vector<28x1xbf16> to vector<28x1xf32>
      %536 = arith.extf %534 : vector<1x32xbf16> to vector<1x32xf32>
      %537 = vector.broadcast %535 : vector<28x1xf32> to vector<28x32xf32>
      %538 = vector.broadcast %536 : vector<1x32xf32> to vector<28x32xf32>
      %539 = arith.mulf %537, %538 : vector<28x32xf32>
      %540 = arith.addf %528, %539 : vector<28x32xf32>
      %c3_i32_288 = arith.constant 3 : i32
      %541 = arith.addi %arg4, %c3_i32_288 : i32
      %c1_289 = arith.constant 1 : index
      %542 = arith.index_cast %541 : i32 to index
      %c4_290 = arith.constant 4 : index
      %c0_291 = arith.constant 0 : index
      %543 = vector.load %arg0[%c1_289, %542, %c4_290, %c0_291] : memref<2x32x32x1xbf16, #tpu.memory_space<vmem>>, vector<1x1x28x1xbf16>
      %544 = vector.shape_cast %543 : vector<1x1x28x1xbf16> to vector<28x1xbf16>
      %c19_292 = arith.constant 19 : index
      %c0_293 = arith.constant 0 : index
      %c0_294 = arith.constant 0 : index
      %545 = vector.load %arg1[%c19_292, %c0_293, %c0_294] : memref<25x1x32xbf16, #tpu.memory_space<vmem>>, vector<1x1x32xbf16>
      %546 = vector.shape_cast %545 : vector<1x1x32xbf16> to vector<1x32xbf16>
      %547 = arith.extf %544 : vector<28x1xbf16> to vector<28x1xf32>
      %548 = arith.extf %546 : vector<1x32xbf16> to vector<1x32xf32>
      %549 = vector.broadcast %547 : vector<28x1xf32> to vector<28x32xf32>
      %550 = vector.broadcast %548 : vector<1x32xf32> to vector<28x32xf32>
      %551 = arith.mulf %549, %550 : vector<28x32xf32>
      %552 = arith.addf %540, %551 : vector<28x32xf32>
      %c4_i32_295 = arith.constant 4 : i32
      %553 = arith.addi %arg4, %c4_i32_295 : i32
      %c1_296 = arith.constant 1 : index
      %554 = arith.index_cast %553 : i32 to index
      %c0_297 = arith.constant 0 : index
      %c0_298 = arith.constant 0 : index
      %555 = vector.load %arg0[%c1_296, %554, %c0_297, %c0_298] : memref<2x32x32x1xbf16, #tpu.memory_space<vmem>>, vector<1x1x28x1xbf16>
      %556 = vector.shape_cast %555 : vector<1x1x28x1xbf16> to vector<28x1xbf16>
      %c20_299 = arith.constant 20 : index
      %c0_300 = arith.constant 0 : index
      %c0_301 = arith.constant 0 : index
      %557 = vector.load %arg1[%c20_299, %c0_300, %c0_301] : memref<25x1x32xbf16, #tpu.memory_space<vmem>>, vector<1x1x32xbf16>
      %558 = vector.shape_cast %557 : vector<1x1x32xbf16> to vector<1x32xbf16>
      %559 = arith.extf %556 : vector<28x1xbf16> to vector<28x1xf32>
      %560 = arith.extf %558 : vector<1x32xbf16> to vector<1x32xf32>
      %561 = vector.broadcast %559 : vector<28x1xf32> to vector<28x32xf32>
      %562 = vector.broadcast %560 : vector<1x32xf32> to vector<28x32xf32>
      %563 = arith.mulf %561, %562 : vector<28x32xf32>
      %564 = arith.addf %552, %563 : vector<28x32xf32>
      %c4_i32_302 = arith.constant 4 : i32
      %565 = arith.addi %arg4, %c4_i32_302 : i32
      %c1_303 = arith.constant 1 : index
      %566 = arith.index_cast %565 : i32 to index
      %c1_304 = arith.constant 1 : index
      %c0_305 = arith.constant 0 : index
      %567 = vector.load %arg0[%c1_303, %566, %c1_304, %c0_305] : memref<2x32x32x1xbf16, #tpu.memory_space<vmem>>, vector<1x1x28x1xbf16>
      %568 = vector.shape_cast %567 : vector<1x1x28x1xbf16> to vector<28x1xbf16>
      %c21_306 = arith.constant 21 : index
      %c0_307 = arith.constant 0 : index
      %c0_308 = arith.constant 0 : index
      %569 = vector.load %arg1[%c21_306, %c0_307, %c0_308] : memref<25x1x32xbf16, #tpu.memory_space<vmem>>, vector<1x1x32xbf16>
      %570 = vector.shape_cast %569 : vector<1x1x32xbf16> to vector<1x32xbf16>
      %571 = arith.extf %568 : vector<28x1xbf16> to vector<28x1xf32>
      %572 = arith.extf %570 : vector<1x32xbf16> to vector<1x32xf32>
      %573 = vector.broadcast %571 : vector<28x1xf32> to vector<28x32xf32>
      %574 = vector.broadcast %572 : vector<1x32xf32> to vector<28x32xf32>
      %575 = arith.mulf %573, %574 : vector<28x32xf32>
      %576 = arith.addf %564, %575 : vector<28x32xf32>
      %c4_i32_309 = arith.constant 4 : i32
      %577 = arith.addi %arg4, %c4_i32_309 : i32
      %c1_310 = arith.constant 1 : index
      %578 = arith.index_cast %577 : i32 to index
      %c2_311 = arith.constant 2 : index
      %c0_312 = arith.constant 0 : index
      %579 = vector.load %arg0[%c1_310, %578, %c2_311, %c0_312] : memref<2x32x32x1xbf16, #tpu.memory_space<vmem>>, vector<1x1x28x1xbf16>
      %580 = vector.shape_cast %579 : vector<1x1x28x1xbf16> to vector<28x1xbf16>
      %c22_313 = arith.constant 22 : index
      %c0_314 = arith.constant 0 : index
      %c0_315 = arith.constant 0 : index
      %581 = vector.load %arg1[%c22_313, %c0_314, %c0_315] : memref<25x1x32xbf16, #tpu.memory_space<vmem>>, vector<1x1x32xbf16>
      %582 = vector.shape_cast %581 : vector<1x1x32xbf16> to vector<1x32xbf16>
      %583 = arith.extf %580 : vector<28x1xbf16> to vector<28x1xf32>
      %584 = arith.extf %582 : vector<1x32xbf16> to vector<1x32xf32>
      %585 = vector.broadcast %583 : vector<28x1xf32> to vector<28x32xf32>
      %586 = vector.broadcast %584 : vector<1x32xf32> to vector<28x32xf32>
      %587 = arith.mulf %585, %586 : vector<28x32xf32>
      %588 = arith.addf %576, %587 : vector<28x32xf32>
      %c4_i32_316 = arith.constant 4 : i32
      %589 = arith.addi %arg4, %c4_i32_316 : i32
      %c1_317 = arith.constant 1 : index
      %590 = arith.index_cast %589 : i32 to index
      %c3_318 = arith.constant 3 : index
      %c0_319 = arith.constant 0 : index
      %591 = vector.load %arg0[%c1_317, %590, %c3_318, %c0_319] : memref<2x32x32x1xbf16, #tpu.memory_space<vmem>>, vector<1x1x28x1xbf16>
      %592 = vector.shape_cast %591 : vector<1x1x28x1xbf16> to vector<28x1xbf16>
      %c23_320 = arith.constant 23 : index
      %c0_321 = arith.constant 0 : index
      %c0_322 = arith.constant 0 : index
      %593 = vector.load %arg1[%c23_320, %c0_321, %c0_322] : memref<25x1x32xbf16, #tpu.memory_space<vmem>>, vector<1x1x32xbf16>
      %594 = vector.shape_cast %593 : vector<1x1x32xbf16> to vector<1x32xbf16>
      %595 = arith.extf %592 : vector<28x1xbf16> to vector<28x1xf32>
      %596 = arith.extf %594 : vector<1x32xbf16> to vector<1x32xf32>
      %597 = vector.broadcast %595 : vector<28x1xf32> to vector<28x32xf32>
      %598 = vector.broadcast %596 : vector<1x32xf32> to vector<28x32xf32>
      %599 = arith.mulf %597, %598 : vector<28x32xf32>
      %600 = arith.addf %588, %599 : vector<28x32xf32>
      %c4_i32_323 = arith.constant 4 : i32
      %601 = arith.addi %arg4, %c4_i32_323 : i32
      %c1_324 = arith.constant 1 : index
      %602 = arith.index_cast %601 : i32 to index
      %c4_325 = arith.constant 4 : index
      %c0_326 = arith.constant 0 : index
      %603 = vector.load %arg0[%c1_324, %602, %c4_325, %c0_326] : memref<2x32x32x1xbf16, #tpu.memory_space<vmem>>, vector<1x1x28x1xbf16>
      %604 = vector.shape_cast %603 : vector<1x1x28x1xbf16> to vector<28x1xbf16>
      %c24_327 = arith.constant 24 : index
      %c0_328 = arith.constant 0 : index
      %c0_329 = arith.constant 0 : index
      %605 = vector.load %arg1[%c24_327, %c0_328, %c0_329] : memref<25x1x32xbf16, #tpu.memory_space<vmem>>, vector<1x1x32xbf16>
      %606 = vector.shape_cast %605 : vector<1x1x32xbf16> to vector<1x32xbf16>
      %607 = arith.extf %604 : vector<28x1xbf16> to vector<28x1xf32>
      %608 = arith.extf %606 : vector<1x32xbf16> to vector<1x32xf32>
      %609 = vector.broadcast %607 : vector<28x1xf32> to vector<28x32xf32>
      %610 = vector.broadcast %608 : vector<1x32xf32> to vector<28x32xf32>
      %611 = arith.mulf %609, %610 : vector<28x32xf32>
      %612 = arith.addf %600, %611 : vector<28x32xf32>
      %613 = vector.broadcast %0 : vector<1x32xf32> to vector<28x32xf32>
      %614 = arith.addf %612, %613 : vector<28x32xf32>
      %cst_330 = arith.constant 0.000000e+00 : f32
      %615 = vector.broadcast %cst_330 : f32 to vector<28x32xf32>
      %616 = arith.maximumf %614, %615 : vector<28x32xf32>
      %617 = arith.truncf %616 : vector<28x32xf32> to vector<28x32xbf16>
      %c1_331 = arith.constant 1 : index
      %618 = arith.index_cast %arg4 : i32 to index
      %c0_332 = arith.constant 0 : index
      %c0_333 = arith.constant 0 : index
      %619 = vector.load %arg3[%c1_331, %618, %c0_332, %c0_333] : memref<2x28x28x32xbf16, #tpu.memory_space<vmem>>, vector<1x1x28x32xbf16>
      %620 = vector.shape_cast %619 : vector<1x1x28x32xbf16> to vector<28x32xbf16>
      %621 = vector.shape_cast %617 : vector<28x32xbf16> to vector<1x1x28x32xbf16>
      tpu.vector_store %arg3[%c1_331, %618, %c0_332, %c0_333], %621 {strides = array<i32>} : memref<2x28x28x32xbf16, #tpu.memory_space<vmem>>, vector<1x1x28x32xbf16>,
    }
    %c28_i32_1 = arith.constant 28 : i32
    return
  }
}

module attributes {stable_mosaic.version = 11 : i64} {
  func.func @_maxpool_kernel(%arg0: memref<2x14x2x14x64xbf16, #tpu.memory_space<vmem>>, %arg1: memref<2x14x14x32xbf16, #tpu.memory_space<vmem>>) attributes {dimension_semantics = [], scalar_prefetch = 0 : i64, scratch_operands = 0 : i64, tpu.core_type = #tpu.core_type<tc>} {
    %c0 = arith.constant 0 : index
    %c0_0 = arith.constant 0 : index
    %c0_1 = arith.constant 0 : index
    %c0_2 = arith.constant 0 : index
    %c0_3 = arith.constant 0 : index
    %0 = vector.load %arg0[%c0, %c0_0, %c0_1, %c0_2, %c0_3] : memref<2x14x2x14x64xbf16, #tpu.memory_space<vmem>>, vector<2x14x1x14x64xbf16>
    %1 = vector.shape_cast %0 : vector<2x14x1x14x64xbf16> to vector<2x14x14x64xbf16>
    %c0_4 = arith.constant 0 : index
    %c0_5 = arith.constant 0 : index
    %c1 = arith.constant 1 : index
    %c0_6 = arith.constant 0 : index
    %c0_7 = arith.constant 0 : index
    %2 = vector.load %arg0[%c0_4, %c0_5, %c1, %c0_6, %c0_7] : memref<2x14x2x14x64xbf16, #tpu.memory_space<vmem>>, vector<2x14x1x14x64xbf16>
    %3 = vector.shape_cast %2 : vector<2x14x1x14x64xbf16> to vector<2x14x14x64xbf16>
    %4 = arith.maximumf %1, %3 : vector<2x14x14x64xbf16>
    %5 = vector.extract_strided_slice %4 {offsets = [0, 0, 0, 0], sizes = [2, 14, 14, 32], strides = [1, 1, 1, 1]} : vector<2x14x14x64xbf16> to vector<2x14x14x32xbf16>
    %6 = vector.extract_strided_slice %4 {offsets = [0, 0, 0, 32], sizes = [2, 14, 14, 32], strides = [1, 1, 1, 1]} : vector<2x14x14x64xbf16> to vector<2x14x14x32xbf16>
    %7 = arith.maximumf %5, %6 : vector<2x14x14x32xbf16>
    %c0_8 = arith.constant 0 : index
    %c0_9 = arith.constant 0 : index
    %c0_10 = arith.constant 0 : index
    %c0_11 = arith.constant 0 : index
    %8 = vector.load %arg1[%c0_8, %c0_9, %c0_10, %c0_11] : memref<2x14x14x32xbf16, #tpu.memory_space<vmem>>, vector<2x14x14x32xbf16>
    tpu.vector_store %arg1[%c0_8, %c0_9, %c0_10, %c0_11], %7 {strides = array<i32>} : memref<2x14x14x32xbf16, #tpu.memory_space<vmem>>, vector<2x14x14x32xbf16>,
    return
  }
}

module attributes {stable_mosaic.version = 11 : i64} {
  func.func @_conv_relu_kernel(%arg0: memref<2x18x18x32xbf16, #tpu.memory_space<vmem>>, %arg1: memref<25x32x64xbf16, #tpu.memory_space<vmem>>, %arg2: memref<1x64xf32, #tpu.memory_space<vmem>>, %arg3: memref<2x14x14x64xbf16, #tpu.memory_space<vmem>>) attributes {dimension_semantics = [], scalar_prefetch = 0 : i64, scratch_operands = 0 : i64, tpu.core_type = #tpu.core_type<tc>} {
    %c0 = arith.constant 0 : index
    %c0_0 = arith.constant 0 : index
    %0 = vector.load %arg2[%c0, %c0_0] : memref<1x64xf32, #tpu.memory_space<vmem>>, vector<1x64xf32>
    %c0_i32 = arith.constant 0 : i32
    %c14_i32 = arith.constant 14 : i32
    %1 = arith.addi %c0_i32, %c14_i32 : i32
    %c1_i32 = arith.constant 1 : i32
    scf.for %arg4 = %c0_i32 to %1 step %c1_i32  : i32 {
      %cst = arith.constant 0.000000e+00 : f32
      %2 = vector.broadcast %cst : f32 to vector<14x64xf32>
      %c0_i32_2 = arith.constant 0 : i32
      %3 = arith.addi %arg4, %c0_i32_2 : i32
      %c0_3 = arith.constant 0 : index
      %4 = arith.index_cast %3 : i32 to index
      %c0_4 = arith.constant 0 : index
      %c0_5 = arith.constant 0 : index
      %5 = vector.load %arg0[%c0_3, %4, %c0_4, %c0_5] : memref<2x18x18x32xbf16, #tpu.memory_space<vmem>>, vector<1x1x14x32xbf16>
      %6 = vector.shape_cast %5 : vector<1x1x14x32xbf16> to vector<14x32xbf16>
      %c0_6 = arith.constant 0 : index
      %c0_7 = arith.constant 0 : index
      %c0_8 = arith.constant 0 : index
      %7 = vector.load %arg1[%c0_6, %c0_7, %c0_8] : memref<25x32x64xbf16, #tpu.memory_space<vmem>>, vector<1x32x64xbf16>
      %8 = vector.shape_cast %7 : vector<1x32x64xbf16> to vector<32x64xbf16>
      %cst_9 = arith.constant dense<0.000000e+00> : vector<14x64xf32>
      %9 = tpu.matmul %6, %8, %cst_9 {dimension_numbers = #tpu.dot_dimension_numbers<[1], [0], [0], [1], [0, 0, 1, 1], [], []>} : vector<14x32xbf16>, vector<32x64xbf16>, vector<14x64xf32> -> vector<14x64xf32>
      %10 = arith.addf %2, %9 : vector<14x64xf32>
      %c0_i32_10 = arith.constant 0 : i32
      %11 = arith.addi %arg4, %c0_i32_10 : i32
      %c0_11 = arith.constant 0 : index
      %12 = arith.index_cast %11 : i32 to index
      %c1 = arith.constant 1 : index
      %c0_12 = arith.constant 0 : index
      %13 = vector.load %arg0[%c0_11, %12, %c1, %c0_12] : memref<2x18x18x32xbf16, #tpu.memory_space<vmem>>, vector<1x1x14x32xbf16>
      %14 = vector.shape_cast %13 : vector<1x1x14x32xbf16> to vector<14x32xbf16>
      %c1_13 = arith.constant 1 : index
      %c0_14 = arith.constant 0 : index
      %c0_15 = arith.constant 0 : index
      %15 = vector.load %arg1[%c1_13, %c0_14, %c0_15] : memref<25x32x64xbf16, #tpu.memory_space<vmem>>, vector<1x32x64xbf16>
      %16 = vector.shape_cast %15 : vector<1x32x64xbf16> to vector<32x64xbf16>
      %cst_16 = arith.constant dense<0.000000e+00> : vector<14x64xf32>
      %17 = tpu.matmul %14, %16, %cst_16 {dimension_numbers = #tpu.dot_dimension_numbers<[1], [0], [0], [1], [0, 0, 1, 1], [], []>} : vector<14x32xbf16>, vector<32x64xbf16>, vector<14x64xf32> -> vector<14x64xf32>
      %18 = arith.addf %10, %17 : vector<14x64xf32>
      %c0_i32_17 = arith.constant 0 : i32
      %19 = arith.addi %arg4, %c0_i32_17 : i32
      %c0_18 = arith.constant 0 : index
      %20 = arith.index_cast %19 : i32 to index
      %c2 = arith.constant 2 : index
      %c0_19 = arith.constant 0 : index
      %21 = vector.load %arg0[%c0_18, %20, %c2, %c0_19] : memref<2x18x18x32xbf16, #tpu.memory_space<vmem>>, vector<1x1x14x32xbf16>
      %22 = vector.shape_cast %21 : vector<1x1x14x32xbf16> to vector<14x32xbf16>
      %c2_20 = arith.constant 2 : index
      %c0_21 = arith.constant 0 : index
      %c0_22 = arith.constant 0 : index
      %23 = vector.load %arg1[%c2_20, %c0_21, %c0_22] : memref<25x32x64xbf16, #tpu.memory_space<vmem>>, vector<1x32x64xbf16>
      %24 = vector.shape_cast %23 : vector<1x32x64xbf16> to vector<32x64xbf16>
      %cst_23 = arith.constant dense<0.000000e+00> : vector<14x64xf32>
      %25 = tpu.matmul %22, %24, %cst_23 {dimension_numbers = #tpu.dot_dimension_numbers<[1], [0], [0], [1], [0, 0, 1, 1], [], []>} : vector<14x32xbf16>, vector<32x64xbf16>, vector<14x64xf32> -> vector<14x64xf32>
      %26 = arith.addf %18, %25 : vector<14x64xf32>
      %c0_i32_24 = arith.constant 0 : i32
      %27 = arith.addi %arg4, %c0_i32_24 : i32
      %c0_25 = arith.constant 0 : index
      %28 = arith.index_cast %27 : i32 to index
      %c3 = arith.constant 3 : index
      %c0_26 = arith.constant 0 : index
      %29 = vector.load %arg0[%c0_25, %28, %c3, %c0_26] : memref<2x18x18x32xbf16, #tpu.memory_space<vmem>>, vector<1x1x14x32xbf16>
      %30 = vector.shape_cast %29 : vector<1x1x14x32xbf16> to vector<14x32xbf16>
      %c3_27 = arith.constant 3 : index
      %c0_28 = arith.constant 0 : index
      %c0_29 = arith.constant 0 : index
      %31 = vector.load %arg1[%c3_27, %c0_28, %c0_29] : memref<25x32x64xbf16, #tpu.memory_space<vmem>>, vector<1x32x64xbf16>
      %32 = vector.shape_cast %31 : vector<1x32x64xbf16> to vector<32x64xbf16>
      %cst_30 = arith.constant dense<0.000000e+00> : vector<14x64xf32>
      %33 = tpu.matmul %30, %32, %cst_30 {dimension_numbers = #tpu.dot_dimension_numbers<[1], [0], [0], [1], [0, 0, 1, 1], [], []>} : vector<14x32xbf16>, vector<32x64xbf16>, vector<14x64xf32> -> vector<14x64xf32>
      %34 = arith.addf %26, %33 : vector<14x64xf32>
      %c0_i32_31 = arith.constant 0 : i32
      %35 = arith.addi %arg4, %c0_i32_31 : i32
      %c0_32 = arith.constant 0 : index
      %36 = arith.index_cast %35 : i32 to index
      %c4 = arith.constant 4 : index
      %c0_33 = arith.constant 0 : index
      %37 = vector.load %arg0[%c0_32, %36, %c4, %c0_33] : memref<2x18x18x32xbf16, #tpu.memory_space<vmem>>, vector<1x1x14x32xbf16>
      %38 = vector.shape_cast %37 : vector<1x1x14x32xbf16> to vector<14x32xbf16>
      %c4_34 = arith.constant 4 : index
      %c0_35 = arith.constant 0 : index
      %c0_36 = arith.constant 0 : index
      %39 = vector.load %arg1[%c4_34, %c0_35, %c0_36] : memref<25x32x64xbf16, #tpu.memory_space<vmem>>, vector<1x32x64xbf16>
      %40 = vector.shape_cast %39 : vector<1x32x64xbf16> to vector<32x64xbf16>
      %cst_37 = arith.constant dense<0.000000e+00> : vector<14x64xf32>
      %41 = tpu.matmul %38, %40, %cst_37 {dimension_numbers = #tpu.dot_dimension_numbers<[1], [0], [0], [1], [0, 0, 1, 1], [], []>} : vector<14x32xbf16>, vector<32x64xbf16>, vector<14x64xf32> -> vector<14x64xf32>
      %42 = arith.addf %34, %41 : vector<14x64xf32>
      %c1_i32_38 = arith.constant 1 : i32
      %43 = arith.addi %arg4, %c1_i32_38 : i32
      %c0_39 = arith.constant 0 : index
      %44 = arith.index_cast %43 : i32 to index
      %c0_40 = arith.constant 0 : index
      %c0_41 = arith.constant 0 : index
      %45 = vector.load %arg0[%c0_39, %44, %c0_40, %c0_41] : memref<2x18x18x32xbf16, #tpu.memory_space<vmem>>, vector<1x1x14x32xbf16>
      %46 = vector.shape_cast %45 : vector<1x1x14x32xbf16> to vector<14x32xbf16>
      %c5 = arith.constant 5 : index
      %c0_42 = arith.constant 0 : index
      %c0_43 = arith.constant 0 : index
      %47 = vector.load %arg1[%c5, %c0_42, %c0_43] : memref<25x32x64xbf16, #tpu.memory_space<vmem>>, vector<1x32x64xbf16>
      %48 = vector.shape_cast %47 : vector<1x32x64xbf16> to vector<32x64xbf16>
      %cst_44 = arith.constant dense<0.000000e+00> : vector<14x64xf32>
      %49 = tpu.matmul %46, %48, %cst_44 {dimension_numbers = #tpu.dot_dimension_numbers<[1], [0], [0], [1], [0, 0, 1, 1], [], []>} : vector<14x32xbf16>, vector<32x64xbf16>, vector<14x64xf32> -> vector<14x64xf32>
      %50 = arith.addf %42, %49 : vector<14x64xf32>
      %c1_i32_45 = arith.constant 1 : i32
      %51 = arith.addi %arg4, %c1_i32_45 : i32
      %c0_46 = arith.constant 0 : index
      %52 = arith.index_cast %51 : i32 to index
      %c1_47 = arith.constant 1 : index
      %c0_48 = arith.constant 0 : index
      %53 = vector.load %arg0[%c0_46, %52, %c1_47, %c0_48] : memref<2x18x18x32xbf16, #tpu.memory_space<vmem>>, vector<1x1x14x32xbf16>
      %54 = vector.shape_cast %53 : vector<1x1x14x32xbf16> to vector<14x32xbf16>
      %c6 = arith.constant 6 : index
      %c0_49 = arith.constant 0 : index
      %c0_50 = arith.constant 0 : index
      %55 = vector.load %arg1[%c6, %c0_49, %c0_50] : memref<25x32x64xbf16, #tpu.memory_space<vmem>>, vector<1x32x64xbf16>
      %56 = vector.shape_cast %55 : vector<1x32x64xbf16> to vector<32x64xbf16>
      %cst_51 = arith.constant dense<0.000000e+00> : vector<14x64xf32>
      %57 = tpu.matmul %54, %56, %cst_51 {dimension_numbers = #tpu.dot_dimension_numbers<[1], [0], [0], [1], [0, 0, 1, 1], [], []>} : vector<14x32xbf16>, vector<32x64xbf16>, vector<14x64xf32> -> vector<14x64xf32>
      %58 = arith.addf %50, %57 : vector<14x64xf32>
      %c1_i32_52 = arith.constant 1 : i32
      %59 = arith.addi %arg4, %c1_i32_52 : i32
      %c0_53 = arith.constant 0 : index
      %60 = arith.index_cast %59 : i32 to index
      %c2_54 = arith.constant 2 : index
      %c0_55 = arith.constant 0 : index
      %61 = vector.load %arg0[%c0_53, %60, %c2_54, %c0_55] : memref<2x18x18x32xbf16, #tpu.memory_space<vmem>>, vector<1x1x14x32xbf16>
      %62 = vector.shape_cast %61 : vector<1x1x14x32xbf16> to vector<14x32xbf16>
      %c7 = arith.constant 7 : index
      %c0_56 = arith.constant 0 : index
      %c0_57 = arith.constant 0 : index
      %63 = vector.load %arg1[%c7, %c0_56, %c0_57] : memref<25x32x64xbf16, #tpu.memory_space<vmem>>, vector<1x32x64xbf16>
      %64 = vector.shape_cast %63 : vector<1x32x64xbf16> to vector<32x64xbf16>
      %cst_58 = arith.constant dense<0.000000e+00> : vector<14x64xf32>
      %65 = tpu.matmul %62, %64, %cst_58 {dimension_numbers = #tpu.dot_dimension_numbers<[1], [0], [0], [1], [0, 0, 1, 1], [], []>} : vector<14x32xbf16>, vector<32x64xbf16>, vector<14x64xf32> -> vector<14x64xf32>
      %66 = arith.addf %58, %65 : vector<14x64xf32>
      %c1_i32_59 = arith.constant 1 : i32
      %67 = arith.addi %arg4, %c1_i32_59 : i32
      %c0_60 = arith.constant 0 : index
      %68 = arith.index_cast %67 : i32 to index
      %c3_61 = arith.constant 3 : index
      %c0_62 = arith.constant 0 : index
      %69 = vector.load %arg0[%c0_60, %68, %c3_61, %c0_62] : memref<2x18x18x32xbf16, #tpu.memory_space<vmem>>, vector<1x1x14x32xbf16>
      %70 = vector.shape_cast %69 : vector<1x1x14x32xbf16> to vector<14x32xbf16>
      %c8 = arith.constant 8 : index
      %c0_63 = arith.constant 0 : index
      %c0_64 = arith.constant 0 : index
      %71 = vector.load %arg1[%c8, %c0_63, %c0_64] : memref<25x32x64xbf16, #tpu.memory_space<vmem>>, vector<1x32x64xbf16>
      %72 = vector.shape_cast %71 : vector<1x32x64xbf16> to vector<32x64xbf16>
      %cst_65 = arith.constant dense<0.000000e+00> : vector<14x64xf32>
      %73 = tpu.matmul %70, %72, %cst_65 {dimension_numbers = #tpu.dot_dimension_numbers<[1], [0], [0], [1], [0, 0, 1, 1], [], []>} : vector<14x32xbf16>, vector<32x64xbf16>, vector<14x64xf32> -> vector<14x64xf32>
      %74 = arith.addf %66, %73 : vector<14x64xf32>
      %c1_i32_66 = arith.constant 1 : i32
      %75 = arith.addi %arg4, %c1_i32_66 : i32
      %c0_67 = arith.constant 0 : index
      %76 = arith.index_cast %75 : i32 to index
      %c4_68 = arith.constant 4 : index
      %c0_69 = arith.constant 0 : index
      %77 = vector.load %arg0[%c0_67, %76, %c4_68, %c0_69] : memref<2x18x18x32xbf16, #tpu.memory_space<vmem>>, vector<1x1x14x32xbf16>
      %78 = vector.shape_cast %77 : vector<1x1x14x32xbf16> to vector<14x32xbf16>
      %c9 = arith.constant 9 : index
      %c0_70 = arith.constant 0 : index
      %c0_71 = arith.constant 0 : index
      %79 = vector.load %arg1[%c9, %c0_70, %c0_71] : memref<25x32x64xbf16, #tpu.memory_space<vmem>>, vector<1x32x64xbf16>
      %80 = vector.shape_cast %79 : vector<1x32x64xbf16> to vector<32x64xbf16>
      %cst_72 = arith.constant dense<0.000000e+00> : vector<14x64xf32>
      %81 = tpu.matmul %78, %80, %cst_72 {dimension_numbers = #tpu.dot_dimension_numbers<[1], [0], [0], [1], [0, 0, 1, 1], [], []>} : vector<14x32xbf16>, vector<32x64xbf16>, vector<14x64xf32> -> vector<14x64xf32>
      %82 = arith.addf %74, %81 : vector<14x64xf32>
      %c2_i32 = arith.constant 2 : i32
      %83 = arith.addi %arg4, %c2_i32 : i32
      %c0_73 = arith.constant 0 : index
      %84 = arith.index_cast %83 : i32 to index
      %c0_74 = arith.constant 0 : index
      %c0_75 = arith.constant 0 : index
      %85 = vector.load %arg0[%c0_73, %84, %c0_74, %c0_75] : memref<2x18x18x32xbf16, #tpu.memory_space<vmem>>, vector<1x1x14x32xbf16>
      %86 = vector.shape_cast %85 : vector<1x1x14x32xbf16> to vector<14x32xbf16>
      %c10 = arith.constant 10 : index
      %c0_76 = arith.constant 0 : index
      %c0_77 = arith.constant 0 : index
      %87 = vector.load %arg1[%c10, %c0_76, %c0_77] : memref<25x32x64xbf16, #tpu.memory_space<vmem>>, vector<1x32x64xbf16>
      %88 = vector.shape_cast %87 : vector<1x32x64xbf16> to vector<32x64xbf16>
      %cst_78 = arith.constant dense<0.000000e+00> : vector<14x64xf32>
      %89 = tpu.matmul %86, %88, %cst_78 {dimension_numbers = #tpu.dot_dimension_numbers<[1], [0], [0], [1], [0, 0, 1, 1], [], []>} : vector<14x32xbf16>, vector<32x64xbf16>, vector<14x64xf32> -> vector<14x64xf32>
      %90 = arith.addf %82, %89 : vector<14x64xf32>
      %c2_i32_79 = arith.constant 2 : i32
      %91 = arith.addi %arg4, %c2_i32_79 : i32
      %c0_80 = arith.constant 0 : index
      %92 = arith.index_cast %91 : i32 to index
      %c1_81 = arith.constant 1 : index
      %c0_82 = arith.constant 0 : index
      %93 = vector.load %arg0[%c0_80, %92, %c1_81, %c0_82] : memref<2x18x18x32xbf16, #tpu.memory_space<vmem>>, vector<1x1x14x32xbf16>
      %94 = vector.shape_cast %93 : vector<1x1x14x32xbf16> to vector<14x32xbf16>
      %c11 = arith.constant 11 : index
      %c0_83 = arith.constant 0 : index
      %c0_84 = arith.constant 0 : index
      %95 = vector.load %arg1[%c11, %c0_83, %c0_84] : memref<25x32x64xbf16, #tpu.memory_space<vmem>>, vector<1x32x64xbf16>
      %96 = vector.shape_cast %95 : vector<1x32x64xbf16> to vector<32x64xbf16>
      %cst_85 = arith.constant dense<0.000000e+00> : vector<14x64xf32>
      %97 = tpu.matmul %94, %96, %cst_85 {dimension_numbers = #tpu.dot_dimension_numbers<[1], [0], [0], [1], [0, 0, 1, 1], [], []>} : vector<14x32xbf16>, vector<32x64xbf16>, vector<14x64xf32> -> vector<14x64xf32>
      %98 = arith.addf %90, %97 : vector<14x64xf32>
      %c2_i32_86 = arith.constant 2 : i32
      %99 = arith.addi %arg4, %c2_i32_86 : i32
      %c0_87 = arith.constant 0 : index
      %100 = arith.index_cast %99 : i32 to index
      %c2_88 = arith.constant 2 : index
      %c0_89 = arith.constant 0 : index
      %101 = vector.load %arg0[%c0_87, %100, %c2_88, %c0_89] : memref<2x18x18x32xbf16, #tpu.memory_space<vmem>>, vector<1x1x14x32xbf16>
      %102 = vector.shape_cast %101 : vector<1x1x14x32xbf16> to vector<14x32xbf16>
      %c12 = arith.constant 12 : index
      %c0_90 = arith.constant 0 : index
      %c0_91 = arith.constant 0 : index
      %103 = vector.load %arg1[%c12, %c0_90, %c0_91] : memref<25x32x64xbf16, #tpu.memory_space<vmem>>, vector<1x32x64xbf16>
      %104 = vector.shape_cast %103 : vector<1x32x64xbf16> to vector<32x64xbf16>
      %cst_92 = arith.constant dense<0.000000e+00> : vector<14x64xf32>
      %105 = tpu.matmul %102, %104, %cst_92 {dimension_numbers = #tpu.dot_dimension_numbers<[1], [0], [0], [1], [0, 0, 1, 1], [], []>} : vector<14x32xbf16>, vector<32x64xbf16>, vector<14x64xf32> -> vector<14x64xf32>
      %106 = arith.addf %98, %105 : vector<14x64xf32>
      %c2_i32_93 = arith.constant 2 : i32
      %107 = arith.addi %arg4, %c2_i32_93 : i32
      %c0_94 = arith.constant 0 : index
      %108 = arith.index_cast %107 : i32 to index
      %c3_95 = arith.constant 3 : index
      %c0_96 = arith.constant 0 : index
      %109 = vector.load %arg0[%c0_94, %108, %c3_95, %c0_96] : memref<2x18x18x32xbf16, #tpu.memory_space<vmem>>, vector<1x1x14x32xbf16>
      %110 = vector.shape_cast %109 : vector<1x1x14x32xbf16> to vector<14x32xbf16>
      %c13 = arith.constant 13 : index
      %c0_97 = arith.constant 0 : index
      %c0_98 = arith.constant 0 : index
      %111 = vector.load %arg1[%c13, %c0_97, %c0_98] : memref<25x32x64xbf16, #tpu.memory_space<vmem>>, vector<1x32x64xbf16>
      %112 = vector.shape_cast %111 : vector<1x32x64xbf16> to vector<32x64xbf16>
      %cst_99 = arith.constant dense<0.000000e+00> : vector<14x64xf32>
      %113 = tpu.matmul %110, %112, %cst_99 {dimension_numbers = #tpu.dot_dimension_numbers<[1], [0], [0], [1], [0, 0, 1, 1], [], []>} : vector<14x32xbf16>, vector<32x64xbf16>, vector<14x64xf32> -> vector<14x64xf32>
      %114 = arith.addf %106, %113 : vector<14x64xf32>
      %c2_i32_100 = arith.constant 2 : i32
      %115 = arith.addi %arg4, %c2_i32_100 : i32
      %c0_101 = arith.constant 0 : index
      %116 = arith.index_cast %115 : i32 to index
      %c4_102 = arith.constant 4 : index
      %c0_103 = arith.constant 0 : index
      %117 = vector.load %arg0[%c0_101, %116, %c4_102, %c0_103] : memref<2x18x18x32xbf16, #tpu.memory_space<vmem>>, vector<1x1x14x32xbf16>
      %118 = vector.shape_cast %117 : vector<1x1x14x32xbf16> to vector<14x32xbf16>
      %c14 = arith.constant 14 : index
      %c0_104 = arith.constant 0 : index
      %c0_105 = arith.constant 0 : index
      %119 = vector.load %arg1[%c14, %c0_104, %c0_105] : memref<25x32x64xbf16, #tpu.memory_space<vmem>>, vector<1x32x64xbf16>
      %120 = vector.shape_cast %119 : vector<1x32x64xbf16> to vector<32x64xbf16>
      %cst_106 = arith.constant dense<0.000000e+00> : vector<14x64xf32>
      %121 = tpu.matmul %118, %120, %cst_106 {dimension_numbers = #tpu.dot_dimension_numbers<[1], [0], [0], [1], [0, 0, 1, 1], [], []>} : vector<14x32xbf16>, vector<32x64xbf16>, vector<14x64xf32> -> vector<14x64xf32>
      %122 = arith.addf %114, %121 : vector<14x64xf32>
      %c3_i32 = arith.constant 3 : i32
      %123 = arith.addi %arg4, %c3_i32 : i32
      %c0_107 = arith.constant 0 : index
      %124 = arith.index_cast %123 : i32 to index
      %c0_108 = arith.constant 0 : index
      %c0_109 = arith.constant 0 : index
      %125 = vector.load %arg0[%c0_107, %124, %c0_108, %c0_109] : memref<2x18x18x32xbf16, #tpu.memory_space<vmem>>, vector<1x1x14x32xbf16>
      %126 = vector.shape_cast %125 : vector<1x1x14x32xbf16> to vector<14x32xbf16>
      %c15 = arith.constant 15 : index
      %c0_110 = arith.constant 0 : index
      %c0_111 = arith.constant 0 : index
      %127 = vector.load %arg1[%c15, %c0_110, %c0_111] : memref<25x32x64xbf16, #tpu.memory_space<vmem>>, vector<1x32x64xbf16>
      %128 = vector.shape_cast %127 : vector<1x32x64xbf16> to vector<32x64xbf16>
      %cst_112 = arith.constant dense<0.000000e+00> : vector<14x64xf32>
      %129 = tpu.matmul %126, %128, %cst_112 {dimension_numbers = #tpu.dot_dimension_numbers<[1], [0], [0], [1], [0, 0, 1, 1], [], []>} : vector<14x32xbf16>, vector<32x64xbf16>, vector<14x64xf32> -> vector<14x64xf32>
      %130 = arith.addf %122, %129 : vector<14x64xf32>
      %c3_i32_113 = arith.constant 3 : i32
      %131 = arith.addi %arg4, %c3_i32_113 : i32
      %c0_114 = arith.constant 0 : index
      %132 = arith.index_cast %131 : i32 to index
      %c1_115 = arith.constant 1 : index
      %c0_116 = arith.constant 0 : index
      %133 = vector.load %arg0[%c0_114, %132, %c1_115, %c0_116] : memref<2x18x18x32xbf16, #tpu.memory_space<vmem>>, vector<1x1x14x32xbf16>
      %134 = vector.shape_cast %133 : vector<1x1x14x32xbf16> to vector<14x32xbf16>
      %c16 = arith.constant 16 : index
      %c0_117 = arith.constant 0 : index
      %c0_118 = arith.constant 0 : index
      %135 = vector.load %arg1[%c16, %c0_117, %c0_118] : memref<25x32x64xbf16, #tpu.memory_space<vmem>>, vector<1x32x64xbf16>
      %136 = vector.shape_cast %135 : vector<1x32x64xbf16> to vector<32x64xbf16>
      %cst_119 = arith.constant dense<0.000000e+00> : vector<14x64xf32>
      %137 = tpu.matmul %134, %136, %cst_119 {dimension_numbers = #tpu.dot_dimension_numbers<[1], [0], [0], [1], [0, 0, 1, 1], [], []>} : vector<14x32xbf16>, vector<32x64xbf16>, vector<14x64xf32> -> vector<14x64xf32>
      %138 = arith.addf %130, %137 : vector<14x64xf32>
      %c3_i32_120 = arith.constant 3 : i32
      %139 = arith.addi %arg4, %c3_i32_120 : i32
      %c0_121 = arith.constant 0 : index
      %140 = arith.index_cast %139 : i32 to index
      %c2_122 = arith.constant 2 : index
      %c0_123 = arith.constant 0 : index
      %141 = vector.load %arg0[%c0_121, %140, %c2_122, %c0_123] : memref<2x18x18x32xbf16, #tpu.memory_space<vmem>>, vector<1x1x14x32xbf16>
      %142 = vector.shape_cast %141 : vector<1x1x14x32xbf16> to vector<14x32xbf16>
      %c17 = arith.constant 17 : index
      %c0_124 = arith.constant 0 : index
      %c0_125 = arith.constant 0 : index
      %143 = vector.load %arg1[%c17, %c0_124, %c0_125] : memref<25x32x64xbf16, #tpu.memory_space<vmem>>, vector<1x32x64xbf16>
      %144 = vector.shape_cast %143 : vector<1x32x64xbf16> to vector<32x64xbf16>
      %cst_126 = arith.constant dense<0.000000e+00> : vector<14x64xf32>
      %145 = tpu.matmul %142, %144, %cst_126 {dimension_numbers = #tpu.dot_dimension_numbers<[1], [0], [0], [1], [0, 0, 1, 1], [], []>} : vector<14x32xbf16>, vector<32x64xbf16>, vector<14x64xf32> -> vector<14x64xf32>
      %146 = arith.addf %138, %145 : vector<14x64xf32>
      %c3_i32_127 = arith.constant 3 : i32
      %147 = arith.addi %arg4, %c3_i32_127 : i32
      %c0_128 = arith.constant 0 : index
      %148 = arith.index_cast %147 : i32 to index
      %c3_129 = arith.constant 3 : index
      %c0_130 = arith.constant 0 : index
      %149 = vector.load %arg0[%c0_128, %148, %c3_129, %c0_130] : memref<2x18x18x32xbf16, #tpu.memory_space<vmem>>, vector<1x1x14x32xbf16>
      %150 = vector.shape_cast %149 : vector<1x1x14x32xbf16> to vector<14x32xbf16>
      %c18 = arith.constant 18 : index
      %c0_131 = arith.constant 0 : index
      %c0_132 = arith.constant 0 : index
      %151 = vector.load %arg1[%c18, %c0_131, %c0_132] : memref<25x32x64xbf16, #tpu.memory_space<vmem>>, vector<1x32x64xbf16>
      %152 = vector.shape_cast %151 : vector<1x32x64xbf16> to vector<32x64xbf16>
      %cst_133 = arith.constant dense<0.000000e+00> : vector<14x64xf32>
      %153 = tpu.matmul %150, %152, %cst_133 {dimension_numbers = #tpu.dot_dimension_numbers<[1], [0], [0], [1], [0, 0, 1, 1], [], []>} : vector<14x32xbf16>, vector<32x64xbf16>, vector<14x64xf32> -> vector<14x64xf32>
      %154 = arith.addf %146, %153 : vector<14x64xf32>
      %c3_i32_134 = arith.constant 3 : i32
      %155 = arith.addi %arg4, %c3_i32_134 : i32
      %c0_135 = arith.constant 0 : index
      %156 = arith.index_cast %155 : i32 to index
      %c4_136 = arith.constant 4 : index
      %c0_137 = arith.constant 0 : index
      %157 = vector.load %arg0[%c0_135, %156, %c4_136, %c0_137] : memref<2x18x18x32xbf16, #tpu.memory_space<vmem>>, vector<1x1x14x32xbf16>
      %158 = vector.shape_cast %157 : vector<1x1x14x32xbf16> to vector<14x32xbf16>
      %c19 = arith.constant 19 : index
      %c0_138 = arith.constant 0 : index
      %c0_139 = arith.constant 0 : index
      %159 = vector.load %arg1[%c19, %c0_138, %c0_139] : memref<25x32x64xbf16, #tpu.memory_space<vmem>>, vector<1x32x64xbf16>
      %160 = vector.shape_cast %159 : vector<1x32x64xbf16> to vector<32x64xbf16>
      %cst_140 = arith.constant dense<0.000000e+00> : vector<14x64xf32>
      %161 = tpu.matmul %158, %160, %cst_140 {dimension_numbers = #tpu.dot_dimension_numbers<[1], [0], [0], [1], [0, 0, 1, 1], [], []>} : vector<14x32xbf16>, vector<32x64xbf16>, vector<14x64xf32> -> vector<14x64xf32>
      %162 = arith.addf %154, %161 : vector<14x64xf32>
      %c4_i32 = arith.constant 4 : i32
      %163 = arith.addi %arg4, %c4_i32 : i32
      %c0_141 = arith.constant 0 : index
      %164 = arith.index_cast %163 : i32 to index
      %c0_142 = arith.constant 0 : index
      %c0_143 = arith.constant 0 : index
      %165 = vector.load %arg0[%c0_141, %164, %c0_142, %c0_143] : memref<2x18x18x32xbf16, #tpu.memory_space<vmem>>, vector<1x1x14x32xbf16>
      %166 = vector.shape_cast %165 : vector<1x1x14x32xbf16> to vector<14x32xbf16>
      %c20 = arith.constant 20 : index
      %c0_144 = arith.constant 0 : index
      %c0_145 = arith.constant 0 : index
      %167 = vector.load %arg1[%c20, %c0_144, %c0_145] : memref<25x32x64xbf16, #tpu.memory_space<vmem>>, vector<1x32x64xbf16>
      %168 = vector.shape_cast %167 : vector<1x32x64xbf16> to vector<32x64xbf16>
      %cst_146 = arith.constant dense<0.000000e+00> : vector<14x64xf32>
      %169 = tpu.matmul %166, %168, %cst_146 {dimension_numbers = #tpu.dot_dimension_numbers<[1], [0], [0], [1], [0, 0, 1, 1], [], []>} : vector<14x32xbf16>, vector<32x64xbf16>, vector<14x64xf32> -> vector<14x64xf32>
      %170 = arith.addf %162, %169 : vector<14x64xf32>
      %c4_i32_147 = arith.constant 4 : i32
      %171 = arith.addi %arg4, %c4_i32_147 : i32
      %c0_148 = arith.constant 0 : index
      %172 = arith.index_cast %171 : i32 to index
      %c1_149 = arith.constant 1 : index
      %c0_150 = arith.constant 0 : index
      %173 = vector.load %arg0[%c0_148, %172, %c1_149, %c0_150] : memref<2x18x18x32xbf16, #tpu.memory_space<vmem>>, vector<1x1x14x32xbf16>
      %174 = vector.shape_cast %173 : vector<1x1x14x32xbf16> to vector<14x32xbf16>
      %c21 = arith.constant 21 : index
      %c0_151 = arith.constant 0 : index
      %c0_152 = arith.constant 0 : index
      %175 = vector.load %arg1[%c21, %c0_151, %c0_152] : memref<25x32x64xbf16, #tpu.memory_space<vmem>>, vector<1x32x64xbf16>
      %176 = vector.shape_cast %175 : vector<1x32x64xbf16> to vector<32x64xbf16>
      %cst_153 = arith.constant dense<0.000000e+00> : vector<14x64xf32>
      %177 = tpu.matmul %174, %176, %cst_153 {dimension_numbers = #tpu.dot_dimension_numbers<[1], [0], [0], [1], [0, 0, 1, 1], [], []>} : vector<14x32xbf16>, vector<32x64xbf16>, vector<14x64xf32> -> vector<14x64xf32>
      %178 = arith.addf %170, %177 : vector<14x64xf32>
      %c4_i32_154 = arith.constant 4 : i32
      %179 = arith.addi %arg4, %c4_i32_154 : i32
      %c0_155 = arith.constant 0 : index
      %180 = arith.index_cast %179 : i32 to index
      %c2_156 = arith.constant 2 : index
      %c0_157 = arith.constant 0 : index
      %181 = vector.load %arg0[%c0_155, %180, %c2_156, %c0_157] : memref<2x18x18x32xbf16, #tpu.memory_space<vmem>>, vector<1x1x14x32xbf16>
      %182 = vector.shape_cast %181 : vector<1x1x14x32xbf16> to vector<14x32xbf16>
      %c22 = arith.constant 22 : index
      %c0_158 = arith.constant 0 : index
      %c0_159 = arith.constant 0 : index
      %183 = vector.load %arg1[%c22, %c0_158, %c0_159] : memref<25x32x64xbf16, #tpu.memory_space<vmem>>, vector<1x32x64xbf16>
      %184 = vector.shape_cast %183 : vector<1x32x64xbf16> to vector<32x64xbf16>
      %cst_160 = arith.constant dense<0.000000e+00> : vector<14x64xf32>
      %185 = tpu.matmul %182, %184, %cst_160 {dimension_numbers = #tpu.dot_dimension_numbers<[1], [0], [0], [1], [0, 0, 1, 1], [], []>} : vector<14x32xbf16>, vector<32x64xbf16>, vector<14x64xf32> -> vector<14x64xf32>
      %186 = arith.addf %178, %185 : vector<14x64xf32>
      %c4_i32_161 = arith.constant 4 : i32
      %187 = arith.addi %arg4, %c4_i32_161 : i32
      %c0_162 = arith.constant 0 : index
      %188 = arith.index_cast %187 : i32 to index
      %c3_163 = arith.constant 3 : index
      %c0_164 = arith.constant 0 : index
      %189 = vector.load %arg0[%c0_162, %188, %c3_163, %c0_164] : memref<2x18x18x32xbf16, #tpu.memory_space<vmem>>, vector<1x1x14x32xbf16>
      %190 = vector.shape_cast %189 : vector<1x1x14x32xbf16> to vector<14x32xbf16>
      %c23 = arith.constant 23 : index
      %c0_165 = arith.constant 0 : index
      %c0_166 = arith.constant 0 : index
      %191 = vector.load %arg1[%c23, %c0_165, %c0_166] : memref<25x32x64xbf16, #tpu.memory_space<vmem>>, vector<1x32x64xbf16>
      %192 = vector.shape_cast %191 : vector<1x32x64xbf16> to vector<32x64xbf16>
      %cst_167 = arith.constant dense<0.000000e+00> : vector<14x64xf32>
      %193 = tpu.matmul %190, %192, %cst_167 {dimension_numbers = #tpu.dot_dimension_numbers<[1], [0], [0], [1], [0, 0, 1, 1], [], []>} : vector<14x32xbf16>, vector<32x64xbf16>, vector<14x64xf32> -> vector<14x64xf32>
      %194 = arith.addf %186, %193 : vector<14x64xf32>
      %c4_i32_168 = arith.constant 4 : i32
      %195 = arith.addi %arg4, %c4_i32_168 : i32
      %c0_169 = arith.constant 0 : index
      %196 = arith.index_cast %195 : i32 to index
      %c4_170 = arith.constant 4 : index
      %c0_171 = arith.constant 0 : index
      %197 = vector.load %arg0[%c0_169, %196, %c4_170, %c0_171] : memref<2x18x18x32xbf16, #tpu.memory_space<vmem>>, vector<1x1x14x32xbf16>
      %198 = vector.shape_cast %197 : vector<1x1x14x32xbf16> to vector<14x32xbf16>
      %c24 = arith.constant 24 : index
      %c0_172 = arith.constant 0 : index
      %c0_173 = arith.constant 0 : index
      %199 = vector.load %arg1[%c24, %c0_172, %c0_173] : memref<25x32x64xbf16, #tpu.memory_space<vmem>>, vector<1x32x64xbf16>
      %200 = vector.shape_cast %199 : vector<1x32x64xbf16> to vector<32x64xbf16>
      %cst_174 = arith.constant dense<0.000000e+00> : vector<14x64xf32>
      %201 = tpu.matmul %198, %200, %cst_174 {dimension_numbers = #tpu.dot_dimension_numbers<[1], [0], [0], [1], [0, 0, 1, 1], [], []>} : vector<14x32xbf16>, vector<32x64xbf16>, vector<14x64xf32> -> vector<14x64xf32>
      %202 = arith.addf %194, %201 : vector<14x64xf32>
      %203 = vector.broadcast %0 : vector<1x64xf32> to vector<14x64xf32>
      %204 = arith.addf %202, %203 : vector<14x64xf32>
      %cst_175 = arith.constant 0.000000e+00 : f32
      %205 = vector.broadcast %cst_175 : f32 to vector<14x64xf32>
      %206 = arith.maximumf %204, %205 : vector<14x64xf32>
      %207 = arith.truncf %206 : vector<14x64xf32> to vector<14x64xbf16>
      %c0_176 = arith.constant 0 : index
      %208 = arith.index_cast %arg4 : i32 to index
      %c0_177 = arith.constant 0 : index
      %c0_178 = arith.constant 0 : index
      %209 = vector.load %arg3[%c0_176, %208, %c0_177, %c0_178] : memref<2x14x14x64xbf16, #tpu.memory_space<vmem>>, vector<1x1x14x64xbf16>
      %210 = vector.shape_cast %209 : vector<1x1x14x64xbf16> to vector<14x64xbf16>
      %211 = vector.shape_cast %207 : vector<14x64xbf16> to vector<1x1x14x64xbf16>
      tpu.vector_store %arg3[%c0_176, %208, %c0_177, %c0_178], %211 {strides = array<i32>} : memref<2x14x14x64xbf16, #tpu.memory_space<vmem>>, vector<1x1x14x64xbf16>,
      %cst_179 = arith.constant 0.000000e+00 : f32
      %212 = vector.broadcast %cst_179 : f32 to vector<14x64xf32>
      %c0_i32_180 = arith.constant 0 : i32
      %213 = arith.addi %arg4, %c0_i32_180 : i32
      %c1_181 = arith.constant 1 : index
      %214 = arith.index_cast %213 : i32 to index
      %c0_182 = arith.constant 0 : index
      %c0_183 = arith.constant 0 : index
      %215 = vector.load %arg0[%c1_181, %214, %c0_182, %c0_183] : memref<2x18x18x32xbf16, #tpu.memory_space<vmem>>, vector<1x1x14x32xbf16>
      %216 = vector.shape_cast %215 : vector<1x1x14x32xbf16> to vector<14x32xbf16>
      %c0_184 = arith.constant 0 : index
      %c0_185 = arith.constant 0 : index
      %c0_186 = arith.constant 0 : index
      %217 = vector.load %arg1[%c0_184, %c0_185, %c0_186] : memref<25x32x64xbf16, #tpu.memory_space<vmem>>, vector<1x32x64xbf16>
      %218 = vector.shape_cast %217 : vector<1x32x64xbf16> to vector<32x64xbf16>
      %cst_187 = arith.constant dense<0.000000e+00> : vector<14x64xf32>
      %219 = tpu.matmul %216, %218, %cst_187 {dimension_numbers = #tpu.dot_dimension_numbers<[1], [0], [0], [1], [0, 0, 1, 1], [], []>} : vector<14x32xbf16>, vector<32x64xbf16>, vector<14x64xf32> -> vector<14x64xf32>
      %220 = arith.addf %212, %219 : vector<14x64xf32>
      %c0_i32_188 = arith.constant 0 : i32
      %221 = arith.addi %arg4, %c0_i32_188 : i32
      %c1_189 = arith.constant 1 : index
      %222 = arith.index_cast %221 : i32 to index
      %c1_190 = arith.constant 1 : index
      %c0_191 = arith.constant 0 : index
      %223 = vector.load %arg0[%c1_189, %222, %c1_190, %c0_191] : memref<2x18x18x32xbf16, #tpu.memory_space<vmem>>, vector<1x1x14x32xbf16>
      %224 = vector.shape_cast %223 : vector<1x1x14x32xbf16> to vector<14x32xbf16>
      %c1_192 = arith.constant 1 : index
      %c0_193 = arith.constant 0 : index
      %c0_194 = arith.constant 0 : index
      %225 = vector.load %arg1[%c1_192, %c0_193, %c0_194] : memref<25x32x64xbf16, #tpu.memory_space<vmem>>, vector<1x32x64xbf16>
      %226 = vector.shape_cast %225 : vector<1x32x64xbf16> to vector<32x64xbf16>
      %cst_195 = arith.constant dense<0.000000e+00> : vector<14x64xf32>
      %227 = tpu.matmul %224, %226, %cst_195 {dimension_numbers = #tpu.dot_dimension_numbers<[1], [0], [0], [1], [0, 0, 1, 1], [], []>} : vector<14x32xbf16>, vector<32x64xbf16>, vector<14x64xf32> -> vector<14x64xf32>
      %228 = arith.addf %220, %227 : vector<14x64xf32>
      %c0_i32_196 = arith.constant 0 : i32
      %229 = arith.addi %arg4, %c0_i32_196 : i32
      %c1_197 = arith.constant 1 : index
      %230 = arith.index_cast %229 : i32 to index
      %c2_198 = arith.constant 2 : index
      %c0_199 = arith.constant 0 : index
      %231 = vector.load %arg0[%c1_197, %230, %c2_198, %c0_199] : memref<2x18x18x32xbf16, #tpu.memory_space<vmem>>, vector<1x1x14x32xbf16>
      %232 = vector.shape_cast %231 : vector<1x1x14x32xbf16> to vector<14x32xbf16>
      %c2_200 = arith.constant 2 : index
      %c0_201 = arith.constant 0 : index
      %c0_202 = arith.constant 0 : index
      %233 = vector.load %arg1[%c2_200, %c0_201, %c0_202] : memref<25x32x64xbf16, #tpu.memory_space<vmem>>, vector<1x32x64xbf16>
      %234 = vector.shape_cast %233 : vector<1x32x64xbf16> to vector<32x64xbf16>
      %cst_203 = arith.constant dense<0.000000e+00> : vector<14x64xf32>
      %235 = tpu.matmul %232, %234, %cst_203 {dimension_numbers = #tpu.dot_dimension_numbers<[1], [0], [0], [1], [0, 0, 1, 1], [], []>} : vector<14x32xbf16>, vector<32x64xbf16>, vector<14x64xf32> -> vector<14x64xf32>
      %236 = arith.addf %228, %235 : vector<14x64xf32>
      %c0_i32_204 = arith.constant 0 : i32
      %237 = arith.addi %arg4, %c0_i32_204 : i32
      %c1_205 = arith.constant 1 : index
      %238 = arith.index_cast %237 : i32 to index
      %c3_206 = arith.constant 3 : index
      %c0_207 = arith.constant 0 : index
      %239 = vector.load %arg0[%c1_205, %238, %c3_206, %c0_207] : memref<2x18x18x32xbf16, #tpu.memory_space<vmem>>, vector<1x1x14x32xbf16>
      %240 = vector.shape_cast %239 : vector<1x1x14x32xbf16> to vector<14x32xbf16>
      %c3_208 = arith.constant 3 : index
      %c0_209 = arith.constant 0 : index
      %c0_210 = arith.constant 0 : index
      %241 = vector.load %arg1[%c3_208, %c0_209, %c0_210] : memref<25x32x64xbf16, #tpu.memory_space<vmem>>, vector<1x32x64xbf16>
      %242 = vector.shape_cast %241 : vector<1x32x64xbf16> to vector<32x64xbf16>
      %cst_211 = arith.constant dense<0.000000e+00> : vector<14x64xf32>
      %243 = tpu.matmul %240, %242, %cst_211 {dimension_numbers = #tpu.dot_dimension_numbers<[1], [0], [0], [1], [0, 0, 1, 1], [], []>} : vector<14x32xbf16>, vector<32x64xbf16>, vector<14x64xf32> -> vector<14x64xf32>
      %244 = arith.addf %236, %243 : vector<14x64xf32>
      %c0_i32_212 = arith.constant 0 : i32
      %245 = arith.addi %arg4, %c0_i32_212 : i32
      %c1_213 = arith.constant 1 : index
      %246 = arith.index_cast %245 : i32 to index
      %c4_214 = arith.constant 4 : index
      %c0_215 = arith.constant 0 : index
      %247 = vector.load %arg0[%c1_213, %246, %c4_214, %c0_215] : memref<2x18x18x32xbf16, #tpu.memory_space<vmem>>, vector<1x1x14x32xbf16>
      %248 = vector.shape_cast %247 : vector<1x1x14x32xbf16> to vector<14x32xbf16>
      %c4_216 = arith.constant 4 : index
      %c0_217 = arith.constant 0 : index
      %c0_218 = arith.constant 0 : index
      %249 = vector.load %arg1[%c4_216, %c0_217, %c0_218] : memref<25x32x64xbf16, #tpu.memory_space<vmem>>, vector<1x32x64xbf16>
      %250 = vector.shape_cast %249 : vector<1x32x64xbf16> to vector<32x64xbf16>
      %cst_219 = arith.constant dense<0.000000e+00> : vector<14x64xf32>
      %251 = tpu.matmul %248, %250, %cst_219 {dimension_numbers = #tpu.dot_dimension_numbers<[1], [0], [0], [1], [0, 0, 1, 1], [], []>} : vector<14x32xbf16>, vector<32x64xbf16>, vector<14x64xf32> -> vector<14x64xf32>
      %252 = arith.addf %244, %251 : vector<14x64xf32>
      %c1_i32_220 = arith.constant 1 : i32
      %253 = arith.addi %arg4, %c1_i32_220 : i32
      %c1_221 = arith.constant 1 : index
      %254 = arith.index_cast %253 : i32 to index
      %c0_222 = arith.constant 0 : index
      %c0_223 = arith.constant 0 : index
      %255 = vector.load %arg0[%c1_221, %254, %c0_222, %c0_223] : memref<2x18x18x32xbf16, #tpu.memory_space<vmem>>, vector<1x1x14x32xbf16>
      %256 = vector.shape_cast %255 : vector<1x1x14x32xbf16> to vector<14x32xbf16>
      %c5_224 = arith.constant 5 : index
      %c0_225 = arith.constant 0 : index
      %c0_226 = arith.constant 0 : index
      %257 = vector.load %arg1[%c5_224, %c0_225, %c0_226] : memref<25x32x64xbf16, #tpu.memory_space<vmem>>, vector<1x32x64xbf16>
      %258 = vector.shape_cast %257 : vector<1x32x64xbf16> to vector<32x64xbf16>
      %cst_227 = arith.constant dense<0.000000e+00> : vector<14x64xf32>
      %259 = tpu.matmul %256, %258, %cst_227 {dimension_numbers = #tpu.dot_dimension_numbers<[1], [0], [0], [1], [0, 0, 1, 1], [], []>} : vector<14x32xbf16>, vector<32x64xbf16>, vector<14x64xf32> -> vector<14x64xf32>
      %260 = arith.addf %252, %259 : vector<14x64xf32>
      %c1_i32_228 = arith.constant 1 : i32
      %261 = arith.addi %arg4, %c1_i32_228 : i32
      %c1_229 = arith.constant 1 : index
      %262 = arith.index_cast %261 : i32 to index
      %c1_230 = arith.constant 1 : index
      %c0_231 = arith.constant 0 : index
      %263 = vector.load %arg0[%c1_229, %262, %c1_230, %c0_231] : memref<2x18x18x32xbf16, #tpu.memory_space<vmem>>, vector<1x1x14x32xbf16>
      %264 = vector.shape_cast %263 : vector<1x1x14x32xbf16> to vector<14x32xbf16>
      %c6_232 = arith.constant 6 : index
      %c0_233 = arith.constant 0 : index
      %c0_234 = arith.constant 0 : index
      %265 = vector.load %arg1[%c6_232, %c0_233, %c0_234] : memref<25x32x64xbf16, #tpu.memory_space<vmem>>, vector<1x32x64xbf16>
      %266 = vector.shape_cast %265 : vector<1x32x64xbf16> to vector<32x64xbf16>
      %cst_235 = arith.constant dense<0.000000e+00> : vector<14x64xf32>
      %267 = tpu.matmul %264, %266, %cst_235 {dimension_numbers = #tpu.dot_dimension_numbers<[1], [0], [0], [1], [0, 0, 1, 1], [], []>} : vector<14x32xbf16>, vector<32x64xbf16>, vector<14x64xf32> -> vector<14x64xf32>
      %268 = arith.addf %260, %267 : vector<14x64xf32>
      %c1_i32_236 = arith.constant 1 : i32
      %269 = arith.addi %arg4, %c1_i32_236 : i32
      %c1_237 = arith.constant 1 : index
      %270 = arith.index_cast %269 : i32 to index
      %c2_238 = arith.constant 2 : index
      %c0_239 = arith.constant 0 : index
      %271 = vector.load %arg0[%c1_237, %270, %c2_238, %c0_239] : memref<2x18x18x32xbf16, #tpu.memory_space<vmem>>, vector<1x1x14x32xbf16>
      %272 = vector.shape_cast %271 : vector<1x1x14x32xbf16> to vector<14x32xbf16>
      %c7_240 = arith.constant 7 : index
      %c0_241 = arith.constant 0 : index
      %c0_242 = arith.constant 0 : index
      %273 = vector.load %arg1[%c7_240, %c0_241, %c0_242] : memref<25x32x64xbf16, #tpu.memory_space<vmem>>, vector<1x32x64xbf16>
      %274 = vector.shape_cast %273 : vector<1x32x64xbf16> to vector<32x64xbf16>
      %cst_243 = arith.constant dense<0.000000e+00> : vector<14x64xf32>
      %275 = tpu.matmul %272, %274, %cst_243 {dimension_numbers = #tpu.dot_dimension_numbers<[1], [0], [0], [1], [0, 0, 1, 1], [], []>} : vector<14x32xbf16>, vector<32x64xbf16>, vector<14x64xf32> -> vector<14x64xf32>
      %276 = arith.addf %268, %275 : vector<14x64xf32>
      %c1_i32_244 = arith.constant 1 : i32
      %277 = arith.addi %arg4, %c1_i32_244 : i32
      %c1_245 = arith.constant 1 : index
      %278 = arith.index_cast %277 : i32 to index
      %c3_246 = arith.constant 3 : index
      %c0_247 = arith.constant 0 : index
      %279 = vector.load %arg0[%c1_245, %278, %c3_246, %c0_247] : memref<2x18x18x32xbf16, #tpu.memory_space<vmem>>, vector<1x1x14x32xbf16>
      %280 = vector.shape_cast %279 : vector<1x1x14x32xbf16> to vector<14x32xbf16>
      %c8_248 = arith.constant 8 : index
      %c0_249 = arith.constant 0 : index
      %c0_250 = arith.constant 0 : index
      %281 = vector.load %arg1[%c8_248, %c0_249, %c0_250] : memref<25x32x64xbf16, #tpu.memory_space<vmem>>, vector<1x32x64xbf16>
      %282 = vector.shape_cast %281 : vector<1x32x64xbf16> to vector<32x64xbf16>
      %cst_251 = arith.constant dense<0.000000e+00> : vector<14x64xf32>
      %283 = tpu.matmul %280, %282, %cst_251 {dimension_numbers = #tpu.dot_dimension_numbers<[1], [0], [0], [1], [0, 0, 1, 1], [], []>} : vector<14x32xbf16>, vector<32x64xbf16>, vector<14x64xf32> -> vector<14x64xf32>
      %284 = arith.addf %276, %283 : vector<14x64xf32>
      %c1_i32_252 = arith.constant 1 : i32
      %285 = arith.addi %arg4, %c1_i32_252 : i32
      %c1_253 = arith.constant 1 : index
      %286 = arith.index_cast %285 : i32 to index
      %c4_254 = arith.constant 4 : index
      %c0_255 = arith.constant 0 : index
      %287 = vector.load %arg0[%c1_253, %286, %c4_254, %c0_255] : memref<2x18x18x32xbf16, #tpu.memory_space<vmem>>, vector<1x1x14x32xbf16>
      %288 = vector.shape_cast %287 : vector<1x1x14x32xbf16> to vector<14x32xbf16>
      %c9_256 = arith.constant 9 : index
      %c0_257 = arith.constant 0 : index
      %c0_258 = arith.constant 0 : index
      %289 = vector.load %arg1[%c9_256, %c0_257, %c0_258] : memref<25x32x64xbf16, #tpu.memory_space<vmem>>, vector<1x32x64xbf16>
      %290 = vector.shape_cast %289 : vector<1x32x64xbf16> to vector<32x64xbf16>
      %cst_259 = arith.constant dense<0.000000e+00> : vector<14x64xf32>
      %291 = tpu.matmul %288, %290, %cst_259 {dimension_numbers = #tpu.dot_dimension_numbers<[1], [0], [0], [1], [0, 0, 1, 1], [], []>} : vector<14x32xbf16>, vector<32x64xbf16>, vector<14x64xf32> -> vector<14x64xf32>
      %292 = arith.addf %284, %291 : vector<14x64xf32>
      %c2_i32_260 = arith.constant 2 : i32
      %293 = arith.addi %arg4, %c2_i32_260 : i32
      %c1_261 = arith.constant 1 : index
      %294 = arith.index_cast %293 : i32 to index
      %c0_262 = arith.constant 0 : index
      %c0_263 = arith.constant 0 : index
      %295 = vector.load %arg0[%c1_261, %294, %c0_262, %c0_263] : memref<2x18x18x32xbf16, #tpu.memory_space<vmem>>, vector<1x1x14x32xbf16>
      %296 = vector.shape_cast %295 : vector<1x1x14x32xbf16> to vector<14x32xbf16>
      %c10_264 = arith.constant 10 : index
      %c0_265 = arith.constant 0 : index
      %c0_266 = arith.constant 0 : index
      %297 = vector.load %arg1[%c10_264, %c0_265, %c0_266] : memref<25x32x64xbf16, #tpu.memory_space<vmem>>, vector<1x32x64xbf16>
      %298 = vector.shape_cast %297 : vector<1x32x64xbf16> to vector<32x64xbf16>
      %cst_267 = arith.constant dense<0.000000e+00> : vector<14x64xf32>
      %299 = tpu.matmul %296, %298, %cst_267 {dimension_numbers = #tpu.dot_dimension_numbers<[1], [0], [0], [1], [0, 0, 1, 1], [], []>} : vector<14x32xbf16>, vector<32x64xbf16>, vector<14x64xf32> -> vector<14x64xf32>
      %300 = arith.addf %292, %299 : vector<14x64xf32>
      %c2_i32_268 = arith.constant 2 : i32
      %301 = arith.addi %arg4, %c2_i32_268 : i32
      %c1_269 = arith.constant 1 : index
      %302 = arith.index_cast %301 : i32 to index
      %c1_270 = arith.constant 1 : index
      %c0_271 = arith.constant 0 : index
      %303 = vector.load %arg0[%c1_269, %302, %c1_270, %c0_271] : memref<2x18x18x32xbf16, #tpu.memory_space<vmem>>, vector<1x1x14x32xbf16>
      %304 = vector.shape_cast %303 : vector<1x1x14x32xbf16> to vector<14x32xbf16>
      %c11_272 = arith.constant 11 : index
      %c0_273 = arith.constant 0 : index
      %c0_274 = arith.constant 0 : index
      %305 = vector.load %arg1[%c11_272, %c0_273, %c0_274] : memref<25x32x64xbf16, #tpu.memory_space<vmem>>, vector<1x32x64xbf16>
      %306 = vector.shape_cast %305 : vector<1x32x64xbf16> to vector<32x64xbf16>
      %cst_275 = arith.constant dense<0.000000e+00> : vector<14x64xf32>
      %307 = tpu.matmul %304, %306, %cst_275 {dimension_numbers = #tpu.dot_dimension_numbers<[1], [0], [0], [1], [0, 0, 1, 1], [], []>} : vector<14x32xbf16>, vector<32x64xbf16>, vector<14x64xf32> -> vector<14x64xf32>
      %308 = arith.addf %300, %307 : vector<14x64xf32>
      %c2_i32_276 = arith.constant 2 : i32
      %309 = arith.addi %arg4, %c2_i32_276 : i32
      %c1_277 = arith.constant 1 : index
      %310 = arith.index_cast %309 : i32 to index
      %c2_278 = arith.constant 2 : index
      %c0_279 = arith.constant 0 : index
      %311 = vector.load %arg0[%c1_277, %310, %c2_278, %c0_279] : memref<2x18x18x32xbf16, #tpu.memory_space<vmem>>, vector<1x1x14x32xbf16>
      %312 = vector.shape_cast %311 : vector<1x1x14x32xbf16> to vector<14x32xbf16>
      %c12_280 = arith.constant 12 : index
      %c0_281 = arith.constant 0 : index
      %c0_282 = arith.constant 0 : index
      %313 = vector.load %arg1[%c12_280, %c0_281, %c0_282] : memref<25x32x64xbf16, #tpu.memory_space<vmem>>, vector<1x32x64xbf16>
      %314 = vector.shape_cast %313 : vector<1x32x64xbf16> to vector<32x64xbf16>
      %cst_283 = arith.constant dense<0.000000e+00> : vector<14x64xf32>
      %315 = tpu.matmul %312, %314, %cst_283 {dimension_numbers = #tpu.dot_dimension_numbers<[1], [0], [0], [1], [0, 0, 1, 1], [], []>} : vector<14x32xbf16>, vector<32x64xbf16>, vector<14x64xf32> -> vector<14x64xf32>
      %316 = arith.addf %308, %315 : vector<14x64xf32>
      %c2_i32_284 = arith.constant 2 : i32
      %317 = arith.addi %arg4, %c2_i32_284 : i32
      %c1_285 = arith.constant 1 : index
      %318 = arith.index_cast %317 : i32 to index
      %c3_286 = arith.constant 3 : index
      %c0_287 = arith.constant 0 : index
      %319 = vector.load %arg0[%c1_285, %318, %c3_286, %c0_287] : memref<2x18x18x32xbf16, #tpu.memory_space<vmem>>, vector<1x1x14x32xbf16>
      %320 = vector.shape_cast %319 : vector<1x1x14x32xbf16> to vector<14x32xbf16>
      %c13_288 = arith.constant 13 : index
      %c0_289 = arith.constant 0 : index
      %c0_290 = arith.constant 0 : index
      %321 = vector.load %arg1[%c13_288, %c0_289, %c0_290] : memref<25x32x64xbf16, #tpu.memory_space<vmem>>, vector<1x32x64xbf16>
      %322 = vector.shape_cast %321 : vector<1x32x64xbf16> to vector<32x64xbf16>
      %cst_291 = arith.constant dense<0.000000e+00> : vector<14x64xf32>
      %323 = tpu.matmul %320, %322, %cst_291 {dimension_numbers = #tpu.dot_dimension_numbers<[1], [0], [0], [1], [0, 0, 1, 1], [], []>} : vector<14x32xbf16>, vector<32x64xbf16>, vector<14x64xf32> -> vector<14x64xf32>
      %324 = arith.addf %316, %323 : vector<14x64xf32>
      %c2_i32_292 = arith.constant 2 : i32
      %325 = arith.addi %arg4, %c2_i32_292 : i32
      %c1_293 = arith.constant 1 : index
      %326 = arith.index_cast %325 : i32 to index
      %c4_294 = arith.constant 4 : index
      %c0_295 = arith.constant 0 : index
      %327 = vector.load %arg0[%c1_293, %326, %c4_294, %c0_295] : memref<2x18x18x32xbf16, #tpu.memory_space<vmem>>, vector<1x1x14x32xbf16>
      %328 = vector.shape_cast %327 : vector<1x1x14x32xbf16> to vector<14x32xbf16>
      %c14_296 = arith.constant 14 : index
      %c0_297 = arith.constant 0 : index
      %c0_298 = arith.constant 0 : index
      %329 = vector.load %arg1[%c14_296, %c0_297, %c0_298] : memref<25x32x64xbf16, #tpu.memory_space<vmem>>, vector<1x32x64xbf16>
      %330 = vector.shape_cast %329 : vector<1x32x64xbf16> to vector<32x64xbf16>
      %cst_299 = arith.constant dense<0.000000e+00> : vector<14x64xf32>
      %331 = tpu.matmul %328, %330, %cst_299 {dimension_numbers = #tpu.dot_dimension_numbers<[1], [0], [0], [1], [0, 0, 1, 1], [], []>} : vector<14x32xbf16>, vector<32x64xbf16>, vector<14x64xf32> -> vector<14x64xf32>
      %332 = arith.addf %324, %331 : vector<14x64xf32>
      %c3_i32_300 = arith.constant 3 : i32
      %333 = arith.addi %arg4, %c3_i32_300 : i32
      %c1_301 = arith.constant 1 : index
      %334 = arith.index_cast %333 : i32 to index
      %c0_302 = arith.constant 0 : index
      %c0_303 = arith.constant 0 : index
      %335 = vector.load %arg0[%c1_301, %334, %c0_302, %c0_303] : memref<2x18x18x32xbf16, #tpu.memory_space<vmem>>, vector<1x1x14x32xbf16>
      %336 = vector.shape_cast %335 : vector<1x1x14x32xbf16> to vector<14x32xbf16>
      %c15_304 = arith.constant 15 : index
      %c0_305 = arith.constant 0 : index
      %c0_306 = arith.constant 0 : index
      %337 = vector.load %arg1[%c15_304, %c0_305, %c0_306] : memref<25x32x64xbf16, #tpu.memory_space<vmem>>, vector<1x32x64xbf16>
      %338 = vector.shape_cast %337 : vector<1x32x64xbf16> to vector<32x64xbf16>
      %cst_307 = arith.constant dense<0.000000e+00> : vector<14x64xf32>
      %339 = tpu.matmul %336, %338, %cst_307 {dimension_numbers = #tpu.dot_dimension_numbers<[1], [0], [0], [1], [0, 0, 1, 1], [], []>} : vector<14x32xbf16>, vector<32x64xbf16>, vector<14x64xf32> -> vector<14x64xf32>
      %340 = arith.addf %332, %339 : vector<14x64xf32>
      %c3_i32_308 = arith.constant 3 : i32
      %341 = arith.addi %arg4, %c3_i32_308 : i32
      %c1_309 = arith.constant 1 : index
      %342 = arith.index_cast %341 : i32 to index
      %c1_310 = arith.constant 1 : index
      %c0_311 = arith.constant 0 : index
      %343 = vector.load %arg0[%c1_309, %342, %c1_310, %c0_311] : memref<2x18x18x32xbf16, #tpu.memory_space<vmem>>, vector<1x1x14x32xbf16>
      %344 = vector.shape_cast %343 : vector<1x1x14x32xbf16> to vector<14x32xbf16>
      %c16_312 = arith.constant 16 : index
      %c0_313 = arith.constant 0 : index
      %c0_314 = arith.constant 0 : index
      %345 = vector.load %arg1[%c16_312, %c0_313, %c0_314] : memref<25x32x64xbf16, #tpu.memory_space<vmem>>, vector<1x32x64xbf16>
      %346 = vector.shape_cast %345 : vector<1x32x64xbf16> to vector<32x64xbf16>
      %cst_315 = arith.constant dense<0.000000e+00> : vector<14x64xf32>
      %347 = tpu.matmul %344, %346, %cst_315 {dimension_numbers = #tpu.dot_dimension_numbers<[1], [0], [0], [1], [0, 0, 1, 1], [], []>} : vector<14x32xbf16>, vector<32x64xbf16>, vector<14x64xf32> -> vector<14x64xf32>
      %348 = arith.addf %340, %347 : vector<14x64xf32>
      %c3_i32_316 = arith.constant 3 : i32
      %349 = arith.addi %arg4, %c3_i32_316 : i32
      %c1_317 = arith.constant 1 : index
      %350 = arith.index_cast %349 : i32 to index
      %c2_318 = arith.constant 2 : index
      %c0_319 = arith.constant 0 : index
      %351 = vector.load %arg0[%c1_317, %350, %c2_318, %c0_319] : memref<2x18x18x32xbf16, #tpu.memory_space<vmem>>, vector<1x1x14x32xbf16>
      %352 = vector.shape_cast %351 : vector<1x1x14x32xbf16> to vector<14x32xbf16>
      %c17_320 = arith.constant 17 : index
      %c0_321 = arith.constant 0 : index
      %c0_322 = arith.constant 0 : index
      %353 = vector.load %arg1[%c17_320, %c0_321, %c0_322] : memref<25x32x64xbf16, #tpu.memory_space<vmem>>, vector<1x32x64xbf16>
      %354 = vector.shape_cast %353 : vector<1x32x64xbf16> to vector<32x64xbf16>
      %cst_323 = arith.constant dense<0.000000e+00> : vector<14x64xf32>
      %355 = tpu.matmul %352, %354, %cst_323 {dimension_numbers = #tpu.dot_dimension_numbers<[1], [0], [0], [1], [0, 0, 1, 1], [], []>} : vector<14x32xbf16>, vector<32x64xbf16>, vector<14x64xf32> -> vector<14x64xf32>
      %356 = arith.addf %348, %355 : vector<14x64xf32>
      %c3_i32_324 = arith.constant 3 : i32
      %357 = arith.addi %arg4, %c3_i32_324 : i32
      %c1_325 = arith.constant 1 : index
      %358 = arith.index_cast %357 : i32 to index
      %c3_326 = arith.constant 3 : index
      %c0_327 = arith.constant 0 : index
      %359 = vector.load %arg0[%c1_325, %358, %c3_326, %c0_327] : memref<2x18x18x32xbf16, #tpu.memory_space<vmem>>, vector<1x1x14x32xbf16>
      %360 = vector.shape_cast %359 : vector<1x1x14x32xbf16> to vector<14x32xbf16>
      %c18_328 = arith.constant 18 : index
      %c0_329 = arith.constant 0 : index
      %c0_330 = arith.constant 0 : index
      %361 = vector.load %arg1[%c18_328, %c0_329, %c0_330] : memref<25x32x64xbf16, #tpu.memory_space<vmem>>, vector<1x32x64xbf16>
      %362 = vector.shape_cast %361 : vector<1x32x64xbf16> to vector<32x64xbf16>
      %cst_331 = arith.constant dense<0.000000e+00> : vector<14x64xf32>
      %363 = tpu.matmul %360, %362, %cst_331 {dimension_numbers = #tpu.dot_dimension_numbers<[1], [0], [0], [1], [0, 0, 1, 1], [], []>} : vector<14x32xbf16>, vector<32x64xbf16>, vector<14x64xf32> -> vector<14x64xf32>
      %364 = arith.addf %356, %363 : vector<14x64xf32>
      %c3_i32_332 = arith.constant 3 : i32
      %365 = arith.addi %arg4, %c3_i32_332 : i32
      %c1_333 = arith.constant 1 : index
      %366 = arith.index_cast %365 : i32 to index
      %c4_334 = arith.constant 4 : index
      %c0_335 = arith.constant 0 : index
      %367 = vector.load %arg0[%c1_333, %366, %c4_334, %c0_335] : memref<2x18x18x32xbf16, #tpu.memory_space<vmem>>, vector<1x1x14x32xbf16>
      %368 = vector.shape_cast %367 : vector<1x1x14x32xbf16> to vector<14x32xbf16>
      %c19_336 = arith.constant 19 : index
      %c0_337 = arith.constant 0 : index
      %c0_338 = arith.constant 0 : index
      %369 = vector.load %arg1[%c19_336, %c0_337, %c0_338] : memref<25x32x64xbf16, #tpu.memory_space<vmem>>, vector<1x32x64xbf16>
      %370 = vector.shape_cast %369 : vector<1x32x64xbf16> to vector<32x64xbf16>
      %cst_339 = arith.constant dense<0.000000e+00> : vector<14x64xf32>
      %371 = tpu.matmul %368, %370, %cst_339 {dimension_numbers = #tpu.dot_dimension_numbers<[1], [0], [0], [1], [0, 0, 1, 1], [], []>} : vector<14x32xbf16>, vector<32x64xbf16>, vector<14x64xf32> -> vector<14x64xf32>
      %372 = arith.addf %364, %371 : vector<14x64xf32>
      %c4_i32_340 = arith.constant 4 : i32
      %373 = arith.addi %arg4, %c4_i32_340 : i32
      %c1_341 = arith.constant 1 : index
      %374 = arith.index_cast %373 : i32 to index
      %c0_342 = arith.constant 0 : index
      %c0_343 = arith.constant 0 : index
      %375 = vector.load %arg0[%c1_341, %374, %c0_342, %c0_343] : memref<2x18x18x32xbf16, #tpu.memory_space<vmem>>, vector<1x1x14x32xbf16>
      %376 = vector.shape_cast %375 : vector<1x1x14x32xbf16> to vector<14x32xbf16>
      %c20_344 = arith.constant 20 : index
      %c0_345 = arith.constant 0 : index
      %c0_346 = arith.constant 0 : index
      %377 = vector.load %arg1[%c20_344, %c0_345, %c0_346] : memref<25x32x64xbf16, #tpu.memory_space<vmem>>, vector<1x32x64xbf16>
      %378 = vector.shape_cast %377 : vector<1x32x64xbf16> to vector<32x64xbf16>
      %cst_347 = arith.constant dense<0.000000e+00> : vector<14x64xf32>
      %379 = tpu.matmul %376, %378, %cst_347 {dimension_numbers = #tpu.dot_dimension_numbers<[1], [0], [0], [1], [0, 0, 1, 1], [], []>} : vector<14x32xbf16>, vector<32x64xbf16>, vector<14x64xf32> -> vector<14x64xf32>
      %380 = arith.addf %372, %379 : vector<14x64xf32>
      %c4_i32_348 = arith.constant 4 : i32
      %381 = arith.addi %arg4, %c4_i32_348 : i32
      %c1_349 = arith.constant 1 : index
      %382 = arith.index_cast %381 : i32 to index
      %c1_350 = arith.constant 1 : index
      %c0_351 = arith.constant 0 : index
      %383 = vector.load %arg0[%c1_349, %382, %c1_350, %c0_351] : memref<2x18x18x32xbf16, #tpu.memory_space<vmem>>, vector<1x1x14x32xbf16>
      %384 = vector.shape_cast %383 : vector<1x1x14x32xbf16> to vector<14x32xbf16>
      %c21_352 = arith.constant 21 : index
      %c0_353 = arith.constant 0 : index
      %c0_354 = arith.constant 0 : index
      %385 = vector.load %arg1[%c21_352, %c0_353, %c0_354] : memref<25x32x64xbf16, #tpu.memory_space<vmem>>, vector<1x32x64xbf16>
      %386 = vector.shape_cast %385 : vector<1x32x64xbf16> to vector<32x64xbf16>
      %cst_355 = arith.constant dense<0.000000e+00> : vector<14x64xf32>
      %387 = tpu.matmul %384, %386, %cst_355 {dimension_numbers = #tpu.dot_dimension_numbers<[1], [0], [0], [1], [0, 0, 1, 1], [], []>} : vector<14x32xbf16>, vector<32x64xbf16>, vector<14x64xf32> -> vector<14x64xf32>
      %388 = arith.addf %380, %387 : vector<14x64xf32>
      %c4_i32_356 = arith.constant 4 : i32
      %389 = arith.addi %arg4, %c4_i32_356 : i32
      %c1_357 = arith.constant 1 : index
      %390 = arith.index_cast %389 : i32 to index
      %c2_358 = arith.constant 2 : index
      %c0_359 = arith.constant 0 : index
      %391 = vector.load %arg0[%c1_357, %390, %c2_358, %c0_359] : memref<2x18x18x32xbf16, #tpu.memory_space<vmem>>, vector<1x1x14x32xbf16>
      %392 = vector.shape_cast %391 : vector<1x1x14x32xbf16> to vector<14x32xbf16>
      %c22_360 = arith.constant 22 : index
      %c0_361 = arith.constant 0 : index
      %c0_362 = arith.constant 0 : index
      %393 = vector.load %arg1[%c22_360, %c0_361, %c0_362] : memref<25x32x64xbf16, #tpu.memory_space<vmem>>, vector<1x32x64xbf16>
      %394 = vector.shape_cast %393 : vector<1x32x64xbf16> to vector<32x64xbf16>
      %cst_363 = arith.constant dense<0.000000e+00> : vector<14x64xf32>
      %395 = tpu.matmul %392, %394, %cst_363 {dimension_numbers = #tpu.dot_dimension_numbers<[1], [0], [0], [1], [0, 0, 1, 1], [], []>} : vector<14x32xbf16>, vector<32x64xbf16>, vector<14x64xf32> -> vector<14x64xf32>
      %396 = arith.addf %388, %395 : vector<14x64xf32>
      %c4_i32_364 = arith.constant 4 : i32
      %397 = arith.addi %arg4, %c4_i32_364 : i32
      %c1_365 = arith.constant 1 : index
      %398 = arith.index_cast %397 : i32 to index
      %c3_366 = arith.constant 3 : index
      %c0_367 = arith.constant 0 : index
      %399 = vector.load %arg0[%c1_365, %398, %c3_366, %c0_367] : memref<2x18x18x32xbf16, #tpu.memory_space<vmem>>, vector<1x1x14x32xbf16>
      %400 = vector.shape_cast %399 : vector<1x1x14x32xbf16> to vector<14x32xbf16>
      %c23_368 = arith.constant 23 : index
      %c0_369 = arith.constant 0 : index
      %c0_370 = arith.constant 0 : index
      %401 = vector.load %arg1[%c23_368, %c0_369, %c0_370] : memref<25x32x64xbf16, #tpu.memory_space<vmem>>, vector<1x32x64xbf16>
      %402 = vector.shape_cast %401 : vector<1x32x64xbf16> to vector<32x64xbf16>
      %cst_371 = arith.constant dense<0.000000e+00> : vector<14x64xf32>
      %403 = tpu.matmul %400, %402, %cst_371 {dimension_numbers = #tpu.dot_dimension_numbers<[1], [0], [0], [1], [0, 0, 1, 1], [], []>} : vector<14x32xbf16>, vector<32x64xbf16>, vector<14x64xf32> -> vector<14x64xf32>
      %404 = arith.addf %396, %403 : vector<14x64xf32>
      %c4_i32_372 = arith.constant 4 : i32
      %405 = arith.addi %arg4, %c4_i32_372 : i32
      %c1_373 = arith.constant 1 : index
      %406 = arith.index_cast %405 : i32 to index
      %c4_374 = arith.constant 4 : index
      %c0_375 = arith.constant 0 : index
      %407 = vector.load %arg0[%c1_373, %406, %c4_374, %c0_375] : memref<2x18x18x32xbf16, #tpu.memory_space<vmem>>, vector<1x1x14x32xbf16>
      %408 = vector.shape_cast %407 : vector<1x1x14x32xbf16> to vector<14x32xbf16>
      %c24_376 = arith.constant 24 : index
      %c0_377 = arith.constant 0 : index
      %c0_378 = arith.constant 0 : index
      %409 = vector.load %arg1[%c24_376, %c0_377, %c0_378] : memref<25x32x64xbf16, #tpu.memory_space<vmem>>, vector<1x32x64xbf16>
      %410 = vector.shape_cast %409 : vector<1x32x64xbf16> to vector<32x64xbf16>
      %cst_379 = arith.constant dense<0.000000e+00> : vector<14x64xf32>
      %411 = tpu.matmul %408, %410, %cst_379 {dimension_numbers = #tpu.dot_dimension_numbers<[1], [0], [0], [1], [0, 0, 1, 1], [], []>} : vector<14x32xbf16>, vector<32x64xbf16>, vector<14x64xf32> -> vector<14x64xf32>
      %412 = arith.addf %404, %411 : vector<14x64xf32>
      %413 = vector.broadcast %0 : vector<1x64xf32> to vector<14x64xf32>
      %414 = arith.addf %412, %413 : vector<14x64xf32>
      %cst_380 = arith.constant 0.000000e+00 : f32
      %415 = vector.broadcast %cst_380 : f32 to vector<14x64xf32>
      %416 = arith.maximumf %414, %415 : vector<14x64xf32>
      %417 = arith.truncf %416 : vector<14x64xf32> to vector<14x64xbf16>
      %c1_381 = arith.constant 1 : index
      %418 = arith.index_cast %arg4 : i32 to index
      %c0_382 = arith.constant 0 : index
      %c0_383 = arith.constant 0 : index
      %419 = vector.load %arg3[%c1_381, %418, %c0_382, %c0_383] : memref<2x14x14x64xbf16, #tpu.memory_space<vmem>>, vector<1x1x14x64xbf16>
      %420 = vector.shape_cast %419 : vector<1x1x14x64xbf16> to vector<14x64xbf16>
      %421 = vector.shape_cast %417 : vector<14x64xbf16> to vector<1x1x14x64xbf16>
      tpu.vector_store %arg3[%c1_381, %418, %c0_382, %c0_383], %421 {strides = array<i32>} : memref<2x14x14x64xbf16, #tpu.memory_space<vmem>>, vector<1x1x14x64xbf16>,
    }
    %c14_i32_1 = arith.constant 14 : i32
    return
  }
}

module attributes {stable_mosaic.version = 11 : i64} {
  func.func @_maxpool_kernel(%arg0: memref<2x7x2x7x128xbf16, #tpu.memory_space<vmem>>, %arg1: memref<2x7x7x64xbf16, #tpu.memory_space<vmem>>) attributes {dimension_semantics = [], scalar_prefetch = 0 : i64, scratch_operands = 0 : i64, tpu.core_type = #tpu.core_type<tc>} {
    %c0 = arith.constant 0 : index
    %c0_0 = arith.constant 0 : index
    %c0_1 = arith.constant 0 : index
    %c0_2 = arith.constant 0 : index
    %c0_3 = arith.constant 0 : index
    %0 = vector.load %arg0[%c0, %c0_0, %c0_1, %c0_2, %c0_3] : memref<2x7x2x7x128xbf16, #tpu.memory_space<vmem>>, vector<2x7x1x7x128xbf16>
    %1 = vector.shape_cast %0 : vector<2x7x1x7x128xbf16> to vector<2x7x7x128xbf16>
    %c0_4 = arith.constant 0 : index
    %c0_5 = arith.constant 0 : index
    %c1 = arith.constant 1 : index
    %c0_6 = arith.constant 0 : index
    %c0_7 = arith.constant 0 : index
    %2 = vector.load %arg0[%c0_4, %c0_5, %c1, %c0_6, %c0_7] : memref<2x7x2x7x128xbf16, #tpu.memory_space<vmem>>, vector<2x7x1x7x128xbf16>
    %3 = vector.shape_cast %2 : vector<2x7x1x7x128xbf16> to vector<2x7x7x128xbf16>
    %4 = arith.maximumf %1, %3 : vector<2x7x7x128xbf16>
    %5 = vector.extract_strided_slice %4 {offsets = [0, 0, 0, 0], sizes = [2, 7, 7, 64], strides = [1, 1, 1, 1]} : vector<2x7x7x128xbf16> to vector<2x7x7x64xbf16>
    %6 = vector.extract_strided_slice %4 {offsets = [0, 0, 0, 64], sizes = [2, 7, 7, 64], strides = [1, 1, 1, 1]} : vector<2x7x7x128xbf16> to vector<2x7x7x64xbf16>
    %7 = arith.maximumf %5, %6 : vector<2x7x7x64xbf16>
    %c0_8 = arith.constant 0 : index
    %c0_9 = arith.constant 0 : index
    %c0_10 = arith.constant 0 : index
    %c0_11 = arith.constant 0 : index
    %8 = vector.load %arg1[%c0_8, %c0_9, %c0_10, %c0_11] : memref<2x7x7x64xbf16, #tpu.memory_space<vmem>>, vector<2x7x7x64xbf16>
    tpu.vector_store %arg1[%c0_8, %c0_9, %c0_10, %c0_11], %7 {strides = array<i32>} : memref<2x7x7x64xbf16, #tpu.memory_space<vmem>>, vector<2x7x7x64xbf16>,
    return
  }
}

module attributes {stable_mosaic.version = 11 : i64} {
  func.func @_fc_kernel(%arg0: i32, %arg1: memref<2x3136xbf16, #tpu.memory_space<vmem>>, %arg2: memref<3136x512xbf16, #tpu.memory_space<vmem>>, %arg3: memref<1x512xf32, #tpu.memory_space<vmem>>, %arg4: memref<2x512xbf16, #tpu.memory_space<vmem>>) attributes {dimension_semantics = [#tpu.dimension_semantics<parallel>], iteration_bounds = array<i64: 2>, scalar_prefetch = 0 : i64, scratch_operands = 0 : i64, tpu.core_type = #tpu.core_type<tc>, window_params = [{pipeline_mode = #tpu.pipeline_mode<synchronous>, transform_indices = @transform_0, window_bounds = array<i64: 2, 3136>}, {transform_indices = @transform_1, window_bounds = array<i64: 3136, 512>}, {transform_indices = @transform_2, window_bounds = array<i64: 1, 512>}, {transform_indices = @transform_3, window_bounds = array<i64: 2, 512>}]} {
    %c0 = arith.constant 0 : index
    %c0_0 = arith.constant 0 : index
    %0 = vector.load %arg1[%c0, %c0_0] : memref<2x3136xbf16, #tpu.memory_space<vmem>>, vector<2x3136xbf16>
    %c0_1 = arith.constant 0 : index
    %c0_2 = arith.constant 0 : index
    %1 = vector.load %arg2[%c0_1, %c0_2] : memref<3136x512xbf16, #tpu.memory_space<vmem>>, vector<3136x512xbf16>
    %cst = arith.constant dense<0.000000e+00> : vector<2x512xf32>
    %2 = tpu.matmul %0, %1, %cst {dimension_numbers = #tpu.dot_dimension_numbers<[1], [0], [0], [1], [0, 0, 1, 1], [], []>} : vector<2x3136xbf16>, vector<3136x512xbf16>, vector<2x512xf32> -> vector<2x512xf32>
    %c0_3 = arith.constant 0 : index
    %c0_4 = arith.constant 0 : index
    %3 = vector.load %arg3[%c0_3, %c0_4] : memref<1x512xf32, #tpu.memory_space<vmem>>, vector<1x512xf32>
    %4 = vector.broadcast %3 : vector<1x512xf32> to vector<2x512xf32>
    %5 = arith.addf %2, %4 : vector<2x512xf32>
    %6 = arith.truncf %5 : vector<2x512xf32> to vector<2x512xbf16>
    %c0_5 = arith.constant 0 : index
    %c0_6 = arith.constant 0 : index
    %7 = vector.load %arg4[%c0_5, %c0_6] : memref<2x512xbf16, #tpu.memory_space<vmem>>, vector<2x512xbf16>
    tpu.vector_store %arg4[%c0_5, %c0_6], %6 {strides = array<i32>} : memref<2x512xbf16, #tpu.memory_space<vmem>>, vector<2x512xbf16>,
    return
  }
  func.func @transform_0(%arg0: i32) -> (i32, i32) {
    %c0_i32 = arith.constant 0 : i32
    %c0_i32_0 = arith.constant 0 : i32
    %c0_i32_1 = arith.constant 0 : i32
    return %c0_i32, %c0_i32_0 : i32, i32
  }
  func.func @transform_1(%arg0: i32) -> (i32, i32) {
    %c0_i32 = arith.constant 0 : i32
    %c0_i32_0 = arith.constant 0 : i32
    return %c0_i32, %arg0 : i32, i32
  }
  func.func @transform_2(%arg0: i32) -> (i32, i32) {
    %c0_i32 = arith.constant 0 : i32
    %c0_i32_0 = arith.constant 0 : i32
    return %c0_i32, %arg0 : i32, i32
  }
  func.func @transform_3(%arg0: i32) -> (i32, i32) {
    %c0_i32 = arith.constant 0 : i32
    %c0_i32_0 = arith.constant 0 : i32
    return %c0_i32, %arg0 : i32, i32
  }
}

module attributes {stable_mosaic.version = 11 : i64} {
  func.func @_fc_kernel(%arg0: i32, %arg1: memref<2x1024xbf16, #tpu.memory_space<vmem>>, %arg2: memref<1024x10xbf16, #tpu.memory_space<vmem>>, %arg3: memref<1x10xf32, #tpu.memory_space<vmem>>, %arg4: memref<2x10xf32, #tpu.memory_space<vmem>>) attributes {dimension_semantics = [#tpu.dimension_semantics<parallel>], iteration_bounds = array<i64: 1>, scalar_prefetch = 0 : i64, scratch_operands = 0 : i64, tpu.core_type = #tpu.core_type<tc>, window_params = [{pipeline_mode = #tpu.pipeline_mode<synchronous>, transform_indices = @transform_0, window_bounds = array<i64: 2, 1024>}, {transform_indices = @transform_1, window_bounds = array<i64: 1024, 10>}, {transform_indices = @transform_2, window_bounds = array<i64: 1, 10>}, {transform_indices = @transform_3, window_bounds = array<i64: 2, 10>}]} {
    %c0 = arith.constant 0 : index
    %c0_0 = arith.constant 0 : index
    %0 = vector.load %arg1[%c0, %c0_0] : memref<2x1024xbf16, #tpu.memory_space<vmem>>, vector<2x1024xbf16>
    %c0_1 = arith.constant 0 : index
    %c0_2 = arith.constant 0 : index
    %1 = vector.load %arg2[%c0_1, %c0_2] : memref<1024x10xbf16, #tpu.memory_space<vmem>>, vector<1024x10xbf16>
    %cst = arith.constant dense<0.000000e+00> : vector<2x10xf32>
    %2 = tpu.matmul %0, %1, %cst {dimension_numbers = #tpu.dot_dimension_numbers<[1], [0], [0], [1], [0, 0, 1, 1], [], []>} : vector<2x1024xbf16>, vector<1024x10xbf16>, vector<2x10xf32> -> vector<2x10xf32>
    %c0_3 = arith.constant 0 : index
    %c0_4 = arith.constant 0 : index
    %3 = vector.load %arg3[%c0_3, %c0_4] : memref<1x10xf32, #tpu.memory_space<vmem>>, vector<1x10xf32>
    %4 = vector.broadcast %3 : vector<1x10xf32> to vector<2x10xf32>
    %5 = arith.addf %2, %4 : vector<2x10xf32>
    %c0_5 = arith.constant 0 : index
    %c0_6 = arith.constant 0 : index
    %6 = vector.load %arg4[%c0_5, %c0_6] : memref<2x10xf32, #tpu.memory_space<vmem>>, vector<2x10xf32>
    tpu.vector_store %arg4[%c0_5, %c0_6], %5 {strides = array<i32>} : memref<2x10xf32, #tpu.memory_space<vmem>>, vector<2x10xf32>,
    return
  }
  func.func @transform_0(%arg0: i32) -> (i32, i32) {
    %c0_i32 = arith.constant 0 : i32
    %c0_i32_0 = arith.constant 0 : i32
    %c0_i32_1 = arith.constant 0 : i32
    return %c0_i32, %c0_i32_0 : i32, i32
  }
  func.func @transform_1(%arg0: i32) -> (i32, i32) {
    %c0_i32 = arith.constant 0 : i32
    %c0_i32_0 = arith.constant 0 : i32
    return %c0_i32, %arg0 : i32, i32
  }
  func.func @transform_2(%arg0: i32) -> (i32, i32) {
    %c0_i32 = arith.constant 0 : i32
    %c0_i32_0 = arith.constant 0 : i32
    return %c0_i32, %arg0 : i32, i32
  }
  func.func @transform_3(%arg0: i32) -> (i32, i32) {
    %c0_i32 = arith.constant 0 : i32
    %c0_i32_0 = arith.constant 0 : i32
    return %c0_i32, %arg0 : i32, i32
  }
}

</mosaic_0001>

<bundles_post_ra>
// kernel: convnet_forward.7
= control target key start
LH: loop header
LB: loop body
LE: loop exit
PB: predicated region body
PF: predicated region fallthrough
CT: control target
= control target key end

     0   :  { %s576_s22 = smov 96   ;;  %vm457_vm0 = vcmask 257024   ;;  %vm459_vm1 = vcmask 256000   ;;  %s1427_s0 = inlined_call_operand.vmem [shape: bf16[2,14,2,14,64], index: 0, kind: input, shape index: {}]   ;;  %s1428_s1 = inlined_call_operand.vmem [shape: bf16[2,14,14,32], index: 1, kind: output, shape index: {}]  }
   0x1   :  { %v10_v0 = vld [vmem:[%s1427_s0 + $0x10] sm:$0xf]  ;;  %v521_v1 = vld [vmem:[%s1427_s0 + $0x18] sm:$0xf]  ;;  %v8_v2 = vld [vmem:[%s1427_s0] sm:$0xf] }
   0x2   :  { %v596_v3 = vmax.bf16 %v521_v1, %v10_v0  ;;  %v519_v4 = vld [vmem:[%s1427_s0 + $0x8] sm:$0xf]  ;;  %v11_v5 = vld [vmem:[%s1427_s0 + $0x14] sm:$0x7]  ;;  %v522_v6 = vld [vmem:[%s1427_s0 + $0x1c] sm:$0x7] }
   0x3   :  { %v607_v7 = vmax.bf16 %v519_v4, %v8_v2  ;;  %v9_v8 = vld [vmem:[%s1427_s0 + $0x4] sm:$0x7]  ;;  %v520_v9 = vld [vmem:[%s1427_s0 + $0xc] sm:$0x7]  ;;  %v617_v10 = vmax.bf16 %v522_v6, %v11_v5  ;;  %v12_v14 = vld [vmem:[%s1427_s0 + $0x20] sm:$0xf] }
   0x4   :  { %237 = vrot.lane.b32.xlu1 %v596_v3, %s576_s22  ;;  %v621_v11 = vmax.bf16 %v520_v9, %v9_v8  ;;  %v13_v12 = vld [vmem:[%s1427_s0 + $0x24] sm:$0x7]  ;;  %v524_v13 = vld [vmem:[%s1427_s0 + $0x2c] sm:$0x7]  ;;  %v523_v15 = vld [vmem:[%s1427_s0 + $0x28] sm:$0xf] }
   0x5   :  { %233 = vrot.lane.b32.xlu0 %v607_v7, %s576_s22  ;;  %v637_v16 = vmax.bf16 %v524_v13, %v13_v12  ;;  %v641_v17 = vmax.bf16 %v523_v15, %v12_v14  ;;  %v15_v18 = vld [vmem:[%s1427_s0 + $0x34] sm:$0x7]  ;;  %v526_v19 = vld [vmem:[%s1427_s0 + $0x3c] sm:$0x7]  ;;  %v14_v20 = vld [vmem:[%s1427_s0 + $0x30] sm:$0xf] }
   0x6   :  { %v525_v21 = vld [vmem:[%s1427_s0 + $0x38] sm:$0xf]  ;;  %v657_v22 = vmax.bf16 %v526_v19, %v15_v18  ;;  %v17_v24 = vld [vmem:[%s1427_s0 + $0x44] sm:$0x7]  ;;  %v528_v25 = vld [vmem:[%s1427_s0 + $0x4c] sm:$0x7] }
   0x7   :  { %v661_v23 = vmax.bf16 %v525_v21, %v14_v20  ;;  %v16_v26 = vld [vmem:[%s1427_s0 + $0x40] sm:$0xf]  ;;  %v527_v27 = vld [vmem:[%s1427_s0 + $0x48] sm:$0xf]  ;;  %v677_v28 = vmax.bf16 %v528_v25, %v17_v24  ;;  %v19_v30 = vld [vmem:[%s1427_s0 + $0x54] sm:$0x7] }
   0x8   :  { %239 = vrot.lane.b32.xlu1 %v617_v10, %s576_s22  ;;  %v681_v29 = vmax.bf16 %v527_v27, %v16_v26  ;;  %v530_v31 = vld [vmem:[%s1427_s0 + $0x5c] sm:$0x7]  ;;  %v18_v32 = vld [vmem:[%s1427_s0 + $0x50] sm:$0xf]  ;;  %v529_v33 = vld [vmem:[%s1427_s0 + $0x58] sm:$0xf] }
   0x9   :  { %235 = vrot.lane.b32.xlu0 %v621_v11, %s576_s22  ;;  %v697_v34 = vmax.bf16 %v530_v31, %v19_v30  ;;  %v701_v35 = vmax.bf16 %v529_v33, %v18_v32  ;;  %v21_v36 = vld [vmem:[%s1427_s0 + $0x64] sm:$0x7]  ;;  %v532_v37 = vld [vmem:[%s1427_s0 + $0x6c] sm:$0x7]  ;;  %v20_v38 = vld [vmem:[%s1427_s0 + $0x60] sm:$0xf] }
   0xa   :  { %v531_v39 = vld [vmem:[%s1427_s0 + $0x68] sm:$0xf]  ;;  %v717_v40 = vmax.bf16 %v532_v37, %v21_v36  ;;  %v23_v42 = vld [vmem:[%s1427_s0 + $0x74] sm:$0x7]  ;;  %v534_v43 = vld [vmem:[%s1427_s0 + $0x7c] sm:$0x7] }
   0xb   :  { %v721_v41 = vmax.bf16 %v531_v39, %v20_v38  ;;  %v22_v44 = vld [vmem:[%s1427_s0 + $0x70] sm:$0xf]  ;;  %v533_v45 = vld [vmem:[%s1427_s0 + $0x78] sm:$0xf]  ;;  %v737_v46 = vmax.bf16 %v534_v43, %v23_v42  ;;  %v25_v48 = vld [vmem:[%s1427_s0 + $0x84] sm:$0x7] }
   0xc   :  { %243 = vrot.lane.b32.xlu1 %v637_v16, %s576_s22  ;;  %v741_v47 = vmax.bf16 %v533_v45, %v22_v44  ;;  %v536_v49 = vld [vmem:[%s1427_s0 + $0x8c] sm:$0x7]  ;;  %v24_v50 = vld [vmem:[%s1427_s0 + $0x80] sm:$0xf]  ;;  %v535_v51 = vld [vmem:[%s1427_s0 + $0x88] sm:$0xf] }
   0xd   :  { %241 = vrot.lane.b32.xlu0 %v641_v17, %s576_s22  ;;  %v757_v52 = vmax.bf16 %v536_v49, %v25_v48  ;;  %v761_v53 = vmax.bf16 %v535_v51, %v24_v50  ;;  %v27_v54 = vld [vmem:[%s1427_s0 + $0x94] sm:$0x7]  ;;  %v538_v55 = vld [vmem:[%s1427_s0 + $0x9c] sm:$0x7]  ;;  %v26_v56 = vld [vmem:[%s1427_s0 + $0x90] sm:$0xf] }
   0xe   :  { %v537_v57 = vld [vmem:[%s1427_s0 + $0x98] sm:$0xf]  ;;  %v777_v58 = vmax.bf16 %v538_v55, %v27_v54  ;;  %v29_v60 = vld [vmem:[%s1427_s0 + $0xa4] sm:$0x7]  ;;  %v540_v61 = vld [vmem:[%s1427_s0 + $0xac] sm:$0x7] }
   0xf   :  { %v781_v59 = vmax.bf16 %v537_v57, %v26_v56  ;;  %v28_v62 = vld [vmem:[%s1427_s0 + $0xa0] sm:$0xf]  ;;  %v539_v63 = vld [vmem:[%s1427_s0 + $0xa8] sm:$0xf]  ;;  %v797_v0 = vmax.bf16 %v540_v61, %v29_v60  ;;  %v31_v2 = vld [vmem:[%s1427_s0 + $0xb4] sm:$0x7] }
  0x10   :  { %247 = vrot.lane.b32.xlu1 %v657_v22, %s576_s22  ;;  %v801_v1 = vmax.bf16 %v539_v63, %v28_v62  ;;  %v542_v4 = vld [vmem:[%s1427_s0 + $0xbc] sm:$0x7]  ;;  %v30_v5 = vld [vmem:[%s1427_s0 + $0xb0] sm:$0xf]  ;;  %v541_v6 = vld [vmem:[%s1427_s0 + $0xb8] sm:$0xf] }
  0x11   :  { %245 = vrot.lane.b32.xlu0 %v661_v23, %s576_s22  ;;  %v817_v8 = vmax.bf16 %v542_v4, %v31_v2  ;;  %v821_v9 = vmax.bf16 %v541_v6, %v30_v5  ;;  %v33_v12 = vld [vmem:[%s1427_s0 + $0xc4] sm:$0x7]  ;;  %v544_v13 = vld [vmem:[%s1427_s0 + $0xcc] sm:$0x7]  ;;  %v32_v14 = vld [vmem:[%s1427_s0 + $0xc0] sm:$0xf] }
  0x12   :  { %v543_v15 = vld [vmem:[%s1427_s0 + $0xc8] sm:$0xf]  ;;  %v837_v18 = vmax.bf16 %v544_v13, %v33_v12  ;;  %v35_v20 = vld [vmem:[%s1427_s0 + $0xd4] sm:$0x7]  ;;  %v546_v21 = vld [vmem:[%s1427_s0 + $0xdc] sm:$0x7] }
  0x13   :  { %v841_v19 = vmax.bf16 %v543_v15, %v32_v14  ;;  %v34_v24 = vld [vmem:[%s1427_s0 + $0xd0] sm:$0xf]  ;;  %v545_v25 = vld [vmem:[%s1427_s0 + $0xd8] sm:$0xf]  ;;  %v857_v26 = vmax.bf16 %v546_v21, %v35_v20  ;;  %v37_v30 = vld [vmem:[%s1427_s0 + $0xe4] sm:$0x7] }
  0x14   :  { %251 = vrot.lane.b32.xlu1 %v677_v28, %s576_s22  ;;  %v861_v27 = vmax.bf16 %v545_v25, %v34_v24  ;;  %v548_v31 = vld [vmem:[%s1427_s0 + $0xec] sm:$0x7]  ;;  %v36_v32 = vld [vmem:[%s1427_s0 + $0xe0] sm:$0xf]  ;;  %v547_v33 = vld [vmem:[%s1427_s0 + $0xe8] sm:$0xf] }
  0x15   :  { %249 = vrot.lane.b32.xlu0 %v681_v29, %s576_s22  ;;  %v877_v36 = vmax.bf16 %v548_v31, %v37_v30  ;;  %v881_v37 = vmax.bf16 %v547_v33, %v36_v32  ;;  %v39_v38 = vld [vmem:[%s1427_s0 + $0xf4] sm:$0x7]  ;;  %v550_v39 = vld [vmem:[%s1427_s0 + $0xfc] sm:$0x7]  ;;  %v38_v42 = vld [vmem:[%s1427_s0 + $0xf0] sm:$0xf] }
  0x16   :  { %v549_v43 = vld [vmem:[%s1427_s0 + $0xf8] sm:$0xf]  ;;  %v897_v44 = vmax.bf16 %v550_v39, %v39_v38  ;;  %v41_v48 = vld [vmem:[%s1427_s0 + $0x104] sm:$0x7]  ;;  %v552_v49 = vld [vmem:[%s1427_s0 + $0x10c] sm:$0x7] }
  0x17   :  { %v901_v45 = vmax.bf16 %v549_v43, %v38_v42  ;;  %v40_v50 = vld [vmem:[%s1427_s0 + $0x100] sm:$0xf]  ;;  %v551_v51 = vld [vmem:[%s1427_s0 + $0x108] sm:$0xf]  ;;  %v917_v54 = vmax.bf16 %v552_v49, %v41_v48  ;;  %v43_v56 = vld [vmem:[%s1427_s0 + $0x114] sm:$0x7] }
  0x18   :  { %255 = vrot.lane.b32.xlu1 %v697_v34, %s576_s22  ;;  %v921_v55 = vmax.bf16 %v551_v51, %v40_v50  ;;  %v554_v57 = vld [vmem:[%s1427_s0 + $0x11c] sm:$0x7]  ;;  %v42_v60 = vld [vmem:[%s1427_s0 + $0x110] sm:$0xf]  ;;  %v553_v61 = vld [vmem:[%s1427_s0 + $0x118] sm:$0xf] }
  0x19   :  { %253 = vrot.lane.b32.xlu0 %v701_v35, %s576_s22  ;;  %v937_v62 = vmax.bf16 %v554_v57, %v43_v56  ;;  %v941_v63 = vmax.bf16 %v553_v61, %v42_v60  ;;  %v45_v2 = vld [vmem:[%s1427_s0 + $0x124] sm:$0x7]  ;;  %v556_v4 = vld [vmem:[%s1427_s0 + $0x12c] sm:$0x7]  ;;  %v44_v5 = vld [vmem:[%s1427_s0 + $0x120] sm:$0xf] }
  0x1a   :  { %v555_v6 = vld [vmem:[%s1427_s0 + $0x128] sm:$0xf]  ;;  %v957_v12 = vmax.bf16 %v556_v4, %v45_v2  ;;  %v47_v14 = vld [vmem:[%s1427_s0 + $0x134] sm:$0x7]  ;;  %v558_v15 = vld [vmem:[%s1427_s0 + $0x13c] sm:$0x7] }
  0x1b   :  { %v961_v13 = vmax.bf16 %v555_v6, %v44_v5  ;;  %v46_v20 = vld [vmem:[%s1427_s0 + $0x130] sm:$0xf]  ;;  %v557_v21 = vld [vmem:[%s1427_s0 + $0x138] sm:$0xf]  ;;  %v977_v24 = vmax.bf16 %v558_v15, %v47_v14  ;;  %v49_v30 = vld [vmem:[%s1427_s0 + $0x144] sm:$0x7] }
  0x1c   :  { %259 = vrot.lane.b32.xlu1 %v717_v40, %s576_s22  ;;  %v981_v25 = vmax.bf16 %v557_v21, %v46_v20  ;;  %v560_v31 = vld [vmem:[%s1427_s0 + $0x14c] sm:$0x7]  ;;  %v48_v32 = vld [vmem:[%s1427_s0 + $0x140] sm:$0xf]  ;;  %v559_v33 = vld [vmem:[%s1427_s0 + $0x148] sm:$0xf] }
  0x1d   :  { %257 = vrot.lane.b32.xlu0 %v721_v41, %s576_s22  ;;  %v997_v38 = vmax.bf16 %v560_v31, %v49_v30  ;;  %v1001_v39 = vmax.bf16 %v559_v33, %v48_v32  ;;  %v51_v42 = vld [vmem:[%s1427_s0 + $0x154] sm:$0x7]  ;;  %v562_v43 = vld [vmem:[%s1427_s0 + $0x15c] sm:$0x7]  ;;  %v50_v48 = vld [vmem:[%s1427_s0 + $0x150] sm:$0xf] }
  0x1e   :  { %v561_v49 = vld [vmem:[%s1427_s0 + $0x158] sm:$0xf]  ;;  %v1017_v50 = vmax.bf16 %v562_v43, %v51_v42  ;;  %v53_v56 = vld [vmem:[%s1427_s0 + $0x164] sm:$0x7]  ;;  %v564_v57 = vld [vmem:[%s1427_s0 + $0x16c] sm:$0x7] }
  0x1f   :  { %v1021_v51 = vmax.bf16 %v561_v49, %v50_v48  ;;  %v52_v60 = vld [vmem:[%s1427_s0 + $0x160] sm:$0xf]  ;;  %v563_v61 = vld [vmem:[%s1427_s0 + $0x168] sm:$0xf]  ;;  %v1037_v2 = vmax.bf16 %v564_v57, %v53_v56  ;;  %v55_v5 = vld [vmem:[%s1427_s0 + $0x174] sm:$0x7] }
  0x20   :  { %263 = vrot.lane.b32.xlu1 %v737_v46, %s576_s22  ;;  %v1041_v4 = vmax.bf16 %v563_v61, %v52_v60  ;;  %v566_v6 = vld [vmem:[%s1427_s0 + $0x17c] sm:$0x7]  ;;  %v54_v14 = vld [vmem:[%s1427_s0 + $0x170] sm:$0xf]  ;;  %v565_v15 = vld [vmem:[%s1427_s0 + $0x178] sm:$0xf] }
  0x21   :  { %261 = vrot.lane.b32.xlu0 %v741_v47, %s576_s22  ;;  %v1057_v20 = vmax.bf16 %v566_v6, %v55_v5  ;;  %v1061_v21 = vmax.bf16 %v565_v15, %v54_v14  ;;  %v57_v30 = vld [vmem:[%s1427_s0 + $0x184] sm:$0x7]  ;;  %v568_v31 = vld [vmem:[%s1427_s0 + $0x18c] sm:$0x7]  ;;  %v56_v32 = vld [vmem:[%s1427_s0 + $0x180] sm:$0xf] }
  0x22   :  { %v567_v33 = vld [vmem:[%s1427_s0 + $0x188] sm:$0xf]  ;;  %v1077_v42 = vmax.bf16 %v568_v31, %v57_v30  ;;  %v59_v48 = vld [vmem:[%s1427_s0 + $0x194] sm:$0x7]  ;;  %v570_v49 = vld [vmem:[%s1427_s0 + $0x19c] sm:$0x7] }
  0x23   :  { %v1081_v43 = vmax.bf16 %v567_v33, %v56_v32  ;;  %v58_v56 = vld [vmem:[%s1427_s0 + $0x190] sm:$0xf]  ;;  %v569_v57 = vld [vmem:[%s1427_s0 + $0x198] sm:$0xf]  ;;  %v1097_v60 = vmax.bf16 %v570_v49, %v59_v48  ;;  %v61_v5 = vld [vmem:[%s1427_s0 + $0x1a4] sm:$0x7] }
  0x24   :  { %267 = vrot.lane.b32.xlu1 %v757_v52, %s576_s22  ;;  %v1101_v61 = vmax.bf16 %v569_v57, %v58_v56  ;;  %v572_v6 = vld [vmem:[%s1427_s0 + $0x1ac] sm:$0x7]  ;;  %v60_v14 = vld [vmem:[%s1427_s0 + $0x1a0] sm:$0xf]  ;;  %v571_v15 = vld [vmem:[%s1427_s0 + $0x1a8] sm:$0xf] }
  0x25   :  { %265 = vrot.lane.b32.xlu0 %v761_v53, %s576_s22  ;;  %v1117_v30 = vmax.bf16 %v572_v6, %v61_v5  ;;  %v1121_v31 = vmax.bf16 %v571_v15, %v60_v14  ;;  %v63_v32 = vld [vmem:[%s1427_s0 + $0x1b4] sm:$0x7]  ;;  %v574_v33 = vld [vmem:[%s1427_s0 + $0x1bc] sm:$0x7]  ;;  %v62_v48 = vld [vmem:[%s1427_s0 + $0x1b0] sm:$0xf] }
  0x26   :  { %v573_v49 = vld [vmem:[%s1427_s0 + $0x1b8] sm:$0xf]  ;;  %v1137_v56 = vmax.bf16 %v574_v33, %v63_v32 }
  0x27   :  { %v1141_v57 = vmax.bf16 %v573_v49, %v62_v48 }
  0x28   :  { %271 = vrot.lane.b32.xlu1 %v777_v58, %s576_s22 }
  0x29   :  { %269 = vrot.lane.b32.xlu0 %v781_v59, %s576_s22 }
  0x2c   :  { %275 = vrot.lane.b32.xlu1 %v797_v0, %s576_s22 }
  0x2d   :  { %273 = vrot.lane.b32.xlu0 %v801_v1, %s576_s22 }
  0x30   :  { %279 = vrot.lane.b32.xlu1 %v817_v8, %s576_s22 }
  0x31   :  { %277 = vrot.lane.b32.xlu0 %v821_v9, %s576_s22 }
  0x34   :  { %283 = vrot.lane.b32.xlu1 %v837_v18, %s576_s22 }
  0x35   :  { %281 = vrot.lane.b32.xlu0 %v841_v19, %s576_s22 }
  0x38   :  { %287 = vrot.lane.b32.xlu1 %v857_v26, %s576_s22 }
  0x39   :  { %285 = vrot.lane.b32.xlu0 %v861_v27, %s576_s22 }
  0x3c   :  { %291 = vrot.lane.b32.xlu1 %v877_v36, %s576_s22 }
  0x3d   :  { %289 = vrot.lane.b32.xlu0 %v881_v37, %s576_s22 }
  0x40   :  { %295 = vrot.lane.b32.xlu1 %v897_v44, %s576_s22 }
  0x41   :  { %293 = vrot.lane.b32.xlu0 %v901_v45, %s576_s22 }
  0x44   :  { %299 = vrot.lane.b32.xlu1 %v917_v54, %s576_s22 }
  0x45   :  { %297 = vrot.lane.b32.xlu0 %v921_v55, %s576_s22 }
  0x48   :  { %303 = vrot.lane.b32.xlu1 %v937_v62, %s576_s22 }
  0x49   :  { %301 = vrot.lane.b32.xlu0 %v941_v63, %s576_s22 }
  0x4c   :  { %307 = vrot.lane.b32.xlu1 %v957_v12, %s576_s22 }
  0x4d   :  { %305 = vrot.lane.b32.xlu0 %v961_v13, %s576_s22 }
  0x50   :  { %311 = vrot.lane.b32.xlu1 %v977_v24, %s576_s22 }
  0x51   :  { %309 = vrot.lane.b32.xlu0 %v981_v25, %s576_s22 }
  0x54   :  { %315 = vrot.lane.b32.xlu1 %v997_v38, %s576_s22 }
  0x55   :  { %313 = vrot.lane.b32.xlu0 %v1001_v39, %s576_s22 }
  0x58   :  { %319 = vrot.lane.b32.xlu1 %v1017_v50, %s576_s22 }
  0x59   :  { %317 = vrot.lane.b32.xlu0 %v1021_v51, %s576_s22 }
  0x5c   :  { %323 = vrot.lane.b32.xlu1 %v1037_v2, %s576_s22 }
  0x5d   :  { %321 = vrot.lane.b32.xlu0 %v1041_v4, %s576_s22 }
  0x60   :  { %327 = vrot.lane.b32.xlu1 %v1057_v20, %s576_s22 }
  0x61   :  { %325 = vrot.lane.b32.xlu0 %v1061_v21, %s576_s22 }
  0x64   :  { %331 = vrot.lane.b32.xlu1 %v1077_v42, %s576_s22 }
  0x65   :  { %329 = vrot.lane.b32.xlu0 %v1081_v43, %s576_s22 }
  0x68   :  { %335 = vrot.lane.b32.xlu1 %v1097_v60, %s576_s22 }
  0x69   :  { %333 = vrot.lane.b32.xlu0 %v1101_v61, %s576_s22 }
  0x6c   :  { %339 = vrot.lane.b32.xlu1 %v1117_v30, %s576_s22 }
  0x6d   :  { %337 = vrot.lane.b32.xlu0 %v1121_v31, %s576_s22 }
  0x70   :  { %343 = vrot.lane.b32.xlu1 %v1137_v56, %s576_s22 }
  0x71   :  { %341 = vrot.lane.b32.xlu0 %v1141_v57, %s576_s22 }
  0x76   :  { %v238_v5 = vpop.permute.xlu1 %237 }
  0x77   :  { %v403_v6 = vmax.bf16 %v238_v5, %v596_v3  ;;  %v234_v14 = vpop.permute.xlu0 %233 }
  0x78   :  { %v401_v15 = vmax.bf16 %v234_v14, %v607_v7 }
  0x79   :  { %461 = vst.msk [vmem:[%s1428_s1 + $0x8] sm:$0xf] %vm457_vm0, %v403_v6 }
  0x7a   :  { %458 = vst.msk [vmem:[%s1428_s1] sm:$0xf] %vm457_vm0, %v401_v15  ;;  %v240_v32 = vpop.permute.xlu1 %239 }
  0x7b   :  { %v404_v33 = vmax.bf16 %v240_v32, %v617_v10  ;;  %v236_v48 = vpop.permute.xlu0 %235 }
  0x7c   :  { %v402_v3 = vmax.bf16 %v236_v48, %v621_v11 }
  0x7d   :  { %462 = vst.msk [vmem:[%s1428_s1 + $0xc] sm:$0x7] %vm459_vm1, %v404_v33 }
  0x7e   :  { %460 = vst.msk [vmem:[%s1428_s1 + $0x4] sm:$0x7] %vm459_vm1, %v402_v3  ;;  %v244_v7 = vpop.permute.xlu1 %243 }
  0x7f   :  { %v406_v49 = vmax.bf16 %v244_v7, %v637_v16  ;;  %v242_v5 = vpop.permute.xlu0 %241 }
  0x80   :  { %v405_v6 = vmax.bf16 %v242_v5, %v641_v17 }
  0x81   :  { %464 = vst.msk [vmem:[%s1428_s1 + $0x14] sm:$0x7] %vm459_vm1, %v406_v49 }
  0x82   :  { %463 = vst.msk [vmem:[%s1428_s1 + $0x10] sm:$0xf] %vm457_vm0, %v405_v6  ;;  %v248_v10 = vpop.permute.xlu1 %247 }
  0x83   :  { %v408_v11 = vmax.bf16 %v248_v10, %v657_v22  ;;  %v246_v14 = vpop.permute.xlu0 %245 }
  0x84   :  { %v407_v15 = vmax.bf16 %v246_v14, %v661_v23 }
  0x85   :  { %466 = vst.msk [vmem:[%s1428_s1 + $0x1c] sm:$0x7] %vm459_vm1, %v408_v11 }
  0x86   :  { %465 = vst.msk [vmem:[%s1428_s1 + $0x18] sm:$0xf] %vm457_vm0, %v407_v15  ;;  %v252_v16 = vpop.permute.xlu1 %251 }
  0x87   :  { %v410_v17 = vmax.bf16 %v252_v16, %v677_v28  ;;  %v250_v32 = vpop.permute.xlu0 %249 }
  0x88   :  { %v409_v33 = vmax.bf16 %v250_v32, %v681_v29 }
  0x89   :  { %468 = vst.msk [vmem:[%s1428_s1 + $0x24] sm:$0x7] %vm459_vm1, %v410_v17 }
  0x8a   :  { %467 = vst.msk [vmem:[%s1428_s1 + $0x20] sm:$0xf] %vm457_vm0, %v409_v33  ;;  %v256_v22 = vpop.permute.xlu1 %255 }
  0x8b   :  { %v412_v23 = vmax.bf16 %v256_v22, %v697_v34  ;;  %v254_v48 = vpop.permute.xlu0 %253 }
  0x8c   :  { %v411_v3 = vmax.bf16 %v254_v48, %v701_v35 }
  0x8d   :  { %470 = vst.msk [vmem:[%s1428_s1 + $0x2c] sm:$0x7] %vm459_vm1, %v412_v23 }
  0x8e   :  { %469 = vst.msk [vmem:[%s1428_s1 + $0x28] sm:$0xf] %vm457_vm0, %v411_v3  ;;  %v260_v28 = vpop.permute.xlu1 %259 }
  0x8f   :  { %v414_v29 = vmax.bf16 %v260_v28, %v717_v40  ;;  %v258_v7 = vpop.permute.xlu0 %257 }
  0x90   :  { %v413_v49 = vmax.bf16 %v258_v7, %v721_v41 }
  0x91   :  { %472 = vst.msk [vmem:[%s1428_s1 + $0x34] sm:$0x7] %vm459_vm1, %v414_v29 }
  0x92   :  { %471 = vst.msk [vmem:[%s1428_s1 + $0x30] sm:$0xf] %vm457_vm0, %v413_v49  ;;  %v264_v34 = vpop.permute.xlu1 %263 }
  0x93   :  { %v416_v35 = vmax.bf16 %v264_v34, %v737_v46  ;;  %v262_v5 = vpop.permute.xlu0 %261 }
  0x94   :  { %v415_v6 = vmax.bf16 %v262_v5, %v741_v47 }
  0x95   :  { %474 = vst.msk [vmem:[%s1428_s1 + $0x3c] sm:$0x7] %vm459_vm1, %v416_v35 }
  0x96   :  { %473 = vst.msk [vmem:[%s1428_s1 + $0x38] sm:$0xf] %vm457_vm0, %v415_v6  ;;  %v268_v40 = vpop.permute.xlu1 %267 }
  0x97   :  { %v418_v41 = vmax.bf16 %v268_v40, %v757_v52  ;;  %v266_v10 = vpop.permute.xlu0 %265 }
  0x98   :  { %v417_v11 = vmax.bf16 %v266_v10, %v761_v53 }
  0x99   :  { %476 = vst.msk [vmem:[%s1428_s1 + $0x44] sm:$0x7] %vm459_vm1, %v418_v41 }
  0x9a   :  { %475 = vst.msk [vmem:[%s1428_s1 + $0x40] sm:$0xf] %vm457_vm0, %v417_v11  ;;  %v272_v46 = vpop.permute.xlu1 %271 }
  0x9b   :  { %v420_v47 = vmax.bf16 %v272_v46, %v777_v58  ;;  %v270_v14 = vpop.permute.xlu0 %269 }
  0x9c   :  { %v419_v15 = vmax.bf16 %v270_v14, %v781_v59 }
  0x9d   :  { %478 = vst.msk [vmem:[%s1428_s1 + $0x4c] sm:$0x7] %vm459_vm1, %v420_v47 }
  0x9e   :  { %477 = vst.msk [vmem:[%s1428_s1 + $0x48] sm:$0xf] %vm457_vm0, %v419_v15  ;;  %v276_v52 = vpop.permute.xlu1 %275 }
  0x9f   :  { %v422_v53 = vmax.bf16 %v276_v52, %v797_v0  ;;  %v274_v16 = vpop.permute.xlu0 %273 }
  0xa0   :  { %v421_v17 = vmax.bf16 %v274_v16, %v801_v1 }
  0xa1   :  { %480 = vst.msk [vmem:[%s1428_s1 + $0x54] sm:$0x7] %vm459_vm1, %v422_v53 }
  0xa2   :  { %479 = vst.msk [vmem:[%s1428_s1 + $0x50] sm:$0xf] %vm457_vm0, %v421_v17  ;;  %v280_v58 = vpop.permute.xlu1 %279 }
  0xa3   :  { %v424_v59 = vmax.bf16 %v280_v58, %v817_v8  ;;  %v278_v32 = vpop.permute.xlu0 %277 }
  0xa4   :  { %v423_v33 = vmax.bf16 %v278_v32, %v821_v9 }
  0xa5   :  { %482 = vst.msk [vmem:[%s1428_s1 + $0x5c] sm:$0x7] %vm459_vm1, %v424_v59 }
  0xa6   :  { %481 = vst.msk [vmem:[%s1428_s1 + $0x58] sm:$0xf] %vm457_vm0, %v423_v33  ;;  %v284_v0 = vpop.permute.xlu1 %283 }
  0xa7   :  { %v426_v1 = vmax.bf16 %v284_v0, %v837_v18  ;;  %v282_v22 = vpop.permute.xlu0 %281 }
  0xa8   :  { %v425_v23 = vmax.bf16 %v282_v22, %v841_v19 }
  0xa9   :  { %484 = vst.msk [vmem:[%s1428_s1 + $0x64] sm:$0x7] %vm459_vm1, %v426_v1 }
  0xaa   :  { %483 = vst.msk [vmem:[%s1428_s1 + $0x60] sm:$0xf] %vm457_vm0, %v425_v23  ;;  %v288_v8 = vpop.permute.xlu1 %287 }
  0xab   :  { %v428_v9 = vmax.bf16 %v288_v8, %v857_v26  ;;  %v286_v48 = vpop.permute.xlu0 %285 }
  0xac   :  { %v427_v3 = vmax.bf16 %v286_v48, %v861_v27 }
  0xad   :  { %486 = vst.msk [vmem:[%s1428_s1 + $0x6c] sm:$0x7] %vm459_vm1, %v428_v9 }
  0xae   :  { %485 = vst.msk [vmem:[%s1428_s1 + $0x68] sm:$0xf] %vm457_vm0, %v427_v3  ;;  %v292_v18 = vpop.permute.xlu1 %291 }
  0xaf   :  { %v430_v19 = vmax.bf16 %v292_v18, %v877_v36  ;;  %v290_v28 = vpop.permute.xlu0 %289 }
  0xb0   :  { %v429_v29 = vmax.bf16 %v290_v28, %v881_v37 }
  0xb1   :  { %488 = vst.msk [vmem:[%s1428_s1 + $0x74] sm:$0x7] %vm459_vm1, %v430_v19 }
  0xb2   :  { %487 = vst.msk [vmem:[%s1428_s1 + $0x70] sm:$0xf] %vm457_vm0, %v429_v29  ;;  %v296_v26 = vpop.permute.xlu1 %295 }
  0xb3   :  { %v432_v27 = vmax.bf16 %v296_v26, %v897_v44  ;;  %v294_v7 = vpop.permute.xlu0 %293 }
  0xb4   :  { %v431_v49 = vmax.bf16 %v294_v7, %v901_v45 }
  0xb5   :  { %490 = vst.msk [vmem:[%s1428_s1 + $0x7c] sm:$0x7] %vm459_vm1, %v432_v27 }
  0xb6   :  { %489 = vst.msk [vmem:[%s1428_s1 + $0x78] sm:$0xf] %vm457_vm0, %v431_v49  ;;  %v300_v36 = vpop.permute.xlu1 %299 }
  0xb7   :  { %v434_v37 = vmax.bf16 %v300_v36, %v917_v54  ;;  %v298_v34 = vpop.permute.xlu0 %297 }
  0xb8   :  { %v433_v35 = vmax.bf16 %v298_v34, %v921_v55 }
  0xb9   :  { %492 = vst.msk [vmem:[%s1428_s1 + $0x84] sm:$0x7] %vm459_vm1, %v434_v37 }
  0xba   :  { %491 = vst.msk [vmem:[%s1428_s1 + $0x80] sm:$0xf] %vm457_vm0, %v433_v35  ;;  %v304_v44 = vpop.permute.xlu1 %303 }
  0xbb   :  { %v436_v45 = vmax.bf16 %v304_v44, %v937_v62  ;;  %v302_v5 = vpop.permute.xlu0 %301 }
  0xbc   :  { %v435_v6 = vmax.bf16 %v302_v5, %v941_v63 }
  0xbd   :  { %494 = vst.msk [vmem:[%s1428_s1 + $0x8c] sm:$0x7] %vm459_vm1, %v436_v45 }
  0xbe   :  { %493 = vst.msk [vmem:[%s1428_s1 + $0x88] sm:$0xf] %vm457_vm0, %v435_v6  ;;  %v308_v54 = vpop.permute.xlu1 %307 }
  0xbf   :  { %v438_v55 = vmax.bf16 %v308_v54, %v957_v12  ;;  %v306_v40 = vpop.permute.xlu0 %305 }
  0xc0   :  { %v437_v41 = vmax.bf16 %v306_v40, %v961_v13 }
  0xc1   :  { %496 = vst.msk [vmem:[%s1428_s1 + $0x94] sm:$0x7] %vm459_vm1, %v438_v55 }
  0xc2   :  { %495 = vst.msk [vmem:[%s1428_s1 + $0x90] sm:$0xf] %vm457_vm0, %v437_v41  ;;  %v312_v62 = vpop.permute.xlu1 %311 }
  0xc3   :  { %v440_v63 = vmax.bf16 %v312_v62, %v977_v24  ;;  %v310_v10 = vpop.permute.xlu0 %309 }
  0xc4   :  { %v439_v11 = vmax.bf16 %v310_v10, %v981_v25 }
  0xc5   :  { %498 = vst.msk [vmem:[%s1428_s1 + $0x9c] sm:$0x7] %vm459_vm1, %v440_v63 }
  0xc6   :  { %497 = vst.msk [vmem:[%s1428_s1 + $0x98] sm:$0xf] %vm457_vm0, %v439_v11  ;;  %v316_v12 = vpop.permute.xlu1 %315 }
  0xc7   :  { %v442_v13 = vmax.bf16 %v316_v12, %v997_v38  ;;  %v314_v46 = vpop.permute.xlu0 %313 }
  0xc8   :  { %v441_v47 = vmax.bf16 %v314_v46, %v1001_v39 }
  0xc9   :  { %500 = vst.msk [vmem:[%s1428_s1 + $0xa4] sm:$0x7] %vm459_vm1, %v442_v13 }
  0xca   :  { %499 = vst.msk [vmem:[%s1428_s1 + $0xa0] sm:$0xf] %vm457_vm0, %v441_v47  ;;  %v320_v24 = vpop.permute.xlu1 %319 }
  0xcb   :  { %v444_v25 = vmax.bf16 %v320_v24, %v1017_v50  ;;  %v318_v14 = vpop.permute.xlu0 %317 }
  0xcc   :  { %v443_v15 = vmax.bf16 %v318_v14, %v1021_v51 }
  0xcd   :  { %502 = vst.msk [vmem:[%s1428_s1 + $0xac] sm:$0x7] %vm459_vm1, %v444_v25 }
  0xce   :  { %501 = vst.msk [vmem:[%s1428_s1 + $0xa8] sm:$0xf] %vm457_vm0, %v443_v15  ;;  %v324_v38 = vpop.permute.xlu1 %323 }
  0xcf   :  { %v446_v39 = vmax.bf16 %v324_v38, %v1037_v2  ;;  %v322_v52 = vpop.permute.xlu0 %321 }
  0xd0   :  { %v445_v53 = vmax.bf16 %v322_v52, %v1041_v4 }
  0xd1   :  { %504 = vst.msk [vmem:[%s1428_s1 + $0xb4] sm:$0x7] %vm459_vm1, %v446_v39 }
  0xd2   :  { %503 = vst.msk [vmem:[%s1428_s1 + $0xb0] sm:$0xf] %vm457_vm0, %v445_v53  ;;  %v328_v50 = vpop.permute.xlu1 %327 }
  0xd3   :  { %v448_v51 = vmax.bf16 %v328_v50, %v1057_v20  ;;  %v326_v16 = vpop.permute.xlu0 %325 }
  0xd4   :  { %v447_v17 = vmax.bf16 %v326_v16, %v1061_v21 }
  0xd5   :  { %506 = vst.msk [vmem:[%s1428_s1 + $0xbc] sm:$0x7] %vm459_vm1, %v448_v51 }
  0xd6   :  { %505 = vst.msk [vmem:[%s1428_s1 + $0xb8] sm:$0xf] %vm457_vm0, %v447_v17  ;;  %v332_v2 = vpop.permute.xlu1 %331 }
  0xd7   :  { %v450_v4 = vmax.bf16 %v332_v2, %v1077_v42  ;;  %v330_v58 = vpop.permute.xlu0 %329 }
  0xd8   :  { %v449_v59 = vmax.bf16 %v330_v58, %v1081_v43 }
  0xd9   :  { %508 = vst.msk [vmem:[%s1428_s1 + $0xc4] sm:$0x7] %vm459_vm1, %v450_v4 }
  0xda   :  { %507 = vst.msk [vmem:[%s1428_s1 + $0xc0] sm:$0xf] %vm457_vm0, %v449_v59  ;;  %v336_v20 = vpop.permute.xlu1 %335 }
  0xdb   :  { %v452_v21 = vmax.bf16 %v336_v20, %v1097_v60  ;;  %v334_v32 = vpop.permute.xlu0 %333 }
  0xdc   :  { %v451_v33 = vmax.bf16 %v334_v32, %v1101_v61 }
  0xdd   :  { %510 = vst.msk [vmem:[%s1428_s1 + $0xcc] sm:$0x7] %vm459_vm1, %v452_v21 }
  0xde   :  { %509 = vst.msk [vmem:[%s1428_s1 + $0xc8] sm:$0xf] %vm457_vm0, %v451_v33  ;;  %v340_v42 = vpop.permute.xlu1 %339 }
  0xdf   :  { %v454_v43 = vmax.bf16 %v340_v42, %v1117_v30  ;;  %v338_v0 = vpop.permute.xlu0 %337 }
  0xe0   :  { %v453_v1 = vmax.bf16 %v338_v0, %v1121_v31 }
  0xe1   :  { %512 = vst.msk [vmem:[%s1428_s1 + $0xd4] sm:$0x7] %vm459_vm1, %v454_v43 }
  0xe2   :  { %511 = vst.msk [vmem:[%s1428_s1 + $0xd0] sm:$0xf] %vm457_vm0, %v453_v1  ;;  %v344_v60 = vpop.permute.xlu1 %343 }
  0xe3   :  { %v456_v61 = vmax.bf16 %v344_v60, %v1137_v56  ;;  %v342_v22 = vpop.permute.xlu0 %341 }
  0xe4   :  { %v455_v23 = vmax.bf16 %v342_v22, %v1141_v57 }
  0xe5   :  { %514 = vst.msk [vmem:[%s1428_s1 + $0xdc] sm:$0x7] %vm459_vm1, %v456_v61 }
  0xe6   :  { %513 = vst.msk [vmem:[%s1428_s1 + $0xd8] sm:$0xf] %vm457_vm0, %v455_v23 }

// kernel: convnet_forward.6
= control target key start
LH: loop header
LB: loop body
LE: loop exit
PB: predicated region body
PF: predicated region fallthrough
CT: control target
= control target key end

     0   :  { %8 = vsyncpa [#allocation3], 0  ;;  %s2530_s12 = smov [#allocation2]   ;;  %s3561_s0 = inlined_call_operand.vmem [shape: bf16[2,32,32,1], index: 0, kind: input, shape index: {}]   ;;  %s3562_s1 = inlined_call_operand.vmem [shape: bf16[25,1,32], index: 1, kind: input, shape index: {}]   ;;  %s3563_s2 = inlined_call_operand.hbm [shape: f32[1,32], index: 2, kind: input, shape index: {}]   ;;  %s3564_s3 = inlined_call_operand.vmem [shape: bf16[2,28,28,32], index: 3, kind: output, shape index: {}]  }
   0x1   :  { %s19_s13 = sshll.u32 %s2530_s12, 4  ;;  %s2498_s16 = scalar_lea.hbm %s3563_s2, 16  ;;  %s20_s13 = int_to_ptr.vmem [resolvable:$true] %s19_s13 }
   0x2   :  { %p2499_p0 = scmp.ne.s32.totalorder %s3563_s2, %s2498_s16  ;;  %p2502_p1 = scmp.lt.u32.totalorder %s2498_s16, %s3563_s2 }
   0x4   :  { %p2504_p2 = pnand %p2502_p1, %p2499_p0 }
   0x6   :  { %2507 = shalt.err (!%p2504_p2)
}
   0x7   :  { %s2508_s21 = scalar_lea.vmem %s20_s13, 16  ;;  %s2512_s22 = scalar_lea.vmem %s20_s13, 32 }
   0x8   :  { %p2509_p3 = scmp.ne.s32.totalorder %s20_s13, %s2508_s21  ;;  %p2513_p4 = scmp.lt.s32.totalorder %s20_s13, %s20_s13 }
   0x9   :  { %p2514_p5 = scmp.lt.s32.totalorder %s2512_s22, %s2508_s21 }
   0xb   :  { %p2515_p6 = por %p2514_p5, %p2513_p4 }
   0xd   :  { %p2516_p7 = pnand %p2515_p6, %p2509_p3 }
   0xf   :  { %2519 = shalt.err (!%p2516_p7)
}
  0x10   :  { %22 = dma.hbm_to_vmem [thread:$0]  %s3563_s2, 16, %s20_s13, [#allocation3]  }
  0x11   :  { %2524 = dma.done.wait [#allocation3], 16  }
  0x12   :  { %2525 = vsyncadd [#allocation3], 4294967280  ;;  %v2564_v0 = vld [vmem:[#allocation2] ss:$0 sm:$0xff]  ;;  %s2566_s25 = smov 0  }
  0x13 LB: > { %v2531_v1 = vmov 0   ;;  %s2226_s26 = sshll.u32 %s2528_s25, 4  ;;  %vm138_vm0 = vcmask 1045504   ;;  %vm176_vm1 = vcmask 1044480   ;;  %vm100_vm2 = vcmask 1046528   ;;  %s32_s25 = sadd.s32 1, %s2528_s25   ;;  %s2528_s25 = sphi %s2566_s25, %s32_s25  }
  0x14   : > { %2312 = vset.pattern.permute.xlu1 %v2531_v1  ;;  %2301 = vset.pattern.permute.xlu0 %v2531_v1  ;;  %s2577_s28 = scalar_lea.vmem %s3561_s0, %s2226_s26  ;;  %vm214_vm3 = vcmask 1043456   ;;  %vm1042_vm4 = vcmask 257024   ;;  %vm1046_vm5 = vcmask 254976   ;;  %s3168_s22 = scalar_lea.vmem %s3564_s3, %s2226_s26 }
  0x15   : > { %v78_v2 = vld [vmem:[%s2577_s28 + $0xc] sm:$0x7]  ;;  %v116_v3 = vld [vmem:[%s2577_s28] sm:$0xe]  ;;  %v2083_v16 = vld [vmem:[%s2577_s28 + $0x18] sm:$0xff]   ;;  %p29_p8 = scmp.ge.s32.totalorder %s32_s25, 28  }
  0x16   : > { %v2243_v4 = vld [vmem:[%s2577_s28] sm:$0xff]   ;;  %v81_v5 = vunpack.c.l.bf16 %v78_v2  ;;  %v119_v6 = vunpack.c.l.bf16 %v116_v3  ;;  %v154_v9 = vld [vmem:[%s2577_s28 + $0x8] sm:$0xff]   ;;  %v2084_v17 = vld [vmem:[%s2577_s28 + $0x1c] sm:$0x3]  ;;  %v242_v21 = vunpack.c.l.bf16 %v2083_v16  ;;  %v354_v31 = vunpack.c.h.bf16 %v2083_v16 }
  0x17   : > { %v2244_v7 = vunpack.c.l.bf16 %v2243_v4  ;;  %v2245_v8 = vunpack.c.h.bf16 %v2243_v4  ;;  %v192_v10 = vld [vmem:[%s2577_s28] sm:$0xc]  ;;  %v39_v11 = vld [vmem:[%s2577_s28 + $0xc] sm:$0x3]  ;;  %v157_v12 = vunpack.c.h.bf16 %v154_v9  ;;  %v43_v14 = vunpack.c.l.bf16 %v154_v9  ;;  %v2282_v18 = vld [vmem:[%s2577_s28 + $0x10] sm:$0xff]  }
  0x18   : > { %v195_v13 = vunpack.c.l.bf16 %v192_v10  ;;  %v44_v15 = vunpack.c.l.bf16 %v39_v11  ;;  %v2313_v19 = vpack.i.bf16 %v119_v6, %v81_v5  ;;  %v243_v22 = vunpack.c.l.bf16 %v2084_v17  ;;  %v2092_v27 = vld [vmem:[%s2577_s28 + $0x10] sm:$0xc]  ;;  %v2086_v28 = vld [vmem:[%s2577_s28 + $0x1c] sm:$0x7]  ;;  %v2097_v36 = vld [vmem:[%s2577_s28 + $0x28] sm:$0xff]  }
  0x19   : > { %v2302_v20 = vpack.i.bf16 %v2245_v8, %v2244_v7  ;;  %v2248_v25 = vunpack.c.l.bf16 %v2282_v18  ;;  %v2249_v26 = vunpack.c.h.bf16 %v2282_v18  ;;  %v2088_v29 = vld [vmem:[%s2577_s28 + $0x10] sm:$0xe]  ;;  %v391_v33 = vunpack.c.l.bf16 %v2092_v27  ;;  %v2098_v37 = vld [vmem:[%s2577_s28 + $0x2c] sm:$0x3]  ;;  %v2283_v38 = vld [vmem:[%s2577_s28 + $0x20] sm:$0xff]  }
  0x1a   : > { %2314 = vperm.xlu1 %2312, %v2313_v19   ;;  %v2318_v23 = vpack.i.bf16 %v195_v13, %v157_v12  ;;  %v2307_v24 = vpack.i.bf16 %v44_v15, %v43_v14  ;;  %v2328_v30 = vpack.i.bf16 %v243_v22, %v242_v21  ;;  %v280_v34 = vunpack.c.l.bf16 %v2086_v28  ;;  %v2106_v45 = vld [vmem:[%s2577_s28 + $0x20] sm:$0xc]  ;;  %v2100_v46 = vld [vmem:[%s2577_s28 + $0x2c] sm:$0x7]  ;;  %v2111_v54 = vld [vmem:[%s2577_s28 + $0x38] sm:$0xff]  }
  0x1b   : > { %2303 = vperm.xlu0 %2301, %v2302_v20   ;;  %v2323_v32 = vpack.i.bf16 %v2249_v26, %v2248_v25  ;;  %v317_v35 = vunpack.c.l.bf16 %v2088_v29  ;;  %v437_v39 = vunpack.c.l.bf16 %v2097_v36  ;;  %v438_v40 = vunpack.c.l.bf16 %v2098_v37  ;;  %v2102_v47 = vld [vmem:[%s2577_s28 + $0x20] sm:$0xe]  ;;  %v2112_v55 = vld [vmem:[%s2577_s28 + $0x3c] sm:$0x3]  ;;  %v2284_v56 = vld [vmem:[%s2577_s28 + $0x30] sm:$0xff]  }
  0x1c   : > { %v2338_v41 = vpack.i.bf16 %v391_v33, %v354_v31  ;;  %v2252_v43 = vunpack.c.l.bf16 %v2283_v38  ;;  %v2253_v44 = vunpack.c.h.bf16 %v2283_v38  ;;  %v549_v49 = vunpack.c.h.bf16 %v2097_v36  ;;  %v2120_v63 = vld [vmem:[%s2577_s28 + $0x30] sm:$0xc]  ;;  %v2114_v1 = vld [vmem:[%s2577_s28 + $0x3c] sm:$0x7]  ;;  %v2125_v9 = vld [vmem:[%s2577_s28 + $0x48] sm:$0xff]  }
  0x1d   : > { %v2333_v42 = vpack.i.bf16 %v317_v35, %v280_v34  ;;  %v2348_v48 = vpack.i.bf16 %v438_v40, %v437_v39  ;;  %v586_v51 = vunpack.c.l.bf16 %v2106_v45  ;;  %v475_v52 = vunpack.c.l.bf16 %v2100_v46  ;;  %v2116_v2 = vld [vmem:[%s2577_s28 + $0x30] sm:$0xe]  ;;  %v2126_v10 = vld [vmem:[%s2577_s28 + $0x4c] sm:$0x3]  ;;  %v2285_v11 = vld [vmem:[%s2577_s28 + $0x40] sm:$0xff]  }
  0x1e   : > { %2319 = vperm.xlu1 %2312, %v2318_v23   ;;  %v2343_v50 = vpack.i.bf16 %v2253_v44, %v2252_v43  ;;  %v512_v53 = vunpack.c.l.bf16 %v2102_v47  ;;  %v632_v57 = vunpack.c.l.bf16 %v2111_v54  ;;  %v633_v58 = vunpack.c.l.bf16 %v2112_v55  ;;  %v2134_v18 = vld [vmem:[%s2577_s28 + $0x40] sm:$0xc]  ;;  %v2128_v19 = vld [vmem:[%s2577_s28 + $0x4c] sm:$0x7]  ;;  %v2160_v45 = vld [vmem:[%s2577_s28 + $0x218] sm:$0xff]  }
  0x1f   : > { %2308 = vperm.xlu0 %2301, %v2307_v24   ;;  %v2358_v59 = vpack.i.bf16 %v586_v51, %v549_v49  ;;  %v2256_v61 = vunpack.c.l.bf16 %v2284_v56  ;;  %v2257_v62 = vunpack.c.h.bf16 %v2284_v56  ;;  %v744_v4 = vunpack.c.h.bf16 %v2111_v54  ;;  %v2130_v20 = vld [vmem:[%s2577_s28 + $0x40] sm:$0xe]  ;;  %v2146_v27 = vld [vmem:[%s2577_s28 + $0x208] sm:$0xff]   ;;  %v2161_v46 = vld [vmem:[%s2577_s28 + $0x21c] sm:$0x3] }
  0x20   : > { %v2353_v60 = vpack.i.bf16 %v512_v53, %v475_v52  ;;  %v2368_v3 = vpack.i.bf16 %v633_v58, %v632_v57  ;;  %v781_v6 = vunpack.c.l.bf16 %v2120_v63  ;;  %v670_v7 = vunpack.c.l.bf16 %v2114_v1  ;;  %v2147_v28 = vld [vmem:[%s2577_s28 + $0x20c] sm:$0x3]  ;;  %v2286_v29 = vld [vmem:[%s2577_s28 + $0x200] sm:$0xff]   ;;  %v2287_v47 = vld [vmem:[%s2577_s28 + $0x210] sm:$0xff]  }
  0x21   : > { %v2363_v5 = vpack.i.bf16 %v2257_v62, %v2256_v61  ;;  %v707_v8 = vunpack.c.l.bf16 %v2116_v2  ;;  %v827_v12 = vunpack.c.l.bf16 %v2125_v9  ;;  %v828_v13 = vunpack.c.l.bf16 %v2126_v10  ;;  %v2154_v36 = vld [vmem:[%s2577_s28 + $0x200] sm:$0xc]  ;;  %v2148_v37 = vld [vmem:[%s2577_s28 + $0x20c] sm:$0x7]  ;;  %v2169_v54 = vld [vmem:[%s2577_s28 + $0x210] sm:$0xc] }
  0x22   : > { %2329 = vperm.xlu1 %2312, %v2328_v30   ;;  %v2378_v14 = vpack.i.bf16 %v781_v6, %v744_v4  ;;  %v2260_v16 = vunpack.c.l.bf16 %v2285_v11  ;;  %v2261_v17 = vunpack.c.h.bf16 %v2285_v11  ;;  %v939_v22 = vunpack.c.h.bf16 %v2125_v9  ;;  %v2150_v38 = vld [vmem:[%s2577_s28 + $0x200] sm:$0xe]  ;;  %v2163_v55 = vld [vmem:[%s2577_s28 + $0x21c] sm:$0x7]  ;;  %v2165_v56 = vld [vmem:[%s2577_s28 + $0x210] sm:$0xe] }
  0x23   : > { %2324 = vperm.xlu0 %2301, %v2323_v32   ;;  %v2373_v15 = vpack.i.bf16 %v707_v8, %v670_v7  ;;  %v2388_v21 = vpack.i.bf16 %v828_v13, %v827_v12  ;;  %v976_v24 = vunpack.c.l.bf16 %v2134_v18  ;;  %v865_v25 = vunpack.c.l.bf16 %v2128_v19  ;;  %v2175_v63 = vld [vmem:[%s2577_s28 + $0x228] sm:$0xff]   ;;  %v2288_v2 = vld [vmem:[%s2577_s28 + $0x220] sm:$0xff]   ;;  %v2190_v18 = vld [vmem:[%s2577_s28 + $0x238] sm:$0xff]  }
  0x24   : > { %v2383_v23 = vpack.i.bf16 %v2261_v17, %v2260_v16  ;;  %v902_v26 = vunpack.c.l.bf16 %v2130_v20  ;;  %v1058_v30 = vunpack.c.l.bf16 %v2146_v27  ;;  %v1059_v31 = vunpack.c.l.bf16 %v2147_v28  ;;  %v2178_v1 = vld [vmem:[%s2577_s28 + $0x22c] sm:$0x7]  ;;  %v2184_v9 = vld [vmem:[%s2577_s28 + $0x220] sm:$0xc]  ;;  %v2193_v19 = vld [vmem:[%s2577_s28 + $0x23c] sm:$0x7] }
  0x25   : > { %v2398_v32 = vpack.i.bf16 %v976_v24, %v939_v22  ;;  %v2264_v34 = vunpack.c.l.bf16 %v2286_v29  ;;  %v2265_v35 = vunpack.c.h.bf16 %v2286_v29  ;;  %v1167_v40 = vunpack.c.h.bf16 %v2146_v27  ;;  %v2176_v10 = vld [vmem:[%s2577_s28 + $0x22c] sm:$0x3]  ;;  %v2180_v11 = vld [vmem:[%s2577_s28 + $0x220] sm:$0xe]  ;;  %v2289_v20 = vld [vmem:[%s2577_s28 + $0x230] sm:$0xff]  }
  0x26   : > { %2339 = vperm.xlu1 %2312, %v2338_v41   ;;  %v2393_v33 = vpack.i.bf16 %v902_v26, %v865_v25  ;;  %v2408_v39 = vpack.i.bf16 %v1059_v31, %v1058_v30  ;;  %v1095_v43 = vunpack.c.l.bf16 %v2148_v37  ;;  %v1131_v44 = vunpack.c.l.bf16 %v2150_v38  ;;  %v2199_v27 = vld [vmem:[%s2577_s28 + $0x230] sm:$0xc]  ;;  %v2191_v28 = vld [vmem:[%s2577_s28 + $0x23c] sm:$0x3]  ;;  %v2208_v37 = vld [vmem:[%s2577_s28 + $0x24c] sm:$0x7] }
  0x27   : > { %2334 = vperm.xlu0 %2301, %v2333_v42   ;;  %v2403_v41 = vpack.i.bf16 %v2265_v35, %v2264_v34  ;;  %v1203_v42 = vunpack.c.l.bf16 %v2154_v36  ;;  %v1248_v49 = vunpack.c.l.bf16 %v2161_v46  ;;  %v2268_v52 = vunpack.c.l.bf16 %v2287_v47  ;;  %v2195_v29 = vld [vmem:[%s2577_s28 + $0x230] sm:$0xe]  ;;  %v2205_v36 = vld [vmem:[%s2577_s28 + $0x248] sm:$0xff]   ;;  %v2290_v38 = vld [vmem:[%s2577_s28 + $0x240] sm:$0xff]  }
  0x28   : > { %v2413_v51 = vpack.i.bf16 %v1131_v44, %v1095_v43  ;;  %v2269_v53 = vunpack.c.h.bf16 %v2287_v47  ;;  %v1356_v58 = vunpack.c.h.bf16 %v2160_v45  ;;  %v1284_v61 = vunpack.c.l.bf16 %v2163_v55  ;;  %v2210_v46 = vld [vmem:[%s2577_s28 + $0x240] sm:$0xe] }
  0x29   : > { %v1320_v62 = vunpack.c.l.bf16 %v2165_v56  ;;  %v1473_v4 = vunpack.c.l.bf16 %v2178_v1  ;;  %v2272_v7 = vunpack.c.l.bf16 %v2288_v2  ;;  %v2273_v8 = vunpack.c.h.bf16 %v2288_v2  ;;  %v2079_v1 = vld [vmem:[%s3562_s1 + $0x4] sm:$0x1]  ;;  %v2085_v2 = vld [vmem:[%s3562_s1 + $0x5] sm:$0x1] }
  0x2a   : > { %2349 = vperm.xlu1 %2312, %v2348_v48   ;;  %v1247_v48 = vunpack.c.l.bf16 %v2160_v45  ;;  %v1545_v13 = vunpack.c.h.bf16 %v2175_v63  ;;  %v1437_v16 = vunpack.c.l.bf16 %v2176_v10  ;;  %v1509_v17 = vunpack.c.l.bf16 %v2180_v11  ;;  %v2206_v45 = vld [vmem:[%s2577_s28 + $0x24c] sm:$0x3] }
  0x2b   : > { %2344 = vperm.xlu0 %2301, %v2343_v50   ;;  %v2418_v50 = vpack.i.bf16 %v1203_v42, %v1167_v40  ;;  %v2433_v6 = vpack.i.bf16 %v1320_v62, %v1284_v61  ;;  %v1662_v22 = vunpack.c.l.bf16 %v2193_v19  ;;  %v2276_v25 = vunpack.c.l.bf16 %v2289_v20 }
  0x2c   : > { %v2428_v57 = vpack.i.bf16 %v1248_v49, %v1247_v48  ;;  %v2453_v24 = vpack.i.bf16 %v1509_v17, %v1437_v16  ;;  %v2277_v26 = vunpack.c.h.bf16 %v2289_v20  ;;  %v1734_v31 = vunpack.c.h.bf16 %v2190_v18 }
  0x2d   : > { %v1626_v34 = vunpack.c.l.bf16 %v2191_v28  ;;  %v1698_v35 = vunpack.c.l.bf16 %v2195_v29  ;;  %v1851_v40 = vunpack.c.l.bf16 %v2208_v37  ;;  %v2280_v43 = vunpack.c.l.bf16 %v2290_v38 }
  0x2e   : > { %2359 = vperm.xlu1 %2312, %v2358_v59   ;;  %v2423_v59 = vpack.i.bf16 %v2269_v53, %v2268_v52  ;;  %v2281_v44 = vunpack.c.h.bf16 %v2290_v38  ;;  %v1815_v49 = vunpack.c.l.bf16 %v2206_v45  ;;  %v2214_v53 = vld [vmem:[%s2577_s28 + $0x240] sm:$0xc]  ;;  %v66_v55 = vlaneseq }
  0x2f   : > { %2354 = vperm.xlu0 %2301, %v2353_v60   ;;  %v1392_v60 = vunpack.c.l.bf16 %v2169_v54  ;;  %v2473_v42 = vpack.i.bf16 %v1698_v35, %v1626_v34  ;;  %v1959_v54 = vunpack.c.l.bf16 %v2214_v53  ;;  %v196_v10 = vunpack.c.l.bf16 %v2079_v1  ;;  %v2121_v34 = vld [vmem:[%s3562_s1 + $0x13] sm:$0x1]  ;;  %v1055_v53 = vld [vmem:[%s3562_s1] sm:$0x1] }
  0x30   : > { %v2483_v48 = vpack.i.bf16 %v2281_v44, %v2280_v43  ;;  %v67_v56 = vshrl.u32 %v66_v55, 7  ;;  %v244_v11 = vunpack.c.l.bf16 %v2085_v2 }
  0x32   : > { %2369 = vperm.xlu1 %2312, %v2368_v3   ;;  %v1436_v3 = vunpack.c.l.bf16 %v2175_v63  ;;  %v40_v63 = vld [vmem:[%s3562_s1] sm:$0x1] }
  0x33   : > { %2364 = vperm.xlu0 %2301, %v2363_v5   ;;  %v2438_v5 = vpack.i.bf16 %v1392_v60, %v1356_v58  ;;  %v2077_v58 = vld [vmem:[%s3562_s1 + $0x2] sm:$0x1]  ;;  %v2078_v60 = vld [vmem:[%s3562_s1 + $0x3] sm:$0x1] }
  0x34   : > { %v2448_v12 = vpack.i.bf16 %v1473_v4, %v1436_v3  ;;  %v120_v62 = vunpack.c.l.bf16 %v2077_v58  ;;  %v2087_v3 = vld [vmem:[%s3562_s1 + $0x6] sm:$0x1]  ;;  %v2091_v4 = vld [vmem:[%s3562_s1 + $0x8] sm:$0x1] }
  0x35   : > { %v281_v17 = vunpack.c.l.bf16 %v2087_v3  ;;  %v355_v19 = vunpack.c.l.bf16 %v2091_v4  ;;  %v2162_v4 = vld [vmem:[%s3562_s1 + $0x5] sm:$0x1] }
  0x36   : > { %2379 = vperm.xlu1 %2312, %v2378_v14   ;;  %v2443_v14 = vpack.i.bf16 %v2273_v8, %v2272_v7  ;;  %v2089_v7 = vld [vmem:[%s3562_s1 + $0x7] sm:$0x1]  ;;  %v2099_v8 = vld [vmem:[%s3562_s1 + $0xa] sm:$0x1] }
  0x37   : > { %2374 = vperm.xlu0 %2301, %v2373_v15   ;;  %v1581_v15 = vunpack.c.l.bf16 %v2184_v9  ;;  %v45_v9 = vunpack.c.l.bf16 %v40_v63 }
  0x3a   : > { %2389 = vperm.xlu1 %2312, %v2388_v21   ;;  %v1625_v21 = vunpack.c.l.bf16 %v2190_v18  ;;  %v2103_v18 = vld [vmem:[%s3562_s1 + $0xc] sm:$0x1] }
  0x3b   : > { %2384 = vperm.xlu0 %2301, %v2383_v23   ;;  %v2458_v23 = vpack.i.bf16 %v1581_v15, %v1545_v13  ;;  %v2105_v13 = vld [vmem:[%s3562_s1 + $0xd] sm:$0x1] }
  0x3c   : > { %v2468_v30 = vpack.i.bf16 %v1662_v22, %v1625_v21  ;;  %v318_v21 = vunpack.c.l.bf16 %v2089_v7  ;;  %v439_v22 = vunpack.c.l.bf16 %v2099_v8  ;;  %v550_v28 = vunpack.c.l.bf16 %v2105_v13 }
  0x3d   : > { %v1060_v7 = vunpack.c.l.bf16 %v1055_v53 }
  0x3e   : > { %2399 = vperm.xlu1 %2312, %v2398_v32   ;;  %v2463_v32 = vpack.i.bf16 %v2277_v26, %v2276_v25  ;;  %v2119_v25 = vld [vmem:[%s3562_s1 + $0x12] sm:$0x1] }
  0x3f   : > { %2394 = vperm.xlu0 %2301, %v2393_v33   ;;  %v1770_v33 = vunpack.c.l.bf16 %v2199_v27  ;;  %v745_v38 = vunpack.c.l.bf16 %v2119_v25 }
  0x42   : > { %2409 = vperm.xlu1 %2312, %v2408_v39   ;;  %v1814_v39 = vunpack.c.l.bf16 %v2205_v36 }
  0x43   : > { %2404 = vperm.xlu0 %2301, %v2403_v41   ;;  %v2478_v41 = vpack.i.bf16 %v1770_v33, %v1734_v31  ;;  %v513_v33 = vunpack.c.l.bf16 %v2103_v18 }
  0x44   : > { %v2488_v47 = vpack.i.bf16 %v1851_v40, %v1814_v39  ;;  %v2117_v39 = vld [vmem:[%s3562_s1 + $0x11] sm:$0x1]  ;;  %v2127_v40 = vld [vmem:[%s3562_s1 + $0x14] sm:$0x1] }
  0x46   : > { %2419 = vperm.xlu1 %2312, %v2418_v50   ;;  %v1887_v50 = vunpack.c.l.bf16 %v2210_v46  ;;  %v2133_v46 = vld [vmem:[%s3562_s1 + $0x17] sm:$0x1] }
  0x47   : > { %2414 = vperm.xlu0 %2301, %v2413_v51   ;;  %v1923_v51 = vunpack.c.h.bf16 %v2205_v36  ;;  %v940_v3 = vunpack.c.l.bf16 %v2133_v46 }
  0x48   : > { %v2493_v52 = vpack.i.bf16 %v1887_v50, %v1815_v49 }
  0x4a   : > { %2429 = vperm.xlu1 %2312, %v2428_v57   ;;  %v2076_v57 = vld [vmem:[%s3562_s1 + $0x1] sm:$0x1] }
  0x4b   : > { %2424 = vperm.xlu0 %2301, %v2423_v59   ;;  %v2645_v59 = vsub.s32 0, %v67_v56  ;;  %v82_v61 = vunpack.c.l.bf16 %v2076_v57  ;;  %v708_v56 = vunpack.c.l.bf16 %v2117_v39  ;;  %v829_v57 = vunpack.c.l.bf16 %v2127_v40 }
  0x4d   : > { %3572 = vst [vmem:[#allocation5_spill] sm:$0xff] %v2645_v59  ;;  %v2684_v15 = vrot.slane %v82_v61, %v2645_v59  ;;  %v2687_v16 = vrot.slane %v120_v62, %v2645_v59  ;;  %v2708_v31 = vrot.slane %v196_v10, %v2645_v59  ;;  %v2717_v35 = vrot.slane %v281_v17, %v2645_v59  ;;  %v2155_v61 = vld [vmem:[%s3562_s1 + $0x4] sm:$0x1]  ;;  %v2151_v62 = vld [vmem:[%s3562_s1 + $0x2] sm:$0x1] }
  0x4e   : > { %2439 = vperm.xlu1 %2312, %v2438_v5   ;;  %v158_v5 = vunpack.c.l.bf16 %v2078_v60  ;;  %v2735_v44 = vrot.slane %v318_v21, %v2645_v59  ;;  %v2738_v45 = vrot.slane %v439_v22, %v2645_v59  ;;  %v2750_v49 = vrot.slane %v550_v28, %v2645_v59  ;;  %v2153_v60 = vld [vmem:[%s3562_s1 + $0x3] sm:$0x1]  ;;  %v2168_v10 = vld [vmem:[%s3562_s1 + $0x8] sm:$0x1]  ;;  %v2166_v22 = vld [vmem:[%s3562_s1 + $0x7] sm:$0x1] }
  0x4f   : > { %2434 = vperm.xlu0 %2301, %v2433_v6   ;;  %v2093_v6 = vld [vmem:[%s3562_s1 + $0x9] sm:$0x1]  ;;  %v2765_v55 = vrot.slane %v513_v33, %v2645_v59  ;;  %v2783_v2 = vrot.slane %v745_v38, %v2645_v59  ;;  %v1168_v13 = vunpack.c.l.bf16 %v2153_v60  ;;  %v1132_v17 = vunpack.c.l.bf16 %v2151_v62 }
  0x50   : > { %v392_v20 = vunpack.c.l.bf16 %v2093_v6  ;;  %v2702_v26 = vrot.slane %v158_v5, %v2645_v59  ;;  %v2801_v18 = vrot.slane %v708_v56, %v2645_v59  ;;  %v1249_v21 = vunpack.c.l.bf16 %v2162_v4 }
  0x51   : > { %v1357_v25 = vunpack.c.l.bf16 %v2168_v10  ;;  %v2822_v33 = vrot.slane %v1060_v7, %v2645_v59  ;;  %v2828_v38 = vrot.slane %v1168_v13, %v2645_v59  ;;  %v2834_v40 = vrot.slane %v1132_v17, %v2645_v59 }
  0x52   : > { %2449 = vperm.xlu1 %2312, %v2448_v12   ;;  %v2101_v12 = vld [vmem:[%s3562_s1 + $0xb] sm:$0x1]  ;;  %v2732_v43 = vrot.slane %v392_v20, %v2645_v59 }
  0x53   : > { %2444 = vperm.xlu0 %2301, %v2443_v14   ;;  %v2107_v14 = vld [vmem:[%s3562_s1 + $0xe] sm:$0x1]  ;;  %v476_v27 = vunpack.c.l.bf16 %v2101_v12  ;;  %v2843_v56 = vrot.slane %v1357_v25, %v2645_v59 }
  0x54   : > { %v587_v29 = vunpack.c.l.bf16 %v2107_v14  ;;  %v1204_v14 = vunpack.c.l.bf16 %v2155_v61 }
  0x55   : > { %3574 = vst [vmem:[#allocation7_spill] sm:$0xff] %v2843_v56 }
  0x56   : > { %2459 = vperm.xlu1 %2312, %v2458_v23   ;;  %v2113_v23 = vld [vmem:[%s3562_s1 + $0xf] sm:$0x1]  ;;  %v2753_v50 = vrot.slane %v587_v29, %v2645_v59  ;;  %v2831_v39 = vrot.slane %v1204_v14, %v2645_v59 }
  0x57   : > { %2454 = vperm.xlu0 %2301, %v2453_v24   ;;  %v2115_v24 = vld [vmem:[%s3562_s1 + $0x10] sm:$0x1]  ;;  %v634_v36 = vunpack.c.l.bf16 %v2113_v23  ;;  %v2813_v23 = vrot.slane %v940_v3, %v2645_v59 }
  0x58   : > { %v671_v37 = vunpack.c.l.bf16 %v2115_v24 }
  0x59   : > { %v2777_v63 = vrot.slane %v634_v36, %v2645_v59 }
  0x5a   : > { %2469 = vperm.xlu1 %2312, %v2468_v30   ;;  %v2705_v30 = vrot.slane %v45_v9, %v2645_v59  ;;  %v2780_v1 = vrot.slane %v671_v37, %v2645_v59  ;;  %v2164_v9 = vld [vmem:[%s3562_s1 + $0x6] sm:$0x1] }
  0x5b   : > { %2464 = vperm.xlu0 %2301, %v2463_v32   ;;  %v2711_v32 = vrot.slane %v244_v11, %v2645_v59  ;;  %v2170_v11 = vld [vmem:[%s3562_s1 + $0x9] sm:$0x1]  ;;  %v1285_v24 = vunpack.c.l.bf16 %v2164_v9 }
  0x5e   : > { %2479 = vperm.xlu1 %2312, %v2478_v41   ;;  %v2129_v41 = vld [vmem:[%s3562_s1 + $0x15] sm:$0x1] }
  0x5f   : > { %2474 = vperm.xlu0 %2301, %v2473_v42   ;;  %v2729_v42 = vrot.slane %v355_v19, %v2645_v59  ;;  %v866_v58 = vunpack.c.l.bf16 %v2129_v41  ;;  %v2804_v19 = vrot.slane %v829_v57, %v2645_v59  ;;  %v1321_v41 = vunpack.c.l.bf16 %v2166_v22 }
  0x61   : > { %v2807_v20 = vrot.slane %v866_v58, %v2645_v59 }
  0x62   : > { %2489 = vperm.xlu1 %2312, %v2488_v47   ;;  %v2135_v47 = vld [vmem:[%s3562_s1 + $0x18] sm:$0x1] }
  0x63   : > { %2484 = vperm.xlu0 %2301, %v2483_v48   ;;  %v2747_v48 = vrot.slane %v476_v27, %v2645_v59  ;;  %v977_v5 = vunpack.c.l.bf16 %v2135_v47  ;;  %v1393_v27 = vunpack.c.l.bf16 %v2170_v11 }
  0x65   : > { %v2816_v28 = vrot.slane %v977_v5, %v2645_v59  ;;  %v2846_v57 = vrot.slane %v1393_v27, %v2645_v59 }
  0x66   : > { %1927 = vperm.xlu1 %2312, %v1923_v51   ;;  %v782_v51 = vunpack.c.l.bf16 %v2121_v34 }
  0x67   : > { %2494 = vperm.xlu0 %2301, %v2493_v52   ;;  %v2131_v52 = vld [vmem:[%s3562_s1 + $0x16] sm:$0x1]  ;;  %3575 = vst [vmem:[#allocation8_spill] sm:$0xff] %v2846_v57 }
  0x68   : > { %v903_v6 = vunpack.c.l.bf16 %v2131_v52  ;;  %v2798_v12 = vrot.slane %v782_v51, %v2645_v59  ;;  %v2837_v52 = vrot.slane %v1249_v21, %v2645_v59 }
  0x6a   : > { %v2819_v29 = vrot.slane %v903_v6, %v2645_v59 }
  0x6b   : > { %1963 = vperm.xlu0 %2301, %v1959_v54   ;;  %v2149_v54 = vld [vmem:[%s3562_s1 + $0x1] sm:$0x1] }
  0x6c   : > { %v1096_v8 = vunpack.c.l.bf16 %v2149_v54  ;;  %v2840_v54 = vrot.slane %v1285_v24, %v2645_v59 }
  0x6e   : > { %v2825_v34 = vrot.slane %v1096_v8, %v2645_v59  ;;  %3573 = vst [vmem:[#allocation6_spill] sm:$0xff] %v2840_v54  ;;  %v2858_v8 = vrot.slane %v1321_v41, %v2645_v59 }
  0x70   : > { %3576 = vst [vmem:[#allocation9_spill] sm:$0xff] %v2858_v8 }
  0x99   : > { %v2315_v36 = vpop.permute.xlu1 %2314 }
  0x9a   : > { %v2304_v37 = vpop.permute.xlu0 %2303  ;;  %v2317_v46 = vunpack.i.h.bf16 %v2315_v36  ;;  %v2316_v47 = vunpack.i.l.bf16 %v2315_v36 }
  0x9b   : > { %v2306_v51 = vunpack.i.h.bf16 %v2304_v37  ;;  %v2305_v53 = vunpack.i.l.bf16 %v2304_v37 }
  0x9c   : > { %v130_v58 = vmul.f32 %v2317_v46, %v2687_v16  ;;  %v168_v60 = vmul.f32 %v2317_v46, %v2702_v26  ;;  %v95_v61 = vmul.f32 %v2316_v47, %v2684_v15  ;;  %v2852_v62 = vmul.f32 %v2316_v47, %v2687_v16 }
  0x9d   : > { %v93_v3 = vmul.f32 %v2306_v51, %v2684_v15  ;;  %v131_v4 = vmul.f32 %v2306_v51, %v2687_v16  ;;  %v169_v5 = vmul.f32 %v2306_v51, %v2702_v26  ;;  %v2320_v6 = vpop.permute.xlu1 %2319  ;;  %v71_v13 = vmul.f32 %v2306_v51, %v2705_v30 }
  0x9e   : > { %v2309_v7 = vpop.permute.xlu0 %2308  ;;  %v139_v9 = vrot.slane %v130_v58, 2  ;;  %v177_v10 = vrot.slane %v168_v60, 3  ;;  %v106_v11 = vrot.slane %v95_v61, 1  ;;  %v92_v24 = vmul.f32 %v2305_v53, %v2684_v15 }
  0x9f   : > { %v102_v17 = vrot.slane %v93_v3, 1  ;;  %v140_v21 = vrot.slane %v131_v4, 2  ;;  %v178_v22 = vrot.slane %v169_v5, 3  ;;  %v2322_v25 = vunpack.i.h.bf16 %v2320_v6 }
  0xa0   : > { %v2321_v27 = vunpack.i.l.bf16 %v2320_v6  ;;  %v2311_v36 = vunpack.i.h.bf16 %v2309_v7  ;;  %v70_v41 = vmul.f32 %v2305_v53, %v2705_v30  ;;  %v2310_v46 = vunpack.i.l.bf16 %v2309_v7 }
  0xa1   : > { %v141_v37 = vsel %vm138_vm0, %v139_v9, %v140_v21  ;;  %v179_v47 = vsel %vm176_vm1, %v177_v10, %v178_v22  ;;  %v101_v58 = vrot.slane %v92_v24, 1  ;;  %v206_v60 = vmul.f32 %v2322_v25, %v2708_v31  ;;  %v2330_v53 = vpop.permute.xlu1 %2329 }
  0xa2   : > { %v2868_v61 = vmul.f32 %v2321_v27, %v2702_v26  ;;  %v2871_v3 = vmul.f32 %v2321_v27, %v2708_v31  ;;  %v73_v4 = vmul.f32 %v2311_v36, %v2705_v30  ;;  %v94_v5 = vmul.f32 %v2310_v46, %v2684_v15 }
  0xa3   : > { %v2876_v6 = vmul.f32 %v2310_v46, %v2687_v16  ;;  %v207_v7 = vmul.f32 %v2306_v51, %v2708_v31  ;;  %v103_v9 = vsel %vm100_vm2, %v101_v58, %v102_v17  ;;  %v215_v10 = vrot.slane %v206_v60, 4  ;;  %v2325_v58 = vpop.permute.xlu0 %2324 }
  0xa4   : > { %v72_v25 = vmul.f32 %v2310_v46, %v2705_v30  ;;  %v112_v27 = vadd.f32 %v103_v9, %v70_v41  ;;  %v115_v14 = vadd.f32 %v106_v11, %v73_v4  ;;  %v104_v59 = vrot.slane %v94_v5, 1 }
  0xa5   : > { %v142_v36 = vrot.slane %v2876_v6, 2  ;;  %v2885_v16 = vmul.f32 %v2310_v46, %v2702_v26  ;;  %v2888_v8 = vmul.f32 %v2310_v46, %v2708_v31  ;;  %v2332_v51 = vunpack.i.h.bf16 %v2330_v53 }
  0xa6   : > { %v150_v60 = vadd.f32 %v141_v37, %v112_v27  ;;  %v3577_v24 = vrot.slane %v2852_v62, 2  ;;  %v105_v30 = vsel %vm100_vm2, %v102_v17, %v104_v59  ;;  %v107_v41 = vsel %vm100_vm2, %v104_v59, %v106_v11 }
  0xa7   : > { %v113_v4 = vadd.f32 %v105_v30, %v71_v13  ;;  %v114_v5 = vadd.f32 %v107_v41, %v72_v25  ;;  %v180_v9 = vrot.slane %v2885_v16, 3  ;;  %v2331_v15 = vunpack.i.l.bf16 %v2330_v53 }
  0xa8   : > { %v153_v56 = vadd.f32 %v3577_v24, %v115_v14  ;;  %v143_v26 = vsel %vm138_vm0, %v140_v21, %v142_v36  ;;  %v218_v31 = vrot.slane %v2888_v8, 4  ;;  %v3578_v37 = vrot.slane %v2868_v61, 3  ;;  %v2340_v14 = vpop.permute.xlu1 %2339 }
  0xa9   : > { %v2901_v27 = vunpack.i.h.bf16 %v2325_v58  ;;  %v151_v17 = vadd.f32 %v143_v26, %v113_v4  ;;  %v272_v59 = vmul.f32 %v2332_v51, %v2711_v32  ;;  %v2326_v11 = vunpack.i.l.bf16 %v2325_v58 }
  0xaa   : > { %v191_v46 = vadd.f32 %v3578_v37, %v153_v56  ;;  %v188_v13 = vadd.f32 %v179_v47, %v150_v60  ;;  %v181_v24 = vsel %vm176_vm1, %v178_v22, %v180_v9  ;;  %v3579_v53 = vrot.slane %v2871_v3, 4 }
  0xab   : > { %v292_v21 = vmul.f32 %v2901_v27, %v2717_v35  ;;  %v216_v8 = vrot.slane %v207_v7, 4  ;;  %v270_v56 = vmul.f32 %v2901_v27, %v2711_v32  ;;  %v189_v16 = vadd.f32 %v181_v24, %v151_v17 }
  0xac   : > { %v229_v25 = vadd.f32 %v3579_v53, %v191_v46  ;;  %v291_v30 = vmul.f32 %v2326_v11, %v2717_v35  ;;  %v2342_v41 = vunpack.i.h.bf16 %v2340_v14  ;;  %v269_v22 = vmul.f32 %v2326_v11, %v2711_v32  ;;  %v2335_v53 = vpop.permute.xlu0 %2334 }
  0xad   : > { %v300_v4 = vrot.slane %v292_v21, 1  ;;  %v217_v51 = vsel %vm214_vm3, %v215_v10, %v216_v8  ;;  %v219_v47 = vsel %vm214_vm3, %v216_v8, %v218_v31  ;;  %v2341_v46 = vunpack.i.l.bf16 %v2340_v14 }
  0xae   : > { %v226_v58 = vadd.f32 %v217_v51, %v188_v13  ;;  %v227_v60 = vadd.f32 %v219_v47, %v189_v16  ;;  %v299_v26 = vrot.slane %v291_v30, 1  ;;  %v2916_v37 = vmul.f32 %v2342_v41, %v2732_v43 }
  0xaf   : > { %v276_v7 = vadd.f32 %v272_v59, %v229_v25  ;;  %v367_v17 = vmul.f32 %v2331_v15, %v2729_v42  ;;  %v2920_v24 = vmul.f32 %v2331_v15, %v2732_v43  ;;  %v271_v11 = vmul.f32 %v2331_v15, %v2711_v32 }
  0xb0   : > { %v273_v21 = vadd.f32 %v269_v22, %v226_v58  ;;  %v274_v10 = vadd.f32 %v270_v56, %v227_v60  ;;  %v301_v8 = vsel %vm100_vm2, %v299_v26, %v300_v4  ;;  %v368_v16 = vmul.f32 %v2341_v46, %v2729_v42 }
  0xb1   : > { %v376_v30 = vrot.slane %v367_v17, 3  ;;  %v405_v59 = vmul.f32 %v2341_v46, %v2732_v43  ;;  %v3569_v14 = vrot.slane %v2920_v24, 4  ;;  %v293_v25 = vmul.f32 %v2331_v15, %v2717_v35 }
  0xb2   : > { %v330_v41 = vmul.f32 %v2331_v15, %v2735_v44  ;;  %v2337_v51 = vunpack.i.h.bf16 %v2335_v53  ;;  %v310_v47 = vadd.f32 %v301_v8, %v273_v21  ;;  %v378_v56 = vrot.slane %v368_v16, 3  ;;  %v2350_v8 = vpop.permute.xlu1 %2349 }
  0xb3   : > { %v415_v22 = vrot.slane %v405_v59, 4  ;;  %v2336_v58 = vunpack.i.l.bf16 %v2335_v53  ;;  %v302_v60 = vrot.slane %v293_v25, 1  ;;  %v3580_v13 = vrot.slane %v2852_v62, 2 }
  0xb4   : > { %v339_v32 = vrot.slane %v330_v41, 2  ;;  %v328_v26 = vmul.f32 %v2337_v51, %v2735_v44  ;;  %v379_v17 = vsel %vm176_vm1, %v376_v30, %v378_v56  ;;  %v365_v21 = vmul.f32 %v2337_v51, %v2729_v42 }
  0xb5   : > { %v145_v46 = vsel %vm138_vm0, %v142_v36, %v3580_v13  ;;  %v2940_v15 = vsel %vm214_vm3, %v3569_v14, %v415_v22  ;;  %v3581_v59 = vrot.slane %v2868_v61, 3  ;;  %v3582_v6 = vrot.slane %v2871_v3, 4 }
  0xb6   : > { %v152_v53 = vadd.f32 %v145_v46, %v114_v5  ;;  %v336_v16 = vrot.slane %v328_v26, 2  ;;  %v294_v13 = vmul.f32 %v2336_v58, %v2717_v35  ;;  %v303_v41 = vsel %vm100_vm2, %v300_v4, %v302_v60 }
  0xb7   : > { %v183_v62 = vsel %vm176_vm1, %v180_v9, %v3581_v59  ;;  %v221_v36 = vsel %vm214_vm3, %v218_v31, %v3582_v6  ;;  %v329_v14 = vmul.f32 %v2901_v27, %v2735_v44  ;;  %v331_v5 = vmul.f32 %v2336_v58, %v2735_v44  ;;  %v2345_v6 = vpop.permute.xlu0 %2344 }
  0xb8   : > { %v190_v25 = vadd.f32 %v183_v62, %v152_v53  ;;  %v304_v51 = vrot.slane %v294_v13, 1  ;;  %v311_v26 = vadd.f32 %v303_v41, %v274_v10  ;;  %v366_v61 = vmul.f32 %v2901_v27, %v2729_v42 }
  0xb9   : > { %v2352_v9 = vunpack.i.h.bf16 %v2350_v8  ;;  %v373_v46 = vrot.slane %v365_v21, 3  ;;  %v337_v59 = vrot.slane %v329_v14, 2  ;;  %v341_v31 = vrot.slane %v331_v5, 2 }
  0xba   : > { %v228_v3 = vadd.f32 %v221_v36, %v190_v25  ;;  %v305_v35 = vsel %vm100_vm2, %v302_v60, %v304_v51  ;;  %v313_v53 = vadd.f32 %v304_v51, %v276_v7  ;;  %v374_v62 = vrot.slane %v366_v61, 3 }
  0xbb   : > { %v2351_v4 = vunpack.i.l.bf16 %v2350_v8  ;;  %v338_v54 = vsel %vm138_vm0, %v336_v16, %v337_v59  ;;  %v340_v44 = vsel %vm138_vm0, %v337_v59, %v339_v32  ;;  %v467_v10 = vmul.f32 %v2352_v9, %v2738_v45  ;;  %v2360_v8 = vpop.permute.xlu1 %2359 }
  0xbc   : > { %v275_v57 = vadd.f32 %v271_v11, %v228_v3  ;;  %v342_v42 = vsel %vm138_vm0, %v339_v32, %v341_v31  ;;  %v347_v58 = vadd.f32 %v338_v54, %v310_v47  ;;  %v348_v21 = vadd.f32 %v340_v44, %v311_v26 }
  0xbd   : > { %v350_v36 = vadd.f32 %v341_v31, %v313_v53  ;;  %v377_v13 = vsel %vm176_vm1, %v374_v62, %v376_v30  ;;  %v2962_v60 = vunpack.i.h.bf16 %v2345_v6  ;;  %v2346_v7 = vunpack.i.l.bf16 %v2345_v6 }
  0xbe   : > { %v312_v14 = vadd.f32 %v305_v35, %v275_v57  ;;  %v375_v11 = vsel %vm176_vm1, %v373_v46, %v374_v62  ;;  %v385_v25 = vadd.f32 %v377_v13, %v348_v21  ;;  %v403_v41 = vmul.f32 %v2901_v27, %v2732_v43 }
  0xbf   : > { %v387_v16 = vadd.f32 %v378_v56, %v350_v36  ;;  %v465_v54 = vmul.f32 %v2962_v60, %v2738_v45  ;;  %v487_v57 = vmul.f32 %v2962_v60, %v2747_v48  ;;  %v384_v47 = vadd.f32 %v375_v11, %v347_v58 }
  0xc0   : > { %v349_v5 = vadd.f32 %v342_v42, %v312_v14  ;;  %v411_v32 = vrot.slane %v403_v41, 4  ;;  %v486_v51 = vmul.f32 %v2346_v7, %v2747_v48  ;;  %v2362_v26 = vunpack.i.h.bf16 %v2360_v8 }
  0xc1   : > { %v424_v30 = vadd.f32 %v415_v22, %v387_v16  ;;  %v495_v61 = vrot.slane %v487_v57, 1  ;;  %v464_v9 = vmul.f32 %v2346_v7, %v2738_v45  ;;  %v2361_v56 = vunpack.i.l.bf16 %v2360_v8 }
  0xc2   : > { %v2974_v46 = vmul.f32 %v2351_v4, %v2750_v49  ;;  %v386_v43 = vadd.f32 %v379_v17, %v349_v5  ;;  %v3583_v27 = vrot.slane %v2916_v37, 4  ;;  %v3584_v59 = vrot.slane %v2920_v24, 4  ;;  %v2355_v24 = vpop.permute.xlu0 %2354 }
  0xc3   : > { %v494_v31 = vrot.slane %v486_v51, 1  ;;  %v2983_v62 = vmul.f32 %v2362_v26, %v2753_v50  ;;  %v2986_v6 = vmul.f32 %v2361_v56, %v2750_v49  ;;  %v471_v44 = vadd.f32 %v467_v10, %v424_v30 }
  0xc4   : > { %v412_v3 = vsel %vm214_vm3, %v3583_v27, %v411_v32  ;;  %v414_v22 = vsel %vm214_vm3, %v411_v32, %v3584_v59  ;;  %v2990_v37 = vmul.f32 %v2351_v4, %v2753_v50  ;;  %v2993_v42 = vmul.f32 %v2361_v56, %v2753_v50 }
  0xc5   : > { %v421_v35 = vadd.f32 %v412_v3, %v384_v47  ;;  %v422_v53 = vadd.f32 %v414_v22, %v385_v25  ;;  %v496_v17 = vsel %vm100_vm2, %v494_v31, %v495_v61  ;;  %v571_v36 = vrot.slane %v2974_v46, 3 }
  0xc6   : > { %v573_v14 = vrot.slane %v2986_v6, 3  ;;  %v605_v13 = vrot.slane %v2983_v62, 4  ;;  %v608_v7 = vrot.slane %v2990_v37, 4  ;;  %v610_v10 = vrot.slane %v2993_v42, 4  ;;  %v2365_v46 = vpop.permute.xlu0 %2364 }
  0xc7   : > { %v468_v58 = vadd.f32 %v464_v9, %v421_v35  ;;  %v469_v21 = vadd.f32 %v465_v54, %v422_v53  ;;  %v488_v8 = vmul.f32 %v2351_v4, %v2747_v48  ;;  %v466_v25 = vmul.f32 %v2351_v4, %v2738_v45  ;;  %v2370_v9 = vpop.permute.xlu1 %2369 }
  0xc8   : > { %v525_v16 = vmul.f32 %v2351_v4, %v2765_v55  ;;  %v2357_v41 = vunpack.i.h.bf16 %v2355_v24  ;;  %v574_v5 = vsel %vm176_vm1, %v571_v36, %v573_v14  ;;  %v2356_v57 = vunpack.i.l.bf16 %v2355_v24 }
  0xc9   : > { %v505_v11 = vadd.f32 %v496_v17, %v468_v58  ;;  %v497_v54 = vrot.slane %v488_v8, 1  ;;  %v423_v47 = vadd.f32 %v2940_v15, %v386_v43  ;;  %v524_v26 = vmul.f32 %v2962_v60, %v2765_v55 }
  0xca   : > { %v534_v30 = vrot.slane %v525_v16, 2  ;;  %v523_v32 = vmul.f32 %v2357_v41, %v2765_v55  ;;  %v560_v51 = vmul.f32 %v2357_v41, %v2750_v49  ;;  %v3012_v45 = vsel %vm214_vm3, %v608_v7, %v610_v10 }
  0xcb   : > { %v489_v4 = vmul.f32 %v2356_v57, %v2747_v48  ;;  %v498_v56 = vsel %vm100_vm2, %v495_v61, %v497_v54  ;;  %v526_v15 = vmul.f32 %v2356_v57, %v2765_v55  ;;  %v470_v27 = vadd.f32 %v466_v25, %v423_v47 }
  0xcc   : > { %v531_v43 = vrot.slane %v523_v32, 2  ;;  %v506_v3 = vadd.f32 %v498_v56, %v469_v21  ;;  %v532_v59 = vrot.slane %v524_v26, 2  ;;  %v561_v35 = vmul.f32 %v2962_v60, %v2750_v49 }
  0xcd   : > { %v499_v22 = vrot.slane %v489_v4, 1  ;;  %v536_v31 = vrot.slane %v526_v15, 2  ;;  %v2372_v53 = vunpack.i.h.bf16 %v2370_v9  ;;  %v568_v6 = vrot.slane %v560_v51, 3 }
  0xce   : > { %v533_v17 = vsel %vm138_vm0, %v531_v43, %v532_v59  ;;  %v535_v48 = vsel %vm138_vm0, %v532_v59, %v534_v30  ;;  %v3021_v42 = vunpack.i.h.bf16 %v2365_v46  ;;  %v2371_v58 = vunpack.i.l.bf16 %v2370_v9 }
  0xcf   : > { %v500_v55 = vsel %vm100_vm2, %v497_v54, %v499_v22  ;;  %v508_v61 = vadd.f32 %v499_v22, %v471_v44  ;;  %v542_v24 = vadd.f32 %v533_v17, %v505_v11  ;;  %v537_v8 = vsel %vm138_vm0, %v534_v30, %v536_v31  ;;  %v2380_v11 = vpop.permute.xlu1 %2379 }
  0xd0   : > { %v507_v21 = vadd.f32 %v500_v55, %v470_v27  ;;  %v543_v25 = vadd.f32 %v535_v48, %v506_v3  ;;  %v569_v16 = vrot.slane %v561_v35, 3  ;;  %v662_v49 = vmul.f32 %v2372_v53, %v2777_v63 }
  0xd1   : > { %v545_v41 = vadd.f32 %v536_v31, %v508_v61  ;;  %v682_v57 = vmul.f32 %v3021_v42, %v2780_v1  ;;  %v2366_v47 = vunpack.i.l.bf16 %v2365_v46  ;;  %v598_v44 = vmul.f32 %v2962_v60, %v2753_v50 }
  0xd2   : > { %v544_v32 = vadd.f32 %v537_v8, %v507_v21  ;;  %v570_v51 = vsel %vm176_vm1, %v568_v6, %v569_v16  ;;  %v572_v54 = vsel %vm176_vm1, %v569_v16, %v571_v36  ;;  %v660_v9 = vmul.f32 %v3021_v42, %v2777_v63  ;;  %v2375_v6 = vpop.permute.xlu0 %2374 }
  0xd3   : > { %v580_v26 = vadd.f32 %v572_v54, %v543_v25  ;;  %v582_v30 = vadd.f32 %v573_v14, %v545_v41  ;;  %v579_v4 = vadd.f32 %v570_v51, %v542_v24  ;;  %v690_v15 = vrot.slane %v682_v57, 1 }
  0xd4   : > { %v581_v56 = vadd.f32 %v574_v5, %v544_v32  ;;  %v606_v43 = vrot.slane %v598_v44, 4  ;;  %v681_v46 = vmul.f32 %v2366_v47, %v2780_v1  ;;  %v2382_v3 = vunpack.i.h.bf16 %v2380_v11 }
  0xd5   : > { %v619_v27 = vadd.f32 %v610_v10, %v582_v30  ;;  %v2381_v59 = vunpack.i.l.bf16 %v2380_v11  ;;  %v3036_v36 = vmul.f32 %v2371_v58, %v2783_v2  ;;  %v3045_v5 = vmul.f32 %v2371_v58, %v2798_v12  ;;  %v2390_v30 = vpop.permute.xlu1 %2389 }
  0xd6   : > { %v607_v50 = vsel %vm214_vm3, %v605_v13, %v606_v43  ;;  %v609_v60 = vsel %vm214_vm3, %v606_v43, %v608_v7  ;;  %v689_v14 = vrot.slane %v681_v46, 1  ;;  %v659_v10 = vmul.f32 %v2366_v47, %v2777_v63  ;;  %v2385_v43 = vpop.permute.xlu0 %2384 }
  0xd7   : > { %v616_v22 = vadd.f32 %v607_v50, %v579_v4  ;;  %v617_v31 = vadd.f32 %v609_v60, %v580_v26  ;;  %v3049_v35 = vmul.f32 %v2382_v3, %v2798_v12  ;;  %v666_v53 = vadd.f32 %v662_v49, %v619_v27 }
  0xd8   : > { %v691_v62 = vsel %vm100_vm2, %v689_v14, %v690_v15  ;;  %v758_v13 = vmul.f32 %v2381_v59, %v2783_v2  ;;  %v795_v37 = vmul.f32 %v2381_v59, %v2798_v12  ;;  %v766_v55 = vrot.slane %v3036_v36, 3 }
  0xd9   : > { %v663_v7 = vadd.f32 %v659_v10, %v616_v22  ;;  %v664_v17 = vadd.f32 %v660_v9, %v617_v31  ;;  %v800_v48 = vrot.slane %v3049_v35, 4  ;;  %v803_v24 = vrot.slane %v3045_v5, 4 }
  0xda   : > { %v768_v61 = vrot.slane %v758_v13, 3  ;;  %v805_v21 = vrot.slane %v795_v37, 4  ;;  %v683_v8 = vmul.f32 %v2371_v58, %v2780_v1  ;;  %v661_v25 = vmul.f32 %v2371_v58, %v2777_v63 }
  0xdb   : > { %v720_v16 = vmul.f32 %v2371_v58, %v2801_v18  ;;  %v2377_v41 = vunpack.i.h.bf16 %v2375_v6  ;;  %v2376_v49 = vunpack.i.l.bf16 %v2375_v6  ;;  %v700_v57 = vadd.f32 %v691_v62, %v663_v7 }
  0xdc   : > { %v769_v47 = vsel %vm176_vm1, %v766_v55, %v768_v61  ;;  %v692_v32 = vrot.slane %v683_v8, 1  ;;  %v618_v51 = vadd.f32 %v3012_v45, %v581_v56  ;;  %v719_v58 = vmul.f32 %v3021_v42, %v2801_v18 }
  0xdd   : > { %v729_v54 = vrot.slane %v720_v16, 2  ;;  %v718_v44 = vmul.f32 %v2377_v41, %v2801_v18  ;;  %v755_v11 = vmul.f32 %v2377_v41, %v2783_v2  ;;  %v684_v26 = vmul.f32 %v2376_v49, %v2780_v1 }
  0xde   : > { %v665_v9 = vadd.f32 %v661_v25, %v618_v51  ;;  %v693_v63 = vsel %vm100_vm2, %v690_v15, %v692_v32  ;;  %v721_v4 = vmul.f32 %v2376_v49, %v2801_v18  ;;  %v3072_v45 = vsel %vm214_vm3, %v803_v24, %v805_v21  ;;  %v2400_v49 = vpop.permute.xlu1 %2399 }
  0xdf   : > { %v726_v56 = vrot.slane %v718_v44, 2  ;;  %v694_v46 = vrot.slane %v684_v26, 1  ;;  %v701_v27 = vadd.f32 %v693_v63, %v664_v17  ;;  %v727_v3 = vrot.slane %v719_v58, 2 }
  0xe0   : > { %v731_v1 = vrot.slane %v721_v4, 2  ;;  %v756_v59 = vmul.f32 %v3021_v42, %v2783_v2  ;;  %v2392_v15 = vunpack.i.h.bf16 %v2390_v30  ;;  %v763_v36 = vrot.slane %v755_v11, 3 }
  0xe1   : > { %v695_v50 = vsel %vm100_vm2, %v692_v32, %v694_v46  ;;  %v703_v60 = vadd.f32 %v694_v46, %v666_v53  ;;  %v3077_v18 = vunpack.i.h.bf16 %v2385_v43  ;;  %v728_v22 = vsel %vm138_vm0, %v726_v56, %v727_v3 }
  0xe2   : > { %v702_v14 = vadd.f32 %v695_v50, %v665_v9  ;;  %v730_v31 = vsel %vm138_vm0, %v727_v3, %v729_v54  ;;  %v732_v10 = vsel %vm138_vm0, %v729_v54, %v731_v1  ;;  %v737_v62 = vadd.f32 %v728_v22, %v700_v57  ;;  %v2395_v22 = vpop.permute.xlu0 %2394 }
  0xe3   : > { %v738_v13 = vadd.f32 %v730_v31, %v701_v27  ;;  %v740_v37 = vadd.f32 %v731_v1, %v703_v60  ;;  %v764_v6 = vrot.slane %v756_v59, 3  ;;  %v857_v2 = vmul.f32 %v2392_v15, %v2804_v19 }
  0xe4   : > { %v739_v7 = vadd.f32 %v732_v10, %v702_v14  ;;  %v2391_v17 = vunpack.i.l.bf16 %v2390_v30  ;;  %v877_v53 = vmul.f32 %v3077_v18, %v2807_v20  ;;  %v855_v16 = vmul.f32 %v3077_v18, %v2804_v19 }
  0xe5   : > { %v767_v8 = vsel %vm176_vm1, %v764_v6, %v766_v55  ;;  %v777_v25 = vadd.f32 %v768_v61, %v740_v37  ;;  %v2386_v41 = vunpack.i.l.bf16 %v2385_v43  ;;  %v765_v57 = vsel %vm176_vm1, %v763_v36, %v764_v6 }
  0xe6   : > { %v775_v32 = vadd.f32 %v767_v8, %v738_v13  ;;  %v776_v51 = vadd.f32 %v769_v47, %v739_v7  ;;  %v885_v54 = vrot.slane %v877_v53, 1  ;;  %v774_v11 = vadd.f32 %v765_v57, %v737_v62  ;;  %v2410_v8 = vpop.permute.xlu1 %2409 }
  0xe7   : > { %v814_v44 = vadd.f32 %v805_v21, %v777_v25  ;;  %v793_v26 = vmul.f32 %v3021_v42, %v2798_v12  ;;  %v876_v30 = vmul.f32 %v2386_v41, %v2807_v20  ;;  %v2402_v9 = vunpack.i.h.bf16 %v2400_v49 }
  0xe8   : > { %v2401_v55 = vunpack.i.l.bf16 %v2400_v49  ;;  %v952_v61 = vmul.f32 %v2391_v17, %v2813_v23  ;;  %v988_v63 = vmul.f32 %v3077_v18, %v2816_v28  ;;  %v854_v4 = vmul.f32 %v2386_v41, %v2804_v19 }
  0xe9   : > { %v801_v58 = vrot.slane %v793_v26, 4  ;;  %v884_v43 = vrot.slane %v876_v30, 1  ;;  %v989_v47 = vmul.f32 %v2391_v17, %v2816_v28  ;;  %v861_v21 = vadd.f32 %v857_v2, %v814_v44 }
  0xea   : > { %v987_v56 = vmul.f32 %v2402_v9, %v2816_v28  ;;  %v3099_v12 = vmul.f32 %v2401_v55, %v2813_v23  ;;  %v3102_v42 = vmul.f32 %v2401_v55, %v2816_v28  ;;  %v961_v3 = vrot.slane %v952_v61, 3 }
  0xeb   : > { %v802_v46 = vsel %vm214_vm3, %v800_v48, %v801_v58  ;;  %v804_v27 = vsel %vm214_vm3, %v801_v58, %v803_v24  ;;  %v996_v1 = vrot.slane %v988_v63, 4  ;;  %v886_v60 = vsel %vm100_vm2, %v884_v43, %v885_v54  ;;  %v2405_v63 = vpop.permute.xlu0 %2404  ;;  %v2420_v43 = vpop.permute.xlu1 %2419 }
  0xec   : > { %v811_v59 = vadd.f32 %v802_v46, %v774_v11  ;;  %v812_v15 = vadd.f32 %v804_v27, %v775_v32  ;;  %v995_v36 = vrot.slane %v987_v56, 4  ;;  %v963_v50 = vrot.slane %v3099_v12, 3 }
  0xed   : > { %v998_v14 = vrot.slane %v989_v47, 4  ;;  %v1000_v28 = vrot.slane %v3102_v42, 4  ;;  %v878_v35 = vmul.f32 %v2391_v17, %v2807_v20  ;;  %v856_v24 = vmul.f32 %v2391_v17, %v2804_v19 }
  0xee   : > { %v858_v48 = vadd.f32 %v854_v4, %v811_v59  ;;  %v859_v31 = vadd.f32 %v855_v16, %v812_v15  ;;  %v964_v5 = vsel %vm176_vm1, %v961_v3, %v963_v50  ;;  %v997_v10 = vsel %vm214_vm3, %v995_v36, %v996_v1 }
  0xef   : > { %v999_v62 = vsel %vm214_vm3, %v996_v1, %v998_v14  ;;  %v887_v13 = vrot.slane %v878_v35, 1  ;;  %v915_v37 = vmul.f32 %v2391_v17, %v2819_v29  ;;  %v2397_v7 = vunpack.i.h.bf16 %v2395_v22 }
  0xf0   : > { %v895_v6 = vadd.f32 %v886_v60, %v858_v48  ;;  %v2396_v2 = vunpack.i.l.bf16 %v2395_v22  ;;  %v813_v53 = vadd.f32 %v3072_v45, %v776_v51  ;;  %v914_v41 = vmul.f32 %v3077_v18, %v2819_v29 }
  0xf1   : > { %v924_v25 = vrot.slane %v915_v37, 2  ;;  %v888_v16 = vsel %vm100_vm2, %v885_v54, %v887_v13  ;;  %v951_v19 = vmul.f32 %v3077_v18, %v2813_v23  ;;  %v913_v49 = vmul.f32 %v2397_v7, %v2819_v29 }
  0xf2   : > { %v950_v57 = vmul.f32 %v2397_v7, %v2813_v23  ;;  %v860_v17 = vadd.f32 %v856_v24, %v813_v53  ;;  %v879_v32 = vmul.f32 %v2396_v2, %v2807_v20  ;;  %v896_v44 = vadd.f32 %v888_v16, %v859_v31 }
  0xf3   : > { %v916_v45 = vmul.f32 %v2396_v2, %v2819_v29  ;;  %v922_v51 = vrot.slane %v914_v41, 2  ;;  %v959_v11 = vrot.slane %v951_v19, 3  ;;  %v1001_v54 = vsel %vm214_vm3, %v998_v14, %v1000_v28 }
  0xf4   : > { %v921_v26 = vrot.slane %v913_v49, 2  ;;  %v958_v30 = vrot.slane %v950_v57, 3  ;;  %v889_v9 = vrot.slane %v879_v32, 1  ;;  %v2412_v61 = vunpack.i.h.bf16 %v2410_v8 }
  0xf5   : > { %v925_v18 = vsel %vm138_vm0, %v922_v51, %v924_v25  ;;  %v926_v55 = vrot.slane %v916_v45, 2  ;;  %v962_v23 = vsel %vm176_vm1, %v959_v11, %v961_v3  ;;  %v2411_v46 = vunpack.i.l.bf16 %v2410_v8 }
  0xf6   : > { %v890_v20 = vsel %vm100_vm2, %v887_v13, %v889_v9  ;;  %v898_v58 = vadd.f32 %v889_v9, %v861_v21  ;;  %v923_v29 = vsel %vm138_vm0, %v921_v26, %v922_v51  ;;  %v933_v4 = vadd.f32 %v925_v18, %v896_v44  ;;  %v2415_v26 = vpop.permute.xlu0 %2414 }
  0xf7   : > { %v897_v47 = vadd.f32 %v890_v20, %v860_v17  ;;  %v927_v56 = vsel %vm138_vm0, %v924_v25, %v926_v55  ;;  %v932_v12 = vadd.f32 %v923_v29, %v895_v6  ;;  %v960_v1 = vsel %vm176_vm1, %v958_v30, %v959_v11 }
  0xf8   : > { %v935_v27 = vadd.f32 %v926_v55, %v898_v58  ;;  %v970_v59 = vadd.f32 %v962_v23, %v933_v4  ;;  %v3138_v3 = vunpack.i.h.bf16 %v2405_v63  ;;  %v2406_v21 = vunpack.i.l.bf16 %v2405_v63  ;;  %v2430_v58 = vpop.permute.xlu1 %2429 }
  0xf9   : > { %v934_v15 = vadd.f32 %v927_v56, %v897_v47  ;;  %v969_v36 = vadd.f32 %v960_v1, %v932_v12  ;;  %v2422_v60 = vunpack.i.h.bf16 %v2420_v43  ;;  %v3141_v22 = vmul.f32 %v2412_v61, %v2822_v33 }
  0xfa   : > { %v972_v14 = vadd.f32 %v963_v50, %v935_v27  ;;  %v1007_v35 = vadd.f32 %v999_v62, %v970_v59  ;;  %v1107_v48 = vmul.f32 %v3138_v3, %v2825_v34  ;;  %v1086_v13 = vmul.f32 %v3138_v3, %v2822_v33 }
  0xfb   : > { %v971_v31 = vadd.f32 %v964_v5, %v934_v15  ;;  %v1006_v24 = vadd.f32 %v997_v10, %v969_v36  ;;  %v1106_v37 = vmul.f32 %v2406_v21, %v2825_v34  ;;  %v3152_v7 = vmul.f32 %v2422_v60, %v2831_v39 }
  0xfc   : > { %v1009_v6 = vadd.f32 %v1000_v28, %v972_v14  ;;  %v1017_v50 = vadd.f32 %v2564_v0, %v1007_v35  ;;  %v1115_v62 = vrot.slane %v1107_v48, 1  ;;  %v2421_v10 = vunpack.i.l.bf16 %v2420_v43 }
  0xfd   : > { %v1008_v2 = vadd.f32 %v1001_v54, %v971_v31  ;;  %v1016_v53 = vadd.f32 %v2564_v0, %v1006_v24  ;;  %v1114_v5 = vrot.slane %v1106_v37, 1  ;;  %v1085_v16 = vmul.f32 %v2406_v21, %v2822_v33 }
  0xfe   : > { %v1019_v8 = vadd.f32 %v2564_v0, %v1009_v6  ;;  %v1021_v25 = vmax.f32 %v1017_v50, 0.0  ;;  %v1180_v42 = vmul.f32 %v2411_v46, %v2828_v38  ;;  %v3161_v49 = vmul.f32 %v2421_v10, %v2828_v38 }
  0xff   : > { %v1018_v28 = vadd.f32 %v2564_v0, %v1008_v2  ;;  %v1020_v41 = vmax.f32 %v1016_v53, 0.0  ;;  %v1116_v19 = vsel %vm100_vm2, %v1114_v5, %v1115_v62  ;;  %v1222_v32 = vrot.slane %v3152_v7, 4  ;;  %v2425_v2 = vpop.permute.xlu0 %2424 }
 0x100   : > { %v1023_v57 = vmax.f32 %v1019_v8, 0.0  ;;  %v2228_v17 = vpack.c.bf16 %v1021_v25, %v1021_v25  ;;  %v1189_v44 = vrot.slane %v1180_v42, 3  ;;  %v1191_v11 = vrot.slane %v3161_v49, 3  ;;  %v2440_v25 = vpop.permute.xlu1 %2439 }
 0x101   : > { %v1022_v45 = vmax.f32 %v1018_v28, 0.0  ;;  %v2227_v51 = vpack.c.bf16 %v1020_v41, %v1020_v41  ;;  %v3173_v54 = vmul.f32 %v2411_v46, %v2831_v39  ;;  %v1125_v9 = vadd.f32 %v1116_v19, %v1085_v16 }
 0x102   : > { %v2230_v30 = vpack.c.bf16 %v1023_v57, %v1023_v57  ;;  %1044 = vst.msk [vmem:[%s3168_s22 + $0x4] sm:$0xf] %vm1042_vm4, %v2228_v17  ;;  %v1217_v18 = vmul.f32 %v2421_v10, %v2831_v39  ;;  %v1108_v55 = vmul.f32 %v2411_v46, %v2825_v34  ;;  %v1192_v61 = vsel %vm176_vm1, %v1189_v44, %v1191_v11 }
 0x103   : > { %v2229_v23 = vpack.c.bf16 %v1022_v45, %v1022_v45  ;;  %1043 = vst.msk [vmem:[%s3168_s22] sm:$0xf] %vm1042_vm4, %v2227_v51  ;;  %v1087_v63 = vmul.f32 %v2411_v46, %v2822_v33  ;;  %v1144_v20 = vmul.f32 %v2411_v46, %v2834_v40  ;;  %v1225_v29 = vrot.slane %v3173_v54, 4 }
 0x104   : > { %1047 = vst.msk [vmem:[%s3168_s22 + $0xc] sm:$0x3] %vm1046_vm5, %v2230_v30  ;;  %v1117_v4 = vrot.slane %v1108_v55, 1  ;;  %v2417_v43 = vunpack.i.h.bf16 %v2415_v26  ;;  %v2416_v47 = vunpack.i.l.bf16 %v2415_v26  ;;  %v1227_v56 = vrot.slane %v1217_v18, 4 }
 0x105   : > { %1045 = vst.msk [vmem:[%s3168_s22 + $0x8] sm:$0xf] %vm1042_vm4, %v2229_v23  ;;  %v1153_v12 = vrot.slane %v1144_v20, 2  ;;  %v1143_v27 = vmul.f32 %v3138_v3, %v2834_v40  ;;  %v1179_v33 = vmul.f32 %v3138_v3, %v2828_v38  ;;  %v2432_v15 = vunpack.i.h.bf16 %v2430_v58 }
 0x106   : > { %v1142_v46 = vmul.f32 %v2417_v43, %v2834_v40  ;;  %v1178_v1 = vmul.f32 %v2417_v43, %v2828_v38  ;;  %v1109_v59 = vmul.f32 %v2416_v47, %v2825_v34  ;;  %v1118_v36 = vsel %vm100_vm2, %v1115_v62, %v1117_v4 }
 0x107   : > { %v1145_v21 = vmul.f32 %v2416_v47, %v2834_v40  ;;  %v1151_v60 = vrot.slane %v1143_v27, 2  ;;  %v1187_v14 = vrot.slane %v1179_v33, 3  ;;  %v1126_v24 = vadd.f32 %v1118_v36, %v1086_v13 }
 0x108   : > { %v1150_v35 = vrot.slane %v1142_v46, 2  ;;  %v1186_v48 = vrot.slane %v1178_v1, 3  ;;  %v1119_v31 = vrot.slane %v1109_v59, 1  ;;  %v1228_v37 = vsel %vm214_vm3, %v1225_v29, %v1227_v56 }
 0x109   : > { %v1154_v6 = vsel %vm138_vm0, %v1151_v60, %v1153_v12  ;;  %v1155_v50 = vrot.slane %v1145_v21, 2  ;;  %v1190_v38 = vsel %vm176_vm1, %v1187_v14, %v1189_v44  ;;  %v1277_v13 = vmul.f32 %v2432_v15, %v2837_v52  ;;  %v3585_v44 = vld [vmem:[#allocation6_spill] sm:$0xff] }
 0x10a   : > { %v1120_v34 = vsel %vm100_vm2, %v1117_v4, %v1119_v31  ;;  %v1128_v62 = vadd.f32 %v1119_v31, %v3141_v22  ;;  %v1152_v40 = vsel %vm138_vm0, %v1150_v35, %v1151_v60  ;;  %v1162_v53 = vadd.f32 %v1154_v6, %v1126_v24 }
 0x10b   : > { %v1127_v5 = vadd.f32 %v1120_v34, %v1087_v63  ;;  %v1156_v10 = vsel %vm138_vm0, %v1153_v12, %v1155_v50  ;;  %v1161_v8 = vadd.f32 %v1152_v40, %v1125_v9  ;;  %v1188_v42 = vsel %vm176_vm1, %v1186_v48, %v1187_v14  ;;  %v3586_v63 = vld [vmem:[#allocation8_spill] sm:$0xff]  ;;  %v3588_v14 = vld [vmem:[#allocation9_spill] sm:$0xff] }
 0x10c   : > { %v1164_v16 = vadd.f32 %v1155_v50, %v1128_v62  ;;  %v1198_v28 = vadd.f32 %v1190_v38, %v1162_v53  ;;  %v3207_v41 = vunpack.i.h.bf16 %v2425_v2  ;;  %v2431_v49 = vunpack.i.l.bf16 %v2430_v58 }
 0x10d   : > { %v1163_v19 = vadd.f32 %v1156_v10, %v1127_v5  ;;  %v2426_v57 = vunpack.i.l.bf16 %v2425_v2  ;;  %v1215_v22 = vmul.f32 %v3138_v3, %v2831_v39  ;;  %v1197_v51 = vadd.f32 %v1188_v42, %v1161_v8  ;;  %v2177_v5 = vld [vmem:[%s3562_s1 + $0xa] sm:$0x1] }
 0x10e   : > { %v1200_v17 = vadd.f32 %v1191_v11, %v1164_v16  ;;  %v1296_v45 = vmul.f32 %v3207_v41, %v3585_v44  ;;  %v2442_v54 = vunpack.i.h.bf16 %v2440_v25  ;;  %v1275_v30 = vmul.f32 %v3207_v41, %v2837_v52  ;;  %v2181_v16 = vld [vmem:[%s3562_s1 + $0xc] sm:$0x1] }
 0x10f   : > { %v1199_v26 = vadd.f32 %v1192_v61, %v1163_v19  ;;  %v1223_v9 = vrot.slane %v1215_v22, 4  ;;  %v1295_v18 = vmul.f32 %v2426_v57, %v3585_v44  ;;  %v2441_v58 = vunpack.i.l.bf16 %v2440_v25  ;;  %v3587_v61 = vld [vmem:[#allocation7_spill] sm:$0xff] }
 0x110   : > { %v1236_v55 = vadd.f32 %v1227_v56, %v1200_v17  ;;  %v1304_v23 = vrot.slane %v1296_v45, 1  ;;  %v3217_v20 = vmul.f32 %v2442_v54, %v3586_v63  ;;  %v3224_v4 = vmul.f32 %v2431_v49, %v3587_v61 }
 0x111   : > { %v1224_v39 = vsel %vm214_vm3, %v1222_v32, %v1223_v9  ;;  %v1226_v3 = vsel %vm214_vm3, %v1223_v9, %v1225_v29  ;;  %v1303_v11 = vrot.slane %v1295_v18, 1  ;;  %v1274_v56 = vmul.f32 %v2426_v57, %v2837_v52  ;;  %v2435_v32 = vpop.permute.xlu0 %2434 }
 0x112   : > { %v1281_v43 = vadd.f32 %v1277_v13, %v1236_v55  ;;  %v1233_v47 = vadd.f32 %v1224_v39, %v1197_v51  ;;  %v1234_v12 = vadd.f32 %v1226_v3, %v1198_v28  ;;  %v1411_v33 = vrot.slane %v3217_v20, 4 }
 0x113   : > { %v1305_v27 = vsel %vm100_vm2, %v1303_v11, %v1304_v23  ;;  %v1370_v46 = vmul.f32 %v2441_v58, %v3587_v61  ;;  %v3231_v7 = vmul.f32 %v2431_v49, %v3586_v63  ;;  %v1378_v59 = vrot.slane %v3224_v4, 3 }
 0x114   : > { %v1278_v29 = vadd.f32 %v1274_v56, %v1233_v47  ;;  %v1279_v1 = vadd.f32 %v1275_v30, %v1234_v12  ;;  %v3235_v15 = vmul.f32 %v2441_v58, %v3586_v63  ;;  %v1276_v21 = vmul.f32 %v2431_v49, %v2837_v52 }
 0x115   : > { %v1380_v36 = vrot.slane %v1370_v46, 3  ;;  %v1297_v60 = vmul.f32 %v2431_v49, %v3585_v44  ;;  %v1333_v35 = vmul.f32 %v2431_v49, %v3588_v14  ;;  %v1414_v31 = vrot.slane %v3231_v7, 4 }
 0x116   : > { %v1314_v48 = vadd.f32 %v1305_v27, %v1278_v29  ;;  %v2437_v24 = vunpack.i.h.bf16 %v2435_v32  ;;  %v2436_v6 = vunpack.i.l.bf16 %v2435_v32  ;;  %v1416_v38 = vrot.slane %v3235_v15, 4 }
 0x117   : > { %v1381_v50 = vsel %vm176_vm1, %v1378_v59, %v1380_v36  ;;  %v1306_v2 = vrot.slane %v1297_v60, 1  ;;  %v1235_v34 = vadd.f32 %v1228_v37, %v1199_v26  ;;  %v1342_v62 = vrot.slane %v1333_v35, 2  ;;  %v2179_v37 = vld [vmem:[%s3562_s1 + $0xb] sm:$0x1] }
 0x118   : > { %v1331_v40 = vmul.f32 %v2437_v24, %v3588_v14  ;;  %v1367_v52 = vmul.f32 %v2437_v24, %v3587_v61  ;;  %v1298_v53 = vmul.f32 %v2436_v6, %v3585_v44  ;;  %v1332_v13 = vmul.f32 %v3207_v41, %v3588_v14 }
 0x119   : > { %v1280_v10 = vadd.f32 %v1276_v21, %v1235_v34  ;;  %v1307_v8 = vsel %vm100_vm2, %v1304_v23, %v1306_v2  ;;  %v1334_v25 = vmul.f32 %v2436_v6, %v3588_v14  ;;  %v1368_v17 = vmul.f32 %v3207_v41, %v3587_v61  ;;  %v2450_v23 = vpop.permute.xlu1 %2449  ;;  %v2445_v61 = vpop.permute.xlu0 %2444 }
 0x11a   : > { %v1339_v42 = vrot.slane %v1331_v40, 2  ;;  %v1375_v28 = vrot.slane %v1367_v52, 3  ;;  %v1308_v19 = vrot.slane %v1298_v53, 1  ;;  %v1315_v49 = vadd.f32 %v1307_v8, %v1279_v1 }
 0x11b   : > { %v1340_v57 = vrot.slane %v1332_v13, 2  ;;  %v1344_v22 = vrot.slane %v1334_v25, 2  ;;  %v1438_v44 = vunpack.c.l.bf16 %v2177_v5  ;;  %v1474_v54 = vunpack.c.l.bf16 %v2179_v37  ;;  %v2185_v5 = vld [vmem:[%s3562_s1 + $0xe] sm:$0x1] }
 0x11c   : > { %v1309_v45 = vsel %vm100_vm2, %v1306_v2, %v1308_v19  ;;  %v1317_v51 = vadd.f32 %v1308_v19, %v1281_v43  ;;  %v1510_v26 = vunpack.c.l.bf16 %v2181_v16  ;;  %v1417_v30 = vsel %vm214_vm3, %v1414_v31, %v1416_v38  ;;  %v3589_v43 = vld [vmem:[#allocation5_spill] sm:$0xff] }
 0x11d   : > { %v1316_v9 = vadd.f32 %v1309_v45, %v1280_v10  ;;  %v1341_v18 = vsel %vm138_vm0, %v1339_v42, %v1340_v57  ;;  %v1343_v55 = vsel %vm138_vm0, %v1340_v57, %v1342_v62  ;;  %v1345_v58 = vsel %vm138_vm0, %v1342_v62, %v1344_v22  ;;  %v2460_v19 = vpop.permute.xlu1 %2459 }
 0x11e   : > { %v1351_v39 = vadd.f32 %v1343_v55, %v1315_v49  ;;  %v1353_v3 = vadd.f32 %v1344_v22, %v1317_v51  ;;  %v1376_v11 = vrot.slane %v1368_v17, 3  ;;  %v3271_v47 = vrot.slane %v1438_v44, %v3589_v43 }
 0x11f   : > { %v1352_v4 = vadd.f32 %v1345_v58, %v1316_v9  ;;  %v1483_v12 = vrot.slane %v1474_v54, %v3589_v43  ;;  %v3275_v56 = vrot.slane %v1510_v26, %v3589_v43  ;;  %v1350_v27 = vadd.f32 %v1341_v18, %v1314_v48  ;;  %v2455_v9 = vpop.permute.xlu0 %2454 }
 0x120   : > { %v1377_v46 = vsel %vm176_vm1, %v1375_v28, %v1376_v11  ;;  %v1379_v32 = vsel %vm176_vm1, %v1376_v11, %v1378_v59  ;;  %v2452_v29 = vunpack.i.h.bf16 %v2450_v23  ;;  %v3279_v21 = vadd.f32 %v1380_v36, %v1353_v3  ;;  %v2183_v36 = vld [vmem:[%s3562_s1 + $0xd] sm:$0x1] }
 0x121   : > { %v1388_v1 = vadd.f32 %v1381_v50, %v1352_v4  ;;  %v2451_v60 = vunpack.i.l.bf16 %v2450_v23  ;;  %v3281_v14 = vunpack.i.h.bf16 %v2445_v61  ;;  %v1387_v35 = vadd.f32 %v1379_v32, %v1351_v39 }
 0x122   : > { %v3283_v24 = vmul.f32 %v2452_v29, %v1483_v12  ;;  %v3286_v6 = vmul.f32 %v2452_v29, %v3275_v56  ;;  %v2446_v2 = vunpack.i.l.bf16 %v2445_v61  ;;  %v1386_v53 = vadd.f32 %v1377_v46, %v1350_v27 }
 0x123   : > { %v1424_v34 = vadd.f32 %v1417_v30, %v1388_v1  ;;  %v1465_v48 = vmul.f32 %v2451_v60, %v3271_v47  ;;  %v1486_v62 = vmul.f32 %v2451_v60, %v1483_v12  ;;  %v3290_v59 = vmul.f32 %v2451_v60, %v3275_v56 }
 0x124   : > { %v1497_v50 = vrot.slane %v3283_v24, 1  ;;  %v1533_v40 = vrot.slane %v3286_v6, 2  ;;  %v1485_v52 = vmul.f32 %v3281_v14, %v1483_v12  ;;  %v1404_v25 = vmul.f32 %v3207_v41, %v3586_v63 }
 0x125   : > { %v1469_v10 = vadd.f32 %v1465_v48, %v1424_v34  ;;  %v1495_v8 = vrot.slane %v1486_v62, 1  ;;  %v1531_v13 = vrot.slane %v3290_v59, 2  ;;  %v1464_v37 = vmul.f32 %v3281_v14, %v3271_v47 }
 0x126   : > { %v1493_v16 = vrot.slane %v1485_v52, 1  ;;  %v1484_v42 = vmul.f32 %v2446_v2, %v1483_v12  ;;  %v1546_v28 = vunpack.c.l.bf16 %v2183_v36  ;;  %v1412_v57 = vrot.slane %v1404_v25, 4  ;;  %v2470_v25 = vpop.permute.xlu1 %2469 }
 0x127   : > { %v1498_v49 = vsel %vm100_vm2, %v1495_v8, %v1497_v50  ;;  %v1463_v22 = vmul.f32 %v2446_v2, %v3271_v47  ;;  %v1582_v17 = vunpack.c.l.bf16 %v2185_v5  ;;  %v1534_v41 = vsel %vm138_vm0, %v1531_v13, %v1533_v40  ;;  %v2192_v2 = vld [vmem:[%s3562_s1 + $0xf] sm:$0x1] }
 0x128   : > { %v1505_v44 = vadd.f32 %v1498_v49, %v1469_v10  ;;  %v1492_v63 = vrot.slane %v1484_v42, 1  ;;  %v1555_v45 = vrot.slane %v1546_v28, %v3589_v43  ;;  %v1413_v51 = vsel %vm214_vm3, %v1411_v33, %v1412_v57  ;;  %v2194_v10 = vld [vmem:[%s3562_s1 + $0x10] sm:$0x1] }
 0x129   : > { %v1415_v54 = vsel %vm214_vm3, %v1412_v57, %v1414_v31  ;;  %v3323_v26 = vrot.slane %v1582_v17, %v3589_v43  ;;  %v2462_v30 = vunpack.i.h.bf16 %v2460_v19  ;;  %v1496_v55 = vsel %vm100_vm2, %v1493_v16, %v1495_v8  ;;  %v2196_v8 = vld [vmem:[%s3562_s1 + $0x11] sm:$0x1] }
 0x12a   : > { %v1541_v18 = vadd.f32 %v1534_v41, %v1505_v44  ;;  %v1422_v23 = vadd.f32 %v1413_v51, %v1386_v53  ;;  %v1423_v58 = vadd.f32 %v1415_v54, %v1387_v35  ;;  %v1494_v39 = vsel %vm100_vm2, %v1492_v63, %v1493_v16  ;;  %v2465_v63 = vpop.permute.xlu0 %2464 }
 0x12b   : > { %v3328_v20 = vmul.f32 %v2462_v30, %v3323_v26  ;;  %v2461_v33 = vunpack.i.l.bf16 %v2460_v19  ;;  %v1558_v3 = vmul.f32 %v2451_v60, %v1555_v45  ;;  %v2457_v31 = vunpack.i.h.bf16 %v2455_v9 }
 0x12c   : > { %v1467_v7 = vadd.f32 %v1463_v22, %v1422_v23  ;;  %v1468_v11 = vadd.f32 %v1464_v37, %v1423_v58  ;;  %v2456_v61 = vunpack.i.l.bf16 %v2455_v9  ;;  %v3334_v27 = vmul.f32 %v2451_v60, %v3323_v26 }
 0x12d   : > { %v1600_v4 = vrot.slane %v3328_v20, 4  ;;  %v3331_v12 = vmul.f32 %v2461_v33, %v1555_v45  ;;  %v3337_v46 = vmul.f32 %v2461_v33, %v3323_v26  ;;  %v1567_v1 = vrot.slane %v1558_v3, 3 }
 0x12e   : > { %v1503_v32 = vadd.f32 %v1494_v39, %v1467_v7  ;;  %v1504_v29 = vadd.f32 %v1496_v55, %v1468_v11  ;;  %v1520_v35 = vmul.f32 %v2457_v31, %v3275_v56  ;;  %v1556_v62 = vmul.f32 %v2457_v31, %v1555_v45 }
 0x12f   : > { %v1569_v34 = vrot.slane %v3331_v12, 3  ;;  %v1605_v48 = vrot.slane %v3337_v46, 4  ;;  %v1425_v60 = vadd.f32 %v1416_v38, %v3279_v21  ;;  %v1466_v52 = vmul.f32 %v2456_v61, %v3271_v47  ;;  %v2200_v61 = vld [vmem:[%s3562_s1 + $0x13] sm:$0x1] }
 0x130   : > { %v1528_v36 = vrot.slane %v1520_v35, 2  ;;  %v1521_v53 = vmul.f32 %v3281_v14, %v3275_v56  ;;  %v1557_v5 = vmul.f32 %v3281_v14, %v1555_v45  ;;  %v1603_v38 = vrot.slane %v3334_v27, 4 }
 0x131   : > { %v1570_v15 = vsel %vm176_vm1, %v1567_v1, %v1569_v34  ;;  %v1564_v47 = vrot.slane %v1556_v62, 3  ;;  %v1627_v21 = vunpack.c.l.bf16 %v2192_v2  ;;  %v1470_v37 = vadd.f32 %v1466_v52, %v1425_v60 }
 0x132   : > { %v1577_v56 = vadd.f32 %v1570_v15, %v1541_v18  ;;  %v1529_v16 = vrot.slane %v1521_v53, 2  ;;  %v1565_v42 = vrot.slane %v1557_v5, 3  ;;  %v1606_v28 = vsel %vm214_vm3, %v1603_v38, %v1605_v48  ;;  %v2480_v53 = vpop.permute.xlu1 %2479 }
 0x133   : > { %v3366_v19 = vrot.slane %v1627_v21, %v3589_v43  ;;  %v1663_v49 = vunpack.c.l.bf16 %v2194_v10  ;;  %v1699_v57 = vunpack.c.l.bf16 %v2196_v8  ;;  %v1506_v22 = vadd.f32 %v1497_v50, %v1470_v37  ;;  %v2475_v37 = vpop.permute.xlu0 %2474 }
 0x134   : > { %v1530_v17 = vsel %vm138_vm0, %v1528_v36, %v1529_v16  ;;  %v1532_v44 = vsel %vm138_vm0, %v1529_v16, %v1531_v13  ;;  %v2472_v41 = vunpack.i.h.bf16 %v2470_v25  ;;  %v1613_v45 = vadd.f32 %v1606_v28, %v1577_v56 }
 0x135   : > { %v1539_v51 = vadd.f32 %v1530_v17, %v1503_v32  ;;  %v1540_v54 = vadd.f32 %v1532_v44, %v1504_v29  ;;  %v1566_v30 = vsel %vm176_vm1, %v1564_v47, %v1565_v42  ;;  %v1568_v9 = vsel %vm176_vm1, %v1565_v42, %v1567_v1 }
 0x136   : > { %v1672_v18 = vrot.slane %v1663_v49, %v3589_v43  ;;  %v3378_v24 = vrot.slane %v1699_v57, %v3589_v43  ;;  %v2471_v50 = vunpack.i.l.bf16 %v2470_v25  ;;  %v1542_v59 = vadd.f32 %v1533_v40, %v1506_v22  ;;  %v2198_v40 = vld [vmem:[%s3562_s1 + $0x12] sm:$0x1] }
 0x137   : > { %v1576_v55 = vadd.f32 %v1568_v9, %v1540_v54  ;;  %v3382_v13 = vunpack.i.h.bf16 %v2465_v63  ;;  %v2466_v23 = vunpack.i.l.bf16 %v2465_v63  ;;  %v1575_v31 = vadd.f32 %v1566_v30, %v1539_v51 }
 0x138   : > { %v3384_v58 = vmul.f32 %v2472_v41, %v1672_v18  ;;  %v3387_v39 = vmul.f32 %v2472_v41, %v3378_v24  ;;  %v1654_v33 = vmul.f32 %v2471_v50, %v3366_v19  ;;  %v1675_v3 = vmul.f32 %v2471_v50, %v1672_v18 }
 0x139   : > { %v3391_v7 = vmul.f32 %v2471_v50, %v3378_v24  ;;  %v1674_v11 = vmul.f32 %v3382_v13, %v1672_v18  ;;  %v1593_v6 = vmul.f32 %v3281_v14, %v3323_v26  ;;  %v1653_v2 = vmul.f32 %v3382_v13, %v3366_v19 }
 0x13a   : > { %v1686_v27 = vrot.slane %v3384_v58, 1  ;;  %v1722_v32 = vrot.slane %v3387_v39, 2  ;;  %v1658_v29 = vadd.f32 %v1654_v33, %v1613_v45  ;;  %v1684_v1 = vrot.slane %v1675_v3, 1 }
 0x13b   : > { %v1720_v35 = vrot.slane %v3391_v7, 2  ;;  %v1682_v14 = vrot.slane %v1674_v11, 1  ;;  %v1601_v26 = vrot.slane %v1593_v6, 4  ;;  %v1673_v60 = vmul.f32 %v2466_v23, %v1672_v18  ;;  %v2207_v11 = vld [vmem:[%s3562_s1 + $0x14] sm:$0x1] }
 0x13c   : > { %v1687_v62 = vsel %vm100_vm2, %v1684_v1, %v1686_v27  ;;  %v1735_v36 = vunpack.c.l.bf16 %v2198_v40  ;;  %v1771_v52 = vunpack.c.l.bf16 %v2200_v61  ;;  %v1652_v15 = vmul.f32 %v2466_v23, %v3366_v19 }
 0x13d   : > { %v1694_v5 = vadd.f32 %v1687_v62, %v1658_v29  ;;  %v1723_v10 = vsel %vm138_vm0, %v1720_v35, %v1722_v32  ;;  %v1602_v8 = vsel %vm214_vm3, %v1600_v4, %v1601_v26  ;;  %v1604_v47 = vsel %vm214_vm3, %v1601_v26, %v1603_v38  ;;  %v2209_v29 = vld [vmem:[%s3562_s1 + $0x15] sm:$0x1] }
 0x13e   : > { %v1611_v21 = vadd.f32 %v1602_v8, %v1575_v31  ;;  %v1681_v25 = vrot.slane %v1673_v60, 1  ;;  %v1744_v56 = vrot.slane %v1735_v36, %v3589_v43  ;;  %v1685_v16 = vsel %vm100_vm2, %v1682_v14, %v1684_v1  ;;  %v2211_v1 = vld [vmem:[%s3562_s1 + $0x16] sm:$0x1] }
 0x13f   : > { %v1612_v42 = vadd.f32 %v1604_v47, %v1576_v55  ;;  %v3423_v28 = vrot.slane %v1771_v52, %v3589_v43  ;;  %v2482_v49 = vunpack.i.h.bf16 %v2480_v53  ;;  %v1730_v57 = vadd.f32 %v1723_v10, %v1694_v5 }
 0x140   : > { %v1656_v20 = vadd.f32 %v1652_v15, %v1611_v21  ;;  %v2481_v22 = vunpack.i.l.bf16 %v2480_v53  ;;  %v1747_v4 = vmul.f32 %v2471_v50, %v1744_v56  ;;  %v1683_v44 = vsel %vm100_vm2, %v1681_v25, %v1682_v14 }
 0x141   : > { %v1657_v17 = vadd.f32 %v1653_v2, %v1612_v42  ;;  %v3427_v38 = vmul.f32 %v2471_v50, %v3423_v28  ;;  %v2477_v41 = vunpack.i.h.bf16 %v2475_v37  ;;  %v3430_v45 = vmul.f32 %v2482_v49, %v3423_v28 }
 0x142   : > { %v1692_v63 = vadd.f32 %v1683_v44, %v1656_v20  ;;  %v3432_v51 = vmul.f32 %v2481_v22, %v1744_v56  ;;  %v3435_v54 = vmul.f32 %v2481_v22, %v3423_v28  ;;  %v1756_v9 = vrot.slane %v1747_v4, 3 }
 0x143   : > { %v1693_v30 = vadd.f32 %v1685_v16, %v1657_v17  ;;  %v1792_v18 = vrot.slane %v3427_v38, 4  ;;  %v1709_v55 = vmul.f32 %v2477_v41, %v3378_v24  ;;  %v1745_v33 = vmul.f32 %v2477_v41, %v1744_v56 }
 0x144   : > { %v1758_v23 = vrot.slane %v3432_v51, 3  ;;  %v1794_v50 = vrot.slane %v3435_v54, 4  ;;  %v2476_v3 = vunpack.i.l.bf16 %v2475_v37  ;;  %v1578_v6 = vadd.f32 %v1569_v34, %v1542_v59  ;;  %v2490_v59 = vpop.permute.xlu1 %2489 }
 0x145   : > { %v1717_v31 = vrot.slane %v1709_v55, 2  ;;  %v1710_v40 = vmul.f32 %v3382_v13, %v3378_v24  ;;  %v1746_v61 = vmul.f32 %v3382_v13, %v1744_v56  ;;  %v1789_v2 = vrot.slane %v3430_v45, 4 }
 0x146   : > { %v1759_v12 = vsel %vm176_vm1, %v1756_v9, %v1758_v23  ;;  %v1795_v34 = vsel %vm214_vm3, %v1792_v18, %v1794_v50  ;;  %v1655_v24 = vmul.f32 %v2476_v3, %v3366_v19  ;;  %v1614_v26 = vadd.f32 %v1605_v48, %v1578_v6  ;;  %v2485_v19 = vpop.permute.xlu0 %2484 }
 0x147   : > { %v1766_v14 = vadd.f32 %v1759_v12, %v1730_v57  ;;  %v1718_v62 = vrot.slane %v1710_v40, 2  ;;  %v1754_v60 = vrot.slane %v1746_v61, 3  ;;  %v1753_v36 = vrot.slane %v1745_v33, 3 }
 0x148   : > { %v1816_v52 = vunpack.c.l.bf16 %v2207_v11  ;;  %v1852_v53 = vunpack.c.l.bf16 %v2209_v29  ;;  %v1888_v5 = vunpack.c.l.bf16 %v2211_v1  ;;  %v1659_v10 = vadd.f32 %v1655_v24, %v1614_v26 }
 0x149   : > { %v1719_v8 = vsel %vm138_vm0, %v1717_v31, %v1718_v62  ;;  %v1721_v15 = vsel %vm138_vm0, %v1718_v62, %v1720_v35  ;;  %v2492_v47 = vunpack.i.h.bf16 %v2490_v59  ;;  %v1802_v21 = vadd.f32 %v1795_v34, %v1766_v14 }
 0x14a   : > { %v1728_v25 = vadd.f32 %v1719_v8, %v1692_v63  ;;  %v1729_v56 = vadd.f32 %v1721_v15, %v1693_v30  ;;  %v1757_v46 = vsel %vm176_vm1, %v1754_v60, %v1756_v9  ;;  %v1695_v48 = vadd.f32 %v1686_v27, %v1659_v10  ;;  %v2213_v63 = vld [vmem:[%s3562_s1 + $0x17] sm:$0x1]  ;;  %v2215_v9 = vld [vmem:[%s3562_s1 + $0x18] sm:$0x1]  ;;  %v2495_v55 = vpop.permute.xlu0 %2494 }
 0x14b   : > { %v3475_v37 = vrot.slane %v1816_v52, %v3589_v43  ;;  %v1861_v16 = vrot.slane %v1852_v53, %v3589_v43  ;;  %v3479_v42 = vrot.slane %v1888_v5, %v3589_v43  ;;  %v1755_v7 = vsel %vm176_vm1, %v1753_v36, %v1754_v60  ;;  %v1928_v52 = vpop.permute.xlu1 %1927 }
 0x14c   : > { %v1765_v35 = vadd.f32 %v1757_v46, %v1729_v56  ;;  %v2491_v49 = vunpack.i.l.bf16 %v2490_v59  ;;  %v3482_v57 = vunpack.i.h.bf16 %v2485_v19  ;;  %v1731_v20 = vadd.f32 %v1722_v32, %v1695_v48 }
 0x14d   : > { %v3486_v22 = vmul.f32 %v2492_v47, %v1861_v16  ;;  %v3489_v58 = vmul.f32 %v2492_v47, %v3479_v42  ;;  %v2486_v27 = vunpack.i.l.bf16 %v2485_v19  ;;  %v1764_v41 = vadd.f32 %v1755_v7, %v1728_v25 }
 0x14e   : > { %v1843_v4 = vmul.f32 %v2491_v49, %v3475_v37  ;;  %v1864_v17 = vmul.f32 %v2491_v49, %v1861_v16  ;;  %v3493_v44 = vmul.f32 %v2491_v49, %v3479_v42  ;;  %v1863_v45 = vmul.f32 %v3482_v57, %v1861_v16  ;;  %v1964_v7 = vpop.permute.xlu0 %1963 }
 0x14f   : > { %v1875_v39 = vrot.slane %v3486_v22, 1  ;;  %v1911_v32 = vrot.slane %v3489_v58, 2  ;;  %v1782_v30 = vmul.f32 %v3382_v13, %v3423_v28  ;;  %v1842_v31 = vmul.f32 %v3482_v57, %v3475_v37 }
 0x150   : > { %v1847_v33 = vadd.f32 %v1843_v4, %v1802_v21  ;;  %v1873_v3 = vrot.slane %v1864_v17, 1  ;;  %v1909_v11 = vrot.slane %v3493_v44, 2  ;;  %v1871_v6 = vrot.slane %v1863_v45, 1 }
 0x151   : > { %v1790_v40 = vrot.slane %v1782_v30, 4  ;;  %v1862_v61 = vmul.f32 %v2486_v27, %v1861_v16  ;;  %v1924_v29 = vunpack.c.l.bf16 %v2213_v63  ;;  %v1841_v28 = vmul.f32 %v2486_v27, %v3475_v37 }
 0x152   : > { %v1876_v13 = vsel %vm100_vm2, %v1873_v3, %v1875_v39  ;;  %v1960_v1 = vunpack.c.l.bf16 %v2215_v9  ;;  %v2497_v12 = vunpack.i.h.bf16 %v2495_v55  ;;  %v1912_v24 = vsel %vm138_vm0, %v1909_v11, %v1911_v32 }
 0x153   : > { %v1883_v34 = vadd.f32 %v1876_v13, %v1847_v33  ;;  %v1791_v59 = vsel %vm214_vm3, %v1789_v2, %v1790_v40  ;;  %v1793_v14 = vsel %vm214_vm3, %v1790_v40, %v1792_v18  ;;  %v1870_v60 = vrot.slane %v1862_v61, 1 }
 0x154   : > { %v1800_v26 = vadd.f32 %v1791_v59, %v1764_v41  ;;  %v1801_v62 = vadd.f32 %v1793_v14, %v1765_v35  ;;  %v1933_v36 = vrot.slane %v1924_v29, %v3589_v43  ;;  %v1874_v53 = vsel %vm100_vm2, %v1871_v6, %v1873_v3 }
 0x155   : > { %v1969_v5 = vrot.slane %v1960_v1, %v3589_v43  ;;  %v1919_v10 = vadd.f32 %v1912_v24, %v1883_v34  ;;  %v1898_v8 = vmul.f32 %v2497_v12, %v3479_v42  ;;  %v2496_v19 = vunpack.i.l.bf16 %v2495_v55 }
 0x156   : > { %v1845_v15 = vadd.f32 %v1841_v28, %v1800_v26  ;;  %v1846_v47 = vadd.f32 %v1842_v31, %v1801_v62  ;;  %v1936_v2 = vmul.f32 %v2491_v49, %v1933_v36  ;;  %v1872_v38 = vsel %vm100_vm2, %v1870_v60, %v1871_v6 }
 0x157   : > { %v1937_v18 = vmul.f32 %v1933_v36, %v1928_v52  ;;  %v1972_v21 = vmul.f32 %v2491_v49, %v1969_v5  ;;  %v1973_v25 = vmul.f32 %v1969_v5, %v1928_v52  ;;  %v1906_v48 = vrot.slane %v1898_v8, 2 }
 0x158   : > { %v1881_v56 = vadd.f32 %v1872_v38, %v1845_v15  ;;  %v1882_v46 = vadd.f32 %v1874_v53, %v1846_v47  ;;  %v1934_v16 = vmul.f32 %v2497_v12, %v1933_v36  ;;  %v1945_v35 = vrot.slane %v1936_v2, 3 }
 0x159   : > { %v1947_v27 = vrot.slane %v1937_v18, 3  ;;  %v1983_v43 = vrot.slane %v1973_v25, 4  ;;  %v1767_v4 = vadd.f32 %v1758_v23, %v1731_v20  ;;  %v1981_v17 = vrot.slane %v1972_v21, 4 }
 0x15a   : > { %v1942_v44 = vrot.slane %v1934_v16, 3  ;;  %v1899_v41 = vmul.f32 %v3482_v57, %v3479_v42  ;;  %v1935_v63 = vmul.f32 %v3482_v57, %v1933_v36  ;;  %v1844_v30 = vmul.f32 %v2496_v19, %v3475_v37 }
 0x15b   : > { %v1948_v49 = vsel %vm176_vm1, %v1945_v35, %v1947_v27  ;;  %v1803_v45 = vadd.f32 %v1794_v50, %v1767_v4  ;;  %v1970_v9 = vmul.f32 %v1969_v5, %v1964_v7  ;;  %v1971_v51 = vmul.f32 %v3482_v57, %v1969_v5 }
 0x15c   : > { %v1955_v55 = vadd.f32 %v1948_v49, %v1919_v10  ;;  %v1907_v33 = vrot.slane %v1899_v41, 2  ;;  %v1943_v3 = vrot.slane %v1935_v63, 3  ;;  %v1984_v23 = vsel %vm214_vm3, %v1981_v17, %v1983_v43 }
 0x15d   : > { %v1848_v20 = vadd.f32 %v1844_v30, %v1803_v45  ;;  %v1978_v40 = vrot.slane %v1970_v9, 4  ;;  %v1979_v13 = vrot.slane %v1971_v51, 4 }
 0x15e   : > { %v1991_v31 = vadd.f32 %v1984_v23, %v1955_v55  ;;  %v1908_v42 = vsel %vm138_vm0, %v1906_v48, %v1907_v33  ;;  %v1910_v6 = vsel %vm138_vm0, %v1907_v33, %v1909_v11  ;;  %v1944_v29 = vsel %vm176_vm1, %v1942_v44, %v1943_v3 }
 0x15f   : > { %v1884_v54 = vadd.f32 %v1875_v39, %v1848_v20  ;;  %v1917_v50 = vadd.f32 %v1908_v42, %v1881_v56  ;;  %v1918_v37 = vadd.f32 %v1910_v6, %v1882_v46  ;;  %v1946_v57 = vsel %vm176_vm1, %v1943_v3, %v1945_v35 }
 0x160   : > { %v1995_v61 = vadd.f32 %v2564_v0, %v1991_v31  ;;  %v1980_v34 = vsel %vm214_vm3, %v1978_v40, %v1979_v13  ;;  %v1982_v22 = vsel %vm214_vm3, %v1979_v13, %v1981_v17 }
 0x161   : > { %v1920_v28 = vadd.f32 %v1911_v32, %v1884_v54  ;;  %v1953_v1 = vadd.f32 %v1944_v29, %v1917_v50  ;;  %v1954_v12 = vadd.f32 %v1946_v57, %v1918_v37 }
 0x162   : > { %v1999_v11 = vmax.f32 %v1995_v61, 0.0 }
 0x163   : > { %v1956_v39 = vadd.f32 %v1947_v27, %v1920_v28  ;;  %v1989_v24 = vadd.f32 %v1980_v34, %v1953_v1  ;;  %v1990_v59 = vadd.f32 %v1982_v22, %v1954_v12 }
 0x164   : > { %v2239_v14 = vpack.c.bf16 %v1999_v11, %v1999_v11 }
 0x165   : > { %v1992_v26 = vadd.f32 %v1983_v43, %v1956_v39  ;;  %v1993_v62 = vadd.f32 %v2564_v0, %v1989_v24  ;;  %v1994_v58 = vadd.f32 %v2564_v0, %v1990_v59 }
 0x166   : > { %2224 = vst.msk [vmem:[%s3168_s22 + $0x1c8] sm:$0xf] %vm1042_vm4, %v2239_v14 }
 0x167   : > { %v1996_v32 = vadd.f32 %v2564_v0, %v1992_v26  ;;  %v1997_v60 = vmax.f32 %v1993_v62, 0.0  ;;  %v1998_v36 = vmax.f32 %v1994_v58, 0.0  ;;  %31 = sbr.rel (!%p29_p8) target bundleno = 19 (0x13), region = 79 }
 0x169   : > { %v2000_v52 = vmax.f32 %v1996_v32, 0.0  ;;  %v2237_v53 = vpack.c.bf16 %v1997_v60, %v1997_v60  ;;  %v2238_v5 = vpack.c.bf16 %v1998_v36, %v1998_v36 }
 0x16b   : > { %v2240_v10 = vpack.c.bf16 %v2000_v52, %v2000_v52  ;;  %2222 = vst.msk [vmem:[%s3168_s22 + $0x1c0] sm:$0xf] %vm1042_vm4, %v2237_v53  ;;  %2223 = vst.msk [vmem:[%s3168_s22 + $0x1c4] sm:$0xf] %vm1042_vm4, %v2238_v5 }
 0x16d   : > { %2225 = vst.msk [vmem:[%s3168_s22 + $0x1cc] sm:$0x3] %vm1046_vm5, %v2240_v10 }
 0x16e   :  { %2028 = vsyncpa [#allocation3], 1 }

// kernel: convnet_forward.9
= control target key start
LH: loop header
LB: loop body
LE: loop exit
PB: predicated region body
PF: predicated region fallthrough
CT: control target
= control target key end

     0   :  { %s185_s22 = smov 64   ;;  %vm121_vm0 = vcmask 519168   ;;  %vm122_vm1 = vsmask.f32 3328  ;;  %s466_s0 = inlined_call_operand.vmem [shape: bf16[2,7,2,7,128], index: 0, kind: input, shape index: {}]   ;;  %s467_s1 = inlined_call_operand.vmem [shape: bf16[2,7,7,64], index: 1, kind: output, shape index: {}]  }
   0x1   :  { %v10_v0 = vld [vmem:[%s466_s0 + $0x10] sm:$0xf]  ;;  %v172_v1 = vld [vmem:[%s466_s0 + $0x14] sm:$0xf]  ;;  %v8_v2 = vld [vmem:[%s466_s0] sm:$0xf] }
   0x2   :  { %v205_v3 = vmax.bf16 %v172_v1, %v10_v0  ;;  %v170_v4 = vld [vmem:[%s466_s0 + $0x4] sm:$0xf]  ;;  %v11_v5 = vld [vmem:[%s466_s0 + $0x18] sm:$0xf]  ;;  %v173_v6 = vld [vmem:[%s466_s0 + $0x1c] sm:$0xf] }
   0x3   :  { %v216_v7 = vmax.bf16 %v170_v4, %v8_v2  ;;  %v9_v8 = vld [vmem:[%s466_s0 + $0x8] sm:$0xf]  ;;  %v171_v9 = vld [vmem:[%s466_s0 + $0xc] sm:$0xf]  ;;  %v226_v10 = vmax.bf16 %v173_v6, %v11_v5  ;;  %v12_v14 = vld [vmem:[%s466_s0 + $0x20] sm:$0xf] }
   0x4   :  { %69 = vrot.lane.b32.xlu1 %v205_v3, %s185_s22  ;;  %v230_v11 = vmax.bf16 %v171_v9, %v9_v8  ;;  %v13_v12 = vld [vmem:[%s466_s0 + $0x28] sm:$0xf]  ;;  %v175_v13 = vld [vmem:[%s466_s0 + $0x2c] sm:$0xf]  ;;  %v174_v15 = vld [vmem:[%s466_s0 + $0x24] sm:$0xf] }
   0x5   :  { %65 = vrot.lane.b32.xlu0 %v216_v7, %s185_s22  ;;  %v246_v16 = vmax.bf16 %v175_v13, %v13_v12  ;;  %v250_v17 = vmax.bf16 %v174_v15, %v12_v14  ;;  %v15_v18 = vld [vmem:[%s466_s0 + $0x38] sm:$0xf]  ;;  %v177_v19 = vld [vmem:[%s466_s0 + $0x3c] sm:$0xf]  ;;  %v14_v20 = vld [vmem:[%s466_s0 + $0x30] sm:$0xf] }
   0x6   :  { %v176_v21 = vld [vmem:[%s466_s0 + $0x34] sm:$0xf]  ;;  %v266_v22 = vmax.bf16 %v177_v19, %v15_v18  ;;  %v17_v24 = vld [vmem:[%s466_s0 + $0x48] sm:$0xf]  ;;  %v179_v25 = vld [vmem:[%s466_s0 + $0x4c] sm:$0xf] }
   0x7   :  { %v270_v23 = vmax.bf16 %v176_v21, %v14_v20  ;;  %v16_v26 = vld [vmem:[%s466_s0 + $0x40] sm:$0xf]  ;;  %v178_v27 = vld [vmem:[%s466_s0 + $0x44] sm:$0xf]  ;;  %v286_v28 = vmax.bf16 %v179_v25, %v17_v24  ;;  %v19_v30 = vld [vmem:[%s466_s0 + $0x58] sm:$0xf] }
   0x8   :  { %71 = vrot.lane.b32.xlu1 %v226_v10, %s185_s22  ;;  %v290_v29 = vmax.bf16 %v178_v27, %v16_v26  ;;  %v181_v31 = vld [vmem:[%s466_s0 + $0x5c] sm:$0xf]  ;;  %v18_v32 = vld [vmem:[%s466_s0 + $0x50] sm:$0xf]  ;;  %v180_v33 = vld [vmem:[%s466_s0 + $0x54] sm:$0xf] }
   0x9   :  { %67 = vrot.lane.b32.xlu0 %v230_v11, %s185_s22  ;;  %v306_v34 = vmax.bf16 %v181_v31, %v19_v30  ;;  %v310_v35 = vmax.bf16 %v180_v33, %v18_v32  ;;  %v21_v36 = vld [vmem:[%s466_s0 + $0x68] sm:$0xf]  ;;  %v183_v37 = vld [vmem:[%s466_s0 + $0x6c] sm:$0xf]  ;;  %v20_v38 = vld [vmem:[%s466_s0 + $0x60] sm:$0xf] }
   0xa   :  { %v182_v39 = vld [vmem:[%s466_s0 + $0x64] sm:$0xf]  ;;  %v326_v40 = vmax.bf16 %v183_v37, %v21_v36  ;;  %vm336_vm2 = vmand %vm121_vm0, %vm122_vm1  ;;  %v130_v43 = vld [vmem:[%s467_s1 + $0x8] sm:$0xf] }
   0xb   :  { %v330_v41 = vmax.bf16 %v182_v39, %v20_v38  ;;  %v124_v46 = vld [vmem:[%s467_s1] sm:$0xf]  ;;  %v133_v51 = vld [vmem:[%s467_s1 + $0xc] sm:$0xf]  ;;  %v127_v54 = vld [vmem:[%s467_s1 + $0x4] sm:$0xf] }
   0xc   :  { %75 = vrot.lane.b32.xlu1 %v246_v16, %s185_s22  ;;  %v139_v59 = vld [vmem:[%s467_s1 + $0x14] sm:$0xf]  ;;  %v136_v62 = vld [vmem:[%s467_s1 + $0x10] sm:$0xf]  ;;  %v142_v6 = vld [vmem:[%s467_s1 + $0x18] sm:$0xf] }
   0xd   :  { %73 = vrot.lane.b32.xlu0 %v250_v17, %s185_s22  ;;  %v148_v14 = vld [vmem:[%s467_s1 + $0x20] sm:$0xf]  ;;  %v157_v19 = vld [vmem:[%s467_s1 + $0x2c] sm:$0xf]  ;;  %v163_v27 = vld [vmem:[%s467_s1 + $0x34] sm:$0xf] }
   0xe   :  { %v160_v30 = vld [vmem:[%s467_s1 + $0x30] sm:$0xf] }
  0x10   :  { %79 = vrot.lane.b32.xlu1 %v266_v22, %s185_s22 }
  0x11   :  { %77 = vrot.lane.b32.xlu0 %v270_v23, %s185_s22 }
  0x14   :  { %83 = vrot.lane.b32.xlu1 %v286_v28, %s185_s22 }
  0x15   :  { %81 = vrot.lane.b32.xlu0 %v290_v29, %s185_s22 }
  0x18   :  { %87 = vrot.lane.b32.xlu1 %v306_v34, %s185_s22 }
  0x19   :  { %85 = vrot.lane.b32.xlu0 %v310_v35, %s185_s22 }
  0x1c   :  { %91 = vrot.lane.b32.xlu1 %v326_v40, %s185_s22 }
  0x1d   :  { %89 = vrot.lane.b32.xlu0 %v330_v41, %s185_s22 }
  0x76   :  { %v70_v44 = vpop.permute.xlu1 %69 }
  0x77   :  { %v109_v45 = vmax.bf16 %v70_v44, %v205_v3  ;;  %v66_v47 = vpop.permute.xlu0 %65  ;;  %v145_v3 = vld [vmem:[%s467_s1 + $0x1c] sm:$0xf] }
  0x78   :  { %v107_v48 = vmax.bf16 %v66_v47, %v216_v7 }
  0x79   :  { %v131_v49 = vsel %vm336_vm2, %v109_v45, %v130_v43 }
  0x7a   :  { %132 = vst [vmem:[%s467_s1 + $0x8] sm:$0xf] %v131_v49  ;;  %v125_v50 = vsel %vm336_vm2, %v107_v48, %v124_v46  ;;  %v72_v52 = vpop.permute.xlu1 %71 }
  0x7b   :  { %126 = vst [vmem:[%s467_s1] sm:$0xf] %v125_v50  ;;  %v110_v53 = vmax.bf16 %v72_v52, %v226_v10  ;;  %v68_v55 = vpop.permute.xlu0 %67 }
  0x7c   :  { %v108_v56 = vmax.bf16 %v68_v55, %v230_v11  ;;  %v151_v11 = vld [vmem:[%s467_s1 + $0x24] sm:$0xf] }
  0x7d   :  { %v134_v57 = vsel %vm336_vm2, %v110_v53, %v133_v51 }
  0x7e   :  { %135 = vst [vmem:[%s467_s1 + $0xc] sm:$0xf] %v134_v57  ;;  %v128_v58 = vsel %vm336_vm2, %v108_v56, %v127_v54  ;;  %v76_v60 = vpop.permute.xlu1 %75 }
  0x7f   :  { %129 = vst [vmem:[%s467_s1 + $0x4] sm:$0xf] %v128_v58  ;;  %v112_v61 = vmax.bf16 %v76_v60, %v246_v16  ;;  %v74_v63 = vpop.permute.xlu0 %73 }
  0x80   :  { %v111_v0 = vmax.bf16 %v74_v63, %v250_v17 }
  0x81   :  { %v140_v1 = vsel %vm336_vm2, %v112_v61, %v139_v59 }
  0x82   :  { %141 = vst [vmem:[%s467_s1 + $0x14] sm:$0xf] %v140_v1  ;;  %v137_v2 = vsel %vm336_vm2, %v111_v0, %v136_v62  ;;  %v80_v4 = vpop.permute.xlu1 %79 }
  0x83   :  { %138 = vst [vmem:[%s467_s1 + $0x10] sm:$0xf] %v137_v2  ;;  %v114_v5 = vmax.bf16 %v80_v4, %v266_v22  ;;  %v78_v7 = vpop.permute.xlu0 %77  ;;  %v154_v22 = vld [vmem:[%s467_s1 + $0x28] sm:$0xf] }
  0x84   :  { %v113_v8 = vmax.bf16 %v78_v7, %v270_v23 }
  0x85   :  { %v146_v9 = vsel %vm336_vm2, %v114_v5, %v145_v3 }
  0x86   :  { %147 = vst [vmem:[%s467_s1 + $0x1c] sm:$0xf] %v146_v9  ;;  %v143_v10 = vsel %vm336_vm2, %v113_v8, %v142_v6  ;;  %v84_v12 = vpop.permute.xlu1 %83 }
  0x87   :  { %144 = vst [vmem:[%s467_s1 + $0x18] sm:$0xf] %v143_v10  ;;  %v116_v13 = vmax.bf16 %v84_v12, %v286_v28  ;;  %v82_v15 = vpop.permute.xlu0 %81 }
  0x88   :  { %v115_v16 = vmax.bf16 %v82_v15, %v290_v29 }
  0x89   :  { %v152_v17 = vsel %vm336_vm2, %v116_v13, %v151_v11 }
  0x8a   :  { %153 = vst [vmem:[%s467_s1 + $0x24] sm:$0xf] %v152_v17  ;;  %v149_v18 = vsel %vm336_vm2, %v115_v16, %v148_v14  ;;  %v88_v20 = vpop.permute.xlu1 %87 }
  0x8b   :  { %150 = vst [vmem:[%s467_s1 + $0x20] sm:$0xf] %v149_v18  ;;  %v118_v21 = vmax.bf16 %v88_v20, %v306_v34  ;;  %v86_v23 = vpop.permute.xlu0 %85 }
  0x8c   :  { %v117_v24 = vmax.bf16 %v86_v23, %v310_v35 }
  0x8d   :  { %v158_v25 = vsel %vm336_vm2, %v118_v21, %v157_v19 }
  0x8e   :  { %159 = vst [vmem:[%s467_s1 + $0x2c] sm:$0xf] %v158_v25  ;;  %v155_v26 = vsel %vm336_vm2, %v117_v24, %v154_v22  ;;  %v92_v28 = vpop.permute.xlu1 %91 }
  0x8f   :  { %156 = vst [vmem:[%s467_s1 + $0x28] sm:$0xf] %v155_v26  ;;  %v120_v29 = vmax.bf16 %v92_v28, %v326_v40  ;;  %v90_v31 = vpop.permute.xlu0 %89 }
  0x90   :  { %v119_v32 = vmax.bf16 %v90_v31, %v330_v41 }
  0x91   :  { %v164_v33 = vsel %vm336_vm2, %v120_v29, %v163_v27 }
  0x92   :  { %165 = vst [vmem:[%s467_s1 + $0x34] sm:$0xf] %v164_v33  ;;  %v161_v34 = vsel %vm336_vm2, %v119_v32, %v160_v30 }
  0x93   :  { %162 = vst [vmem:[%s467_s1 + $0x30] sm:$0xf] %v161_v34 }

// kernel: convnet_forward.11
= control target key start
LH: loop header
LB: loop body
LE: loop exit
PB: predicated region body
PF: predicated region fallthrough
CT: control target
= control target key end

     0   :  { %v157_v28 = vlaneseq  ;;  %v1014_v36 = vmov 1966171168   ;;  %s1259_s0 = inlined_call_operand.vmem [shape: bf16[2,1024], index: 0, kind: input, shape index: {}]   ;;  %s1260_s1 = inlined_call_operand.vmem [shape: bf16[1024,10], index: 1, kind: input, shape index: {}]   ;;  %s1261_s2 = inlined_call_operand.vmem [shape: f32[1,10], index: 2, kind: input, shape index: {}]   ;;  %s1262_s3 = inlined_call_operand.hbm [shape: f32[2,10], index: 3, kind: output, shape index: {}]  }
   0x1   :  { %v925_v0 = vld [vmem:[%s1260_s1 + $0x40] sm:$0xff]   ;;  %v929_v4 = vld [vmem:[%s1260_s1 + $0x48] sm:$0xff]   ;;  %v933_v8 = vld [vmem:[%s1260_s1 + $0x50] sm:$0xff]   ;;  %v155_v37 = vunpack.c.l.s4 %v1014_v36 }
   0x2   :  { %v926_v1 = vld [vmem:[%s1260_s1 + $0xc0] sm:$0xff]   ;;  %835 = vmatprep.subr.bf16.mxu0 %v925_v0  ;;  %v930_v5 = vld [vmem:[%s1260_s1 + $0xc8] sm:$0xff]   ;;  %v934_v9 = vld [vmem:[%s1260_s1 + $0xd0] sm:$0xff]   ;;  %v158_v33 = vshrl.u32 %v157_v28, 7 }
   0x3   :  { %v927_v2 = vld [vmem:[%s1260_s1] sm:$0xff]   ;;  %857 = vmatprep.subr.bf16.mxu1 %v926_v1  ;;  %v931_v6 = vld [vmem:[%s1260_s1 + $0x8] sm:$0xff]   ;;  %v935_v10 = vld [vmem:[%s1260_s1 + $0x10] sm:$0xff]   ;;  %v156_v40 = vunpack.c.0.s8 %v155_v37 }
   0x4   :  { %v928_v3 = vld [vmem:[%s1260_s1 + $0x80] sm:$0xff]   ;;  %836 = vmatpush3.bf16.msra.mxu0 %v927_v2  ;;  %v932_v7 = vld [vmem:[%s1260_s1 + $0x88] sm:$0xff]   ;;  %v936_v11 = vld [vmem:[%s1260_s1 + $0x90] sm:$0xff]  }
   0x5   :  { %858 = vmatpush3.bf16.msra.mxu1 %v928_v3  ;;  %837 = vmatprep.subr.bf16.mxu0 %v929_v4  ;;  %v937_v12 = vld [vmem:[%s1260_s1 + $0x58] sm:$0xff]   ;;  %v941_v16 = vld [vmem:[%s1260_s1 + $0x60] sm:$0xff]   ;;  %v945_v20 = vld [vmem:[%s1260_s1 + $0x68] sm:$0xff]   ;;  %v1141_v41 = vsub.s32 %v156_v40, %v158_v33 }
   0x6   :  { %859 = vmatprep.subr.bf16.mxu1 %v930_v5  ;;  %v938_v13 = vld [vmem:[%s1260_s1 + $0xd8] sm:$0xff]   ;;  %v942_v17 = vld [vmem:[%s1260_s1 + $0xe0] sm:$0xff]   ;;  %v946_v21 = vld [vmem:[%s1260_s1 + $0xe8] sm:$0xff]  }
   0x7   :  { %v939_v14 = vld [vmem:[%s1260_s1 + $0x18] sm:$0xff]   ;;  %v943_v18 = vld [vmem:[%s1260_s1 + $0x20] sm:$0xff]   ;;  %v947_v22 = vld [vmem:[%s1260_s1 + $0x28] sm:$0xff]  }
   0x8   :  { %838 = vmatpush3.bf16.msra.mxu0 %v931_v6  ;;  %v940_v15 = vld [vmem:[%s1260_s1 + $0x98] sm:$0xff]   ;;  %v944_v19 = vld [vmem:[%s1260_s1 + $0xa0] sm:$0xff]   ;;  %v948_v23 = vld [vmem:[%s1260_s1 + $0xa8] sm:$0xff]  }
   0x9   :  { %860 = vmatpush3.bf16.msra.mxu1 %v932_v7  ;;  %839 = vmatprep.subr.bf16.mxu0 %v933_v8  ;;  %v949_v24 = vld [vmem:[%s1260_s1 + $0x70] sm:$0xff]   ;;  %v953_v29 = vld [vmem:[%s1260_s1 + $0x78] sm:$0xff]   ;;  %v16_v34 = vld [vmem:[%s1259_s0] sm:$0xff] }
   0xa   :  { %861 = vmatprep.subr.bf16.mxu1 %v934_v9  ;;  %v950_v25 = vld [vmem:[%s1260_s1 + $0xf0] sm:$0xff]   ;;  %v954_v30 = vld [vmem:[%s1260_s1 + $0xf8] sm:$0xff]   ;;  %v958_v35 = vld [vmem:[%s1260_s1 + $0x140] sm:$0xff]   ;;  %v153_v39 = vcombine.high %v16_v34, %v16_v34  ;;  %v160_v42 = vrot.slane %v16_v34, %v1141_v41 }
   0xb   :  { %v951_v26 = vld [vmem:[%s1260_s1 + $0x30] sm:$0xff]   ;;  %v955_v31 = vld [vmem:[%s1260_s1 + $0x38] sm:$0xff]   ;;  %v959_v38 = vld [vmem:[%s1260_s1 + $0x1c0] sm:$0xff]  }
   0xc   :  { %840 = vmatpush3.bf16.msra.mxu0 %v935_v10  ;;  %v952_v27 = vld [vmem:[%s1260_s1 + $0xb0] sm:$0xff]   ;;  %v956_v32 = vld [vmem:[%s1260_s1 + $0xb8] sm:$0xff]   ;;  %v1145_v43 = vrot.slane %v153_v39, %v1141_v41  ;;  %v168_v44 = vcombine.high %v160_v42, %v160_v42  ;;  %v176_v45 = vrot.slane %v160_v42, %v1141_v41  ;;  %v960_v48 = vld [vmem:[%s1260_s1 + $0x100] sm:$0xff]  }
   0xd   :  { %862 = vmatpush3.bf16.msra.mxu1 %v936_v11  ;;  %841 = vmatprep.subr.bf16.mxu0 %v937_v12  ;;  %v962_v51 = vld [vmem:[%s1260_s1 + $0x148] sm:$0xff]   ;;  %v961_v53 = vld [vmem:[%s1260_s1 + $0x180] sm:$0xff]   ;;  %v966_v57 = vld [vmem:[%s1260_s1 + $0x150] sm:$0xff]  }
   0xe   :  { %863 = vmatprep.subr.bf16.mxu1 %v938_v13  ;;  %v169_v46 = vcombine.high %v1145_v43, %v1145_v43  ;;  %v190_v47 = vrot.slane %v168_v44, %v1141_v41  ;;  %v198_v50 = vcombine.high %v176_v45, %v176_v45  ;;  %v963_v54 = vld [vmem:[%s1260_s1 + $0x1c8] sm:$0xff]   ;;  %v967_v59 = vld [vmem:[%s1260_s1 + $0x1d0] sm:$0xff]   ;;  %v970_v61 = vld [vmem:[%s1260_s1 + $0x158] sm:$0xff]  }
   0xf   :  { %v964_v56 = vld [vmem:[%s1260_s1 + $0x108] sm:$0xff]   ;;  %v968_v60 = vld [vmem:[%s1260_s1 + $0x110] sm:$0xff]   ;;  %v971_v63 = vld [vmem:[%s1260_s1 + $0x1d8] sm:$0xff]  }
  0x10   :  { %842 = vmatpush3.bf16.msra.mxu0 %v939_v14  ;;  %v197_v49 = vrot.slane %v169_v46, %v1141_v41  ;;  %626 = vmatprep.mubr.bf16.mxu0 %v190_v47  ;;  %v200_v52 = vcombine.high %v190_v47, %v190_v47  ;;  %v965_v58 = vld [vmem:[%s1260_s1 + $0x188] sm:$0xff]   ;;  %v969_v62 = vld [vmem:[%s1260_s1 + $0x190] sm:$0xff]   ;;  %v972_v0 = vld [vmem:[%s1260_s1 + $0x118] sm:$0xff]  }
  0x11   :  { %864 = vmatpush3.bf16.msra.mxu1 %v940_v15  ;;  %843 = vmatprep.subr.bf16.mxu0 %v941_v16  ;;  %v974_v1 = vld [vmem:[%s1260_s1 + $0x160] sm:$0xff]   ;;  %v973_v2 = vld [vmem:[%s1260_s1 + $0x198] sm:$0xff]   ;;  %v978_v5 = vld [vmem:[%s1260_s1 + $0x168] sm:$0xff]  }
  0x12   :  { %865 = vmatprep.subr.bf16.mxu1 %v942_v17  ;;  %v201_v55 = vcombine.high %v197_v49, %v197_v49  ;;  %666 = vmatprep.mubr.bf16.mxu1 %v200_v52  ;;  %v975_v3 = vld [vmem:[%s1260_s1 + $0x1e0] sm:$0xff]   ;;  %v979_v7 = vld [vmem:[%s1260_s1 + $0x1e8] sm:$0xff]   ;;  %v982_v9 = vld [vmem:[%s1260_s1 + $0x170] sm:$0xff]  }
  0x13   :  { %v976_v4 = vld [vmem:[%s1260_s1 + $0x120] sm:$0xff]   ;;  %v980_v8 = vld [vmem:[%s1260_s1 + $0x128] sm:$0xff]  }
  0x14   :  { %844 = vmatpush3.bf16.msra.mxu0 %v943_v18  ;;  %v977_v6 = vld [vmem:[%s1260_s1 + $0x1a0] sm:$0xff]  }
  0x15   :  { %866 = vmatpush3.bf16.msra.mxu1 %v944_v19  ;;  %845 = vmatprep.subr.bf16.mxu0 %v945_v20 }
  0x16   :  { %867 = vmatprep.subr.bf16.mxu1 %v946_v21 }
  0x18   :  { %846 = vmatpush3.bf16.msra.mxu0 %v947_v22 }
  0x19   :  { %868 = vmatpush3.bf16.msra.mxu1 %v948_v23  ;;  %847 = vmatprep.subr.bf16.mxu0 %v949_v24 }
  0x1a   :  { %869 = vmatprep.subr.bf16.mxu1 %v950_v25 }
  0x1c   :  { %848 = vmatpush3.bf16.msra.mxu0 %v951_v26 }
  0x1d   :  { %870 = vmatpush3.bf16.msra.mxu1 %v952_v27  ;;  %849 = vmatprep.subr.bf16.mxu0 %v953_v29 }
  0x1e   :  { %871 = vmatprep.subr.bf16.mxu1 %v954_v30 }
  0x20   :  { %850 = vmatpush3.bf16.msra.mxu0 %v955_v31 }
  0x21   :  { %872 = vmatpush3.bf16.msra.mxu1 %v956_v32  ;;  %879 = vmatprep.subr.bf16.mxu0 %v958_v35 }
  0x22   :  { %901 = vmatprep.subr.bf16.mxu1 %v959_v38 }
  0x23   :  { %627 = vmatmul.mubr.bf16.vlgmr.msra.gmra.mrb[0].mxu0 %v176_v45 }
  0x24   :  { %880 = vmatpush3.bf16.msra.mxu0 %v960_v48  ;;  %667 = vmatmul.mubr.bf16.vlgmr.msra.gmra.mrb[0].mxu1 %v198_v50 }
  0x25   :  { %881 = vmatprep.subr.bf16.mxu0 %v962_v51  ;;  %902 = vmatpush3.bf16.msra.mxu1 %v961_v53 }
  0x26   :  { %706 = vmatprep.mubr.bf16.mxu0 %v197_v49  ;;  %903 = vmatprep.subr.bf16.mxu1 %v963_v54 }
  0x27   :  { %746 = vmatprep.mubr.bf16.mxu1 %v201_v55 }
  0x28   :  { %882 = vmatpush3.bf16.msra.mxu0 %v964_v56 }
  0x29   :  { %883 = vmatprep.subr.bf16.mxu0 %v966_v57  ;;  %904 = vmatpush3.bf16.msra.mxu1 %v965_v58 }
  0x2a   :  { %905 = vmatprep.subr.bf16.mxu1 %v967_v59 }
  0x2c   :  { %884 = vmatpush3.bf16.msra.mxu0 %v968_v60 }
  0x2d   :  { %885 = vmatprep.subr.bf16.mxu0 %v970_v61  ;;  %906 = vmatpush3.bf16.msra.mxu1 %v969_v62 }
  0x2e   :  { %907 = vmatprep.subr.bf16.mxu1 %v971_v63 }
  0x30   :  { %886 = vmatpush3.bf16.msra.mxu0 %v972_v0 }
  0x31   :  { %887 = vmatprep.subr.bf16.mxu0 %v974_v1  ;;  %908 = vmatpush3.bf16.msra.mxu1 %v973_v2 }
  0x32   :  { %909 = vmatprep.subr.bf16.mxu1 %v975_v3 }
  0x34   :  { %888 = vmatpush3.bf16.msra.mxu0 %v976_v4 }
  0x35   :  { %889 = vmatprep.subr.bf16.mxu0 %v978_v5 }
  0x36   :  { %8 = vsyncpa [#allocation3], 0  ;;  %910 = vmatpush3.bf16.msra.mxu1 %v977_v6  ;;  %v981_v10 = vld [vmem:[%s1260_s1 + $0x1a8] sm:$0xff]   ;;  %v983_v11 = vld [vmem:[%s1260_s1 + $0x1f0] sm:$0xff]   ;;  %v183_v17 = vrot.slane %v1145_v43, %v1141_v41  ;;  %vm754_vm0 = vcmask 74752  }
  0x37   :  { %911 = vmatprep.subr.bf16.mxu1 %v979_v7  ;;  %v984_v12 = vld [vmem:[%s1260_s1 + $0x130] sm:$0xff]   ;;  %v986_v13 = vld [vmem:[%s1260_s1 + $0x178] sm:$0xff]   ;;  %v770_v21 = vld [vmem:[%s1261_s2] ss:$0 sm:$0xff] }
  0x38   :  { %890 = vmatpush3.bf16.msra.mxu0 %v980_v8  ;;  %v985_v14 = vld [vmem:[%s1260_s1 + $0x1b0] sm:$0xff]   ;;  %v987_v15 = vld [vmem:[%s1260_s1 + $0x1f8] sm:$0xff]   ;;  %v199_v19 = vcombine.high %v183_v17, %v183_v17 }
  0x39   :  { %891 = vmatprep.subr.bf16.mxu0 %v982_v9  ;;  %v988_v16 = vld [vmem:[%s1260_s1 + $0x138] sm:$0xff]  }
  0x3a   :  { %912 = vmatpush3.bf16.msra.mxu1 %v981_v10  ;;  %v989_v18 = vld [vmem:[%s1260_s1 + $0x1b8] sm:$0xff]   ;;  %s1015_s1 = smov [#allocation2]  }
  0x3b   :  { %913 = vmatprep.subr.bf16.mxu1 %v983_v11  ;;  %s762_s2 = sshll.u32 %s1015_s1, 4  ;;  %s763_s2 = int_to_ptr.vmem [resolvable:$true] %s762_s2 }
  0x3c   :  { %892 = vmatpush3.bf16.msra.mxu0 %v984_v12  ;;  %s990_s6 = scalar_lea.vmem %s763_s2, 32  ;;  %p995_p1 = scmp.lt.s32.totalorder %s763_s2, %s763_s2 }
  0x3d   :  { %893 = vmatprep.subr.bf16.mxu0 %v986_v13  ;;  %p991_p0 = scmp.ne.s32.totalorder %s763_s2, %s990_s6  ;;  %p996_p2 = scmp.lt.s32.totalorder %s990_s6, %s990_s6 }
  0x3e   :  { %914 = vmatpush3.bf16.msra.mxu1 %v985_v14 }
  0x3f   :  { %915 = vmatprep.subr.bf16.mxu1 %v987_v15  ;;  %p997_p3 = por %p996_p2, %p995_p1 }
  0x40   :  { %894 = vmatpush3.bf16.msra.mxu0 %v988_v16 }
  0x41   :  { %p998_p4 = pnand %p997_p3, %p991_p0 }
  0x42   :  { %916 = vmatpush3.bf16.msra.mxu1 %v989_v18 }
  0x43   :  { %707 = vmatmul.mubr.bf16.vlgmr.msra.gmra.mrb[4].mxu0 %v183_v17 }
  0x45   :  { %747 = vmatmul.mubr.bf16.vlgmr.msra.gmra.mrb[4].mxu1 %v199_v19 }
  0xf6   :  { %v851_v20 = vpop.f32.mrb[0].mxu0 }
  0xf7   :  { %v852_v22 = vpop.f32.mrb[1].mxu0  ;;  %v873_v23 = vpop.f32.mrb[0].mxu1 }
  0xf8   :  { %v853_v24 = vadd.f32 %v852_v22, %v851_v20  ;;  %v854_v25 = vpop.f32.mrb[2].mxu0  ;;  %v874_v26 = vpop.f32.mrb[1].mxu1 }
  0xf9   :  { %v855_v27 = vpop.f32.mrb[3].mxu0  ;;  %v875_v29 = vadd.f32 %v874_v26, %v873_v23  ;;  %v876_v30 = vpop.f32.mrb[2].mxu1 }
  0xfa   :  { %v629_v28 = vadd.f32 %v853_v24, %v770_v21  ;;  %v877_v31 = vpop.f32.mrb[3].mxu1 }
  0xfc   :  { %v669_v32 = vadd.f32 %v875_v29, %v629_v28 }
 0x116   :  { %v895_v33 = vpop.f32.mrb[4].mxu0 }
 0x117   :  { %v896_v34 = vpop.f32.mrb[5].mxu0 }
 0x118   :  { %v917_v35 = vpop.f32.mrb[4].mxu1  ;;  %v897_v36 = vadd.f32 %v896_v34, %v895_v33  ;;  %v898_v37 = vpop.f32.mrb[6].mxu0 }
 0x119   :  { %v918_v38 = vpop.f32.mrb[5].mxu1  ;;  %v899_v39 = vpop.f32.mrb[7].mxu0 }
 0x11a   :  { %v709_v40 = vadd.f32 %v897_v36, %v669_v32  ;;  %v919_v41 = vadd.f32 %v918_v38, %v917_v35  ;;  %v920_v42 = vpop.f32.mrb[6].mxu1 }
 0x11b   :  { %v921_v43 = vpop.f32.mrb[7].mxu1 }
 0x11c   :  { %v749_v44 = vadd.f32 %v919_v41, %v709_v40 }
 0x11e   :  { %755 = vst.msk [vmem:[#allocation2] sm:$0x3] %vm754_vm0, %v749_v44 }
 0x11f   :  { %1001 = shalt.err (!%p998_p4)
}
 0x120   :  { %s1002_s9 = scalar_lea.hbm %s1262_s3, 32 }
 0x121   :  { %p1003_p5 = scmp.ne.s32.totalorder %s1262_s3, %s1002_s9  ;;  %p1006_p6 = scmp.lt.u32.totalorder %s1002_s9, %s1262_s3 }
 0x123   :  { %p1008_p7 = pnand %p1006_p6, %p1003_p5 }
 0x125   :  { %1011 = shalt.err (!%p1008_p7)
}
 0x126   :  { %765 = dma.vmem_to_hbm [thread:$0]  %s763_s2, 32, %s1262_s3, [#allocation3]  }
 0x127   :  { %1012 = dma.done.wait [#allocation3], 32  }
 0x128   :  { %1013 = vsyncadd [#allocation3], 4294967264 }
 0x129   :  { %769 = vsyncpa [#allocation3], 1 }

// kernel: convnet_forward.8
= control target key start
LH: loop header
LB: loop body
LE: loop exit
PB: predicated region body
PF: predicated region fallthrough
CT: control target
= control target key end

     0   :  { %8 = vsyncpa [#allocation3], 0  ;;  %s5426_s0 = inlined_call_operand.vmem [shape: bf16[2,18,18,32], index: 0, kind: input, shape index: {}]   ;;  %s5427_s1 = inlined_call_operand.hbm [shape: bf16[25,32,64], index: 1, kind: input, shape index: {}]   ;;  %s5428_s2 = inlined_call_operand.hbm [shape: f32[1,64], index: 2, kind: input, shape index: {}]   ;;  %s5429_s3 = inlined_call_operand.vmem [shape: bf16[2,14,14,64], index: 3, kind: output, shape index: {}]  }
   0x1   :  { %9 = vsyncpa [#allocation5], 0  ;;  %s4920_s12 = smov [#allocation2]   ;;  %s4864_s16 = scalar_lea.hbm %s5427_s1, 6400 }
   0x2   :  { %s17_s13 = sshll.u32 %s4920_s12, 4  ;;  %p4865_p0 = scmp.ne.s32.totalorder %s5427_s1, %s4864_s16  ;;  %s18_s13 = int_to_ptr.vmem [resolvable:$true] %s17_s13 }
   0x3   :  { %p4868_p1 = scmp.lt.u32.totalorder %s4864_s16, %s5427_s1 }
   0x5   :  { %p4870_p2 = pnand %p4868_p1, %p4865_p0 }
   0x7   :  { %4873 = shalt.err (!%p4870_p2)
}
   0x8   :  { %s4874_s21 = scalar_lea.vmem %s18_s13, 6400  ;;  %p4879_p4 = scmp.lt.s32.totalorder %s18_s13, %s18_s13 }
   0x9   :  { %p4875_p3 = scmp.ne.s32.totalorder %s18_s13, %s4874_s21  ;;  %p4880_p5 = scmp.lt.s32.totalorder %s4874_s21, %s4874_s21 }
   0xb   :  { %p4881_p6 = por %p4880_p5, %p4879_p4 }
   0xd   :  { %p4882_p7 = pnand %p4881_p6, %p4875_p3 }
   0xf   :  { %4885 = shalt.err (!%p4882_p7)
}
  0x10   :  { %s4921_s22 = smov 64   ;;  %s4922_s23 = smov 4  }
  0x11   :  { %23 = dma.hbm_to_vmem [thread:$0]  %s5427_s1, 6400, %s18_s13, [#allocation3], %s4921_s22, %s4921_s22, %s4922_s23  }
  0x12   :  { %s4923_s26 = smov [#allocation4]   ;;  %s4886_s30 = scalar_lea.hbm %s5428_s2, 16 }
  0x13   :  { %s30_s27 = sshll.u32 %s4923_s26, 4  ;;  %p4887_p8 = scmp.ne.s32.totalorder %s5428_s2, %s4886_s30  ;;  %s31_s27 = int_to_ptr.vmem [resolvable:$true] %s30_s27 }
  0x14   :  { %p4890_p9 = scmp.lt.u32.totalorder %s4886_s30, %s5428_s2 }
  0x16   :  { %p4892_p10 = pnand %p4890_p9, %p4887_p8 }
  0x18   :  { %4895 = shalt.err (!%p4892_p10)
}
  0x19   :  { %s4896_s8 = scalar_lea.vmem %s31_s27, 16  ;;  %s4900_s1 = scalar_lea.vmem %s31_s27, 32 }
  0x1a   :  { %p4897_p11 = scmp.ne.s32.totalorder %s31_s27, %s4896_s8  ;;  %p4901_p12 = scmp.lt.s32.totalorder %s31_s27, %s31_s27 }
  0x1b   :  { %p4902_p13 = scmp.lt.s32.totalorder %s4900_s1, %s4896_s8 }
  0x1d   :  { %p4903_p0 = por %p4902_p13, %p4901_p12 }
  0x1f   :  { %p4904_p1 = pnand %p4903_p0, %p4897_p11 }
  0x21   :  { %4907 = shalt.err (!%p4904_p1)
}
  0x22   :  { %33 = dma.hbm_to_vmem [thread:$0]  %s5428_s2, 16, %s31_s27, [#allocation5]  }
  0x23   :  { %4912 = dma.done.wait [#allocation3], 6400  }
  0x24   :  { %4913 = vsyncadd [#allocation3], 4294960896 }
  0x25   :  { %4914 = dma.done.wait [#allocation5], 16  }
  0x26   :  { %4915 = vsyncadd [#allocation5], 4294967280  ;;  %v4970_v0 = vld [vmem:[#allocation4] ss:$0 sm:$0xff]  ;;  %s4972_s11 = smov 0  }
  0x27 LB: > { %v4704_v1 = vld [vmem:[#allocation2 + $0x10] sm:$0xff]   ;;  %v4924_v2 = vmov 0.0   ;;  %v4705_v3 = vld [vmem:[#allocation2] sm:$0xff]   ;;  %v4706_v4 = vld [vmem:[#allocation2 + $0x18] sm:$0xff]   ;;  %vm4925_vm0 = vmmov 0   ;;  %s4133_s2 = smul.u32 12, %s4918_s11  ;;  %s4918_s11 = sphi %s4972_s11, %s47_s11  }
  0x28   : > { %4290 = vmatprep.subr.bf16.mxu0 %v4924_v2  ;;  %4298 = vmatprep.subr.bf16.mxu1 %v4924_v2  ;;  %v4707_v5 = vld [vmem:[#allocation2 + $0x8] sm:$0xff]   ;;  %vm87_vm1 = vcmask 261120   ;;  %v4712_v11 = vld [vmem:[#allocation2 + $0x30] sm:$0xff]   ;;  %v4711_v14 = vld [vmem:[#allocation2 + $0x20] sm:$0xff]   ;;  %vm275_vm2 = vsmask.f32 6400 }
  0x29   : > { %4291 = vmatpush3.bf16.msra.mxu0 %v4704_v1  ;;  %4302 = vmatprep.mubr.msk.bf16.mxu1 %vm4925_vm0, %v4924_v2  ;;  %s4989_s14 = scalar_lea.vmem %s5426_s0, %s4133_s2  ;;  %v4714_v21 = vld [vmem:[#allocation2 + $0x38] sm:$0xff]   ;;  %v4713_v27 = vld [vmem:[#allocation2 + $0x28] sm:$0xff]   ;;  %v4718_v32 = vld [vmem:[#allocation2 + $0x50] sm:$0xff]   ;;  %vm356_vm3 = vcmask 1045504   ;;  %s4136_s15 = sshll.u32 %s4918_s11, 3  ;;  %vm1931_vm4 = vcmask 519168  }
  0x2a   : > { %4299 = vmatpush3.bf16.msra.mxu1 %v4705_v3  ;;  %4292 = vmatprep.subr.bf16.mxu0 %v4924_v2  ;;  %v51_v6 = vld [vmem:[%s4989_s14] sm:$0xf]  ;;  %v52_v7 = vld [vmem:[%s4989_s14 + $0x4] sm:$0x7]  ;;  %v4720_v37 = vld [vmem:[#allocation2 + $0x58] sm:$0xff]   ;;  %s5411_s18 = scalar_lea.vmem %s5429_s3, %s4136_s15  ;;  %vm1933_vm5 = vcmask 518144  }
  0x2b   : > { %4300 = vmatprep.subr.bf16.mxu1 %v4924_v2  ;;  %4294 = vmatprep.mubr.msk.bf16.mxu0 %vm4925_vm0, %v4924_v2  ;;  %v57_v8 = vld [vmem:[%s4989_s14 + $0x4] sm:$0xf]  ;;  %v3839_v10 = vcombine.low %v51_v6, %v52_v7  ;;  %v259_v15 = vld [vmem:[%s4989_s14] sm:$0xe]  ;;  %v3856_v38 = vld [vmem:[%s4989_s14 + $0xc] sm:$0xf] }
  0x2c   : > { %v3835_v9 = vcombine.low %v51_v6, %v57_v8  ;;  %v260_v16 = vld [vmem:[%s4989_s14 + $0x4] sm:$0xf]  ;;  %v4716_v19 = vld [vmem:[%s4989_s14 + $0x8] ss:$0 sps:$4 sm:$0x11]   ;;  %v4724_v47 = vld [vmem:[#allocation2 + $0x70] sm:$0xff]  }
  0x2d   : > { %4293 = vmatpush3.bf16.msra.mxu0 %v4706_v4  ;;  %v3847_v18 = vcombine.low %v259_v15, %v260_v16  ;;  %v191_v20 = vld [vmem:[%s4989_s14] sm:$0xe]  ;;  %v285_v25 = vshll.u32 %v4716_v19, 16  ;;  %v3857_v40 = vld [vmem:[%s4989_s14 + $0x10] sm:$0x7]  ;;  %v4719_v42 = vld [vmem:[#allocation2 + $0x48] sm:$0xff]  }
  0x2e   : > { %4301 = vmatpush3.bf16.msra.mxu1 %v4707_v5  ;;  %4306 = vmatprep.subr.bf16.mxu0 %v4924_v2  ;;  %v69_v12 = vshrl.u32 %v3835_v9, 16  ;;  %v71_v13 = vshll.u32 %v3835_v9, 16  ;;  %v3843_v26 = vcombine.low %v191_v20, %v57_v8  ;;  %v347_v33 = vld [vmem:[%s4989_s14] sm:$0xc]  ;;  %v3862_v41 = vld [vmem:[%s4989_s14 + $0x10] sm:$0xf]  ;;  %v3858_v44 = vcombine.low %v3856_v38, %v3857_v40 }
  0x2f   : > { %4314 = vmatprep.subr.bf16.mxu1 %v4924_v2  ;;  %v277_v23 = vshrl.u32 %v3847_v18, 16  ;;  %v280_v24 = vshll.u32 %v3847_v18, 16  ;;  %v287_v30 = vrot.slane %v285_v25, 2  ;;  %v4717_v34 = vld [vmem:[#allocation2 + $0x40] sm:$0xff]   ;;  %v3852_v39 = vcombine.low %v347_v33, %v260_v16  ;;  %v3867_v48 = vld [vmem:[%s4989_s14 + $0xc] sm:$0xe] }
  0x30   : > { %v73_v17 = vrot.slane %v71_v13, 1  ;;  %v200_v36 = vrot.slane %v3843_v26, 1  ;;  %v3863_v43 = vcombine.low %v3856_v38, %v3862_v41  ;;  %v358_v46 = vrot.slane %v4716_v19, 2  ;;  %v3872_v50 = vld [vmem:[%s4989_s14 + $0xc] sm:$0xe]  ;;  %v4723_v53 = vld [vmem:[#allocation2 + $0x60] sm:$0xff]  }
  0x31   : > { %4303 = vmatmul.mubr.msk.bf16.vlgmr.msra.gmra.mrb[0].mxu1 %vm87_vm1, %v3839_v10  ;;  %v279_v28 = vrot.slane %v277_v23, 1  ;;  %v282_v29 = vrot.slane %v280_v24, 2  ;;  %v357_v45 = vrot.slane %v3852_v39, 2  ;;  %v3873_v51 = vld [vmem:[%s4989_s14 + $0x10] sm:$0xf]  ;;  %v3868_v54 = vcombine.low %v3867_v48, %v3862_v41  ;;  %v4726_v57 = vld [vmem:[#allocation2 + $0x78] sm:$0xff]  }
  0x32   : > { %4315 = vmatpush3.bf16.msra.mxu1 %v4712_v11  ;;  %4318 = vmatprep.mubr.msk.bf16.mxu1 %vm4925_vm0, %v4924_v2  ;;  %v74_v22 = vor.u32 %v73_v17, %v69_v12  ;;  %v504_v49 = vshll.u32 %v3863_v43, 16  ;;  %v3875_v55 = vcombine.low %v3872_v50, %v3873_v51  ;;  %v4734_v56 = vld [vmem:[%s4989_s14 + $0x14] ss:$0 sps:$4 sm:$0x11]   ;;  %v3880_v58 = vld [vmem:[%s4989_s14 + $0xc] sm:$0xc] }
  0x33   : > { %4316 = vmatprep.subr.bf16.mxu1 %v4924_v2  ;;  %v283_v31 = vor.u32 %v282_v29, %v279_v28  ;;  %v359_v52 = vsel %vm356_vm3, %v357_v45, %v358_v46  ;;  %v502_v61 = vshrl.u32 %v3863_v43, 16  ;;  %v4725_v63 = vld [vmem:[#allocation2 + $0x68] sm:$0xff]   ;;  %v575_v1 = vrot.slane %v3868_v54, 1  ;;  %v4730_v3 = vld [vmem:[#allocation2 + $0x90] sm:$0xff]   ;;  %v4729_v6 = vld [vmem:[#allocation2 + $0x80] sm:$0xff]   ;;  %s47_s11 = sadd.s32 1, %s4918_s11  }
  0x34   : > { %4295 = vmatmul.mubr.msk.bf16.vlgmr.msra.gmra.mrb[0].mxu0 %vm87_vm1, %v74_v22  ;;  %v651_v59 = vshrl.u32 %v3875_v55, 16  ;;  %v654_v60 = vshll.u32 %v3875_v55, 16  ;;  %v506_v62 = vrot.slane %v504_v49, 1  ;;  %v3881_v4 = vcombine.low %v3880_v58, %v3873_v51  ;;  %v5041_v9 = vld [vmem:[%s4989_s14 + $0x18] sm:$0xf]  ;;  %v4731_v18 = vld [vmem:[#allocation2 + $0x88] sm:$0xff]  }
  0x35   : > { %4307 = vmatpush3.bf16.msra.mxu0 %v4711_v14  ;;  %4310 = vmatprep.mubr.msk.bf16.mxu0 %vm4925_vm0, %v4924_v2  ;;  %v288_v35 = vsel %vm275_vm2, %v283_v31, %v287_v30  ;;  %v659_v5 = vshll.u32 %v4734_v56, 16  ;;  %v5044_v10 = vld [vmem:[%s4989_s14 + $0x1c] sm:$0xf]  ;;  %v731_v15 = vrot.slane %v4734_v56, 2  ;;  %v3901_v16 = vld [vmem:[%s4989_s14 + $0x18] sm:$0xe] }
  0x36   : > { %4317 = vmatpush3.bf16.msra.mxu1 %v4714_v21  ;;  %4308 = vmatprep.subr.bf16.mxu0 %v4924_v2  ;;  %v653_v7 = vrot.slane %v651_v59, 1  ;;  %v656_v8 = vrot.slane %v654_v60, 2  ;;  %v507_v11 = vor.u32 %v506_v62, %v502_v61  ;;  %v3892_v12 = vcombine.low %v5041_v9, %v5044_v10  ;;  %v4732_v13 = vld [vmem:[#allocation2 + $0x98] sm:$0xff]   ;;  %v4737_v23 = vld [vmem:[#allocation2 + $0xb0] sm:$0xff]   ;;  %v4736_v25 = vld [vmem:[#allocation2 + $0xa0] sm:$0xff]   ;;  %p44_p2 = scmp.ge.s32.totalorder %s47_s11, 14  }
  0x37   : > { %4330 = vmatprep.subr.bf16.mxu1 %v4924_v2  ;;  %v730_v14 = vrot.slane %v3881_v4, 2  ;;  %v5055_v17 = vld [vmem:[%s4989_s14 + $0x1c] sm:$0xf]  ;;  %v661_v20 = vrot.slane %v659_v5, 2  ;;  %v4738_v33 = vld [vmem:[#allocation2 + $0xa8] sm:$0xff]   ;;  %v4742_v41 = vld [vmem:[#allocation2 + $0xc0] sm:$0xff]  }
  0x38   : > { %v657_v19 = vor.u32 %v656_v8, %v653_v7  ;;  %v877_v21 = vshll.u32 %v3892_v12, 16  ;;  %v3904_v24 = vcombine.low %v3901_v16, %v5055_v17  ;;  %v5065_v26 = vld [vmem:[%s4989_s14 + $0x20] ss:$0 sps:$4 sm:$0x11]   ;;  %v875_v28 = vshrl.u32 %v3892_v12, 16  ;;  %v4739_v30 = vld [vmem:[#allocation2 + $0xb8] sm:$0xff]  }
  0x39   : > { %4309 = vmatpush3.bf16.msra.mxu0 %v4713_v27  ;;  %4319 = vmatmul.mubr.msk.bf16.vlgmr.msra.gmra.mrb[4].mxu1 %vm87_vm1, %v288_v35  ;;  %v732_v22 = vsel %vm356_vm3, %v730_v14, %v731_v15  ;;  %v4745_v43 = vld [vmem:[#allocation2 + $0xd8] sm:$0xff]   ;;  %v4744_v48 = vld [vmem:[#allocation2 + $0xc8] sm:$0xff]   ;;  %v4750_v50 = vld [vmem:[#allocation2 + $0xf0] sm:$0xff]  }
  0x3a   : > { %4322 = vmatprep.subr.bf16.mxu0 %v4924_v2  ;;  %4331 = vmatpush3.bf16.msra.mxu1 %v4718_v32  ;;  %v662_v27 = vsel %vm275_vm2, %v657_v19, %v661_v20  ;;  %v879_v29 = vrot.slane %v877_v21, 1  ;;  %v1024_v31 = vshrl.u32 %v3904_v24, 16  ;;  %v1027_v32 = vshll.u32 %v3904_v24, 16  ;;  %v4749_v51 = vld [vmem:[#allocation2 + $0xe0] sm:$0xff]   ;;  %v4752_v55 = vld [vmem:[#allocation2 + $0xf8] sm:$0xff]   ;;  %v4751_v59 = vld [vmem:[#allocation2 + $0xe8] sm:$0xff]  }
  0x3b   : > { %4332 = vmatprep.subr.bf16.mxu1 %v4924_v2  ;;  %4334 = vmatprep.mubr.msk.bf16.mxu1 %vm4925_vm0, %v4924_v2  ;;  %v3914_v56 = vld [vmem:[%s4989_s14 + $0x24] sm:$0xf]  ;;  %v3915_v58 = vld [vmem:[%s4989_s14 + $0x28] sm:$0x7]  ;;  %v4762_v20 = vld [vmem:[#allocation2 + $0x130] sm:$0xff]  }
  0x3c   : > { %4311 = vmatmul.mubr.msk.bf16.vlgmr.msra.gmra.mrb[4].mxu0 %vm87_vm1, %v200_v36  ;;  %v880_v35 = vor.u32 %v879_v29, %v875_v28  ;;  %v4743_v36 = vld [vmem:[#allocation2 + $0xd0] sm:$0xff]   ;;  %v1026_v38 = vrot.slane %v1024_v31, 1  ;;  %v1029_v39 = vrot.slane %v1027_v32, 2  ;;  %v3930_v61 = vld [vmem:[%s4989_s14 + $0x24] sm:$0xe]  ;;  %v4764_v28 = vld [vmem:[#allocation2 + $0x138] sm:$0xff]  }
  0x3d   : > { %4323 = vmatpush3.bf16.msra.mxu0 %v4717_v34  ;;  %4326 = vmatprep.mubr.msk.bf16.mxu0 %vm4925_vm0, %v4924_v2  ;;  %v3886_v34 = vld [vmem:[%s4989_s14 + $0x1c] sm:$0x7]  ;;  %v3931_v62 = vld [vmem:[%s4989_s14 + $0x28] sm:$0xf]  ;;  %v3925_v4 = vld [vmem:[%s4989_s14 + $0x24] sm:$0xe] }
  0x3e   : > { %4324 = vmatprep.subr.bf16.mxu0 %v4924_v2  ;;  %4333 = vmatpush3.bf16.msra.mxu1 %v4720_v37  ;;  %v1032_v37 = vshll.u32 %v5065_v26, 16  ;;  %v3887_v40 = vcombine.low %v5041_v9, %v3886_v34  ;;  %v3938_v7 = vld [vmem:[%s4989_s14 + $0x24] sm:$0xc]  ;;  %v4766_v12 = vld [vmem:[%s4989_s14 + $0x2c] ss:$0 sps:$4 sm:$0x11]  }
  0x3f   : > { %4346 = vmatprep.subr.bf16.mxu1 %v4924_v2  ;;  %v4755_v9 = vld [vmem:[#allocation2 + $0x100] sm:$0xff]   ;;  %v1477_v21 = vrot.slane %v4766_v12, 2  ;;  %v3959_v32 = vld [vmem:[%s4989_s14 + $0x30] sm:$0xe]  ;;  %v4763_v34 = vld [vmem:[#allocation2 + $0x128] sm:$0xff]  }
  0x40   : > { %v1034_v45 = vrot.slane %v1032_v37, 2  ;;  %v4761_v24 = vld [vmem:[#allocation2 + $0x120] sm:$0xff]  }
  0x41   : > { %4325 = vmatpush3.bf16.msra.mxu0 %v4719_v42  ;;  %4335 = vmatmul.mubr.msk.bf16.vlgmr.msra.gmra.mrb[8].mxu1 %vm87_vm1, %v3858_v44  ;;  %v3896_v42 = vld [vmem:[%s4989_s14 + $0x18] sm:$0xe]  ;;  %v1030_v44 = vor.u32 %v1029_v39, %v1026_v38 }
  0x42   : > { %4338 = vmatprep.subr.bf16.mxu0 %v4924_v2  ;;  %4347 = vmatpush3.bf16.msra.mxu1 %v4724_v47  ;;  %v3897_v46 = vcombine.low %v3896_v42, %v5044_v10  ;;  %v3909_v47 = vld [vmem:[%s4989_s14 + $0x18] sm:$0xc] }
  0x43   : > { %4348 = vmatprep.subr.bf16.mxu1 %v4924_v2  ;;  %4350 = vmatprep.mubr.msk.bf16.mxu1 %vm4925_vm0, %v4924_v2  ;;  %v1035_v49 = vsel %vm275_vm2, %v1030_v44, %v1034_v45  ;;  %v4771_v42 = vld [vmem:[#allocation2 + $0x158] sm:$0xff]  }
  0x44   : > { %4327 = vmatmul.mubr.msk.bf16.vlgmr.msra.gmra.mrb[8].mxu0 %vm87_vm1, %v359_v52  ;;  %v3910_v52 = vcombine.low %v3909_v47, %v5055_v17  ;;  %v948_v54 = vrot.slane %v3897_v46, 1  ;;  %v5153_v46 = vld [vmem:[%s4989_s14 + $0x38] ss:$0 sps:$4 sm:$0x11]  }
  0x45   : > { %4339 = vmatpush3.bf16.msra.mxu0 %v4723_v53  ;;  %4342 = vmatprep.mubr.msk.bf16.mxu0 %vm4925_vm0, %v4924_v2  ;;  %v1104_v53 = vrot.slane %v5065_v26, 2  ;;  %v1405_v26 = vshll.u32 %v4766_v12, 16 }
  0x46   : > { %4340 = vmatprep.subr.bf16.mxu0 %v4924_v2  ;;  %4349 = vmatpush3.bf16.msra.mxu1 %v4726_v57  ;;  %v3920_v57 = vld [vmem:[%s4989_s14 + $0x28] sm:$0xf]  ;;  %v1103_v60 = vrot.slane %v3910_v52, 2  ;;  %v4775_v52 = vld [vmem:[#allocation2 + $0x170] sm:$0xff]  }
  0x47   : > { %4362 = vmatprep.subr.bf16.mxu1 %v4924_v2  ;;  %v3926_v10 = vcombine.low %v3925_v4, %v3920_v57  ;;  %v3967_v4 = vld [vmem:[%s4989_s14 + $0x30] sm:$0xc] }
  0x48   : > { %v1105_v8 = vsel %vm356_vm3, %v1103_v60, %v1104_v53  ;;  %v3954_v60 = vld [vmem:[%s4989_s14 + $0x30] sm:$0xe] }
  0x49   : > { %4341 = vmatpush3.bf16.msra.mxu0 %v4725_v63  ;;  %4351 = vmatmul.mubr.msk.bf16.vlgmr.msra.gmra.mrb[12].mxu1 %vm87_vm1, %v575_v1  ;;  %v3921_v63 = vcombine.low %v3914_v56, %v3920_v57  ;;  %v3916_v1 = vcombine.low %v3914_v56, %v3915_v58  ;;  %v1321_v19 = vrot.slane %v3926_v10, 1  ;;  %v5166_v56 = vld [vmem:[%s4989_s14 + $0xd8] sm:$0xf]  ;;  %v5169_v57 = vld [vmem:[%s4989_s14 + $0xdc] sm:$0xf] }
  0x4a   : > { %4354 = vmatprep.subr.bf16.mxu0 %v4924_v2  ;;  %4363 = vmatpush3.bf16.msra.mxu1 %v4730_v3  ;;  %v4756_v3 = vld [vmem:[#allocation2 + $0x110] sm:$0xff]  }
  0x4b   : > { %4364 = vmatprep.subr.bf16.mxu1 %v4924_v2  ;;  %4366 = vmatprep.mubr.msk.bf16.mxu1 %vm4925_vm0, %v4924_v2  ;;  %v1250_v5 = vshll.u32 %v3921_v63, 16  ;;  %v1248_v14 = vshrl.u32 %v3921_v63, 16 }
  0x4c   : > { %4343 = vmatmul.mubr.msk.bf16.vlgmr.msra.gmra.mrb[12].mxu0 %vm87_vm1, %v507_v11  ;;  %v4758_v11 = vld [vmem:[#allocation2 + $0x118] sm:$0xff]  }
  0x4d   : > { %4355 = vmatpush3.bf16.msra.mxu0 %v4729_v6  ;;  %4358 = vmatprep.mubr.msk.bf16.mxu0 %vm4925_vm0, %v4924_v2  ;;  %v3933_v6 = vcombine.low %v3930_v61, %v3931_v62  ;;  %v1252_v15 = vrot.slane %v1250_v5, 1  ;;  %v3981_v61 = vcombine.low %v5166_v56, %v5169_v57  ;;  %v4776_v5 = vld [vmem:[#allocation2 + $0x168] sm:$0xff]  }
  0x4e   : > { %4356 = vmatprep.subr.bf16.mxu0 %v4924_v2  ;;  %4365 = vmatpush3.bf16.msra.mxu1 %v4732_v13  ;;  %v3939_v13 = vcombine.low %v3938_v7, %v3931_v62  ;;  %v4777_v62 = vld [vmem:[#allocation2 + $0x178] sm:$0xff]  }
  0x4f   : > { %4378 = vmatprep.subr.bf16.mxu1 %v4924_v2  ;;  %v1397_v16 = vshrl.u32 %v3933_v6, 16  ;;  %v1400_v17 = vshll.u32 %v3933_v6, 16  ;;  %v4782_v6 = vld [vmem:[#allocation2 + $0x10] sm:$0xff]   ;;  %v1957_v7 = vshll.u32 %v3981_v61, 16  ;;  %v1955_v12 = vshrl.u32 %v3981_v61, 16 }
  0x51   : > { %4357 = vmatpush3.bf16.msra.mxu0 %v4731_v18  ;;  %4367 = vmatmul.mubr.msk.bf16.vlgmr.msra.gmra.mrb[16].mxu1 %vm87_vm1, %v732_v22  ;;  %v4757_v18 = vld [vmem:[#allocation2 + $0x108] sm:$0xff]   ;;  %v5126_v22 = vld [vmem:[%s4989_s14 + $0x30] sm:$0xf]  ;;  %v1399_v29 = vrot.slane %v1397_v16, 1 }
  0x52   : > { %4370 = vmatprep.subr.bf16.mxu0 %v4924_v2  ;;  %4379 = vmatpush3.bf16.msra.mxu1 %v4737_v23  ;;  %v5129_v23 = vld [vmem:[%s4989_s14 + $0x34] sm:$0xf]  ;;  %v4783_v16 = vld [vmem:[#allocation2 + $0x188] sm:$0xff]  }
  0x53   : > { %4380 = vmatprep.subr.bf16.mxu1 %v4924_v2  ;;  %4382 = vmatprep.mubr.msk.bf16.mxu1 %vm4925_vm0, %v4924_v2  ;;  %v3950_v31 = vcombine.low %v5126_v22, %v5129_v23 }
  0x54   : > { %4359 = vmatmul.mubr.msk.bf16.vlgmr.msra.gmra.mrb[16].mxu0 %vm87_vm1, %v662_v27  ;;  %v1253_v27 = vor.u32 %v1252_v15, %v1248_v14  ;;  %v4784_v14 = vld [vmem:[#allocation2 + $0x18] sm:$0xff]   ;;  %v1850_v15 = vrot.slane %v5153_v46, 2 }
  0x55   : > { %4371 = vmatpush3.bf16.msra.mxu0 %v4736_v25  ;;  %4374 = vmatprep.mubr.msk.bf16.mxu0 %vm4925_vm0, %v4924_v2  ;;  %v1476_v25 = vrot.slane %v3939_v13, 2  ;;  %v1623_v37 = vshll.u32 %v3950_v31, 16  ;;  %v1959_v13 = vrot.slane %v1957_v7, 1 }
  0x56   : > { %4372 = vmatprep.subr.bf16.mxu0 %v4924_v2  ;;  %4381 = vmatpush3.bf16.msra.mxu1 %v4739_v30  ;;  %v1402_v30 = vrot.slane %v1400_v17, 2 }
  0x57   : > { %4394 = vmatprep.subr.bf16.mxu1 %v4924_v2  ;;  %v1478_v39 = vsel %vm356_vm3, %v1476_v25, %v1477_v21  ;;  %v1625_v45 = vrot.slane %v1623_v37, 1  ;;  %v3994_v21 = vld [vmem:[%s4989_s14 + $0xd8] sm:$0xe]  ;;  %v5218_v37 = vld [vmem:[%s4989_s14 + $0xe4] sm:$0xf] }
  0x59   : > { %4373 = vmatpush3.bf16.msra.mxu0 %v4738_v33  ;;  %4383 = vmatmul.mubr.msk.bf16.vlgmr.msra.gmra.mrb[20].mxu1 %vm87_vm1, %v880_v35  ;;  %v5137_v33 = vld [vmem:[%s4989_s14 + $0x34] sm:$0xf]  ;;  %v1403_v35 = vor.u32 %v1402_v30, %v1399_v29  ;;  %v4798_v29 = vld [vmem:[%s4989_s14 + $0xe0] ss:$0 sps:$4 sm:$0x11]   ;;  %v4789_v30 = vld [vmem:[#allocation2 + $0x8] sm:$0xff]  }
  0x5a   : > { %4386 = vmatprep.subr.bf16.mxu0 %v4924_v2  ;;  %4395 = vmatpush3.bf16.msra.mxu1 %v4743_v36  ;;  %v1407_v36 = vrot.slane %v1405_v26, 2  ;;  %v3962_v38 = vcombine.low %v3959_v32, %v5137_v33  ;;  %v3979_v32 = vld [vmem:[%s4989_s14 + $0xdc] sm:$0x7] }
  0x5b   : > { %4396 = vmatprep.subr.bf16.mxu1 %v4924_v2  ;;  %4398 = vmatprep.mubr.msk.bf16.mxu1 %vm4925_vm0, %v4924_v2 }
  0x5c   : > { %4375 = vmatmul.mubr.msk.bf16.vlgmr.msra.gmra.mrb[20].mxu0 %vm87_vm1, %v3887_v40  ;;  %v4769_v40 = vld [vmem:[#allocation2 + $0x150] sm:$0xff]   ;;  %v1408_v44 = vsel %vm275_vm2, %v1403_v35, %v1407_v36  ;;  %v1770_v47 = vshrl.u32 %v3962_v38, 16 }
  0x5d   : > { %4387 = vmatpush3.bf16.msra.mxu0 %v4742_v41  ;;  %4390 = vmatprep.mubr.msk.bf16.mxu0 %vm4925_vm0, %v4924_v2  ;;  %v4768_v41 = vld [vmem:[#allocation2 + $0x140] sm:$0xff]  }
  0x5e   : > { %4388 = vmatprep.subr.bf16.mxu0 %v4924_v2  ;;  %4397 = vmatpush3.bf16.msra.mxu1 %v4745_v43  ;;  %v1621_v43 = vshrl.u32 %v3950_v31, 16  ;;  %v1772_v53 = vrot.slane %v1770_v47, 1 }
  0x5f   : > { %4410 = vmatprep.subr.bf16.mxu1 %v4924_v2 }
  0x61   : > { %4389 = vmatpush3.bf16.msra.mxu0 %v4744_v48  ;;  %4399 = vmatmul.mubr.msk.bf16.vlgmr.msra.gmra.mrb[24].mxu1 %vm87_vm1, %v1035_v49  ;;  %v1773_v48 = vshll.u32 %v3962_v38, 16  ;;  %v4770_v49 = vld [vmem:[#allocation2 + $0x148] sm:$0xff]  }
  0x62   : > { %4402 = vmatprep.subr.bf16.mxu0 %v4924_v2  ;;  %4411 = vmatpush3.bf16.msra.mxu1 %v4750_v50  ;;  %v3944_v50 = vld [vmem:[%s4989_s14 + $0x34] sm:$0x7]  ;;  %v5222_v38 = vld [vmem:[%s4989_s14 + $0xe8] sm:$0xf] }
  0x63   : > { %4412 = vmatprep.subr.bf16.mxu1 %v4924_v2  ;;  %4414 = vmatprep.mubr.msk.bf16.mxu1 %vm4925_vm0, %v4924_v2  ;;  %v3945_v58 = vcombine.low %v5126_v22, %v3944_v50  ;;  %v3995_v22 = vld [vmem:[%s4989_s14 + $0xdc] sm:$0xf]  ;;  %v4015_v47 = vcombine.low %v5218_v37, %v5222_v38 }
  0x64   : > { %4391 = vmatmul.mubr.msk.bf16.vlgmr.msra.gmra.mrb[24].mxu0 %vm87_vm1, %v948_v54  ;;  %v1775_v54 = vrot.slane %v1773_v48, 2  ;;  %v3997_v26 = vcombine.low %v3994_v21, %v3995_v22  ;;  %v4024_v48 = vld [vmem:[%s4989_s14 + $0xe4] sm:$0xe]  ;;  %v4795_v50 = vld [vmem:[#allocation2 + $0x38] sm:$0xff]  }
  0x65   : > { %4403 = vmatpush3.bf16.msra.mxu0 %v4749_v51  ;;  %4406 = vmatprep.mubr.msk.bf16.mxu0 %vm4925_vm0, %v4924_v2  ;;  %v1626_v51 = vor.u32 %v1625_v45, %v1621_v43 }
  0x66   : > { %4404 = vmatprep.subr.bf16.mxu0 %v4924_v2  ;;  %4413 = vmatpush3.bf16.msra.mxu1 %v4752_v55  ;;  %v1778_v55 = vshll.u32 %v5153_v46, 16  ;;  %v1776_v63 = vor.u32 %v1775_v54, %v1772_v53  ;;  %v2159_v35 = vshrl.u32 %v3997_v26, 16  ;;  %v2162_v36 = vshll.u32 %v3997_v26, 16  ;;  %v4038_v26 = vld [vmem:[%s4989_s14 + $0xf0] sm:$0xf] }
  0x67   : > { %4426 = vmatprep.subr.bf16.mxu1 %v4924_v2  ;;  %v2381_v53 = vshll.u32 %v4015_v47, 16 }
  0x68   : > { %v2161_v45 = vrot.slane %v2159_v35, 1  ;;  %v2164_v46 = vrot.slane %v2162_v36, 2  ;;  %v4054_v35 = vld [vmem:[%s4989_s14 + $0xf0] sm:$0xe]  ;;  %v4055_v36 = vld [vmem:[%s4989_s14 + $0xf4] sm:$0xf] }
  0x69   : > { %4405 = vmatpush3.bf16.msra.mxu0 %v4751_v59  ;;  %4415 = vmatmul.mubr.msk.bf16.vlgmr.msra.gmra.mrb[28].mxu1 %vm87_vm1, %v3916_v1  ;;  %v4774_v59 = vld [vmem:[#allocation2 + $0x160] sm:$0xff]   ;;  %v1780_v1 = vrot.slane %v1778_v55, 2  ;;  %v2383_v61 = vrot.slane %v2381_v53, 1  ;;  %v5306_v53 = vld [vmem:[%s4989_s14 + $0xfc] sm:$0xf] }
  0x6a   : > { %4418 = vmatprep.subr.bf16.mxu0 %v4924_v2  ;;  %4427 = vmatpush3.bf16.msra.mxu1 %v4756_v3  ;;  %v3955_v3 = vcombine.low %v3954_v60, %v5129_v23  ;;  %v4787_v23 = vld [vmem:[#allocation2] sm:$0xff]  }
  0x6b   : > { %4428 = vmatprep.subr.bf16.mxu1 %v4924_v2  ;;  %4430 = vmatprep.mubr.msk.bf16.mxu1 %vm4925_vm0, %v4924_v2 }
  0x6c   : > { %4407 = vmatmul.mubr.msk.bf16.vlgmr.msra.gmra.mrb[28].mxu0 %vm87_vm1, %v1105_v8  ;;  %v1781_v8 = vsel %vm275_vm2, %v1776_v63, %v1780_v1  ;;  %v1694_v10 = vrot.slane %v3955_v3, 1  ;;  %v4802_v3 = vld [vmem:[#allocation2 + $0x58] sm:$0xff]  }
  0x6d   : > { %4419 = vmatpush3.bf16.msra.mxu0 %v4755_v9  ;;  %4422 = vmatprep.mubr.msk.bf16.mxu0 %vm4925_vm0, %v4924_v2  ;;  %v3968_v9 = vcombine.low %v3967_v4, %v5137_v33  ;;  %v4794_v33 = vld [vmem:[#allocation2 + $0x40] sm:$0xff]  }
  0x6e   : > { %4420 = vmatprep.subr.bf16.mxu0 %v4924_v2  ;;  %4429 = vmatpush3.bf16.msra.mxu1 %v4758_v11  ;;  %v4781_v11 = vld [vmem:[#allocation2 + $0x180] sm:$0xff]  }
  0x6f   : > { %4442 = vmatprep.subr.bf16.mxu1 %v4924_v2  ;;  %v1849_v17 = vrot.slane %v3968_v9, 2 }
  0x71   : > { %4421 = vmatpush3.bf16.msra.mxu0 %v4757_v18  ;;  %4431 = vmatmul.mubr.msk.bf16.vlgmr.msra.gmra.mrb[32].mxu1 %vm87_vm1, %v1321_v19  ;;  %v4788_v18 = vld [vmem:[#allocation2 + $0x20] sm:$0xff]   ;;  %v3989_v19 = vld [vmem:[%s4989_s14 + $0xd8] sm:$0xe]  ;;  %v1851_v25 = vsel %vm356_vm3, %v1849_v17, %v1850_v15 }
  0x72   : > { %4434 = vmatprep.subr.bf16.mxu0 %v4924_v2  ;;  %4443 = vmatpush3.bf16.msra.mxu1 %v4762_v20  ;;  %v1960_v20 = vor.u32 %v1959_v13, %v1955_v12  ;;  %v4019_v12 = vld [vmem:[%s4989_s14 + $0xe4] sm:$0xe]  ;;  %v4809_v13 = vld [vmem:[#allocation2 + $0x88] sm:$0xff]   ;;  %v4808_v17 = vld [vmem:[#allocation2 + $0x78] sm:$0xff]  }
  0x73   : > { %4444 = vmatprep.subr.bf16.mxu1 %v4924_v2  ;;  %4446 = vmatprep.mubr.msk.bf16.mxu1 %vm4925_vm0, %v4924_v2 }
  0x74   : > { %4423 = vmatmul.mubr.msk.bf16.vlgmr.msra.gmra.mrb[32].mxu0 %vm87_vm1, %v1253_v27  ;;  %v4002_v27 = vld [vmem:[%s4989_s14 + $0xd8] sm:$0xc] }
  0x75   : > { %4435 = vmatpush3.bf16.msra.mxu0 %v4761_v24  ;;  %4438 = vmatprep.mubr.msk.bf16.mxu0 %vm4925_vm0, %v4924_v2  ;;  %v3990_v24 = vcombine.low %v3989_v19, %v5169_v57  ;;  %v4800_v57 = vld [vmem:[#allocation2 + $0x50] sm:$0xff]   ;;  %v4814_v19 = vld [vmem:[#allocation2 + $0xa0] sm:$0xff]  }
  0x76   : > { %4436 = vmatprep.subr.bf16.mxu0 %v4924_v2  ;;  %4445 = vmatpush3.bf16.msra.mxu1 %v4764_v28  ;;  %v4790_v28 = vld [vmem:[#allocation2 + $0x28] sm:$0xff]  }
  0x77   : > { %4458 = vmatprep.subr.bf16.mxu1 %v4924_v2  ;;  %v2084_v31 = vrot.slane %v3990_v24, 1  ;;  %v4044_v24 = vld [vmem:[%s4989_s14 + $0xf4] sm:$0xf] }
  0x79   : > { %4437 = vmatpush3.bf16.msra.mxu0 %v4763_v34  ;;  %4447 = vmatmul.mubr.msk.bf16.vlgmr.msra.gmra.mrb[36].mxu1 %vm87_vm1, %v1478_v39  ;;  %v4003_v34 = vcombine.low %v4002_v27, %v3995_v22  ;;  %v4793_v39 = vld [vmem:[#allocation2 + $0x30] sm:$0xff]  }
  0x7a   : > { %4450 = vmatprep.subr.bf16.mxu0 %v4924_v2  ;;  %4459 = vmatpush3.bf16.msra.mxu1 %v4769_v40  ;;  %v2238_v40 = vrot.slane %v4798_v29, 2  ;;  %v4813_v22 = vld [vmem:[#allocation2 + $0x90] sm:$0xff]  }
  0x7b   : > { %4460 = vmatprep.subr.bf16.mxu1 %v4924_v2  ;;  %4462 = vmatprep.mubr.msk.bf16.mxu1 %vm4925_vm0, %v4924_v2  ;;  %v2237_v43 = vrot.slane %v4003_v34, 2  ;;  %v4039_v27 = vld [vmem:[%s4989_s14 + $0xf4] sm:$0x7]  ;;  %v4049_v34 = vld [vmem:[%s4989_s14 + $0xf0] sm:$0xe] }
  0x7c   : > { %4439 = vmatmul.mubr.msk.bf16.vlgmr.msra.gmra.mrb[36].mxu0 %vm87_vm1, %v1408_v44  ;;  %v2167_v44 = vshll.u32 %v4798_v29, 16  ;;  %v4815_v29 = vld [vmem:[#allocation2 + $0x98] sm:$0xff]  }
  0x7d   : > { %4451 = vmatpush3.bf16.msra.mxu0 %v4768_v41  ;;  %4454 = vmatprep.mubr.msk.bf16.mxu0 %vm4925_vm0, %v4924_v2  ;;  %v3985_v41 = vcombine.low %v5166_v56, %v3979_v32  ;;  %v2239_v55 = vsel %vm356_vm3, %v2237_v43, %v2238_v40  ;;  %v4801_v56 = vld [vmem:[#allocation2 + $0x60] sm:$0xff]   ;;  %v4050_v40 = vcombine.low %v4049_v34, %v4044_v24  ;;  %v4062_v43 = vld [vmem:[%s4989_s14 + $0xf0] sm:$0xc] }
  0x7e   : > { %4452 = vmatprep.subr.bf16.mxu0 %v4924_v2  ;;  %4461 = vmatpush3.bf16.msra.mxu1 %v4771_v42  ;;  %v4796_v42 = vld [vmem:[#allocation2 + $0x48] sm:$0xff]  }
  0x7f   : > { %4474 = vmatprep.subr.bf16.mxu1 %v4924_v2 }
  0x81   : > { %4453 = vmatpush3.bf16.msra.mxu0 %v4770_v49  ;;  %4463 = vmatmul.mubr.msk.bf16.vlgmr.msra.gmra.mrb[40].mxu1 %vm87_vm1, %v1626_v51  ;;  %v5232_v49 = vld [vmem:[%s4989_s14 + $0xe8] sm:$0xf]  ;;  %v2165_v51 = vor.u32 %v2164_v46, %v2161_v45 }
  0x82   : > { %4466 = vmatprep.subr.bf16.mxu0 %v4924_v2  ;;  %4475 = vmatpush3.bf16.msra.mxu1 %v4775_v52  ;;  %v2169_v52 = vrot.slane %v2167_v44, 2  ;;  %v4027_v54 = vcombine.low %v4024_v48, %v5232_v49  ;;  %v4821_v44 = vld [vmem:[#allocation2 + $0xb8] sm:$0xff]  }
  0x83   : > { %4476 = vmatprep.subr.bf16.mxu1 %v4924_v2  ;;  %4478 = vmatprep.mubr.msk.bf16.mxu1 %vm4925_vm0, %v4924_v2  ;;  %v4830_v48 = vld [vmem:[%s4989_s14 + $0xf8] ss:$0 sps:$4 sm:$0x11]  }
  0x84   : > { %4455 = vmatmul.mubr.msk.bf16.vlgmr.msra.gmra.mrb[40].mxu0 %vm87_vm1, %v3945_v58  ;;  %v4803_v58 = vld [vmem:[#allocation2 + $0x68] sm:$0xff]   ;;  %v2170_v60 = vsel %vm275_vm2, %v2165_v51, %v2169_v52  ;;  %v2526_v63 = vshrl.u32 %v4027_v54, 16  ;;  %v2529_v1 = vshll.u32 %v4027_v54, 16  ;;  %v4826_v51 = vld [vmem:[#allocation2 + $0xe0] sm:$0xff]   ;;  %v4063_v52 = vcombine.low %v4062_v43, %v4055_v36 }
  0x85   : > { %4467 = vmatpush3.bf16.msra.mxu0 %v4774_v59  ;;  %4470 = vmatprep.mubr.msk.bf16.mxu0 %vm4925_vm0, %v4924_v2  ;;  %v2379_v59 = vshrl.u32 %v4015_v47, 16  ;;  %v2818_v47 = vrot.slane %v4050_v40, 1  ;;  %v5309_v54 = vld [vmem:[%s4989_s14 + $0x100] sm:$0xf]  ;;  %v4104_v40 = vld [vmem:[%s4989_s14 + $0x10c] sm:$0xf] }
  0x86   : > { %4468 = vmatprep.subr.bf16.mxu0 %v4924_v2  ;;  %4477 = vmatpush3.bf16.msra.mxu1 %v4777_v62  ;;  %v5247_v62 = vld [vmem:[%s4989_s14 + $0xec] ss:$0 sps:$4 sm:$0x11]   ;;  %v2528_v7 = vrot.slane %v2526_v63, 1  ;;  %v2972_v63 = vrot.slane %v4830_v48, 2 }
  0x87   : > { %4490 = vmatprep.subr.bf16.mxu1 %v4924_v2  ;;  %v2384_v4 = vor.u32 %v2383_v61, %v2379_v59  ;;  %v2534_v9 = vshll.u32 %v5247_v62, 16  ;;  %v2605_v32 = vrot.slane %v5247_v62, 2  ;;  %v2901_v59 = vshll.u32 %v4830_v48, 16  ;;  %v4828_v61 = vld [vmem:[#allocation2 + $0xe8] sm:$0xff]  }
  0x88   : > { %v2971_v62 = vrot.slane %v4063_v52, 2  ;;  %v4099_v43 = vld [vmem:[%s4989_s14 + $0x10c] sm:$0x7] }
  0x89   : > { %4469 = vmatpush3.bf16.msra.mxu0 %v4776_v5  ;;  %4479 = vmatmul.mubr.msk.bf16.vlgmr.msra.gmra.mrb[44].mxu1 %vm87_vm1, %v1781_v8  ;;  %v4009_v5 = vld [vmem:[%s4989_s14 + $0xe8] sm:$0x7]  ;;  %v2531_v8 = vrot.slane %v2529_v1, 2  ;;  %v2536_v15 = vrot.slane %v2534_v9, 2  ;;  %v4084_v1 = vld [vmem:[%s4989_s14 + $0xfc] sm:$0xe] }
  0x8a   : > { %4482 = vmatprep.subr.bf16.mxu0 %v4924_v2  ;;  %4491 = vmatpush3.bf16.msra.mxu1 %v4782_v6  ;;  %v4807_v6 = vld [vmem:[#allocation2 + $0x80] sm:$0xff]   ;;  %v4115_v52 = vld [vmem:[%s4989_s14 + $0x10c] sm:$0xf] }
  0x8b   : > { %4492 = vmatprep.subr.bf16.mxu1 %v4924_v2  ;;  %4494 = vmatprep.mubr.msk.bf16.mxu1 %vm4925_vm0, %v4924_v2  ;;  %v4833_v9 = vld [vmem:[#allocation2 + $0x100] sm:$0xff]  }
  0x8c   : > { %4471 = vmatmul.mubr.msk.bf16.vlgmr.msra.gmra.mrb[44].mxu0 %vm87_vm1, %v1694_v10  ;;  %v4010_v10 = vcombine.low %v5218_v37, %v4009_v5 }
  0x8d   : > { %4483 = vmatpush3.bf16.msra.mxu0 %v4781_v11  ;;  %4486 = vmatprep.mubr.msk.bf16.mxu0 %vm4925_vm0, %v4924_v2  ;;  %v4806_v11 = vld [vmem:[#allocation2 + $0x70] sm:$0xff]  }
  0x8e   : > { %4484 = vmatprep.subr.bf16.mxu0 %v4924_v2  ;;  %4493 = vmatpush3.bf16.msra.mxu1 %v4784_v14  ;;  %v2532_v14 = vor.u32 %v2531_v8, %v2528_v7  ;;  %v2973_v8 = vsel %vm356_vm3, %v2971_v62, %v2972_v63 }
  0x8f   : > { %4506 = vmatprep.subr.bf16.mxu1 %v4924_v2 }
  0x91   : > { %4485 = vmatpush3.bf16.msra.mxu0 %v4783_v16  ;;  %4495 = vmatmul.mubr.msk.bf16.vlgmr.msra.gmra.mrb[48].mxu1 %vm87_vm1, %v1960_v20  ;;  %v4020_v16 = vcombine.low %v4019_v12, %v5222_v38  ;;  %v4032_v20 = vld [vmem:[%s4989_s14 + $0xe4] sm:$0xc]  ;;  %v4832_v12 = vld [vmem:[#allocation2 + $0xf0] sm:$0xff]  }
  0x92   : > { %4498 = vmatprep.subr.bf16.mxu0 %v4924_v2  ;;  %4507 = vmatpush3.bf16.msra.mxu1 %v4788_v18  ;;  %v2537_v18 = vsel %vm275_vm2, %v2532_v14, %v2536_v15  ;;  %v4835_v15 = vld [vmem:[#allocation2 + $0x108] sm:$0xff]  }
  0x93   : > { %4508 = vmatprep.subr.bf16.mxu1 %v4924_v2  ;;  %4510 = vmatprep.mubr.msk.bf16.mxu1 %vm4925_vm0, %v4924_v2  ;;  %v2451_v21 = vrot.slane %v4020_v16, 1  ;;  %v5334_v16 = vld [vmem:[%s4989_s14 + $0x104] ss:$0 sps:$4 sm:$0x11]  }
  0x94   : > { %4487 = vmatmul.mubr.msk.bf16.vlgmr.msra.gmra.mrb[48].mxu0 %vm87_vm1, %v1851_v25  ;;  %v4816_v25 = vld [vmem:[#allocation2 + $0xa8] sm:$0xff]   ;;  %v3339_v48 = vrot.slane %v5334_v16, 2 }
  0x95   : > { %4499 = vmatpush3.bf16.msra.mxu0 %v4787_v23  ;;  %4502 = vmatprep.mubr.msk.bf16.mxu0 %vm4925_vm0, %v4924_v2  ;;  %v4033_v23 = vcombine.low %v4032_v20, %v5232_v49 }
  0x96   : > { %4500 = vmatprep.subr.bf16.mxu0 %v4924_v2  ;;  %4509 = vmatpush3.bf16.msra.mxu1 %v4790_v28  ;;  %v4045_v28 = vcombine.low %v4038_v26, %v4044_v24 }
  0x97   : > { %4522 = vmatprep.subr.bf16.mxu1 %v4924_v2 }
  0x98   : > { %v2748_v37 = vshll.u32 %v4045_v28, 16  ;;  %v2746_v45 = vshrl.u32 %v4045_v28, 16  ;;  %v4079_v28 = vld [vmem:[%s4989_s14 + $0xfc] sm:$0xe] }
  0x99   : > { %4501 = vmatpush3.bf16.msra.mxu0 %v4789_v30  ;;  %4511 = vmatmul.mubr.msk.bf16.vlgmr.msra.gmra.mrb[52].mxu1 %vm87_vm1, %v2084_v31  ;;  %v4040_v30 = vcombine.low %v4038_v26, %v4039_v27  ;;  %v2604_v31 = vrot.slane %v4033_v23, 2  ;;  %v4838_v27 = vld [vmem:[#allocation2 + $0x110] sm:$0xff]  }
  0x9a   : > { %4514 = vmatprep.subr.bf16.mxu0 %v4924_v2  ;;  %4523 = vmatpush3.bf16.msra.mxu1 %v4794_v33  ;;  %v4820_v33 = vld [vmem:[#allocation2 + $0xc0] sm:$0xff]   ;;  %v2750_v46 = vrot.slane %v2748_v37, 1 }
  0x9b   : > { %4524 = vmatprep.subr.bf16.mxu1 %v4924_v2  ;;  %4526 = vmatprep.mubr.msk.bf16.mxu1 %vm4925_vm0, %v4924_v2  ;;  %v2606_v38 = vsel %vm356_vm3, %v2604_v31, %v2605_v32  ;;  %v4080_v32 = vcombine.low %v4079_v28, %v5309_v54 }
  0x9c   : > { %4503 = vmatmul.mubr.msk.bf16.vlgmr.msra.gmra.mrb[52].mxu0 %vm87_vm1, %v3985_v41  ;;  %v4057_v41 = vcombine.low %v4054_v35, %v4055_v36  ;;  %v4846_v35 = vld [vmem:[#allocation2 + $0x140] sm:$0xff]   ;;  %v4092_v36 = vld [vmem:[%s4989_s14 + $0xfc] sm:$0xc] }
  0x9d   : > { %4515 = vmatpush3.bf16.msra.mxu0 %v4793_v39  ;;  %4518 = vmatprep.mubr.msk.bf16.mxu0 %vm4925_vm0, %v4924_v2  ;;  %v4819_v39 = vld [vmem:[#allocation2 + $0xb0] sm:$0xff]   ;;  %v3185_v37 = vrot.slane %v4080_v32, 1 }
  0x9e   : > { %4516 = vmatprep.subr.bf16.mxu0 %v4924_v2  ;;  %4525 = vmatpush3.bf16.msra.mxu1 %v4796_v42  ;;  %v4822_v42 = vld [vmem:[#allocation2 + $0xc8] sm:$0xff]   ;;  %v2893_v49 = vshrl.u32 %v4057_v41, 16 }
  0x9f   : > { %4538 = vmatprep.subr.bf16.mxu1 %v4924_v2 }
  0xa1   : > { %4517 = vmatpush3.bf16.msra.mxu0 %v4795_v50  ;;  %4527 = vmatmul.mubr.msk.bf16.vlgmr.msra.gmra.mrb[56].mxu1 %vm87_vm1, %v2239_v55  ;;  %v2896_v50 = vshll.u32 %v4057_v41, 16  ;;  %v2751_v55 = vor.u32 %v2750_v46, %v2746_v45  ;;  %v4848_v41 = vld [vmem:[#allocation2 + $0x148] sm:$0xff]   ;;  %v4847_v45 = vld [vmem:[#allocation2 + $0x138] sm:$0xff]  }
  0xa2   : > { %4530 = vmatprep.subr.bf16.mxu0 %v4924_v2  ;;  %4539 = vmatpush3.bf16.msra.mxu1 %v4801_v56  ;;  %v4825_v56 = vld [vmem:[#allocation2 + $0xd0] sm:$0xff]  }
  0xa3   : > { %4540 = vmatprep.subr.bf16.mxu1 %v4924_v2  ;;  %4542 = vmatprep.mubr.msk.bf16.mxu1 %vm4925_vm0, %v4924_v2 }
  0xa4   : > { %4519 = vmatmul.mubr.msk.bf16.vlgmr.msra.gmra.mrb[56].mxu0 %vm87_vm1, %v2170_v60  ;;  %v4075_v60 = vcombine.low %v5306_v53, %v5309_v54 }
  0xa5   : > { %4531 = vmatpush3.bf16.msra.mxu0 %v4800_v57  ;;  %4534 = vmatprep.mubr.msk.bf16.mxu0 %vm4925_vm0, %v4924_v2  ;;  %v2895_v57 = vrot.slane %v2893_v49, 1  ;;  %v4852_v49 = vld [vmem:[#allocation2 + $0x160] sm:$0xff]  }
  0xa6   : > { %4532 = vmatprep.subr.bf16.mxu0 %v4924_v2  ;;  %4541 = vmatpush3.bf16.msra.mxu1 %v4803_v58  ;;  %v2898_v58 = vrot.slane %v2896_v50, 2  ;;  %v3115_v7 = vshll.u32 %v4075_v60, 16  ;;  %v4109_v50 = vld [vmem:[%s4989_s14 + $0x108] sm:$0xe] }
  0xa7   : > { %4554 = vmatprep.subr.bf16.mxu1 %v4924_v2 }
  0xa8   : > { %v2899_v5 = vor.u32 %v2898_v58, %v2895_v57  ;;  %v3117_v14 = vrot.slane %v3115_v7, 1  ;;  %v4854_v58 = vld [vmem:[#allocation2 + $0x168] sm:$0xff]  }
  0xa9   : > { %4533 = vmatpush3.bf16.msra.mxu0 %v4802_v3  ;;  %4543 = vmatmul.mubr.msk.bf16.vlgmr.msra.gmra.mrb[60].mxu1 %vm87_vm1, %v2384_v4  ;;  %v5321_v3 = vld [vmem:[%s4989_s14 + $0x100] sm:$0xf]  ;;  %v4827_v4 = vld [vmem:[#allocation2 + $0xd8] sm:$0xff]  }
  0xaa   : > { %4546 = vmatprep.subr.bf16.mxu0 %v4924_v2  ;;  %4555 = vmatpush3.bf16.msra.mxu1 %v4807_v6  ;;  %v2903_v6 = vrot.slane %v2901_v59, 2  ;;  %v4122_v59 = vld [vmem:[%s4989_s14 + $0x108] sm:$0xc] }
  0xab   : > { %4556 = vmatprep.subr.bf16.mxu1 %v4924_v2  ;;  %4558 = vmatprep.mubr.msk.bf16.mxu1 %vm4925_vm0, %v4924_v2 }
  0xac   : > { %4535 = vmatmul.mubr.msk.bf16.vlgmr.msra.gmra.mrb[60].mxu0 %vm87_vm1, %v4010_v10  ;;  %v4087_v10 = vcombine.low %v4084_v1, %v5321_v3  ;;  %v4862_v1 = vld [vmem:[%s4989_s14 + $0x110] ss:$0 sps:$4 sm:$0x11]  }
  0xad   : > { %4547 = vmatpush3.bf16.msra.mxu0 %v4806_v11  ;;  %4550 = vmatprep.mubr.msk.bf16.mxu0 %vm4925_vm0, %v4924_v2  ;;  %v2904_v11 = vsel %vm275_vm2, %v2899_v5, %v2903_v6  ;;  %v4858_v5 = vld [vmem:[#allocation2 + $0x180] sm:$0xff]   ;;  %v4123_v6 = vcombine.low %v4122_v59, %v4115_v52 }
  0xae   : > { %4548 = vmatprep.subr.bf16.mxu0 %v4924_v2  ;;  %4557 = vmatpush3.bf16.msra.mxu1 %v4809_v13  ;;  %v3113_v13 = vshrl.u32 %v4075_v60, 16  ;;  %v4853_v60 = vld [vmem:[#allocation2 + $0x158] sm:$0xff]  }
  0xaf   : > { %4570 = vmatprep.subr.bf16.mxu1 %v4924_v2 }
  0xb0   : > { %v3118_v20 = vor.u32 %v3117_v14, %v3113_v13  ;;  %v3705_v13 = vrot.slane %v4123_v6, 2  ;;  %v3706_v14 = vrot.slane %v4862_v1, 2 }
  0xb1   : > { %4549 = vmatpush3.bf16.msra.mxu0 %v4808_v17  ;;  %4559 = vmatmul.mubr.msk.bf16.vlgmr.msra.gmra.mrb[64].mxu1 %vm87_vm1, %v2537_v18  ;;  %v3260_v17 = vshrl.u32 %v4087_v10, 16  ;;  %v3263_v18 = vshll.u32 %v4087_v10, 16 }
  0xb2   : > { %4562 = vmatprep.subr.bf16.mxu0 %v4924_v2  ;;  %4571 = vmatpush3.bf16.msra.mxu1 %v4814_v19  ;;  %v4834_v19 = vld [vmem:[#allocation2 + $0xf8] sm:$0xff]  }
  0xb3   : > { %4572 = vmatprep.subr.bf16.mxu1 %v4924_v2  ;;  %4574 = vmatprep.mubr.msk.bf16.mxu1 %vm4925_vm0, %v4924_v2  ;;  %v3262_v23 = vrot.slane %v3260_v17, 1  ;;  %v3265_v24 = vrot.slane %v3263_v18, 2  ;;  %v3707_v18 = vsel %vm356_vm3, %v3705_v13, %v3706_v14 }
  0xb4   : > { %4551 = vmatmul.mubr.msk.bf16.vlgmr.msra.gmra.mrb[64].mxu0 %vm87_vm1, %v2451_v21  ;;  %v4069_v21 = vld [vmem:[%s4989_s14 + $0x100] sm:$0x7] }
  0xb5   : > { %4563 = vmatpush3.bf16.msra.mxu0 %v4813_v22  ;;  %4566 = vmatprep.mubr.msk.bf16.mxu0 %vm4925_vm0, %v4924_v2  ;;  %v4839_v22 = vld [vmem:[#allocation2 + $0x120] sm:$0xff]   ;;  %v4070_v26 = vcombine.low %v5306_v53, %v4069_v21 }
  0xb6   : > { %4564 = vmatprep.subr.bf16.mxu0 %v4924_v2  ;;  %4573 = vmatpush3.bf16.msra.mxu1 %v4816_v25  ;;  %v3268_v25 = vshll.u32 %v5334_v16, 16 }
  0xb7   : > { %4586 = vmatprep.subr.bf16.mxu1 %v4924_v2 }
  0xb8   : > { %v3270_v31 = vrot.slane %v3268_v25, 2 }
  0xb9   : > { %4565 = vmatpush3.bf16.msra.mxu0 %v4815_v29  ;;  %4575 = vmatmul.mubr.msk.bf16.vlgmr.msra.gmra.mrb[68].mxu1 %vm87_vm1, %v4040_v30  ;;  %v4841_v29 = vld [vmem:[#allocation2 + $0x128] sm:$0xff]   ;;  %v3266_v30 = vor.u32 %v3265_v24, %v3262_v23 }
  0xba   : > { %4578 = vmatprep.subr.bf16.mxu0 %v4924_v2  ;;  %4587 = vmatpush3.bf16.msra.mxu1 %v4820_v33  ;;  %v4840_v33 = vld [vmem:[#allocation2 + $0x118] sm:$0xff]  }
  0xbb   : > { %4588 = vmatprep.subr.bf16.mxu1 %v4924_v2  ;;  %4590 = vmatprep.mubr.msk.bf16.mxu1 %vm4925_vm0, %v4924_v2  ;;  %v3271_v34 = vsel %vm275_vm2, %v3266_v30, %v3270_v31 }
  0xbc   : > { %4567 = vmatmul.mubr.msk.bf16.vlgmr.msra.gmra.mrb[68].mxu0 %vm87_vm1, %v2606_v38  ;;  %v4845_v38 = vld [vmem:[#allocation2 + $0x130] sm:$0xff]  }
  0xbd   : > { %4579 = vmatpush3.bf16.msra.mxu0 %v4819_v39  ;;  %4582 = vmatprep.mubr.msk.bf16.mxu0 %vm4925_vm0, %v4924_v2  ;;  %v4093_v39 = vcombine.low %v4092_v36, %v5321_v3 }
  0xbe   : > { %4580 = vmatprep.subr.bf16.mxu0 %v4924_v2  ;;  %4589 = vmatpush3.bf16.msra.mxu1 %v4822_v42  ;;  %v4098_v42 = vld [vmem:[%s4989_s14 + $0x108] sm:$0xf] }
  0xbf   : > { %4602 = vmatprep.subr.bf16.mxu1 %v4924_v2  ;;  %v4100_v46 = vcombine.low %v4098_v42, %v4099_v43 }
  0xc1   : > { %4581 = vmatpush3.bf16.msra.mxu0 %v4821_v44  ;;  %4591 = vmatmul.mubr.msk.bf16.vlgmr.msra.gmra.mrb[72].mxu1 %vm87_vm1, %v2818_v47  ;;  %v4105_v44 = vcombine.low %v4098_v42, %v4104_v40  ;;  %v3338_v47 = vrot.slane %v4093_v39, 2 }
  0xc2   : > { %4594 = vmatprep.subr.bf16.mxu0 %v4924_v2  ;;  %4603 = vmatpush3.bf16.msra.mxu1 %v4826_v51  ;;  %v4114_v51 = vld [vmem:[%s4989_s14 + $0x108] sm:$0xe] }
  0xc3   : > { %4604 = vmatprep.subr.bf16.mxu1 %v4924_v2  ;;  %4606 = vmatprep.mubr.msk.bf16.mxu1 %vm4925_vm0, %v4924_v2  ;;  %v3482_v53 = vshll.u32 %v4105_v44, 16  ;;  %v3340_v54 = vsel %vm356_vm3, %v3338_v47, %v3339_v48  ;;  %v4117_v57 = vcombine.low %v4114_v51, %v4115_v52 }
  0xc4   : > { %4583 = vmatmul.mubr.msk.bf16.vlgmr.msra.gmra.mrb[72].mxu0 %vm87_vm1, %v2751_v55  ;;  %v4851_v55 = vld [vmem:[#allocation2 + $0x150] sm:$0xff]  }
  0xc5   : > { %4595 = vmatpush3.bf16.msra.mxu0 %v4825_v56  ;;  %4598 = vmatprep.mubr.msk.bf16.mxu0 %vm4925_vm0, %v4924_v2  ;;  %v4110_v56 = vcombine.low %v4109_v50, %v4104_v40  ;;  %v3484_v62 = vrot.slane %v3482_v53, 1  ;;  %v3627_v3 = vshrl.u32 %v4117_v57, 16 }
  0xc6   : > { %4596 = vmatprep.subr.bf16.mxu0 %v4924_v2  ;;  %4605 = vmatpush3.bf16.msra.mxu1 %v4828_v61  ;;  %v3480_v61 = vshrl.u32 %v4105_v44, 16 }
  0xc7   : > { %4618 = vmatprep.subr.bf16.mxu1 %v4924_v2  ;;  %v3552_v63 = vrot.slane %v4110_v56, 1 }
  0xc8   : > { %v3485_v7 = vor.u32 %v3484_v62, %v3480_v61 }
  0xc9   : > { %4597 = vmatpush3.bf16.msra.mxu0 %v4827_v4  ;;  %4607 = vmatmul.mubr.msk.bf16.vlgmr.msra.gmra.mrb[76].mxu1 %vm87_vm1, %v2973_v8  ;;  %v3630_v4 = vshll.u32 %v4117_v57, 16  ;;  %v4857_v8 = vld [vmem:[#allocation2 + $0x170] sm:$0xff]  }
  0xca   : > { %4610 = vmatprep.subr.bf16.mxu0 %v4924_v2  ;;  %4619 = vmatpush3.bf16.msra.mxu1 %v4833_v9  ;;  %v3629_v9 = vrot.slane %v3627_v3, 1 }
  0xcb   : > { %4620 = vmatprep.subr.bf16.mxu1 %v4924_v2  ;;  %4622 = vmatprep.mubr.msk.bf16.mxu1 %vm4925_vm0, %v4924_v2  ;;  %v3632_v10 = vrot.slane %v3630_v4, 2 }
  0xcc   : > { %4599 = vmatmul.mubr.msk.bf16.vlgmr.msra.gmra.mrb[76].mxu0 %vm87_vm1, %v2904_v11  ;;  %v3635_v11 = vshll.u32 %v4862_v1, 16 }
  0xcd   : > { %4611 = vmatpush3.bf16.msra.mxu0 %v4832_v12  ;;  %4614 = vmatprep.mubr.msk.bf16.mxu0 %vm4925_vm0, %v4924_v2  ;;  %v4860_v12 = vld [vmem:[#allocation2 + $0x188] sm:$0xff]   ;;  %v3633_v16 = vor.u32 %v3632_v10, %v3629_v9 }
  0xce   : > { %4612 = vmatprep.subr.bf16.mxu0 %v4924_v2  ;;  %4621 = vmatpush3.bf16.msra.mxu1 %v4835_v15  ;;  %v4859_v15 = vld [vmem:[#allocation2 + $0x178] sm:$0xff]   ;;  %v3637_v17 = vrot.slane %v3635_v11, 2 }
  0xcf   : > { %4634 = vmatprep.subr.bf16.mxu1 %v4924_v2 }
  0xd1   : > { %4613 = vmatpush3.bf16.msra.mxu0 %v4834_v19  ;;  %4623 = vmatmul.mubr.msk.bf16.vlgmr.msra.gmra.mrb[80].mxu1 %vm87_vm1, %v3118_v20  ;;  %v3638_v19 = vsel %vm275_vm2, %v3633_v16, %v3637_v17 }
  0xd2   : > { %4626 = vmatprep.subr.bf16.mxu0 %v4924_v2  ;;  %4635 = vmatpush3.bf16.msra.mxu1 %v4839_v22 }
  0xd3   : > { %4636 = vmatprep.subr.bf16.mxu1 %v4924_v2  ;;  %4638 = vmatprep.mubr.msk.bf16.mxu1 %vm4925_vm0, %v4924_v2 }
  0xd4   : > { %4615 = vmatmul.mubr.msk.bf16.vlgmr.msra.gmra.mrb[80].mxu0 %vm87_vm1, %v4070_v26 }
  0xd5   : > { %4627 = vmatpush3.bf16.msra.mxu0 %v4838_v27  ;;  %4630 = vmatprep.mubr.msk.bf16.mxu0 %vm4925_vm0, %v4924_v2 }
  0xd6   : > { %4628 = vmatprep.subr.bf16.mxu0 %v4924_v2  ;;  %4637 = vmatpush3.bf16.msra.mxu1 %v4841_v29 }
  0xd7   : > { %4650 = vmatprep.subr.bf16.mxu1 %v4924_v2 }
  0xd9   : > { %4629 = vmatpush3.bf16.msra.mxu0 %v4840_v33  ;;  %4639 = vmatmul.mubr.msk.bf16.vlgmr.msra.gmra.mrb[84].mxu1 %vm87_vm1, %v3271_v34 }
  0xda   : > { %4642 = vmatprep.subr.bf16.mxu0 %v4924_v2  ;;  %4651 = vmatpush3.bf16.msra.mxu1 %v4846_v35 }
  0xdb   : > { %4652 = vmatprep.subr.bf16.mxu1 %v4924_v2  ;;  %4654 = vmatprep.mubr.msk.bf16.mxu1 %vm4925_vm0, %v4924_v2 }
  0xdc   : > { %4631 = vmatmul.mubr.msk.bf16.vlgmr.msra.gmra.mrb[84].mxu0 %vm87_vm1, %v3185_v37 }
  0xdd   : > { %4643 = vmatpush3.bf16.msra.mxu0 %v4845_v38  ;;  %4646 = vmatprep.mubr.msk.bf16.mxu0 %vm4925_vm0, %v4924_v2 }
  0xde   : > { %4644 = vmatprep.subr.bf16.mxu0 %v4924_v2  ;;  %4653 = vmatpush3.bf16.msra.mxu1 %v4848_v41 }
  0xdf   : > { %4666 = vmatprep.subr.bf16.mxu1 %v4924_v2 }
  0xe1   : > { %4645 = vmatpush3.bf16.msra.mxu0 %v4847_v45  ;;  %4655 = vmatmul.mubr.msk.bf16.vlgmr.msra.gmra.mrb[88].mxu1 %vm87_vm1, %v4100_v46 }
  0xe2   : > { %4658 = vmatprep.subr.bf16.mxu0 %v4924_v2  ;;  %4667 = vmatpush3.bf16.msra.mxu1 %v4852_v49 }
  0xe3   : > { %4668 = vmatprep.subr.bf16.mxu1 %v4924_v2  ;;  %4670 = vmatprep.mubr.msk.bf16.mxu1 %vm4925_vm0, %v4924_v2 }
  0xe4   : > { %4647 = vmatmul.mubr.msk.bf16.vlgmr.msra.gmra.mrb[88].mxu0 %vm87_vm1, %v3340_v54 }
  0xe5   : > { %4659 = vmatpush3.bf16.msra.mxu0 %v4851_v55  ;;  %4662 = vmatprep.mubr.msk.bf16.mxu0 %vm4925_vm0, %v4924_v2 }
  0xe6   : > { %4660 = vmatprep.subr.bf16.mxu0 %v4924_v2  ;;  %4669 = vmatpush3.bf16.msra.mxu1 %v4854_v58 }
  0xe7   : > { %4682 = vmatprep.subr.bf16.mxu1 %v4924_v2 }
  0xe9   : > { %4661 = vmatpush3.bf16.msra.mxu0 %v4853_v60  ;;  %4671 = vmatmul.mubr.msk.bf16.vlgmr.msra.gmra.mrb[92].mxu1 %vm87_vm1, %v3552_v63 }
  0xea   : > { %4674 = vmatprep.subr.bf16.mxu0 %v4924_v2  ;;  %4683 = vmatpush3.bf16.msra.mxu1 %v4858_v5 }
  0xeb   : > { %4684 = vmatprep.subr.bf16.mxu1 %v4924_v2  ;;  %4686 = vmatprep.mubr.msk.bf16.mxu1 %vm4925_vm0, %v4924_v2 }
  0xec   : > { %4663 = vmatmul.mubr.msk.bf16.vlgmr.msra.gmra.mrb[92].mxu0 %vm87_vm1, %v3485_v7 }
  0xed   : > { %4675 = vmatpush3.bf16.msra.mxu0 %v4857_v8  ;;  %4678 = vmatprep.mubr.msk.bf16.mxu0 %vm4925_vm0, %v4924_v2 }
  0xee   : > { %4676 = vmatprep.subr.bf16.mxu0 %v4924_v2  ;;  %4685 = vmatpush3.bf16.msra.mxu1 %v4860_v12 }
  0xf1   : > { %4677 = vmatpush3.bf16.msra.mxu0 %v4859_v15  ;;  %4687 = vmatmul.mubr.msk.bf16.vlgmr.msra.gmra.mrb[96].mxu1 %vm87_vm1, %v3707_v18 }
  0xf4   : > { %4679 = vmatmul.mubr.msk.bf16.vlgmr.msra.gmra.mrb[96].mxu0 %vm87_vm1, %v3638_v19 }
 0x104   : > { %v184_v20 = vpop.f32.mrb[0].mxu1 }
 0x105   : > { %v4304_v21 = vpop.f32.mrb[1].mxu1 }
 0x106   : > { %v187_v22 = vpop.f32.mrb[2].mxu1 }
 0x107   : > { %v4305_v23 = vpop.f32.mrb[3].mxu1  ;;  %v125_v24 = vpop.f32.mrb[0].mxu0 }
 0x108   : > { %v185_v25 = vadd.f32 %v184_v20, %v125_v24  ;;  %v4296_v26 = vpop.f32.mrb[1].mxu0 }
 0x109   : > { %v128_v27 = vpop.f32.mrb[2].mxu0 }
 0x10a   : > { %v188_v28 = vadd.f32 %v187_v22, %v128_v27  ;;  %v4297_v2 = vpop.f32.mrb[3].mxu0 }
 0x10c   : > { %v338_v29 = vpop.f32.mrb[4].mxu1 }
 0x10d   : > { %v4320_v30 = vpop.f32.mrb[5].mxu1 }
 0x10e   : > { %v341_v31 = vpop.f32.mrb[6].mxu1 }
 0x10f   : > { %v250_v32 = vpop.f32.mrb[4].mxu0  ;;  %v4321_v33 = vpop.f32.mrb[7].mxu1 }
 0x110   : > { %v257_v34 = vadd.f32 %v250_v32, %v185_v25  ;;  %v4312_v35 = vpop.f32.mrb[5].mxu0 }
 0x111   : > { %v253_v36 = vpop.f32.mrb[6].mxu0 }
 0x112   : > { %v258_v37 = vadd.f32 %v253_v36, %v188_v28  ;;  %v4313_v38 = vpop.f32.mrb[7].mxu0  ;;  %v345_v39 = vadd.f32 %v338_v29, %v257_v34 }
 0x114   : > { %v483_v40 = vpop.f32.mrb[8].mxu1  ;;  %v346_v41 = vadd.f32 %v341_v31, %v258_v37 }
 0x115   : > { %v4336_v42 = vpop.f32.mrb[9].mxu1 }
 0x116   : > { %v486_v43 = vpop.f32.mrb[10].mxu1 }
 0x117   : > { %v409_v44 = vpop.f32.mrb[8].mxu0  ;;  %v4337_v45 = vpop.f32.mrb[11].mxu1 }
 0x118   : > { %v416_v46 = vadd.f32 %v409_v44, %v345_v39  ;;  %v4328_v47 = vpop.f32.mrb[9].mxu0 }
 0x119   : > { %v412_v48 = vpop.f32.mrb[10].mxu0 }
 0x11a   : > { %v417_v49 = vadd.f32 %v412_v48, %v346_v41  ;;  %v4329_v50 = vpop.f32.mrb[11].mxu0  ;;  %v490_v51 = vadd.f32 %v483_v40, %v416_v46 }
 0x11c   : > { %v625_v52 = vpop.f32.mrb[12].mxu1  ;;  %v491_v53 = vadd.f32 %v486_v43, %v417_v49 }
 0x11d   : > { %v4352_v54 = vpop.f32.mrb[13].mxu1 }
 0x11e   : > { %v628_v55 = vpop.f32.mrb[14].mxu1 }
 0x11f   : > { %v557_v56 = vpop.f32.mrb[12].mxu0  ;;  %v4353_v57 = vpop.f32.mrb[15].mxu1 }
 0x120   : > { %v564_v58 = vadd.f32 %v557_v56, %v490_v51  ;;  %v4344_v59 = vpop.f32.mrb[13].mxu0 }
 0x121   : > { %v560_v60 = vpop.f32.mrb[14].mxu0 }
 0x122   : > { %v565_v61 = vadd.f32 %v560_v60, %v491_v53  ;;  %v4345_v62 = vpop.f32.mrb[15].mxu0  ;;  %v632_v63 = vadd.f32 %v625_v52, %v564_v58 }
 0x124   : > { %v782_v1 = vpop.f32.mrb[16].mxu1  ;;  %v633_v3 = vadd.f32 %v628_v55, %v565_v61 }
 0x125   : > { %v4368_v4 = vpop.f32.mrb[17].mxu1 }
 0x126   : > { %v785_v5 = vpop.f32.mrb[18].mxu1 }
 0x127   : > { %v712_v6 = vpop.f32.mrb[16].mxu0  ;;  %v4369_v7 = vpop.f32.mrb[19].mxu1 }
 0x128   : > { %v719_v8 = vadd.f32 %v712_v6, %v632_v63  ;;  %v4360_v9 = vpop.f32.mrb[17].mxu0 }
 0x129   : > { %v715_v10 = vpop.f32.mrb[18].mxu0 }
 0x12a   : > { %v720_v11 = vadd.f32 %v715_v10, %v633_v3  ;;  %v4361_v12 = vpop.f32.mrb[19].mxu0  ;;  %v789_v13 = vadd.f32 %v782_v1, %v719_v8 }
 0x12c   : > { %v930_v14 = vpop.f32.mrb[20].mxu1  ;;  %v790_v15 = vadd.f32 %v785_v5, %v720_v11 }
 0x12d   : > { %v4384_v16 = vpop.f32.mrb[21].mxu1 }
 0x12e   : > { %v933_v17 = vpop.f32.mrb[22].mxu1 }
 0x12f   : > { %v856_v18 = vpop.f32.mrb[20].mxu0  ;;  %v4385_v19 = vpop.f32.mrb[23].mxu1 }
 0x130   : > { %v863_v20 = vadd.f32 %v856_v18, %v789_v13  ;;  %v4376_v21 = vpop.f32.mrb[21].mxu0 }
 0x131   : > { %v859_v22 = vpop.f32.mrb[22].mxu0 }
 0x132   : > { %v864_v23 = vadd.f32 %v859_v22, %v790_v15  ;;  %v4377_v24 = vpop.f32.mrb[23].mxu0  ;;  %v937_v25 = vadd.f32 %v930_v14, %v863_v20 }
 0x134   : > { %v1085_v26 = vpop.f32.mrb[24].mxu1  ;;  %v938_v27 = vadd.f32 %v933_v17, %v864_v23 }
 0x135   : > { %v4400_v28 = vpop.f32.mrb[25].mxu1 }
 0x136   : > { %v1088_v2 = vpop.f32.mrb[26].mxu1 }
 0x137   : > { %v998_v29 = vpop.f32.mrb[24].mxu0  ;;  %v4401_v30 = vpop.f32.mrb[27].mxu1 }
 0x138   : > { %v1005_v31 = vadd.f32 %v998_v29, %v937_v25  ;;  %v4392_v32 = vpop.f32.mrb[25].mxu0 }
 0x139   : > { %v1001_v33 = vpop.f32.mrb[26].mxu0 }
 0x13a   : > { %v1006_v34 = vadd.f32 %v1001_v33, %v938_v27  ;;  %v4393_v35 = vpop.f32.mrb[27].mxu0  ;;  %v1092_v36 = vadd.f32 %v1085_v26, %v1005_v31 }
 0x13c   : > { %v1229_v37 = vpop.f32.mrb[28].mxu1  ;;  %v1093_v38 = vadd.f32 %v1088_v2, %v1006_v34 }
 0x13d   : > { %v4416_v39 = vpop.f32.mrb[29].mxu1 }
 0x13e   : > { %v1232_v40 = vpop.f32.mrb[30].mxu1 }
 0x13f   : > { %v1155_v41 = vpop.f32.mrb[28].mxu0  ;;  %v4417_v42 = vpop.f32.mrb[31].mxu1 }
 0x140   : > { %v1162_v43 = vadd.f32 %v1155_v41, %v1092_v36  ;;  %v4408_v44 = vpop.f32.mrb[29].mxu0 }
 0x141   : > { %v1158_v45 = vpop.f32.mrb[30].mxu0 }
 0x142   : > { %v1163_v46 = vadd.f32 %v1158_v45, %v1093_v38  ;;  %v4409_v47 = vpop.f32.mrb[31].mxu0  ;;  %v1236_v48 = vadd.f32 %v1229_v37, %v1162_v43 }
 0x144   : > { %v1371_v49 = vpop.f32.mrb[32].mxu1  ;;  %v1237_v50 = vadd.f32 %v1232_v40, %v1163_v46 }
 0x145   : > { %v4432_v51 = vpop.f32.mrb[33].mxu1 }
 0x146   : > { %v1374_v52 = vpop.f32.mrb[34].mxu1 }
 0x147   : > { %v1303_v53 = vpop.f32.mrb[32].mxu0  ;;  %v4433_v54 = vpop.f32.mrb[35].mxu1 }
 0x148   : > { %v1310_v55 = vadd.f32 %v1303_v53, %v1236_v48  ;;  %v4424_v56 = vpop.f32.mrb[33].mxu0 }
 0x149   : > { %v1306_v57 = vpop.f32.mrb[34].mxu0 }
 0x14a   : > { %v1311_v58 = vadd.f32 %v1306_v57, %v1237_v50  ;;  %v4425_v59 = vpop.f32.mrb[35].mxu0  ;;  %v1378_v60 = vadd.f32 %v1371_v49, %v1310_v55 }
 0x14c   : > { %v1528_v61 = vpop.f32.mrb[36].mxu1  ;;  %v1379_v62 = vadd.f32 %v1374_v52, %v1311_v58 }
 0x14d   : > { %v4448_v63 = vpop.f32.mrb[37].mxu1 }
 0x14e   : > { %v1531_v1 = vpop.f32.mrb[38].mxu1 }
 0x14f   : > { %v1458_v3 = vpop.f32.mrb[36].mxu0  ;;  %v4449_v4 = vpop.f32.mrb[39].mxu1 }
 0x150   : > { %v1465_v5 = vadd.f32 %v1458_v3, %v1378_v60  ;;  %v4440_v6 = vpop.f32.mrb[37].mxu0 }
 0x151   : > { %v1461_v7 = vpop.f32.mrb[38].mxu0 }
 0x152   : > { %v1466_v8 = vadd.f32 %v1461_v7, %v1379_v62  ;;  %v4441_v9 = vpop.f32.mrb[39].mxu0  ;;  %v1535_v10 = vadd.f32 %v1528_v61, %v1465_v5 }
 0x154   : > { %v1676_v11 = vpop.f32.mrb[40].mxu1  ;;  %v1536_v12 = vadd.f32 %v1531_v1, %v1466_v8 }
 0x155   : > { %v4464_v13 = vpop.f32.mrb[41].mxu1 }
 0x156   : > { %v1679_v14 = vpop.f32.mrb[42].mxu1 }
 0x157   : > { %v1602_v15 = vpop.f32.mrb[40].mxu0  ;;  %v4465_v16 = vpop.f32.mrb[43].mxu1 }
 0x158   : > { %v1609_v17 = vadd.f32 %v1602_v15, %v1535_v10  ;;  %v4456_v18 = vpop.f32.mrb[41].mxu0 }
 0x159   : > { %v1605_v19 = vpop.f32.mrb[42].mxu0 }
 0x15a   : > { %v1610_v20 = vadd.f32 %v1605_v19, %v1536_v12  ;;  %v4457_v21 = vpop.f32.mrb[43].mxu0  ;;  %v1683_v22 = vadd.f32 %v1676_v11, %v1609_v17 }
 0x15c   : > { %v1831_v23 = vpop.f32.mrb[44].mxu1  ;;  %v1684_v24 = vadd.f32 %v1679_v14, %v1610_v20 }
 0x15d   : > { %v4480_v25 = vpop.f32.mrb[45].mxu1 }
 0x15e   : > { %v1834_v26 = vpop.f32.mrb[46].mxu1 }
 0x15f   : > { %v1744_v27 = vpop.f32.mrb[44].mxu0  ;;  %v4481_v28 = vpop.f32.mrb[47].mxu1 }
 0x160   : > { %v1751_v2 = vadd.f32 %v1744_v27, %v1683_v22  ;;  %v4472_v29 = vpop.f32.mrb[45].mxu0 }
 0x161   : > { %v1747_v30 = vpop.f32.mrb[46].mxu0 }
 0x162   : > { %v1752_v31 = vadd.f32 %v1747_v30, %v1684_v24  ;;  %v4473_v32 = vpop.f32.mrb[47].mxu0  ;;  %v1838_v33 = vadd.f32 %v1831_v23, %v1751_v2 }
 0x164   : > { %v2010_v34 = vpop.f32.mrb[48].mxu1  ;;  %v1839_v35 = vadd.f32 %v1834_v26, %v1752_v31 }
 0x165   : > { %v4496_v36 = vpop.f32.mrb[49].mxu1 }
 0x166   : > { %v2013_v37 = vpop.f32.mrb[50].mxu1 }
 0x167   : > { %v1901_v38 = vpop.f32.mrb[48].mxu0  ;;  %v4497_v39 = vpop.f32.mrb[51].mxu1 }
 0x168   : > { %v1908_v40 = vadd.f32 %v1901_v38, %v1838_v33  ;;  %v4488_v41 = vpop.f32.mrb[49].mxu0 }
 0x169   : > { %v1904_v42 = vpop.f32.mrb[50].mxu0 }
 0x16a   : > { %v1916_v43 = vadd.f32 %v4970_v0, %v1908_v40  ;;  %v1909_v44 = vadd.f32 %v1904_v42, %v1839_v35  ;;  %v4489_v45 = vpop.f32.mrb[51].mxu0 }
 0x16c   : > { %v1918_v46 = vmax.f32 %v1916_v43, 0.0  ;;  %v1917_v47 = vadd.f32 %v4970_v0, %v1909_v44  ;;  %v2134_v48 = vpop.f32.mrb[52].mxu1 }
 0x16d   : > { %v4512_v49 = vpop.f32.mrb[53].mxu1 }
 0x16e   : > { %v4134_v50 = vpack.c.bf16 %v1918_v46, %v1918_v46  ;;  %v1919_v51 = vmax.f32 %v1917_v47, 0.0  ;;  %v2137_v52 = vpop.f32.mrb[54].mxu1 }
 0x16f   : > { %v2069_v53 = vpop.f32.mrb[52].mxu0  ;;  %v4513_v54 = vpop.f32.mrb[55].mxu1 }
 0x170   : > { %1932 = vst.msk [vmem:[%s5411_s18] sm:$0xf] %vm1931_vm4, %v4134_v50  ;;  %v4135_v55 = vpack.c.bf16 %v1919_v51, %v1919_v51  ;;  %v2070_v56 = vadd.f32 %v2069_v53, %v2010_v34  ;;  %v4504_v57 = vpop.f32.mrb[53].mxu0 }
 0x171   : > { %v2072_v58 = vpop.f32.mrb[54].mxu0 }
 0x172   : > { %1934 = vst.msk [vmem:[%s5411_s18 + $0x4] sm:$0x7] %vm1933_vm5, %v4135_v55  ;;  %v2073_v59 = vadd.f32 %v2072_v58, %v2013_v37  ;;  %v4505_v60 = vpop.f32.mrb[55].mxu0  ;;  %v2141_v61 = vadd.f32 %v2134_v48, %v2070_v56 }
 0x174   : > { %v2289_v62 = vpop.f32.mrb[56].mxu1  ;;  %v2142_v63 = vadd.f32 %v2137_v52, %v2073_v59 }
 0x175   : > { %v4528_v1 = vpop.f32.mrb[57].mxu1 }
 0x176   : > { %v2292_v3 = vpop.f32.mrb[58].mxu1 }
 0x177   : > { %v2220_v4 = vpop.f32.mrb[56].mxu0  ;;  %v4529_v5 = vpop.f32.mrb[59].mxu1 }
 0x178   : > { %v2227_v6 = vadd.f32 %v2220_v4, %v2141_v61  ;;  %v4520_v7 = vpop.f32.mrb[57].mxu0 }
 0x179   : > { %v2223_v8 = vpop.f32.mrb[58].mxu0 }
 0x17a   : > { %v2228_v9 = vadd.f32 %v2223_v8, %v2142_v63  ;;  %v4521_v10 = vpop.f32.mrb[59].mxu0  ;;  %v2296_v11 = vadd.f32 %v2289_v62, %v2227_v6 }
 0x17c   : > { %v2434_v12 = vpop.f32.mrb[60].mxu1  ;;  %v2297_v13 = vadd.f32 %v2292_v3, %v2228_v9 }
 0x17d   : > { %v4544_v14 = vpop.f32.mrb[61].mxu1 }
 0x17e   : > { %v2437_v15 = vpop.f32.mrb[62].mxu1 }
 0x17f   : > { %v2361_v16 = vpop.f32.mrb[60].mxu0  ;;  %v4545_v17 = vpop.f32.mrb[63].mxu1 }
 0x180   : > { %v2368_v18 = vadd.f32 %v2361_v16, %v2296_v11  ;;  %v4536_v19 = vpop.f32.mrb[61].mxu0 }
 0x181   : > { %v2364_v20 = vpop.f32.mrb[62].mxu0 }
 0x182   : > { %v2369_v21 = vadd.f32 %v2364_v20, %v2297_v13  ;;  %v4537_v22 = vpop.f32.mrb[63].mxu0  ;;  %v2441_v23 = vadd.f32 %v2434_v12, %v2368_v18 }
 0x184   : > { %v2587_v24 = vpop.f32.mrb[64].mxu1  ;;  %v2442_v25 = vadd.f32 %v2437_v15, %v2369_v21 }
 0x185   : > { %v4560_v26 = vpop.f32.mrb[65].mxu1 }
 0x186   : > { %v2590_v27 = vpop.f32.mrb[66].mxu1 }
 0x187   : > { %v2501_v28 = vpop.f32.mrb[64].mxu0  ;;  %v4561_v2 = vpop.f32.mrb[67].mxu1 }
 0x188   : > { %v2508_v29 = vadd.f32 %v2501_v28, %v2441_v23  ;;  %v4552_v30 = vpop.f32.mrb[65].mxu0 }
 0x189   : > { %v2504_v31 = vpop.f32.mrb[66].mxu0 }
 0x18a   : > { %v2509_v32 = vadd.f32 %v2504_v31, %v2442_v25  ;;  %v4553_v33 = vpop.f32.mrb[67].mxu0  ;;  %v2594_v34 = vadd.f32 %v2587_v24, %v2508_v29 }
 0x18c   : > { %v2728_v35 = vpop.f32.mrb[68].mxu1  ;;  %v2595_v36 = vadd.f32 %v2590_v27, %v2509_v32 }
 0x18d   : > { %v4576_v37 = vpop.f32.mrb[69].mxu1 }
 0x18e   : > { %v2731_v38 = vpop.f32.mrb[70].mxu1 }
 0x18f   : > { %v2656_v39 = vpop.f32.mrb[68].mxu0  ;;  %v4577_v40 = vpop.f32.mrb[71].mxu1 }
 0x190   : > { %v2663_v41 = vadd.f32 %v2656_v39, %v2594_v34  ;;  %v4568_v42 = vpop.f32.mrb[69].mxu0 }
 0x191   : > { %v2659_v43 = vpop.f32.mrb[70].mxu0 }
 0x192   : > { %v2664_v44 = vadd.f32 %v2659_v43, %v2595_v36  ;;  %v4569_v45 = vpop.f32.mrb[71].mxu0  ;;  %v2735_v46 = vadd.f32 %v2728_v35, %v2663_v41 }
 0x194   : > { %v2868_v47 = vpop.f32.mrb[72].mxu1  ;;  %v2736_v48 = vadd.f32 %v2731_v38, %v2664_v44 }
 0x195   : > { %v4592_v49 = vpop.f32.mrb[73].mxu1 }
 0x196   : > { %v2871_v50 = vpop.f32.mrb[74].mxu1 }
 0x197   : > { %v2801_v51 = vpop.f32.mrb[72].mxu0  ;;  %v4593_v52 = vpop.f32.mrb[75].mxu1 }
 0x198   : > { %v2808_v53 = vadd.f32 %v2801_v51, %v2735_v46  ;;  %v4584_v54 = vpop.f32.mrb[73].mxu0 }
 0x199   : > { %v2804_v55 = vpop.f32.mrb[74].mxu0 }
 0x19a   : > { %v2809_v56 = vadd.f32 %v2804_v55, %v2736_v48  ;;  %v4585_v57 = vpop.f32.mrb[75].mxu0  ;;  %v2875_v58 = vadd.f32 %v2868_v47, %v2808_v53 }
 0x19c   : > { %v3023_v59 = vpop.f32.mrb[76].mxu1  ;;  %v2876_v60 = vadd.f32 %v2871_v50, %v2809_v56 }
 0x19d   : > { %v4608_v61 = vpop.f32.mrb[77].mxu1 }
 0x19e   : > { %v3026_v62 = vpop.f32.mrb[78].mxu1 }
 0x19f   : > { %v2954_v63 = vpop.f32.mrb[76].mxu0  ;;  %v4609_v1 = vpop.f32.mrb[79].mxu1 }
 0x1a0   : > { %v2961_v3 = vadd.f32 %v2954_v63, %v2875_v58  ;;  %v4600_v4 = vpop.f32.mrb[77].mxu0 }
 0x1a1   : > { %v2957_v5 = vpop.f32.mrb[78].mxu0 }
 0x1a2   : > { %v2962_v6 = vadd.f32 %v2957_v5, %v2876_v60  ;;  %v4601_v7 = vpop.f32.mrb[79].mxu0  ;;  %v3030_v8 = vadd.f32 %v3023_v59, %v2961_v3 }
 0x1a4   : > { %v3168_v9 = vpop.f32.mrb[80].mxu1  ;;  %v3031_v10 = vadd.f32 %v3026_v62, %v2962_v6 }
 0x1a5   : > { %v4624_v11 = vpop.f32.mrb[81].mxu1 }
 0x1a6   : > { %v3171_v12 = vpop.f32.mrb[82].mxu1 }
 0x1a7   : > { %v3095_v13 = vpop.f32.mrb[80].mxu0  ;;  %v4625_v14 = vpop.f32.mrb[83].mxu1 }
 0x1a8   : > { %v3102_v15 = vadd.f32 %v3095_v13, %v3030_v8  ;;  %v4616_v16 = vpop.f32.mrb[81].mxu0 }
 0x1a9   : > { %v3098_v17 = vpop.f32.mrb[82].mxu0 }
 0x1aa   : > { %v3103_v18 = vadd.f32 %v3098_v17, %v3031_v10  ;;  %v4617_v19 = vpop.f32.mrb[83].mxu0  ;;  %v3175_v20 = vadd.f32 %v3168_v9, %v3102_v15 }
 0x1ac   : > { %v3321_v21 = vpop.f32.mrb[84].mxu1  ;;  %v3176_v22 = vadd.f32 %v3171_v12, %v3103_v18 }
 0x1ad   : > { %v4640_v23 = vpop.f32.mrb[85].mxu1 }
 0x1ae   : > { %v3324_v24 = vpop.f32.mrb[86].mxu1 }
 0x1af   : > { %v3235_v25 = vpop.f32.mrb[84].mxu0  ;;  %v4641_v26 = vpop.f32.mrb[87].mxu1 }
 0x1b0   : > { %v3242_v27 = vadd.f32 %v3235_v25, %v3175_v20  ;;  %v4632_v28 = vpop.f32.mrb[85].mxu0 }
 0x1b1   : > { %v3238_v2 = vpop.f32.mrb[86].mxu0 }
 0x1b2   : > { %v3243_v29 = vadd.f32 %v3238_v2, %v3176_v22  ;;  %v4633_v30 = vpop.f32.mrb[87].mxu0  ;;  %v3328_v31 = vadd.f32 %v3321_v21, %v3242_v27 }
 0x1b4   : > { %v3462_v32 = vpop.f32.mrb[88].mxu1  ;;  %v3329_v33 = vadd.f32 %v3324_v24, %v3243_v29 }
 0x1b5   : > { %v4656_v34 = vpop.f32.mrb[89].mxu1 }
 0x1b6   : > { %v3465_v35 = vpop.f32.mrb[90].mxu1 }
 0x1b7   : > { %v3390_v36 = vpop.f32.mrb[88].mxu0  ;;  %v4657_v37 = vpop.f32.mrb[91].mxu1 }
 0x1b8   : > { %v3397_v38 = vadd.f32 %v3390_v36, %v3328_v31  ;;  %v4648_v39 = vpop.f32.mrb[89].mxu0 }
 0x1b9   : > { %v3393_v40 = vpop.f32.mrb[90].mxu0 }
 0x1ba   : > { %v3398_v41 = vadd.f32 %v3393_v40, %v3329_v33  ;;  %v4649_v42 = vpop.f32.mrb[91].mxu0  ;;  %v3469_v43 = vadd.f32 %v3462_v32, %v3397_v38 }
 0x1bc   : > { %v3602_v44 = vpop.f32.mrb[92].mxu1  ;;  %v3470_v45 = vadd.f32 %v3465_v35, %v3398_v41 }
 0x1bd   : > { %v4672_v46 = vpop.f32.mrb[93].mxu1 }
 0x1be   : > { %v3605_v47 = vpop.f32.mrb[94].mxu1 }
 0x1bf   : > { %v3535_v48 = vpop.f32.mrb[92].mxu0  ;;  %v4673_v49 = vpop.f32.mrb[95].mxu1 }
 0x1c0   : > { %v3542_v50 = vadd.f32 %v3535_v48, %v3469_v43  ;;  %v4664_v51 = vpop.f32.mrb[93].mxu0 }
 0x1c1   : > { %v3538_v52 = vpop.f32.mrb[94].mxu0 }
 0x1c2   : > { %v3543_v53 = vadd.f32 %v3538_v52, %v3470_v45  ;;  %v4665_v54 = vpop.f32.mrb[95].mxu0  ;;  %v3609_v55 = vadd.f32 %v3602_v44, %v3542_v50 }
 0x1c4   : > { %v3757_v56 = vpop.f32.mrb[96].mxu1  ;;  %v3610_v57 = vadd.f32 %v3605_v47, %v3543_v53 }
 0x1c5   : > { %v4688_v58 = vpop.f32.mrb[97].mxu1 }
 0x1c6   : > { %v3760_v59 = vpop.f32.mrb[98].mxu1 }
 0x1c7   : > { %v3688_v60 = vpop.f32.mrb[96].mxu0  ;;  %v4689_v61 = vpop.f32.mrb[99].mxu1 }
 0x1c8   : > { %v3695_v62 = vadd.f32 %v3688_v60, %v3609_v55  ;;  %v4680_v63 = vpop.f32.mrb[97].mxu0 }
 0x1c9   : > { %v3691_v1 = vpop.f32.mrb[98].mxu0 }
 0x1ca   : > { %v3764_v3 = vadd.f32 %v3757_v56, %v3695_v62  ;;  %v3696_v4 = vadd.f32 %v3691_v1, %v3610_v57  ;;  %v4681_v5 = vpop.f32.mrb[99].mxu0 }
 0x1cc   : > { %v3766_v6 = vadd.f32 %v4970_v0, %v3764_v3  ;;  %v3765_v7 = vadd.f32 %v3760_v59, %v3696_v4 }
 0x1ce   : > { %v3768_v8 = vmax.f32 %v3766_v6, 0.0  ;;  %v3767_v9 = vadd.f32 %v4970_v0, %v3765_v7  ;;  %46 = sbr.rel (!%p44_p2) target bundleno = 39 (0x27), region = 83 }
 0x1d0   : > { %v4137_v10 = vpack.c.bf16 %v3768_v8, %v3768_v8  ;;  %v3769_v11 = vmax.f32 %v3767_v9, 0.0 }
 0x1d2   : > { %4131 = vst.msk [vmem:[%s5411_s18 + $0x70] sm:$0xf] %vm1931_vm4, %v4137_v10  ;;  %v4138_v12 = vpack.c.bf16 %v3769_v11, %v3769_v11 }
 0x1d4   : > { %4132 = vst.msk [vmem:[%s5411_s18 + $0x74] sm:$0x7] %vm1933_vm5, %v4138_v12 }
 0x1d5   :  { %3787 = vsyncpa [#allocation3], 1 }
 0x1d6   :  { %3788 = vsyncpa [#allocation5], 1 }

// kernel: convnet_forward.10
= control target key start
LH: loop header
LB: loop body
LE: loop exit
PB: predicated region body
PF: predicated region fallthrough
CT: control target
= control target key end

     0   :  { %8 = vsyncpa [#allocation3], 0  ;;  %s9682_s0 = inlined_call_operand.vmem [shape: bf16[2,3136], index: 0, kind: input, shape index: {}]   ;;  %s9683_s1 = inlined_call_operand.hbm [shape: bf16[3136,1024], index: 1, kind: input, shape index: {}]   ;;  %s9684_s2 = inlined_call_operand.hbm [shape: f32[1,1024], index: 2, kind: input, shape index: {}]   ;;  %s9685_s3 = inlined_call_operand.vmem [shape: bf16[2,1024], index: 3, kind: output, shape index: {}]  }
   0x1   :  { %10 = vsyncpa [#allocation3 + $0x1], 0 }
   0x2   :  { %11 = vsyncpa [#allocation5], 0 }
   0x3   :  { %13 = vsyncpa [#allocation5 + $0x1], 0  ;;  %s8603_s12 = smov 0   ;;  %s8605_s13 = smov 0  }
   0x4   :  { %s8607_s14 = smov 0   ;;  %s8609_s15 = smov 0  }
   0x5 LB: > { %s6338_s16 = sadd.s32 4294967295, %s8574_s15   ;;  %s8623_s17 = sadd.s32 1, %s8574_s15   ;;  %s8574_s15 = sphi %s8609_s15, %s9695_s15   ;;  %s8570_s14 = sphi %s8607_s14, %s9694_s14   ;;  %s8566_s13 = sphi %s8605_s13, %s9693_s13   ;;  %s8562_s12 = sphi %s8603_s12, %s9692_s12  }
   0x6   : > { %s44_s18 = ssub.s32 %s8574_s15, %s8623_s17  ;;  %s47_s19 = sadd.s32 1, %s8570_s14 }
   0x7   : > { %p45_p0 = scmp.eq.s32.totalorder %s44_s18, 0  ;;  %p54_p1 = scmp.ne.s32.totalorder %s8570_s14, %s8566_s13 }
   0x8   : > { %p55_p2 = scmp.eq.s32.totalorder %s8574_s15, 0  ;;  %p60_p3 = scmp.ne.s32.totalorder %s8566_s13, %s8562_s12 }
   0x9   : > { %s8633_s20 = scalar_select %p45_p0, %s8570_s14, %s47_s19  }
   0xa   : > { %p56_p4 = por %p55_p2, %p54_p1  ;;  %p61_p5 = scmp.eq.s32.totalorder %s6338_s16, 0 }
   0xb   : > { %p7257_p6 = scmp.lt.s32.totalorder %s8574_s15, 2  ;;  %s8643_s22 = sand.u32 1, %s8570_s14  }
   0xc   : > { %p8638_p7 = por %p61_p5, %p60_p3  ;;  %s7244_s23 = smul.u32 6272, %s8643_s22 }
   0xd   : > { %s7142_s24 = sshll.u32 %s8574_s15, 8  ;;  %p8647_p8 = pnand %p7257_p6, %p56_p4 }
   0xe   : > { %s9687_s21 = scalar_select %p8638_p7, 1, 0 }
   0xf   : > { %s8654_s28 = scalar_lea.hbm %s9683_s1, %s7142_s24  ;;  %s143_s29 = scalar_lea.vmem [#allocation2], %s7244_s23 }
  0x10   : > { %s150_s30 = sshll.u32 %s143_s29, 4  ;;  %s140_s4 = scalar_lea.sflag [#allocation3], %s8643_s22  ;;  %s8656_s30 = int_to_ptr.vmem [resolvable:$true] %s150_s30 }
  0x11   : > { %s8476_s5 = scalar_lea.hbm %s8654_s28, 100352  ;;  %p8478_p10 = pneg %p8647_p8 }
  0x12   : > { %p8477_p9 = scmp.ne.s32.totalorder %s8654_s28, %s8476_s5  ;;  %s8481_s8 = scalar_lea.hbm %s9683_s1, 200704 }
  0x13   : > { %p8482_p13 = scmp.lt.u32.totalorder %s8654_s28, %s9683_s1  ;;  %p8483_p0 = scmp.lt.u32.totalorder %s8481_s8, %s8476_s5 }
  0x14   : > { %p8479_p11 = pnand %p8478_p10, %p8477_p9  ;;  %p8485_p2 = scmp.lt.u32.totalorder %s8476_s5, %s8654_s28 }
  0x15   : > { %p8484_p1 = por %p8483_p0, %p8482_p13 }
  0x16   : > { %p8480_p12 = pneg %p8479_p11 }
  0x17   : > { %p8486_p3 = por %p8485_p2, %p8484_p1 }
  0x19   : > { %p8487_p4 = pnand %p8486_p3, %p8480_p12 }
  0x1b   : > { %8490 = shalt.err (!%p8487_p4)
}
  0x1c   : > { %s8491_s11 = scalar_lea.vmem %s8656_s30, 100352  ;;  %s8576_s12 = smov [#allocation2]  }
  0x1d   : > { %p8492_p5 = scmp.ne.s32.totalorder %s8656_s30, %s8491_s11  ;;  %s8496_s18 = sshll.u32 %s8576_s12, 4  ;;  %s8497_s18 = int_to_ptr.vmem [resolvable:$false] %s8496_s18 }
  0x1e   : > { %s8498_s19 = scalar_lea.vmem %s8497_s18, 200704  ;;  %p8499_p11 = scmp.lt.s32.totalorder %s8656_s30, %s8497_s18 }
  0x1f   : > { %p8494_p6 = pnand %p8492_p5, %p8478_p10  ;;  %p8500_p13 = scmp.lt.s32.totalorder %s8498_s19, %s8491_s11 }
  0x21   : > { %p8495_p9 = pneg %p8494_p6  ;;  %p8501_p0 = por %p8500_p13, %p8499_p11 }
  0x23   : > { %p8502_p1 = pnand %p8501_p0, %p8495_p9 }
  0x25   : > { %8505 = shalt.err (!%p8502_p1)
}
  0x26   : > { %s8577_s23 = smov 512   ;;  %s8578_s24 = smov 256  }
  0x27   : > { %s8579_s26 = smov 16   ;;  %p6347_p12 = scmp.ge.s32.totalorder %s8574_s15, 1 }
  0x28   : > { %7253 = dma.hbm_to_vmem [thread:$0]  (!%p8647_p8), %s8654_s28, 100352, %s8656_s30, %s140_s4, %s8577_s23, %s8578_s24, %s8579_s26  }
  0x29   : > { %p177_p2 = scmp.lt.s32.totalorder %s8574_s15, 3  ;;  %s6344_s27 = sshll.u32 %s8643_s22, 2 }
  0x2a   : > { %s7143_s5 = sshll.u32 %s8574_s15, 6  ;;  %s164_s6 = scalar_lea.vmem [#allocation4], %s6344_s27 }
  0x2b   : > { %p8689_p3 = pnand %p6347_p12, %p177_p2  ;;  %s172_s7 = sshll.u32 %s164_s6, 4  ;;  %s173_s7 = int_to_ptr.vmem [resolvable:$true] %s172_s7 }
  0x2c   : > { %s8697_s10 = scalar_lea.hbm %s9684_s2, %s7143_s5  ;;  %s161_s28 = scalar_lea.sflag [#allocation5], %s8643_s22 }
  0x2d   : > { %s9689_s29 = scalar_select %p8689_p3, 1, 0 }
  0x2e   : > { %s8506_s30 = scalar_lea.hbm %s8697_s10, 64  ;;  %s8511_s12 = scalar_lea.hbm %s9684_s2, 128 }
  0x2f   : > { %p8507_p4 = scmp.ne.s32.totalorder %s8697_s10, %s8506_s30  ;;  %p8512_p9 = scmp.lt.u32.totalorder %s8697_s10, %s9684_s2 }
  0x30   : > { %p8513_p11 = scmp.lt.u32.totalorder %s8511_s12, %s8506_s30  ;;  %p8515_p0 = scmp.lt.u32.totalorder %s8506_s30, %s8697_s10 }
  0x31   : > { %p8509_p5 = pnand %p8507_p4, %p8478_p10 }
  0x32   : > { %p8514_p13 = por %p8513_p11, %p8512_p9 }
  0x33   : > { %p8510_p6 = pneg %p8509_p5 }
  0x34   : > { %p8516_p1 = por %p8515_p0, %p8514_p13 }
  0x36   : > { %p8517_p12 = pnand %p8516_p1, %p8510_p6 }
  0x38   : > { %8520 = shalt.err (!%p8517_p12)
}
  0x39   : > { %s8521_s22 = scalar_lea.vmem %s173_s7, 64  ;;  %s8580_s23 = smov [#allocation4]  }
  0x3a   : > { %p8522_p2 = scmp.ne.s32.totalorder %s173_s7, %s8521_s22  ;;  %s8526_s24 = sshll.u32 %s8580_s23, 4  ;;  %s8527_s24 = int_to_ptr.vmem [resolvable:$false] %s8526_s24 }
  0x3b   : > { %s8528_s26 = scalar_lea.vmem %s8527_s24, 128  ;;  %p8529_p7 = scmp.lt.s32.totalorder %s173_s7, %s8527_s24 }
  0x3c   : > { %p8524_p4 = pnand %p8522_p2, %p8478_p10  ;;  %p8530_p3 = scmp.lt.s32.totalorder %s8528_s26, %s8521_s22 }
  0x3e   : > { %p8525_p5 = pneg %p8524_p4  ;;  %p8531_p9 = por %p8530_p3, %p8529_p7 }
  0x40   : > { %p8532_p11 = pnand %p8531_p9, %p8525_p5 }
  0x42   : > { %8535 = shalt.err (!%p8532_p11)
}
  0x43   : > { %7256 = dma.hbm_to_vmem [thread:$0]  (!%p8647_p8), %s8697_s10, 64, %s173_s7, %s161_s28  }
  0x44   : > { %p9690_p6 = scmp.ne.s32.totalorder %s9689_s29, 0 }
  0x45   : > { %s183_s27 = sand.u32 (!%p9690_p6), 1, %s8566_s13   ;;  %p9691_p10 = scmp.ne.s32.totalorder (!%p9690_p6), %s9687_s21, 0 }
  0x46   : > { %181 = sbr.rel (%p9690_p6) target bundleno = 1088 (0x440), region = 32  ;;  %s184_s6 = scalar_lea.sflag (!%p9690_p6), [#allocation3], %s183_s27 }
  0x47   : > { %s7245_s5 = smul.u32 (!%p9690_p6), 6272, %s183_s27 }
  0x49   : > { %s8722_s8 = scalar_lea.vmem (!%p9690_p6), [#allocation2], %s7245_s5 }
  0x4d   : > { %8553 = dma.done.wait (%p9691_p10), %s184_s6, 100352  }
  0x4e   : > { %8555 = vsyncadd (%p9691_p10), %s184_s6, 4294866944  ;;  %s6348_s9 = sshll.u32 %s183_s27, 2  ;;  %s193_s25 = scalar_lea.sflag [#allocation5], %s183_s27 }
  0x4f   : > { %s8728_s30 = scalar_lea.vmem [#allocation4], %s6348_s9 }
  0x50   : > { %8557 = dma.done.wait (%p9691_p10), %s193_s25, 64  }
  0x51   : > { %8559 = vsyncadd (%p9691_p10), %s193_s25, 4294967232  ;;  %v7295_v0 = vld [vmem:[%s8722_s8 + $0x4] ss:$16 sps:$4 sm:$0xff]   ;;  %v7297_v1 = vld [vmem:[%s8722_s8 + $0xc] ss:$16 sps:$4 sm:$0xff]   ;;  %v1021_v36 = vlaneseq  ;;  %vm5150_vm0 = vcmask 523264  }
  0x52   : > { %5154 = vmatprep.subr.bf16.mxu0 %v7295_v0  ;;  %v7299_v2 = vld [vmem:[%s8722_s8] ss:$16 sps:$4 sm:$0xff]   ;;  %v7300_v3 = vld [vmem:[%s8722_s8 + $0x8] ss:$16 sps:$4 sm:$0xff]   ;;  %5687 = vmatprep.subr.bf16.mxu1 %v7297_v1  ;;  %v7301_v4 = vld [vmem:[%s8722_s8 + $0x24] ss:$16 sps:$4 sm:$0xff]  }
  0x53   : > { %5155 = vmatpush1.bf16.msra.mxu0 %v7299_v2  ;;  %5688 = vmatpush1.bf16.msra.mxu1 %v7300_v3  ;;  %v7303_v5 = vld [vmem:[%s8722_s8 + $0x2c] ss:$16 sps:$4 sm:$0xff]   ;;  %v7305_v6 = vld [vmem:[%s8722_s8 + $0x20] ss:$16 sps:$4 sm:$0xff]   ;;  %v7306_v7 = vld [vmem:[%s8722_s8 + $0x28] ss:$16 sps:$4 sm:$0xff]  }
  0x54   : > { %5156 = vmatprep.subr.bf16.mxu0 %v7301_v4  ;;  %5689 = vmatprep.subr.bf16.mxu1 %v7303_v5  ;;  %v7307_v8 = vld [vmem:[%s8722_s8 + $0x44] ss:$16 sps:$4 sm:$0xff]   ;;  %v7309_v9 = vld [vmem:[%s8722_s8 + $0x4c] ss:$16 sps:$4 sm:$0xff]   ;;  %v7311_v10 = vld [vmem:[%s8722_s8 + $0x40] ss:$16 sps:$4 sm:$0xff]  }
  0x55   : > { %v7312_v11 = vld [vmem:[%s8722_s8 + $0x48] ss:$16 sps:$4 sm:$0xff]   ;;  %v7313_v12 = vld [vmem:[%s8722_s8 + $0x64] ss:$16 sps:$4 sm:$0xff]   ;;  %v7315_v13 = vld [vmem:[%s8722_s8 + $0x6c] ss:$16 sps:$4 sm:$0xff]  }
  0x56   : > { %v7317_v14 = vld [vmem:[%s8722_s8 + $0x60] ss:$16 sps:$4 sm:$0xff]   ;;  %v7318_v15 = vld [vmem:[%s8722_s8 + $0x68] ss:$16 sps:$4 sm:$0xff]   ;;  %v7319_v16 = vld [vmem:[%s8722_s8 + $0x84] ss:$16 sps:$4 sm:$0xff]  }
  0x57   : > { %5157 = vmatpush1.bf16.msra.mxu0 %v7305_v6  ;;  %5690 = vmatpush1.bf16.msra.mxu1 %v7306_v7  ;;  %v7321_v17 = vld [vmem:[%s8722_s8 + $0x8c] ss:$16 sps:$4 sm:$0xff]   ;;  %v7323_v18 = vld [vmem:[%s8722_s8 + $0x80] ss:$16 sps:$4 sm:$0xff]   ;;  %v7324_v19 = vld [vmem:[%s8722_s8 + $0x88] ss:$16 sps:$4 sm:$0xff]  }
  0x58   : > { %5158 = vmatprep.subr.bf16.mxu0 %v7307_v8  ;;  %5691 = vmatprep.subr.bf16.mxu1 %v7309_v9  ;;  %v7325_v20 = vld [vmem:[%s8722_s8 + $0xa4] ss:$16 sps:$4 sm:$0xff]   ;;  %v7327_v21 = vld [vmem:[%s8722_s8 + $0xac] ss:$16 sps:$4 sm:$0xff]   ;;  %v7329_v22 = vld [vmem:[%s8722_s8 + $0xa0] ss:$16 sps:$4 sm:$0xff]  }
  0x59   : > { %v7330_v23 = vld [vmem:[%s8722_s8 + $0xa8] ss:$16 sps:$4 sm:$0xff]   ;;  %v7331_v24 = vld [vmem:[%s8722_s8 + $0xc4] ss:$16 sps:$4 sm:$0xff]   ;;  %v7333_v25 = vld [vmem:[%s8722_s8 + $0xcc] ss:$16 sps:$4 sm:$0xff]  }
  0x5a   : > { %v7335_v26 = vld [vmem:[%s8722_s8 + $0xc0] ss:$16 sps:$4 sm:$0xff]   ;;  %v7336_v27 = vld [vmem:[%s8722_s8 + $0xc8] ss:$16 sps:$4 sm:$0xff]   ;;  %v7337_v28 = vld [vmem:[%s8722_s8 + $0xe4] ss:$16 sps:$4 sm:$0xff]  }
  0x5b   : > { %5159 = vmatpush1.bf16.msra.mxu0 %v7311_v10  ;;  %5692 = vmatpush1.bf16.msra.mxu1 %v7312_v11  ;;  %v7339_v29 = vld [vmem:[%s8722_s8 + $0xec] ss:$16 sps:$4 sm:$0xff]   ;;  %v7341_v30 = vld [vmem:[%s8722_s8 + $0xe0] ss:$16 sps:$4 sm:$0xff]   ;;  %v7342_v31 = vld [vmem:[%s8722_s8 + $0xe8] ss:$16 sps:$4 sm:$0xff]  }
  0x5c   : > { %5160 = vmatprep.subr.bf16.mxu0 %v7313_v12  ;;  %5693 = vmatprep.subr.bf16.mxu1 %v7315_v13  ;;  %v7343_v32 = vld [vmem:[%s8722_s8 + $0x104] ss:$16 sps:$4 sm:$0xff]   ;;  %v7345_v33 = vld [vmem:[%s8722_s8 + $0x10c] ss:$16 sps:$4 sm:$0xff]   ;;  %v7347_v34 = vld [vmem:[%s8722_s8 + $0x100] ss:$16 sps:$4 sm:$0xff]  }
  0x5d   : > { %v7348_v35 = vld [vmem:[%s8722_s8 + $0x108] ss:$16 sps:$4 sm:$0xff]   ;;  %v8581_v37 = vmov 1966171168   ;;  %v7349_v39 = vld [vmem:[%s8722_s8 + $0x124] ss:$16 sps:$4 sm:$0xff]  }
  0x5e   : > { %v1047_v38 = vunpack.c.l.s4 %v8581_v37  ;;  %v7351_v40 = vld [vmem:[%s8722_s8 + $0x12c] ss:$16 sps:$4 sm:$0xff]   ;;  %v7353_v41 = vld [vmem:[%s8722_s8 + $0x120] ss:$16 sps:$4 sm:$0xff]   ;;  %v8773_v42 = vshrl.u32 %v1021_v36, 7  ;;  %s6349_s22 = sshll.u32 %s6338_s16, 2 }
  0x5f   : > { %5161 = vmatpush1.bf16.msra.mxu0 %v7317_v14  ;;  %5694 = vmatpush1.bf16.msra.mxu1 %v7318_v15  ;;  %v7354_v44 = vld [vmem:[%s8722_s8 + $0x128] ss:$16 sps:$4 sm:$0xff]   ;;  %v7355_v45 = vld [vmem:[%s8722_s8 + $0x144] ss:$16 sps:$4 sm:$0xff]   ;;  %v7357_v46 = vld [vmem:[%s8722_s8 + $0x14c] ss:$16 sps:$4 sm:$0xff]  }
  0x60   : > { %5162 = vmatprep.subr.bf16.mxu0 %v7319_v16  ;;  %5695 = vmatprep.subr.bf16.mxu1 %v7321_v17  ;;  %v1048_v43 = vunpack.c.0.s8 %v1047_v38  ;;  %v7359_v47 = vld [vmem:[%s8722_s8 + $0x140] ss:$16 sps:$4 sm:$0xff]   ;;  %v7360_v48 = vld [vmem:[%s8722_s8 + $0x148] ss:$16 sps:$4 sm:$0xff]   ;;  %v7361_v50 = vld [vmem:[%s8722_s8 + $0x164] ss:$16 sps:$4 sm:$0xff]  }
  0x61   : > { %v7363_v51 = vld [vmem:[%s8722_s8 + $0x16c] ss:$16 sps:$4 sm:$0xff]   ;;  %v8788_v52 = vld [vmem:[%s9682_s0] sm:$0xff]  ;;  %v7366_v55 = vld [vmem:[%s8722_s8 + $0x168] ss:$16 sps:$4 sm:$0xff]   ;;  %p226_p7 = scmp.lt.s32.totalorder %s6349_s22, 7 }
  0x62   : > { %v8781_v49 = vsub.s32 %v1048_v43, %v8773_v42  ;;  %v7365_v53 = vld [vmem:[%s8722_s8 + $0x160] ss:$16 sps:$4 sm:$0xff]   ;;  %v7367_v56 = vld [vmem:[%s8722_s8 + $0x184] ss:$16 sps:$4 sm:$0xff]   ;;  %v7369_v57 = vld [vmem:[%s8722_s8 + $0x18c] ss:$16 sps:$4 sm:$0xff]  }
  0x63   : > { %5163 = vmatpush1.bf16.msra.mxu0 %v7323_v18  ;;  %5696 = vmatpush1.bf16.msra.mxu1 %v7324_v19  ;;  %v7371_v59 = vld [vmem:[%s8722_s8 + $0x180] ss:$16 sps:$4 sm:$0xff]   ;;  %v7372_v61 = vld [vmem:[%s8722_s8 + $0x188] ss:$16 sps:$4 sm:$0xff]   ;;  %v7373_v62 = vld [vmem:[%s8722_s8 + $0x1a4] ss:$16 sps:$4 sm:$0xff]  }
  0x64   : > { %5164 = vmatprep.subr.bf16.mxu0 %v7325_v20  ;;  %5697 = vmatprep.subr.bf16.mxu1 %v7327_v21  ;;  %v1052_v54 = vrot.slane %v8788_v52, %v8781_v49  ;;  %v7375_v63 = vld [vmem:[%s8722_s8 + $0x1ac] ss:$16 sps:$4 sm:$0xff]   ;;  %v7377_v0 = vld [vmem:[%s8722_s8 + $0x1a0] ss:$16 sps:$4 sm:$0xff]   ;;  %v7378_v1 = vld [vmem:[%s8722_s8 + $0x1a8] ss:$16 sps:$4 sm:$0xff]  }
  0x65   : > { %v7379_v2 = vld [vmem:[%s8722_s8 + $0x1c4] ss:$16 sps:$4 sm:$0xff]   ;;  %v7381_v3 = vld [vmem:[%s8722_s8 + $0x1cc] ss:$16 sps:$4 sm:$0xff]   ;;  %v7383_v4 = vld [vmem:[%s8722_s8 + $0x1c0] ss:$16 sps:$4 sm:$0xff]  }
  0x66   : > { %v1060_v58 = vcombine.high %v1052_v54, %v1052_v54  ;;  %v7384_v5 = vld [vmem:[%s8722_s8 + $0x1c8] ss:$16 sps:$4 sm:$0xff]   ;;  %v7385_v6 = vld [vmem:[%s8722_s8 + $0x1e4] ss:$16 sps:$4 sm:$0xff]   ;;  %v7387_v7 = vld [vmem:[%s8722_s8 + $0x1ec] ss:$16 sps:$4 sm:$0xff]   ;;  %v8815_v13 = vrot.slane %v1052_v54, %v8781_v49 }
  0x67   : > { %5165 = vmatpush1.bf16.msra.mxu0 %v7329_v22  ;;  %5698 = vmatpush1.bf16.msra.mxu1 %v7330_v23  ;;  %v7389_v8 = vld [vmem:[%s8722_s8 + $0x1e0] ss:$16 sps:$4 sm:$0xff]   ;;  %v7390_v9 = vld [vmem:[%s8722_s8 + $0x1e8] ss:$16 sps:$4 sm:$0xff]   ;;  %v7393_v10 = vld [vmem:[%s8722_s8 + $0x204] ss:$16 sps:$4 sm:$0xff]  }
  0x68   : > { %5166 = vmatprep.subr.bf16.mxu0 %v7331_v24  ;;  %5699 = vmatprep.subr.bf16.mxu1 %v7333_v25  ;;  %v1082_v60 = vrot.slane %v1060_v58, %v8781_v49  ;;  %v7396_v11 = vld [vmem:[%s8722_s8 + $0x20c] ss:$16 sps:$4 sm:$0xff]   ;;  %v7391_v12 = vld [vmem:[%s8722_s8 + $0x200] ss:$16 sps:$4 sm:$0xff]   ;;  %v7394_v14 = vld [vmem:[%s8722_s8 + $0x208] ss:$16 sps:$4 sm:$0xff]  }
  0x69   : > { %v7399_v15 = vld [vmem:[%s8722_s8 + $0x224] ss:$16 sps:$4 sm:$0xff]   ;;  %v7402_v16 = vld [vmem:[%s8722_s8 + $0x22c] ss:$16 sps:$4 sm:$0xff]   ;;  %v7397_v18 = vld [vmem:[%s8722_s8 + $0x220] ss:$16 sps:$4 sm:$0xff]  }
  0x6a   : > { %5186 = vmatprep.mubr.bf16.mxu0 %v1082_v60  ;;  %5719 = vmatprep.mubr.bf16.mxu1 %v1082_v60  ;;  %v1092_v17 = vcombine.high %v1082_v60, %v1082_v60  ;;  %v7400_v19 = vld [vmem:[%s8722_s8 + $0x228] ss:$16 sps:$4 sm:$0xff]   ;;  %v7405_v20 = vld [vmem:[%s8722_s8 + $0x244] ss:$16 sps:$4 sm:$0xff]   ;;  %v7408_v21 = vld [vmem:[%s8722_s8 + $0x24c] ss:$16 sps:$4 sm:$0xff]  }
  0x6b   : > { %5167 = vmatpush1.bf16.msra.mxu0 %v7335_v26  ;;  %5700 = vmatpush1.bf16.msra.mxu1 %v7336_v27  ;;  %v7403_v22 = vld [vmem:[%s8722_s8 + $0x240] ss:$16 sps:$4 sm:$0xff]   ;;  %v7406_v23 = vld [vmem:[%s8722_s8 + $0x248] ss:$16 sps:$4 sm:$0xff]   ;;  %v7411_v24 = vld [vmem:[%s8722_s8 + $0x264] ss:$16 sps:$4 sm:$0xff]  }
  0x6c   : > { %5168 = vmatprep.subr.bf16.mxu0 %v7337_v28  ;;  %5701 = vmatprep.subr.bf16.mxu1 %v7339_v29  ;;  %v7414_v25 = vld [vmem:[%s8722_s8 + $0x26c] ss:$16 sps:$4 sm:$0xff]   ;;  %v7409_v26 = vld [vmem:[%s8722_s8 + $0x260] ss:$16 sps:$4 sm:$0xff]   ;;  %v7412_v27 = vld [vmem:[%s8722_s8 + $0x268] ss:$16 sps:$4 sm:$0xff]  }
  0x6d   : > { %v7417_v28 = vld [vmem:[%s8722_s8 + $0x284] ss:$16 sps:$4 sm:$0xff]   ;;  %v7420_v29 = vld [vmem:[%s8722_s8 + $0x28c] ss:$16 sps:$4 sm:$0xff]   ;;  %v7427_v38 = vld [vmem:[%s8722_s8 + $0x2c0] ss:$16 sps:$4 sm:$0xff]  }
  0x6e   : > { %v7429_v36 = vld [vmem:[%s8722_s8 + $0x2c4] ss:$16 sps:$4 sm:$0xff]   ;;  %v7432_v37 = vld [vmem:[%s8722_s8 + $0x2cc] ss:$16 sps:$4 sm:$0xff]   ;;  %v7433_v43 = vld [vmem:[%s8722_s8 + $0x2e0] ss:$16 sps:$4 sm:$0xff]  }
  0x6f   : > { %5169 = vmatpush1.bf16.msra.mxu0 %v7341_v30  ;;  %5702 = vmatpush1.bf16.msra.mxu1 %v7342_v31  ;;  %v7415_v30 = vld [vmem:[%s8722_s8 + $0x280] ss:$16 sps:$4 sm:$0xff]   ;;  %v7418_v31 = vld [vmem:[%s8722_s8 + $0x288] ss:$16 sps:$4 sm:$0xff]   ;;  %v7462_v60 = vld [vmem:[%s8722_s8 + $0x36c] ss:$16 sps:$4 sm:$0xff]  }
  0x70   : > { %5170 = vmatprep.subr.bf16.mxu0 %v7343_v32  ;;  %5703 = vmatprep.subr.bf16.mxu1 %v7345_v33  ;;  %v7423_v32 = vld [vmem:[%s8722_s8 + $0x2a4] ss:$16 sps:$4 sm:$0xff]   ;;  %v7426_v33 = vld [vmem:[%s8722_s8 + $0x2ac] ss:$16 sps:$4 sm:$0xff]   ;;  %v7448_v54 = vld [vmem:[%s8722_s8 + $0x328] ss:$16 sps:$4 sm:$0xff]  }
  0x71   : > { %v7454_v58 = vld [vmem:[%s8722_s8 + $0x348] ss:$16 sps:$4 sm:$0xff]   ;;  %s9697_s22 = smov (!%p226_p7, %s6349_s22), 7 }
  0x72   : > { %s228_s23 = scalar_lea.vmem %s9685_s3, %s9697_s22 }
  0x73   : > { %5171 = vmatpush1.bf16.msra.mxu0 %v7347_v34  ;;  %5704 = vmatpush1.bf16.msra.mxu1 %v7348_v35  ;;  %v7421_v34 = vld [vmem:[%s8722_s8 + $0x2a0] ss:$16 sps:$4 sm:$0xff]   ;;  %v7424_v35 = vld [vmem:[%s8722_s8 + $0x2a8] ss:$16 sps:$4 sm:$0xff]  }
  0x74   : > { %5172 = vmatprep.subr.bf16.mxu0 %v7349_v39  ;;  %5705 = vmatprep.subr.bf16.mxu1 %v7351_v40  ;;  %v7430_v39 = vld [vmem:[%s8722_s8 + $0x2c8] ss:$16 sps:$4 sm:$0xff]   ;;  %v7435_v40 = vld [vmem:[%s8722_s8 + $0x2e4] ss:$16 sps:$4 sm:$0xff]  }
  0x77   : > { %5173 = vmatpush1.bf16.msra.mxu0 %v7353_v41  ;;  %5706 = vmatpush1.bf16.msra.mxu1 %v7354_v44  ;;  %v7438_v41 = vld [vmem:[%s8722_s8 + $0x2ec] ss:$16 sps:$4 sm:$0xff]   ;;  %v7436_v44 = vld [vmem:[%s8722_s8 + $0x2e8] ss:$16 sps:$4 sm:$0xff]  }
  0x78   : > { %5174 = vmatprep.subr.bf16.mxu0 %v7355_v45  ;;  %5707 = vmatprep.subr.bf16.mxu1 %v7357_v46  ;;  %v7441_v45 = vld [vmem:[%s8722_s8 + $0x304] ss:$16 sps:$4 sm:$0xff]   ;;  %v7444_v46 = vld [vmem:[%s8722_s8 + $0x30c] ss:$16 sps:$4 sm:$0xff]  }
  0x7b   : > { %5175 = vmatpush1.bf16.msra.mxu0 %v7359_v47  ;;  %5708 = vmatpush1.bf16.msra.mxu1 %v7360_v48  ;;  %v7439_v47 = vld [vmem:[%s8722_s8 + $0x300] ss:$16 sps:$4 sm:$0xff]   ;;  %v7442_v48 = vld [vmem:[%s8722_s8 + $0x308] ss:$16 sps:$4 sm:$0xff]  }
  0x7c   : > { %5176 = vmatprep.subr.bf16.mxu0 %v7361_v50  ;;  %5709 = vmatprep.subr.bf16.mxu1 %v7363_v51  ;;  %v7447_v50 = vld [vmem:[%s8722_s8 + $0x324] ss:$16 sps:$4 sm:$0xff]   ;;  %v7450_v51 = vld [vmem:[%s8722_s8 + $0x32c] ss:$16 sps:$4 sm:$0xff]  }
  0x7f   : > { %5177 = vmatpush1.bf16.msra.mxu0 %v7365_v53  ;;  %5710 = vmatpush1.bf16.msra.mxu1 %v7366_v55  ;;  %v7445_v53 = vld [vmem:[%s8722_s8 + $0x320] ss:$16 sps:$4 sm:$0xff]   ;;  %v7453_v55 = vld [vmem:[%s8722_s8 + $0x344] ss:$16 sps:$4 sm:$0xff]  }
  0x80   : > { %5178 = vmatprep.subr.bf16.mxu0 %v7367_v56  ;;  %5711 = vmatprep.subr.bf16.mxu1 %v7369_v57  ;;  %v7456_v56 = vld [vmem:[%s8722_s8 + $0x34c] ss:$16 sps:$4 sm:$0xff]   ;;  %v7451_v57 = vld [vmem:[%s8722_s8 + $0x340] ss:$16 sps:$4 sm:$0xff]  }
  0x83   : > { %5179 = vmatpush1.bf16.msra.mxu0 %v7371_v59  ;;  %5712 = vmatpush1.bf16.msra.mxu1 %v7372_v61  ;;  %v7459_v59 = vld [vmem:[%s8722_s8 + $0x364] ss:$16 sps:$4 sm:$0xff]   ;;  %v7457_v61 = vld [vmem:[%s8722_s8 + $0x360] ss:$16 sps:$4 sm:$0xff]  }
  0x84   : > { %5180 = vmatprep.subr.bf16.mxu0 %v7373_v62  ;;  %5713 = vmatprep.subr.bf16.mxu1 %v7375_v63  ;;  %v7460_v62 = vld [vmem:[%s8722_s8 + $0x368] ss:$16 sps:$4 sm:$0xff]   ;;  %v7465_v63 = vld [vmem:[%s8722_s8 + $0x384] ss:$16 sps:$4 sm:$0xff]  }
  0x87   : > { %5181 = vmatpush1.bf16.msra.mxu0 %v7377_v0  ;;  %5714 = vmatpush1.bf16.msra.mxu1 %v7378_v1  ;;  %v7468_v0 = vld [vmem:[%s8722_s8 + $0x38c] ss:$16 sps:$4 sm:$0xff]   ;;  %v7463_v1 = vld [vmem:[%s8722_s8 + $0x380] ss:$16 sps:$4 sm:$0xff]  }
  0x88   : > { %5182 = vmatprep.subr.bf16.mxu0 %v7379_v2  ;;  %5715 = vmatprep.subr.bf16.mxu1 %v7381_v3  ;;  %v7466_v2 = vld [vmem:[%s8722_s8 + $0x388] ss:$16 sps:$4 sm:$0xff]   ;;  %v7471_v3 = vld [vmem:[%s8722_s8 + $0x3a4] ss:$16 sps:$4 sm:$0xff]  }
  0x8b   : > { %5183 = vmatpush1.bf16.msra.mxu0 %v7383_v4  ;;  %5716 = vmatpush1.bf16.msra.mxu1 %v7384_v5  ;;  %v7474_v4 = vld [vmem:[%s8722_s8 + $0x3ac] ss:$16 sps:$4 sm:$0xff]   ;;  %v7469_v5 = vld [vmem:[%s8722_s8 + $0x3a0] ss:$16 sps:$4 sm:$0xff]  }
  0x8c   : > { %5184 = vmatprep.subr.bf16.mxu0 %v7385_v6  ;;  %5717 = vmatprep.subr.bf16.mxu1 %v7387_v7  ;;  %v7472_v6 = vld [vmem:[%s8722_s8 + $0x3a8] ss:$16 sps:$4 sm:$0xff]   ;;  %v7477_v7 = vld [vmem:[%s8722_s8 + $0x3c4] ss:$16 sps:$4 sm:$0xff]  }
  0x8f   : > { %5185 = vmatpush1.bf16.msra.mxu0 %v7389_v8  ;;  %5718 = vmatpush1.bf16.msra.mxu1 %v7390_v9  ;;  %v7480_v8 = vld [vmem:[%s8722_s8 + $0x3cc] ss:$16 sps:$4 sm:$0xff]   ;;  %v1045_v9 = vcombine.high %v8788_v52, %v8788_v52  ;;  %v7484_v52 = vld [vmem:[%s8722_s8 + $0x3e8] ss:$16 sps:$4 sm:$0xff]  }
  0x90   : > { %5195 = vmatprep.subr.bf16.mxu0 %v7393_v10  ;;  %5728 = vmatprep.subr.bf16.mxu1 %v7396_v11  ;;  %v7475_v10 = vld [vmem:[%s8722_s8 + $0x3c0] ss:$16 sps:$4 sm:$0xff]   ;;  %v7478_v11 = vld [vmem:[%s8722_s8 + $0x3c8] ss:$16 sps:$4 sm:$0xff]  }
  0x92   : > { %5187 = vmatmul.mubr.bf16.vlgmr.msra.gmra.mrb[0].mxu0 %v8815_v13  ;;  %5720 = vmatmul.mubr.bf16.vlgmr.msra.gmra.mrb[0].mxu1 %v8815_v13 }
  0x93   : > { %5196 = vmatpush1.bf16.msra.mxu0 %v7391_v12  ;;  %5729 = vmatpush1.bf16.msra.mxu1 %v7394_v14  ;;  %v7483_v12 = vld [vmem:[%s8722_s8 + $0x3e4] ss:$16 sps:$4 sm:$0xff]   ;;  %v7486_v14 = vld [vmem:[%s8722_s8 + $0x3ec] ss:$16 sps:$4 sm:$0xff]  }
  0x94   : > { %5197 = vmatprep.subr.bf16.mxu0 %v7399_v15  ;;  %5730 = vmatprep.subr.bf16.mxu1 %v7402_v16  ;;  %v8881_v15 = vrot.slane %v1045_v9, %v8781_v49  ;;  %v7481_v16 = vld [vmem:[%s8722_s8 + $0x3e0] ss:$16 sps:$4 sm:$0xff]   ;;  %v7562_v9 = vld [vmem:[%s8722_s8 + $0x588] ss:$16 sps:$4 sm:$0xff]  }
  0x95   : > { %5227 = vmatprep.mubr.bf16.mxu0 %v1092_v17  ;;  %5760 = vmatprep.mubr.bf16.mxu1 %v1092_v17  ;;  %v7489_v17 = vld [vmem:[%s8722_s8 + $0x404] ss:$16 sps:$4 sm:$0xff]  }
  0x97   : > { %5198 = vmatpush1.bf16.msra.mxu0 %v7397_v18  ;;  %5731 = vmatpush1.bf16.msra.mxu1 %v7400_v19  ;;  %v7492_v18 = vld [vmem:[%s8722_s8 + $0x40c] ss:$16 sps:$4 sm:$0xff]   ;;  %v1061_v19 = vcombine.high %v8881_v15, %v8881_v15 }
  0x98   : > { %5199 = vmatprep.subr.bf16.mxu0 %v7405_v20  ;;  %5732 = vmatprep.subr.bf16.mxu1 %v7408_v21  ;;  %v7487_v20 = vld [vmem:[%s8722_s8 + $0x400] ss:$16 sps:$4 sm:$0xff]   ;;  %v1090_v21 = vcombine.high %v8815_v13, %v8815_v13  ;;  %v7496_v13 = vld [vmem:[%s8722_s8 + $0x428] ss:$16 sps:$4 sm:$0xff]  }
  0x9b   : > { %5200 = vmatpush1.bf16.msra.mxu0 %v7403_v22  ;;  %5733 = vmatpush1.bf16.msra.mxu1 %v7406_v23  ;;  %v7490_v22 = vld [vmem:[%s8722_s8 + $0x408] ss:$16 sps:$4 sm:$0xff]   ;;  %v7495_v23 = vld [vmem:[%s8722_s8 + $0x424] ss:$16 sps:$4 sm:$0xff]  }
  0x9c   : > { %5201 = vmatprep.subr.bf16.mxu0 %v7411_v24  ;;  %5734 = vmatprep.subr.bf16.mxu1 %v7414_v25  ;;  %v7498_v24 = vld [vmem:[%s8722_s8 + $0x42c] ss:$16 sps:$4 sm:$0xff]   ;;  %v8896_v25 = vrot.slane %v1061_v19, %v8781_v49  ;;  %v7579_v19 = vld [vmem:[%s8722_s8 + $0x5e4] ss:$16 sps:$4 sm:$0xff]  }
  0x9f   : > { %5202 = vmatpush1.bf16.msra.mxu0 %v7409_v26  ;;  %5735 = vmatpush1.bf16.msra.mxu1 %v7412_v27  ;;  %v7493_v26 = vld [vmem:[%s8722_s8 + $0x420] ss:$16 sps:$4 sm:$0xff]   ;;  %v7501_v27 = vld [vmem:[%s8722_s8 + $0x444] ss:$16 sps:$4 sm:$0xff]  }
  0xa0   : > { %5203 = vmatprep.subr.bf16.mxu0 %v7417_v28  ;;  %5736 = vmatprep.subr.bf16.mxu1 %v7420_v29  ;;  %v7504_v28 = vld [vmem:[%s8722_s8 + $0x44c] ss:$16 sps:$4 sm:$0xff]   ;;  %v7499_v29 = vld [vmem:[%s8722_s8 + $0x440] ss:$16 sps:$4 sm:$0xff]  }
  0xa3   : > { %5204 = vmatpush1.bf16.msra.mxu0 %v7415_v30  ;;  %5737 = vmatpush1.bf16.msra.mxu1 %v7418_v31  ;;  %v7502_v30 = vld [vmem:[%s8722_s8 + $0x448] ss:$16 sps:$4 sm:$0xff]   ;;  %v7507_v31 = vld [vmem:[%s8722_s8 + $0x464] ss:$16 sps:$4 sm:$0xff]  }
  0xa4   : > { %5205 = vmatprep.subr.bf16.mxu0 %v7423_v32  ;;  %5738 = vmatprep.subr.bf16.mxu1 %v7426_v33  ;;  %v7510_v32 = vld [vmem:[%s8722_s8 + $0x46c] ss:$16 sps:$4 sm:$0xff]   ;;  %v7505_v33 = vld [vmem:[%s8722_s8 + $0x460] ss:$16 sps:$4 sm:$0xff]  }
  0xa7   : > { %5206 = vmatpush1.bf16.msra.mxu0 %v7421_v34  ;;  %5739 = vmatpush1.bf16.msra.mxu1 %v7424_v35  ;;  %v7508_v34 = vld [vmem:[%s8722_s8 + $0x468] ss:$16 sps:$4 sm:$0xff]   ;;  %v7513_v35 = vld [vmem:[%s8722_s8 + $0x484] ss:$16 sps:$4 sm:$0xff]  }
  0xa8   : > { %5207 = vmatprep.subr.bf16.mxu0 %v7429_v36  ;;  %5740 = vmatprep.subr.bf16.mxu1 %v7432_v37  ;;  %v7516_v36 = vld [vmem:[%s8722_s8 + $0x48c] ss:$16 sps:$4 sm:$0xff]   ;;  %v7511_v37 = vld [vmem:[%s8722_s8 + $0x480] ss:$16 sps:$4 sm:$0xff]  }
  0xab   : > { %5208 = vmatpush1.bf16.msra.mxu0 %v7427_v38  ;;  %5741 = vmatpush1.bf16.msra.mxu1 %v7430_v39  ;;  %v7514_v38 = vld [vmem:[%s8722_s8 + $0x488] ss:$16 sps:$4 sm:$0xff]   ;;  %v7519_v39 = vld [vmem:[%s8722_s8 + $0x4a4] ss:$16 sps:$4 sm:$0xff]  }
  0xac   : > { %5209 = vmatprep.subr.bf16.mxu0 %v7435_v40  ;;  %5742 = vmatprep.subr.bf16.mxu1 %v7438_v41  ;;  %v7522_v40 = vld [vmem:[%s8722_s8 + $0x4ac] ss:$16 sps:$4 sm:$0xff]   ;;  %v7517_v41 = vld [vmem:[%s8722_s8 + $0x4a0] ss:$16 sps:$4 sm:$0xff]  }
  0xaf   : > { %5210 = vmatpush1.bf16.msra.mxu0 %v7433_v43  ;;  %5743 = vmatpush1.bf16.msra.mxu1 %v7436_v44  ;;  %v7520_v43 = vld [vmem:[%s8722_s8 + $0x4a8] ss:$16 sps:$4 sm:$0xff]   ;;  %v7525_v44 = vld [vmem:[%s8722_s8 + $0x4c4] ss:$16 sps:$4 sm:$0xff]  }
  0xb0   : > { %5211 = vmatprep.subr.bf16.mxu0 %v7441_v45  ;;  %5744 = vmatprep.subr.bf16.mxu1 %v7444_v46  ;;  %v7528_v45 = vld [vmem:[%s8722_s8 + $0x4cc] ss:$16 sps:$4 sm:$0xff]   ;;  %v7523_v46 = vld [vmem:[%s8722_s8 + $0x4c0] ss:$16 sps:$4 sm:$0xff]  }
  0xb3   : > { %5212 = vmatpush1.bf16.msra.mxu0 %v7439_v47  ;;  %5745 = vmatpush1.bf16.msra.mxu1 %v7442_v48  ;;  %v7526_v47 = vld [vmem:[%s8722_s8 + $0x4c8] ss:$16 sps:$4 sm:$0xff]   ;;  %v7531_v48 = vld [vmem:[%s8722_s8 + $0x4e4] ss:$16 sps:$4 sm:$0xff]  }
  0xb4   : > { %5213 = vmatprep.subr.bf16.mxu0 %v7447_v50  ;;  %5746 = vmatprep.subr.bf16.mxu1 %v7450_v51  ;;  %v7534_v50 = vld [vmem:[%s8722_s8 + $0x4ec] ss:$16 sps:$4 sm:$0xff]   ;;  %v7529_v51 = vld [vmem:[%s8722_s8 + $0x4e0] ss:$16 sps:$4 sm:$0xff]  }
  0xb7   : > { %5214 = vmatpush1.bf16.msra.mxu0 %v7445_v53  ;;  %5747 = vmatpush1.bf16.msra.mxu1 %v7448_v54  ;;  %v7532_v53 = vld [vmem:[%s8722_s8 + $0x4e8] ss:$16 sps:$4 sm:$0xff]   ;;  %v7537_v54 = vld [vmem:[%s8722_s8 + $0x504] ss:$16 sps:$4 sm:$0xff]  }
  0xb8   : > { %5215 = vmatprep.subr.bf16.mxu0 %v7453_v55  ;;  %5748 = vmatprep.subr.bf16.mxu1 %v7456_v56  ;;  %v7540_v55 = vld [vmem:[%s8722_s8 + $0x50c] ss:$16 sps:$4 sm:$0xff]   ;;  %v7535_v56 = vld [vmem:[%s8722_s8 + $0x500] ss:$16 sps:$4 sm:$0xff]  }
  0xbb   : > { %5216 = vmatpush1.bf16.msra.mxu0 %v7451_v57  ;;  %5749 = vmatpush1.bf16.msra.mxu1 %v7454_v58  ;;  %v7538_v57 = vld [vmem:[%s8722_s8 + $0x508] ss:$16 sps:$4 sm:$0xff]   ;;  %v7543_v58 = vld [vmem:[%s8722_s8 + $0x524] ss:$16 sps:$4 sm:$0xff]  }
  0xbc   : > { %5217 = vmatprep.subr.bf16.mxu0 %v7459_v59  ;;  %5750 = vmatprep.subr.bf16.mxu1 %v7462_v60  ;;  %v7546_v59 = vld [vmem:[%s8722_s8 + $0x52c] ss:$16 sps:$4 sm:$0xff]   ;;  %v7541_v60 = vld [vmem:[%s8722_s8 + $0x520] ss:$16 sps:$4 sm:$0xff]  }
  0xbf   : > { %5218 = vmatpush1.bf16.msra.mxu0 %v7457_v61  ;;  %5751 = vmatpush1.bf16.msra.mxu1 %v7460_v62  ;;  %v7544_v61 = vld [vmem:[%s8722_s8 + $0x528] ss:$16 sps:$4 sm:$0xff]   ;;  %v7549_v62 = vld [vmem:[%s8722_s8 + $0x544] ss:$16 sps:$4 sm:$0xff]  }
  0xc0   : > { %5219 = vmatprep.subr.bf16.mxu0 %v7465_v63  ;;  %5752 = vmatprep.subr.bf16.mxu1 %v7468_v0  ;;  %v7552_v63 = vld [vmem:[%s8722_s8 + $0x54c] ss:$16 sps:$4 sm:$0xff]   ;;  %v7547_v0 = vld [vmem:[%s8722_s8 + $0x540] ss:$16 sps:$4 sm:$0xff]  }
  0xc3   : > { %5220 = vmatpush1.bf16.msra.mxu0 %v7463_v1  ;;  %5753 = vmatpush1.bf16.msra.mxu1 %v7466_v2  ;;  %v7550_v1 = vld [vmem:[%s8722_s8 + $0x548] ss:$16 sps:$4 sm:$0xff]   ;;  %v7555_v2 = vld [vmem:[%s8722_s8 + $0x564] ss:$16 sps:$4 sm:$0xff]  }
  0xc4   : > { %5221 = vmatprep.subr.bf16.mxu0 %v7471_v3  ;;  %5754 = vmatprep.subr.bf16.mxu1 %v7474_v4  ;;  %v7558_v3 = vld [vmem:[%s8722_s8 + $0x56c] ss:$16 sps:$4 sm:$0xff]   ;;  %v7553_v4 = vld [vmem:[%s8722_s8 + $0x560] ss:$16 sps:$4 sm:$0xff]  }
  0xc7   : > { %5222 = vmatpush1.bf16.msra.mxu0 %v7469_v5  ;;  %5755 = vmatpush1.bf16.msra.mxu1 %v7472_v6  ;;  %v7556_v5 = vld [vmem:[%s8722_s8 + $0x568] ss:$16 sps:$4 sm:$0xff]   ;;  %v7561_v6 = vld [vmem:[%s8722_s8 + $0x584] ss:$16 sps:$4 sm:$0xff]  }
  0xc8   : > { %5223 = vmatprep.subr.bf16.mxu0 %v7477_v7  ;;  %5756 = vmatprep.subr.bf16.mxu1 %v7480_v8  ;;  %v7564_v7 = vld [vmem:[%s8722_s8 + $0x58c] ss:$16 sps:$4 sm:$0xff]   ;;  %v7559_v8 = vld [vmem:[%s8722_s8 + $0x580] ss:$16 sps:$4 sm:$0xff]  }
  0xcb   : > { %5224 = vmatpush1.bf16.msra.mxu0 %v7475_v10  ;;  %5757 = vmatpush1.bf16.msra.mxu1 %v7478_v11  ;;  %v7567_v10 = vld [vmem:[%s8722_s8 + $0x5a4] ss:$16 sps:$4 sm:$0xff]   ;;  %v7570_v11 = vld [vmem:[%s8722_s8 + $0x5ac] ss:$16 sps:$4 sm:$0xff]  }
  0xcc   : > { %5225 = vmatprep.subr.bf16.mxu0 %v7483_v12  ;;  %5758 = vmatprep.subr.bf16.mxu1 %v7486_v14  ;;  %v7565_v12 = vld [vmem:[%s8722_s8 + $0x5a0] ss:$16 sps:$4 sm:$0xff]   ;;  %v7568_v14 = vld [vmem:[%s8722_s8 + $0x5a8] ss:$16 sps:$4 sm:$0xff]  }
  0xcf   : > { %5226 = vmatpush1.bf16.msra.mxu0 %v7481_v16  ;;  %5759 = vmatpush1.bf16.msra.mxu1 %v7484_v52  ;;  %v7573_v16 = vld [vmem:[%s8722_s8 + $0x5c4] ss:$16 sps:$4 sm:$0xff]   ;;  %v7576_v52 = vld [vmem:[%s8722_s8 + $0x5cc] ss:$16 sps:$4 sm:$0xff]  }
  0xd0   : > { %5236 = vmatprep.subr.bf16.mxu0 %v7489_v17  ;;  %5769 = vmatprep.subr.bf16.mxu1 %v7492_v18  ;;  %v7571_v17 = vld [vmem:[%s8722_s8 + $0x5c0] ss:$16 sps:$4 sm:$0xff]   ;;  %v7574_v18 = vld [vmem:[%s8722_s8 + $0x5c8] ss:$16 sps:$4 sm:$0xff]  }
  0xd2   : > { %5228 = vmatmul.mubr.bf16.vlgmr.msra.gmra.mrb[0].mxu0 %v1090_v21  ;;  %5761 = vmatmul.mubr.bf16.vlgmr.msra.gmra.mrb[0].mxu1 %v1090_v21  ;;  %v7577_v21 = vld [vmem:[%s8722_s8 + $0x5e0] ss:$16 sps:$4 sm:$0xff]  }
  0xd3   : > { %5237 = vmatpush1.bf16.msra.mxu0 %v7487_v20  ;;  %5770 = vmatpush1.bf16.msra.mxu1 %v7490_v22  ;;  %v7582_v20 = vld [vmem:[%s8722_s8 + $0x5ec] ss:$16 sps:$4 sm:$0xff]   ;;  %v7580_v22 = vld [vmem:[%s8722_s8 + $0x5e8] ss:$16 sps:$4 sm:$0xff]  }
  0xd4   : > { %5238 = vmatprep.subr.bf16.mxu0 %v7495_v23  ;;  %5771 = vmatprep.subr.bf16.mxu1 %v7498_v24  ;;  %v7586_v23 = vld [vmem:[%s8722_s8 + $0x604] ss:$16 sps:$4 sm:$0xff]   ;;  %v7589_v24 = vld [vmem:[%s8722_s8 + $0x60c] ss:$16 sps:$4 sm:$0xff]  }
  0xd5   : > { %5268 = vmatprep.mubr.bf16.mxu0 %v8896_v25  ;;  %5801 = vmatprep.mubr.bf16.mxu1 %v8896_v25 }
  0xd7   : > { %5239 = vmatpush1.bf16.msra.mxu0 %v7493_v26  ;;  %5772 = vmatpush1.bf16.msra.mxu1 %v7496_v13  ;;  %v7584_v26 = vld [vmem:[%s8722_s8 + $0x600] ss:$16 sps:$4 sm:$0xff]   ;;  %v8963_v13 = vrot.slane %v8881_v15, %v8781_v49 }
  0xd8   : > { %5240 = vmatprep.subr.bf16.mxu0 %v7501_v27  ;;  %5773 = vmatprep.subr.bf16.mxu1 %v7504_v28  ;;  %v7587_v27 = vld [vmem:[%s8722_s8 + $0x608] ss:$16 sps:$4 sm:$0xff]   ;;  %v7592_v28 = vld [vmem:[%s8722_s8 + $0x624] ss:$16 sps:$4 sm:$0xff]   ;;  %v7590_v15 = vld [vmem:[%s8722_s8 + $0x620] ss:$16 sps:$4 sm:$0xff]  }
  0xdb   : > { %5241 = vmatpush1.bf16.msra.mxu0 %v7499_v29  ;;  %5774 = vmatpush1.bf16.msra.mxu1 %v7502_v30  ;;  %v7595_v29 = vld [vmem:[%s8722_s8 + $0x62c] ss:$16 sps:$4 sm:$0xff]   ;;  %v1093_v30 = vcombine.high %v8896_v25, %v8896_v25  ;;  %v7596_v25 = vld [vmem:[%s8722_s8 + $0x640] ss:$16 sps:$4 sm:$0xff]  }
  0xdc   : > { %5242 = vmatprep.subr.bf16.mxu0 %v7507_v31  ;;  %5775 = vmatprep.subr.bf16.mxu1 %v7510_v32  ;;  %v7593_v31 = vld [vmem:[%s8722_s8 + $0x628] ss:$16 sps:$4 sm:$0xff]   ;;  %v7598_v32 = vld [vmem:[%s8722_s8 + $0x644] ss:$16 sps:$4 sm:$0xff]  }
  0xdf   : > { %5243 = vmatpush1.bf16.msra.mxu0 %v7505_v33  ;;  %5776 = vmatpush1.bf16.msra.mxu1 %v7508_v34  ;;  %v7601_v33 = vld [vmem:[%s8722_s8 + $0x64c] ss:$16 sps:$4 sm:$0xff]   ;;  %v7599_v34 = vld [vmem:[%s8722_s8 + $0x648] ss:$16 sps:$4 sm:$0xff]  }
  0xe0   : > { %5244 = vmatprep.subr.bf16.mxu0 %v7513_v35  ;;  %5777 = vmatprep.subr.bf16.mxu1 %v7516_v36  ;;  %v7604_v35 = vld [vmem:[%s8722_s8 + $0x664] ss:$16 sps:$4 sm:$0xff]   ;;  %v7607_v36 = vld [vmem:[%s8722_s8 + $0x66c] ss:$16 sps:$4 sm:$0xff]  }
  0xe3   : > { %5245 = vmatpush1.bf16.msra.mxu0 %v7511_v37  ;;  %5778 = vmatpush1.bf16.msra.mxu1 %v7514_v38  ;;  %v7602_v37 = vld [vmem:[%s8722_s8 + $0x660] ss:$16 sps:$4 sm:$0xff]   ;;  %v7605_v38 = vld [vmem:[%s8722_s8 + $0x668] ss:$16 sps:$4 sm:$0xff]  }
  0xe4   : > { %5246 = vmatprep.subr.bf16.mxu0 %v7519_v39  ;;  %5779 = vmatprep.subr.bf16.mxu1 %v7522_v40  ;;  %v7610_v39 = vld [vmem:[%s8722_s8 + $0x684] ss:$16 sps:$4 sm:$0xff]   ;;  %v7613_v40 = vld [vmem:[%s8722_s8 + $0x68c] ss:$16 sps:$4 sm:$0xff]  }
  0xe7   : > { %5247 = vmatpush1.bf16.msra.mxu0 %v7517_v41  ;;  %5780 = vmatpush1.bf16.msra.mxu1 %v7520_v43  ;;  %v7608_v41 = vld [vmem:[%s8722_s8 + $0x680] ss:$16 sps:$4 sm:$0xff]   ;;  %v7611_v43 = vld [vmem:[%s8722_s8 + $0x688] ss:$16 sps:$4 sm:$0xff]  }
  0xe8   : > { %5248 = vmatprep.subr.bf16.mxu0 %v7525_v44  ;;  %5781 = vmatprep.subr.bf16.mxu1 %v7528_v45  ;;  %v7616_v44 = vld [vmem:[%s8722_s8 + $0x6a4] ss:$16 sps:$4 sm:$0xff]   ;;  %v7619_v45 = vld [vmem:[%s8722_s8 + $0x6ac] ss:$16 sps:$4 sm:$0xff]  }
  0xeb   : > { %5249 = vmatpush1.bf16.msra.mxu0 %v7523_v46  ;;  %5782 = vmatpush1.bf16.msra.mxu1 %v7526_v47  ;;  %v7614_v46 = vld [vmem:[%s8722_s8 + $0x6a0] ss:$16 sps:$4 sm:$0xff]   ;;  %v7617_v47 = vld [vmem:[%s8722_s8 + $0x6a8] ss:$16 sps:$4 sm:$0xff]  }
  0xec   : > { %5250 = vmatprep.subr.bf16.mxu0 %v7531_v48  ;;  %5783 = vmatprep.subr.bf16.mxu1 %v7534_v50  ;;  %v7622_v48 = vld [vmem:[%s8722_s8 + $0x6c4] ss:$16 sps:$4 sm:$0xff]   ;;  %v7625_v50 = vld [vmem:[%s8722_s8 + $0x6cc] ss:$16 sps:$4 sm:$0xff]  }
  0xef   : > { %5251 = vmatpush1.bf16.msra.mxu0 %v7529_v51  ;;  %5784 = vmatpush1.bf16.msra.mxu1 %v7532_v53  ;;  %v7620_v51 = vld [vmem:[%s8722_s8 + $0x6c0] ss:$16 sps:$4 sm:$0xff]   ;;  %v7623_v53 = vld [vmem:[%s8722_s8 + $0x6c8] ss:$16 sps:$4 sm:$0xff]  }
  0xf0   : > { %5252 = vmatprep.subr.bf16.mxu0 %v7537_v54  ;;  %5785 = vmatprep.subr.bf16.mxu1 %v7540_v55  ;;  %v7628_v54 = vld [vmem:[%s8722_s8 + $0x6e4] ss:$16 sps:$4 sm:$0xff]   ;;  %v7631_v55 = vld [vmem:[%s8722_s8 + $0x6ec] ss:$16 sps:$4 sm:$0xff]  }
  0xf3   : > { %5253 = vmatpush1.bf16.msra.mxu0 %v7535_v56  ;;  %5786 = vmatpush1.bf16.msra.mxu1 %v7538_v57  ;;  %v7626_v56 = vld [vmem:[%s8722_s8 + $0x6e0] ss:$16 sps:$4 sm:$0xff]   ;;  %v7629_v57 = vld [vmem:[%s8722_s8 + $0x6e8] ss:$16 sps:$4 sm:$0xff]  }
  0xf4   : > { %5254 = vmatprep.subr.bf16.mxu0 %v7543_v58  ;;  %5787 = vmatprep.subr.bf16.mxu1 %v7546_v59  ;;  %v7634_v58 = vld [vmem:[%s8722_s8 + $0x704] ss:$16 sps:$4 sm:$0xff]   ;;  %v7637_v59 = vld [vmem:[%s8722_s8 + $0x70c] ss:$16 sps:$4 sm:$0xff]  }
  0xf7   : > { %5255 = vmatpush1.bf16.msra.mxu0 %v7541_v60  ;;  %5788 = vmatpush1.bf16.msra.mxu1 %v7544_v61  ;;  %v7632_v60 = vld [vmem:[%s8722_s8 + $0x700] ss:$16 sps:$4 sm:$0xff]   ;;  %v7635_v61 = vld [vmem:[%s8722_s8 + $0x708] ss:$16 sps:$4 sm:$0xff]  }
  0xf8   : > { %5256 = vmatprep.subr.bf16.mxu0 %v7549_v62  ;;  %5789 = vmatprep.subr.bf16.mxu1 %v7552_v63  ;;  %v7640_v62 = vld [vmem:[%s8722_s8 + $0x724] ss:$16 sps:$4 sm:$0xff]   ;;  %v7643_v63 = vld [vmem:[%s8722_s8 + $0x72c] ss:$16 sps:$4 sm:$0xff]  }
  0xfb   : > { %5257 = vmatpush1.bf16.msra.mxu0 %v7547_v0  ;;  %5790 = vmatpush1.bf16.msra.mxu1 %v7550_v1  ;;  %v7638_v0 = vld [vmem:[%s8722_s8 + $0x720] ss:$16 sps:$4 sm:$0xff]   ;;  %v7641_v1 = vld [vmem:[%s8722_s8 + $0x728] ss:$16 sps:$4 sm:$0xff]  }
  0xfc   : > { %5258 = vmatprep.subr.bf16.mxu0 %v7555_v2  ;;  %5791 = vmatprep.subr.bf16.mxu1 %v7558_v3  ;;  %v7646_v2 = vld [vmem:[%s8722_s8 + $0x744] ss:$16 sps:$4 sm:$0xff]   ;;  %v7649_v3 = vld [vmem:[%s8722_s8 + $0x74c] ss:$16 sps:$4 sm:$0xff]  }
  0xff   : > { %5259 = vmatpush1.bf16.msra.mxu0 %v7553_v4  ;;  %5792 = vmatpush1.bf16.msra.mxu1 %v7556_v5  ;;  %v7644_v4 = vld [vmem:[%s8722_s8 + $0x740] ss:$16 sps:$4 sm:$0xff]   ;;  %v7647_v5 = vld [vmem:[%s8722_s8 + $0x748] ss:$16 sps:$4 sm:$0xff]  }
 0x100   : > { %5260 = vmatprep.subr.bf16.mxu0 %v7561_v6  ;;  %5793 = vmatprep.subr.bf16.mxu1 %v7564_v7  ;;  %v7652_v6 = vld [vmem:[%s8722_s8 + $0x764] ss:$16 sps:$4 sm:$0xff]   ;;  %v7655_v7 = vld [vmem:[%s8722_s8 + $0x76c] ss:$16 sps:$4 sm:$0xff]  }
 0x103   : > { %5261 = vmatpush1.bf16.msra.mxu0 %v7559_v8  ;;  %5794 = vmatpush1.bf16.msra.mxu1 %v7562_v9  ;;  %v7650_v8 = vld [vmem:[%s8722_s8 + $0x760] ss:$16 sps:$4 sm:$0xff]   ;;  %v7653_v9 = vld [vmem:[%s8722_s8 + $0x768] ss:$16 sps:$4 sm:$0xff]  }
 0x104   : > { %5262 = vmatprep.subr.bf16.mxu0 %v7567_v10  ;;  %5795 = vmatprep.subr.bf16.mxu1 %v7570_v11  ;;  %v7658_v10 = vld [vmem:[%s8722_s8 + $0x784] ss:$16 sps:$4 sm:$0xff]   ;;  %v7661_v11 = vld [vmem:[%s8722_s8 + $0x78c] ss:$16 sps:$4 sm:$0xff]  }
 0x107   : > { %5263 = vmatpush1.bf16.msra.mxu0 %v7565_v12  ;;  %5796 = vmatpush1.bf16.msra.mxu1 %v7568_v14  ;;  %v7656_v12 = vld [vmem:[%s8722_s8 + $0x780] ss:$16 sps:$4 sm:$0xff]   ;;  %v7659_v14 = vld [vmem:[%s8722_s8 + $0x788] ss:$16 sps:$4 sm:$0xff]  }
 0x108   : > { %5264 = vmatprep.subr.bf16.mxu0 %v7573_v16  ;;  %5797 = vmatprep.subr.bf16.mxu1 %v7576_v52  ;;  %v7664_v16 = vld [vmem:[%s8722_s8 + $0x7a4] ss:$16 sps:$4 sm:$0xff]   ;;  %v7667_v52 = vld [vmem:[%s8722_s8 + $0x7ac] ss:$16 sps:$4 sm:$0xff]  }
 0x10b   : > { %5265 = vmatpush1.bf16.msra.mxu0 %v7571_v17  ;;  %5798 = vmatpush1.bf16.msra.mxu1 %v7574_v18  ;;  %v7662_v17 = vld [vmem:[%s8722_s8 + $0x7a0] ss:$16 sps:$4 sm:$0xff]   ;;  %v7665_v18 = vld [vmem:[%s8722_s8 + $0x7a8] ss:$16 sps:$4 sm:$0xff]  }
 0x10c   : > { %5266 = vmatprep.subr.bf16.mxu0 %v7579_v19  ;;  %5799 = vmatprep.subr.bf16.mxu1 %v7582_v20  ;;  %v7670_v19 = vld [vmem:[%s8722_s8 + $0x7c4] ss:$16 sps:$4 sm:$0xff]   ;;  %v7673_v20 = vld [vmem:[%s8722_s8 + $0x7cc] ss:$16 sps:$4 sm:$0xff]  }
 0x10f   : > { %5267 = vmatpush1.bf16.msra.mxu0 %v7577_v21  ;;  %5800 = vmatpush1.bf16.msra.mxu1 %v7580_v22  ;;  %v9027_v21 = vld.sshfl [vmem:[%s9682_s0 + $0x8] sm:$0xff pattern:$0x75316420]  ;;  %v7668_v22 = vld [vmem:[%s8722_s8 + $0x7c0] ss:$16 sps:$4 sm:$0xff]  }
 0x110   : > { %5277 = vmatprep.subr.bf16.mxu0 %v7586_v23  ;;  %5810 = vmatprep.subr.bf16.mxu1 %v7589_v24  ;;  %v7671_v23 = vld [vmem:[%s8722_s8 + $0x7c8] ss:$16 sps:$4 sm:$0xff]   ;;  %v7676_v24 = vld [vmem:[%s8722_s8 + $0x7e4] ss:$16 sps:$4 sm:$0xff]  }
 0x112   : > { %5269 = vmatmul.mubr.bf16.vlgmr.msra.gmra.mrb[0].mxu0 %v8963_v13  ;;  %5802 = vmatmul.mubr.bf16.vlgmr.msra.gmra.mrb[0].mxu1 %v8963_v13 }
 0x113   : > { %5278 = vmatpush1.bf16.msra.mxu0 %v7584_v26  ;;  %5811 = vmatpush1.bf16.msra.mxu1 %v7587_v27  ;;  %v7679_v26 = vld [vmem:[%s8722_s8 + $0x7ec] ss:$16 sps:$4 sm:$0xff]   ;;  %v7674_v27 = vld [vmem:[%s8722_s8 + $0x7e0] ss:$16 sps:$4 sm:$0xff]  }
 0x114   : > { %5279 = vmatprep.subr.bf16.mxu0 %v7592_v28  ;;  %5812 = vmatprep.subr.bf16.mxu1 %v7595_v29  ;;  %v7677_v28 = vld [vmem:[%s8722_s8 + $0x7e8] ss:$16 sps:$4 sm:$0xff]   ;;  %v7682_v29 = vld [vmem:[%s8722_s8 + $0x804] ss:$16 sps:$4 sm:$0xff]  }
 0x115   : > { %5309 = vmatprep.mubr.bf16.mxu0 %v1093_v30  ;;  %5842 = vmatprep.mubr.bf16.mxu1 %v1093_v30  ;;  %v7685_v30 = vld [vmem:[%s8722_s8 + $0x80c] ss:$16 sps:$4 sm:$0xff]  }
 0x117   : > { %5280 = vmatpush1.bf16.msra.mxu0 %v7590_v15  ;;  %5813 = vmatpush1.bf16.msra.mxu1 %v7593_v31  ;;  %v1109_v15 = vcombine.high %v9027_v21, %v9027_v21  ;;  %v1091_v31 = vcombine.high %v8963_v13, %v8963_v13  ;;  %v7686_v13 = vld [vmem:[%s8722_s8 + $0x820] ss:$16 sps:$4 sm:$0xff]  }
 0x118   : > { %5281 = vmatprep.subr.bf16.mxu0 %v7598_v32  ;;  %5814 = vmatprep.subr.bf16.mxu1 %v7601_v33  ;;  %v7680_v32 = vld [vmem:[%s8722_s8 + $0x800] ss:$16 sps:$4 sm:$0xff]   ;;  %v7683_v33 = vld [vmem:[%s8722_s8 + $0x808] ss:$16 sps:$4 sm:$0xff]  }
 0x11b   : > { %5282 = vmatpush1.bf16.msra.mxu0 %v7596_v25  ;;  %5815 = vmatpush1.bf16.msra.mxu1 %v7599_v34  ;;  %v7688_v25 = vld [vmem:[%s8722_s8 + $0x824] ss:$16 sps:$4 sm:$0xff]   ;;  %v7691_v34 = vld [vmem:[%s8722_s8 + $0x82c] ss:$16 sps:$4 sm:$0xff]  }
 0x11c   : > { %5283 = vmatprep.subr.bf16.mxu0 %v7604_v35  ;;  %5816 = vmatprep.subr.bf16.mxu1 %v7607_v36  ;;  %v9046_v35 = vrot.slane %v1109_v15, %v8781_v49  ;;  %v7689_v36 = vld [vmem:[%s8722_s8 + $0x828] ss:$16 sps:$4 sm:$0xff]   ;;  %v7772_v15 = vld [vmem:[%s8722_s8 + $0x9e4] ss:$16 sps:$4 sm:$0xff]  }
 0x11f   : > { %5284 = vmatpush1.bf16.msra.mxu0 %v7602_v37  ;;  %5817 = vmatpush1.bf16.msra.mxu1 %v7605_v38  ;;  %v7694_v37 = vld [vmem:[%s8722_s8 + $0x844] ss:$16 sps:$4 sm:$0xff]   ;;  %v7697_v38 = vld [vmem:[%s8722_s8 + $0x84c] ss:$16 sps:$4 sm:$0xff]  }
 0x120   : > { %5285 = vmatprep.subr.bf16.mxu0 %v7610_v39  ;;  %5818 = vmatprep.subr.bf16.mxu1 %v7613_v40  ;;  %v7692_v39 = vld [vmem:[%s8722_s8 + $0x840] ss:$16 sps:$4 sm:$0xff]   ;;  %v7695_v40 = vld [vmem:[%s8722_s8 + $0x848] ss:$16 sps:$4 sm:$0xff]  }
 0x123   : > { %5286 = vmatpush1.bf16.msra.mxu0 %v7608_v41  ;;  %5819 = vmatpush1.bf16.msra.mxu1 %v7611_v43  ;;  %v7700_v41 = vld [vmem:[%s8722_s8 + $0x864] ss:$16 sps:$4 sm:$0xff]   ;;  %v7703_v43 = vld [vmem:[%s8722_s8 + $0x86c] ss:$16 sps:$4 sm:$0xff]  }
 0x124   : > { %5287 = vmatprep.subr.bf16.mxu0 %v7616_v44  ;;  %5820 = vmatprep.subr.bf16.mxu1 %v7619_v45  ;;  %v7698_v44 = vld [vmem:[%s8722_s8 + $0x860] ss:$16 sps:$4 sm:$0xff]   ;;  %v7701_v45 = vld [vmem:[%s8722_s8 + $0x868] ss:$16 sps:$4 sm:$0xff]  }
 0x127   : > { %5288 = vmatpush1.bf16.msra.mxu0 %v7614_v46  ;;  %5821 = vmatpush1.bf16.msra.mxu1 %v7617_v47  ;;  %v7706_v46 = vld [vmem:[%s8722_s8 + $0x884] ss:$16 sps:$4 sm:$0xff]   ;;  %v7709_v47 = vld [vmem:[%s8722_s8 + $0x88c] ss:$16 sps:$4 sm:$0xff]  }
 0x128   : > { %5289 = vmatprep.subr.bf16.mxu0 %v7622_v48  ;;  %5822 = vmatprep.subr.bf16.mxu1 %v7625_v50  ;;  %v7704_v48 = vld [vmem:[%s8722_s8 + $0x880] ss:$16 sps:$4 sm:$0xff]   ;;  %v7707_v50 = vld [vmem:[%s8722_s8 + $0x888] ss:$16 sps:$4 sm:$0xff]  }
 0x12b   : > { %5290 = vmatpush1.bf16.msra.mxu0 %v7620_v51  ;;  %5823 = vmatpush1.bf16.msra.mxu1 %v7623_v53  ;;  %v7712_v51 = vld [vmem:[%s8722_s8 + $0x8a4] ss:$16 sps:$4 sm:$0xff]   ;;  %v7715_v53 = vld [vmem:[%s8722_s8 + $0x8ac] ss:$16 sps:$4 sm:$0xff]  }
 0x12c   : > { %5291 = vmatprep.subr.bf16.mxu0 %v7628_v54  ;;  %5824 = vmatprep.subr.bf16.mxu1 %v7631_v55  ;;  %v7710_v54 = vld [vmem:[%s8722_s8 + $0x8a0] ss:$16 sps:$4 sm:$0xff]   ;;  %v7713_v55 = vld [vmem:[%s8722_s8 + $0x8a8] ss:$16 sps:$4 sm:$0xff]  }
 0x12f   : > { %5292 = vmatpush1.bf16.msra.mxu0 %v7626_v56  ;;  %5825 = vmatpush1.bf16.msra.mxu1 %v7629_v57  ;;  %v7718_v56 = vld [vmem:[%s8722_s8 + $0x8c4] ss:$16 sps:$4 sm:$0xff]   ;;  %v7721_v57 = vld [vmem:[%s8722_s8 + $0x8cc] ss:$16 sps:$4 sm:$0xff]  }
 0x130   : > { %5293 = vmatprep.subr.bf16.mxu0 %v7634_v58  ;;  %5826 = vmatprep.subr.bf16.mxu1 %v7637_v59  ;;  %v7716_v58 = vld [vmem:[%s8722_s8 + $0x8c0] ss:$16 sps:$4 sm:$0xff]   ;;  %v7719_v59 = vld [vmem:[%s8722_s8 + $0x8c8] ss:$16 sps:$4 sm:$0xff]  }
 0x133   : > { %5294 = vmatpush1.bf16.msra.mxu0 %v7632_v60  ;;  %5827 = vmatpush1.bf16.msra.mxu1 %v7635_v61  ;;  %v7724_v60 = vld [vmem:[%s8722_s8 + $0x8e4] ss:$16 sps:$4 sm:$0xff]   ;;  %v7727_v61 = vld [vmem:[%s8722_s8 + $0x8ec] ss:$16 sps:$4 sm:$0xff]  }
 0x134   : > { %5295 = vmatprep.subr.bf16.mxu0 %v7640_v62  ;;  %5828 = vmatprep.subr.bf16.mxu1 %v7643_v63  ;;  %v7722_v62 = vld [vmem:[%s8722_s8 + $0x8e0] ss:$16 sps:$4 sm:$0xff]   ;;  %v7725_v63 = vld [vmem:[%s8722_s8 + $0x8e8] ss:$16 sps:$4 sm:$0xff]  }
 0x137   : > { %5296 = vmatpush1.bf16.msra.mxu0 %v7638_v0  ;;  %5829 = vmatpush1.bf16.msra.mxu1 %v7641_v1  ;;  %v7730_v0 = vld [vmem:[%s8722_s8 + $0x904] ss:$16 sps:$4 sm:$0xff]   ;;  %v7733_v1 = vld [vmem:[%s8722_s8 + $0x90c] ss:$16 sps:$4 sm:$0xff]  }
 0x138   : > { %5297 = vmatprep.subr.bf16.mxu0 %v7646_v2  ;;  %5830 = vmatprep.subr.bf16.mxu1 %v7649_v3  ;;  %v7728_v2 = vld [vmem:[%s8722_s8 + $0x900] ss:$16 sps:$4 sm:$0xff]   ;;  %v7731_v3 = vld [vmem:[%s8722_s8 + $0x908] ss:$16 sps:$4 sm:$0xff]  }
 0x13b   : > { %5298 = vmatpush1.bf16.msra.mxu0 %v7644_v4  ;;  %5831 = vmatpush1.bf16.msra.mxu1 %v7647_v5  ;;  %v7736_v4 = vld [vmem:[%s8722_s8 + $0x924] ss:$16 sps:$4 sm:$0xff]   ;;  %v7739_v5 = vld [vmem:[%s8722_s8 + $0x92c] ss:$16 sps:$4 sm:$0xff]  }
 0x13c   : > { %5299 = vmatprep.subr.bf16.mxu0 %v7652_v6  ;;  %5832 = vmatprep.subr.bf16.mxu1 %v7655_v7  ;;  %v7734_v6 = vld [vmem:[%s8722_s8 + $0x920] ss:$16 sps:$4 sm:$0xff]   ;;  %v7737_v7 = vld [vmem:[%s8722_s8 + $0x928] ss:$16 sps:$4 sm:$0xff]  }
 0x13f   : > { %5300 = vmatpush1.bf16.msra.mxu0 %v7650_v8  ;;  %5833 = vmatpush1.bf16.msra.mxu1 %v7653_v9  ;;  %v7742_v8 = vld [vmem:[%s8722_s8 + $0x944] ss:$16 sps:$4 sm:$0xff]   ;;  %v7745_v9 = vld [vmem:[%s8722_s8 + $0x94c] ss:$16 sps:$4 sm:$0xff]  }
 0x140   : > { %5301 = vmatprep.subr.bf16.mxu0 %v7658_v10  ;;  %5834 = vmatprep.subr.bf16.mxu1 %v7661_v11  ;;  %v7740_v10 = vld [vmem:[%s8722_s8 + $0x940] ss:$16 sps:$4 sm:$0xff]   ;;  %v7743_v11 = vld [vmem:[%s8722_s8 + $0x948] ss:$16 sps:$4 sm:$0xff]  }
 0x143   : > { %5302 = vmatpush1.bf16.msra.mxu0 %v7656_v12  ;;  %5835 = vmatpush1.bf16.msra.mxu1 %v7659_v14  ;;  %v7748_v12 = vld [vmem:[%s8722_s8 + $0x964] ss:$16 sps:$4 sm:$0xff]   ;;  %v7751_v14 = vld [vmem:[%s8722_s8 + $0x96c] ss:$16 sps:$4 sm:$0xff]  }
 0x144   : > { %5303 = vmatprep.subr.bf16.mxu0 %v7664_v16  ;;  %5836 = vmatprep.subr.bf16.mxu1 %v7667_v52  ;;  %v7746_v16 = vld [vmem:[%s8722_s8 + $0x960] ss:$16 sps:$4 sm:$0xff]   ;;  %v7749_v52 = vld [vmem:[%s8722_s8 + $0x968] ss:$16 sps:$4 sm:$0xff]  }
 0x147   : > { %5304 = vmatpush1.bf16.msra.mxu0 %v7662_v17  ;;  %5837 = vmatpush1.bf16.msra.mxu1 %v7665_v18  ;;  %v7754_v17 = vld [vmem:[%s8722_s8 + $0x984] ss:$16 sps:$4 sm:$0xff]   ;;  %v7757_v18 = vld [vmem:[%s8722_s8 + $0x98c] ss:$16 sps:$4 sm:$0xff]  }
 0x148   : > { %5305 = vmatprep.subr.bf16.mxu0 %v7670_v19  ;;  %5838 = vmatprep.subr.bf16.mxu1 %v7673_v20  ;;  %v7752_v19 = vld [vmem:[%s8722_s8 + $0x980] ss:$16 sps:$4 sm:$0xff]   ;;  %v7755_v20 = vld [vmem:[%s8722_s8 + $0x988] ss:$16 sps:$4 sm:$0xff]  }
 0x14b   : > { %5306 = vmatpush1.bf16.msra.mxu0 %v7668_v22  ;;  %5839 = vmatpush1.bf16.msra.mxu1 %v7671_v23  ;;  %v7760_v22 = vld [vmem:[%s8722_s8 + $0x9a4] ss:$16 sps:$4 sm:$0xff]   ;;  %v7763_v23 = vld [vmem:[%s8722_s8 + $0x9ac] ss:$16 sps:$4 sm:$0xff]  }
 0x14c   : > { %5307 = vmatprep.subr.bf16.mxu0 %v7676_v24  ;;  %5840 = vmatprep.subr.bf16.mxu1 %v7679_v26  ;;  %v7758_v24 = vld [vmem:[%s8722_s8 + $0x9a0] ss:$16 sps:$4 sm:$0xff]   ;;  %v7761_v26 = vld [vmem:[%s8722_s8 + $0x9a8] ss:$16 sps:$4 sm:$0xff]  }
 0x14f   : > { %5308 = vmatpush1.bf16.msra.mxu0 %v7674_v27  ;;  %5841 = vmatpush1.bf16.msra.mxu1 %v7677_v28  ;;  %v7766_v27 = vld [vmem:[%s8722_s8 + $0x9c4] ss:$16 sps:$4 sm:$0xff]   ;;  %v7769_v28 = vld [vmem:[%s8722_s8 + $0x9cc] ss:$16 sps:$4 sm:$0xff]  }
 0x150   : > { %5318 = vmatprep.subr.bf16.mxu0 %v7682_v29  ;;  %5851 = vmatprep.subr.bf16.mxu1 %v7685_v30  ;;  %v7764_v29 = vld [vmem:[%s8722_s8 + $0x9c0] ss:$16 sps:$4 sm:$0xff]   ;;  %v7767_v30 = vld [vmem:[%s8722_s8 + $0x9c8] ss:$16 sps:$4 sm:$0xff]  }
 0x152   : > { %5310 = vmatmul.mubr.bf16.vlgmr.msra.gmra.mrb[0].mxu0 %v1091_v31  ;;  %5843 = vmatmul.mubr.bf16.vlgmr.msra.gmra.mrb[0].mxu1 %v1091_v31  ;;  %v7775_v31 = vld [vmem:[%s8722_s8 + $0x9ec] ss:$16 sps:$4 sm:$0xff]  }
 0x153   : > { %5319 = vmatpush1.bf16.msra.mxu0 %v7680_v32  ;;  %5852 = vmatpush1.bf16.msra.mxu1 %v7683_v33  ;;  %v7770_v32 = vld [vmem:[%s8722_s8 + $0x9e0] ss:$16 sps:$4 sm:$0xff]   ;;  %v7773_v33 = vld [vmem:[%s8722_s8 + $0x9e8] ss:$16 sps:$4 sm:$0xff]  }
 0x154   : > { %5320 = vmatprep.subr.bf16.mxu0 %v7688_v25  ;;  %5853 = vmatprep.subr.bf16.mxu1 %v7691_v34  ;;  %v7778_v25 = vld [vmem:[%s8722_s8 + $0xa04] ss:$16 sps:$4 sm:$0xff]   ;;  %v7781_v34 = vld [vmem:[%s8722_s8 + $0xa0c] ss:$16 sps:$4 sm:$0xff]  }
 0x155   : > { %5350 = vmatprep.mubr.bf16.mxu0 %v9046_v35  ;;  %5883 = vmatprep.mubr.bf16.mxu1 %v9046_v35 }
 0x157   : > { %5321 = vmatpush1.bf16.msra.mxu0 %v7686_v13  ;;  %5854 = vmatpush1.bf16.msra.mxu1 %v7689_v36  ;;  %v9112_v13 = vrot.slane %v9027_v21, %v8781_v49  ;;  %v7776_v36 = vld [vmem:[%s8722_s8 + $0xa00] ss:$16 sps:$4 sm:$0xff]  }
 0x158   : > { %5322 = vmatprep.subr.bf16.mxu0 %v7694_v37  ;;  %5855 = vmatprep.subr.bf16.mxu1 %v7697_v38  ;;  %v7779_v37 = vld [vmem:[%s8722_s8 + $0xa08] ss:$16 sps:$4 sm:$0xff]   ;;  %v7784_v38 = vld [vmem:[%s8722_s8 + $0xa24] ss:$16 sps:$4 sm:$0xff]   ;;  %v7782_v21 = vld [vmem:[%s8722_s8 + $0xa20] ss:$16 sps:$4 sm:$0xff]  }
 0x15b   : > { %5323 = vmatpush1.bf16.msra.mxu0 %v7692_v39  ;;  %5856 = vmatpush1.bf16.msra.mxu1 %v7695_v40  ;;  %v7787_v39 = vld [vmem:[%s8722_s8 + $0xa2c] ss:$16 sps:$4 sm:$0xff]   ;;  %v1141_v40 = vcombine.high %v9046_v35, %v9046_v35  ;;  %v7788_v35 = vld [vmem:[%s8722_s8 + $0xa40] ss:$16 sps:$4 sm:$0xff]  }
 0x15c   : > { %5324 = vmatprep.subr.bf16.mxu0 %v7700_v41  ;;  %5857 = vmatprep.subr.bf16.mxu1 %v7703_v43  ;;  %v7785_v41 = vld [vmem:[%s8722_s8 + $0xa28] ss:$16 sps:$4 sm:$0xff]   ;;  %v7790_v43 = vld [vmem:[%s8722_s8 + $0xa44] ss:$16 sps:$4 sm:$0xff]  }
 0x15f   : > { %5325 = vmatpush1.bf16.msra.mxu0 %v7698_v44  ;;  %5858 = vmatpush1.bf16.msra.mxu1 %v7701_v45  ;;  %v7793_v44 = vld [vmem:[%s8722_s8 + $0xa4c] ss:$16 sps:$4 sm:$0xff]   ;;  %v7791_v45 = vld [vmem:[%s8722_s8 + $0xa48] ss:$16 sps:$4 sm:$0xff]  }
 0x160   : > { %5326 = vmatprep.subr.bf16.mxu0 %v7706_v46  ;;  %5859 = vmatprep.subr.bf16.mxu1 %v7709_v47  ;;  %v7796_v46 = vld [vmem:[%s8722_s8 + $0xa64] ss:$16 sps:$4 sm:$0xff]   ;;  %v7799_v47 = vld [vmem:[%s8722_s8 + $0xa6c] ss:$16 sps:$4 sm:$0xff]  }
 0x163   : > { %5327 = vmatpush1.bf16.msra.mxu0 %v7704_v48  ;;  %5860 = vmatpush1.bf16.msra.mxu1 %v7707_v50  ;;  %v7794_v48 = vld [vmem:[%s8722_s8 + $0xa60] ss:$16 sps:$4 sm:$0xff]   ;;  %v7797_v50 = vld [vmem:[%s8722_s8 + $0xa68] ss:$16 sps:$4 sm:$0xff]  }
 0x164   : > { %5328 = vmatprep.subr.bf16.mxu0 %v7712_v51  ;;  %5861 = vmatprep.subr.bf16.mxu1 %v7715_v53  ;;  %v7802_v51 = vld [vmem:[%s8722_s8 + $0xa84] ss:$16 sps:$4 sm:$0xff]   ;;  %v7805_v53 = vld [vmem:[%s8722_s8 + $0xa8c] ss:$16 sps:$4 sm:$0xff]  }
 0x167   : > { %5329 = vmatpush1.bf16.msra.mxu0 %v7710_v54  ;;  %5862 = vmatpush1.bf16.msra.mxu1 %v7713_v55  ;;  %v7800_v54 = vld [vmem:[%s8722_s8 + $0xa80] ss:$16 sps:$4 sm:$0xff]   ;;  %v7803_v55 = vld [vmem:[%s8722_s8 + $0xa88] ss:$16 sps:$4 sm:$0xff]  }
 0x168   : > { %5330 = vmatprep.subr.bf16.mxu0 %v7718_v56  ;;  %5863 = vmatprep.subr.bf16.mxu1 %v7721_v57  ;;  %v7808_v56 = vld [vmem:[%s8722_s8 + $0xaa4] ss:$16 sps:$4 sm:$0xff]   ;;  %v7811_v57 = vld [vmem:[%s8722_s8 + $0xaac] ss:$16 sps:$4 sm:$0xff]  }
 0x16b   : > { %5331 = vmatpush1.bf16.msra.mxu0 %v7716_v58  ;;  %5864 = vmatpush1.bf16.msra.mxu1 %v7719_v59  ;;  %v7806_v58 = vld [vmem:[%s8722_s8 + $0xaa0] ss:$16 sps:$4 sm:$0xff]   ;;  %v7809_v59 = vld [vmem:[%s8722_s8 + $0xaa8] ss:$16 sps:$4 sm:$0xff]  }
 0x16c   : > { %5332 = vmatprep.subr.bf16.mxu0 %v7724_v60  ;;  %5865 = vmatprep.subr.bf16.mxu1 %v7727_v61  ;;  %v7814_v60 = vld [vmem:[%s8722_s8 + $0xac4] ss:$16 sps:$4 sm:$0xff]   ;;  %v7817_v61 = vld [vmem:[%s8722_s8 + $0xacc] ss:$16 sps:$4 sm:$0xff]  }
 0x16f   : > { %5333 = vmatpush1.bf16.msra.mxu0 %v7722_v62  ;;  %5866 = vmatpush1.bf16.msra.mxu1 %v7725_v63  ;;  %v7812_v62 = vld [vmem:[%s8722_s8 + $0xac0] ss:$16 sps:$4 sm:$0xff]   ;;  %v7815_v63 = vld [vmem:[%s8722_s8 + $0xac8] ss:$16 sps:$4 sm:$0xff]  }
 0x170   : > { %5334 = vmatprep.subr.bf16.mxu0 %v7730_v0  ;;  %5867 = vmatprep.subr.bf16.mxu1 %v7733_v1  ;;  %v7820_v0 = vld [vmem:[%s8722_s8 + $0xae4] ss:$16 sps:$4 sm:$0xff]   ;;  %v7823_v1 = vld [vmem:[%s8722_s8 + $0xaec] ss:$16 sps:$4 sm:$0xff]  }
 0x173   : > { %5335 = vmatpush1.bf16.msra.mxu0 %v7728_v2  ;;  %5868 = vmatpush1.bf16.msra.mxu1 %v7731_v3  ;;  %v7818_v2 = vld [vmem:[%s8722_s8 + $0xae0] ss:$16 sps:$4 sm:$0xff]   ;;  %v7821_v3 = vld [vmem:[%s8722_s8 + $0xae8] ss:$16 sps:$4 sm:$0xff]  }
 0x174   : > { %5336 = vmatprep.subr.bf16.mxu0 %v7736_v4  ;;  %5869 = vmatprep.subr.bf16.mxu1 %v7739_v5  ;;  %v7826_v4 = vld [vmem:[%s8722_s8 + $0xb04] ss:$16 sps:$4 sm:$0xff]   ;;  %v7829_v5 = vld [vmem:[%s8722_s8 + $0xb0c] ss:$16 sps:$4 sm:$0xff]  }
 0x177   : > { %5337 = vmatpush1.bf16.msra.mxu0 %v7734_v6  ;;  %5870 = vmatpush1.bf16.msra.mxu1 %v7737_v7  ;;  %v7824_v6 = vld [vmem:[%s8722_s8 + $0xb00] ss:$16 sps:$4 sm:$0xff]   ;;  %v7827_v7 = vld [vmem:[%s8722_s8 + $0xb08] ss:$16 sps:$4 sm:$0xff]  }
 0x178   : > { %5338 = vmatprep.subr.bf16.mxu0 %v7742_v8  ;;  %5871 = vmatprep.subr.bf16.mxu1 %v7745_v9  ;;  %v7832_v8 = vld [vmem:[%s8722_s8 + $0xb24] ss:$16 sps:$4 sm:$0xff]   ;;  %v7835_v9 = vld [vmem:[%s8722_s8 + $0xb2c] ss:$16 sps:$4 sm:$0xff]  }
 0x17b   : > { %5339 = vmatpush1.bf16.msra.mxu0 %v7740_v10  ;;  %5872 = vmatpush1.bf16.msra.mxu1 %v7743_v11  ;;  %v7830_v10 = vld [vmem:[%s8722_s8 + $0xb20] ss:$16 sps:$4 sm:$0xff]   ;;  %v7833_v11 = vld [vmem:[%s8722_s8 + $0xb28] ss:$16 sps:$4 sm:$0xff]  }
 0x17c   : > { %5340 = vmatprep.subr.bf16.mxu0 %v7748_v12  ;;  %5873 = vmatprep.subr.bf16.mxu1 %v7751_v14  ;;  %v7838_v12 = vld [vmem:[%s8722_s8 + $0xb44] ss:$16 sps:$4 sm:$0xff]   ;;  %v7841_v14 = vld [vmem:[%s8722_s8 + $0xb4c] ss:$16 sps:$4 sm:$0xff]  }
 0x17f   : > { %5341 = vmatpush1.bf16.msra.mxu0 %v7746_v16  ;;  %5874 = vmatpush1.bf16.msra.mxu1 %v7749_v52  ;;  %v7836_v16 = vld [vmem:[%s8722_s8 + $0xb40] ss:$16 sps:$4 sm:$0xff]   ;;  %v7839_v52 = vld [vmem:[%s8722_s8 + $0xb48] ss:$16 sps:$4 sm:$0xff]  }
 0x180   : > { %5342 = vmatprep.subr.bf16.mxu0 %v7754_v17  ;;  %5875 = vmatprep.subr.bf16.mxu1 %v7757_v18  ;;  %v7844_v17 = vld [vmem:[%s8722_s8 + $0xb64] ss:$16 sps:$4 sm:$0xff]   ;;  %v7847_v18 = vld [vmem:[%s8722_s8 + $0xb6c] ss:$16 sps:$4 sm:$0xff]  }
 0x183   : > { %5343 = vmatpush1.bf16.msra.mxu0 %v7752_v19  ;;  %5876 = vmatpush1.bf16.msra.mxu1 %v7755_v20  ;;  %v7842_v19 = vld [vmem:[%s8722_s8 + $0xb60] ss:$16 sps:$4 sm:$0xff]   ;;  %v7845_v20 = vld [vmem:[%s8722_s8 + $0xb68] ss:$16 sps:$4 sm:$0xff]  }
 0x184   : > { %5344 = vmatprep.subr.bf16.mxu0 %v7760_v22  ;;  %5877 = vmatprep.subr.bf16.mxu1 %v7763_v23  ;;  %v7850_v22 = vld [vmem:[%s8722_s8 + $0xb84] ss:$16 sps:$4 sm:$0xff]   ;;  %v7853_v23 = vld [vmem:[%s8722_s8 + $0xb8c] ss:$16 sps:$4 sm:$0xff]  }
 0x187   : > { %5345 = vmatpush1.bf16.msra.mxu0 %v7758_v24  ;;  %5878 = vmatpush1.bf16.msra.mxu1 %v7761_v26  ;;  %v7848_v24 = vld [vmem:[%s8722_s8 + $0xb80] ss:$16 sps:$4 sm:$0xff]   ;;  %v7851_v26 = vld [vmem:[%s8722_s8 + $0xb88] ss:$16 sps:$4 sm:$0xff]  }
 0x188   : > { %5346 = vmatprep.subr.bf16.mxu0 %v7766_v27  ;;  %5879 = vmatprep.subr.bf16.mxu1 %v7769_v28  ;;  %v7856_v27 = vld [vmem:[%s8722_s8 + $0xba4] ss:$16 sps:$4 sm:$0xff]   ;;  %v7859_v28 = vld [vmem:[%s8722_s8 + $0xbac] ss:$16 sps:$4 sm:$0xff]  }
 0x18b   : > { %5347 = vmatpush1.bf16.msra.mxu0 %v7764_v29  ;;  %5880 = vmatpush1.bf16.msra.mxu1 %v7767_v30  ;;  %v7854_v29 = vld [vmem:[%s8722_s8 + $0xba0] ss:$16 sps:$4 sm:$0xff]   ;;  %v7857_v30 = vld [vmem:[%s8722_s8 + $0xba8] ss:$16 sps:$4 sm:$0xff]  }
 0x18c   : > { %5348 = vmatprep.subr.bf16.mxu0 %v7772_v15  ;;  %5881 = vmatprep.subr.bf16.mxu1 %v7775_v31  ;;  %v7862_v15 = vld [vmem:[%s8722_s8 + $0xbc4] ss:$16 sps:$4 sm:$0xff]   ;;  %v7865_v31 = vld [vmem:[%s8722_s8 + $0xbcc] ss:$16 sps:$4 sm:$0xff]  }
 0x18f   : > { %5349 = vmatpush1.bf16.msra.mxu0 %v7770_v32  ;;  %5882 = vmatpush1.bf16.msra.mxu1 %v7773_v33  ;;  %v8474_v32 = vld [vmem:[%s9682_s0 + $0x8] sm:$0xff] }
 0x190   : > { %5359 = vmatprep.subr.bf16.mxu0 %v7778_v25  ;;  %5892 = vmatprep.subr.bf16.mxu1 %v7781_v34  ;;  %v1094_v33 = vcombine.high %v8474_v32, %v8474_v32  ;;  %v7860_v25 = vld [vmem:[%s8722_s8 + $0xbc0] ss:$16 sps:$4 sm:$0xff]   ;;  %v7863_v34 = vld [vmem:[%s8722_s8 + $0xbc8] ss:$16 sps:$4 sm:$0xff]  }
 0x191   : > { %v7944_v32 = vld [vmem:[%s8722_s8 + $0xd80] ss:$16 sps:$4 sm:$0xff]  }
 0x192   : > { %5351 = vmatmul.mubr.bf16.vlgmr.msra.gmra.mrb[0].mxu0 %v9112_v13  ;;  %5884 = vmatmul.mubr.bf16.vlgmr.msra.gmra.mrb[0].mxu1 %v9112_v13 }
 0x193   : > { %5360 = vmatpush1.bf16.msra.mxu0 %v7776_v36  ;;  %5893 = vmatpush1.bf16.msra.mxu1 %v7779_v37  ;;  %v7868_v36 = vld [vmem:[%s8722_s8 + $0xbe4] ss:$16 sps:$4 sm:$0xff]   ;;  %v7871_v37 = vld [vmem:[%s8722_s8 + $0xbec] ss:$16 sps:$4 sm:$0xff]  }
 0x194   : > { %5361 = vmatprep.subr.bf16.mxu0 %v7784_v38  ;;  %5894 = vmatprep.subr.bf16.mxu1 %v7787_v39  ;;  %v9182_v38 = vrot.slane %v1094_v33, %v8781_v49  ;;  %v7866_v39 = vld [vmem:[%s8722_s8 + $0xbe0] ss:$16 sps:$4 sm:$0xff]   ;;  %v7947_v33 = vld [vmem:[%s8722_s8 + $0xd88] ss:$16 sps:$4 sm:$0xff]  }
 0x195   : > { %5391 = vmatprep.mubr.bf16.mxu0 %v1141_v40  ;;  %5924 = vmatprep.mubr.bf16.mxu1 %v1141_v40  ;;  %v7869_v40 = vld [vmem:[%s8722_s8 + $0xbe8] ss:$16 sps:$4 sm:$0xff]  }
 0x197   : > { %5362 = vmatpush1.bf16.msra.mxu0 %v7782_v21  ;;  %5895 = vmatpush1.bf16.msra.mxu1 %v7785_v41  ;;  %v7874_v21 = vld [vmem:[%s8722_s8 + $0xc04] ss:$16 sps:$4 sm:$0xff]   ;;  %v7877_v41 = vld [vmem:[%s8722_s8 + $0xc0c] ss:$16 sps:$4 sm:$0xff]  }
 0x198   : > { %5363 = vmatprep.subr.bf16.mxu0 %v7790_v43  ;;  %5896 = vmatprep.subr.bf16.mxu1 %v7793_v44  ;;  %v1110_v43 = vcombine.high %v9182_v38, %v9182_v38  ;;  %v1139_v44 = vcombine.high %v9112_v13, %v9112_v13  ;;  %v7878_v13 = vld [vmem:[%s8722_s8 + $0xc20] ss:$16 sps:$4 sm:$0xff]  }
 0x19b   : > { %5364 = vmatpush1.bf16.msra.mxu0 %v7788_v35  ;;  %5897 = vmatpush1.bf16.msra.mxu1 %v7791_v45  ;;  %v7872_v35 = vld [vmem:[%s8722_s8 + $0xc00] ss:$16 sps:$4 sm:$0xff]   ;;  %v7875_v45 = vld [vmem:[%s8722_s8 + $0xc08] ss:$16 sps:$4 sm:$0xff]  }
 0x19c   : > { %5365 = vmatprep.subr.bf16.mxu0 %v7796_v46  ;;  %5898 = vmatprep.subr.bf16.mxu1 %v7799_v47  ;;  %v7880_v46 = vld [vmem:[%s8722_s8 + $0xc24] ss:$16 sps:$4 sm:$0xff]   ;;  %v7883_v47 = vld [vmem:[%s8722_s8 + $0xc2c] ss:$16 sps:$4 sm:$0xff]  }
 0x19f   : > { %5366 = vmatpush1.bf16.msra.mxu0 %v7794_v48  ;;  %5899 = vmatpush1.bf16.msra.mxu1 %v7797_v50  ;;  %v9197_v48 = vrot.slane %v1110_v43, %v8781_v49  ;;  %v7881_v50 = vld [vmem:[%s8722_s8 + $0xc28] ss:$16 sps:$4 sm:$0xff]   ;;  %v7964_v43 = vld [vmem:[%s8722_s8 + $0xde4] ss:$16 sps:$4 sm:$0xff]  }
 0x1a0   : > { %5367 = vmatprep.subr.bf16.mxu0 %v7802_v51  ;;  %5900 = vmatprep.subr.bf16.mxu1 %v7805_v53  ;;  %v7886_v51 = vld [vmem:[%s8722_s8 + $0xc44] ss:$16 sps:$4 sm:$0xff]   ;;  %v7889_v53 = vld [vmem:[%s8722_s8 + $0xc4c] ss:$16 sps:$4 sm:$0xff]  }
 0x1a3   : > { %5368 = vmatpush1.bf16.msra.mxu0 %v7800_v54  ;;  %5901 = vmatpush1.bf16.msra.mxu1 %v7803_v55  ;;  %v7884_v54 = vld [vmem:[%s8722_s8 + $0xc40] ss:$16 sps:$4 sm:$0xff]   ;;  %v7887_v55 = vld [vmem:[%s8722_s8 + $0xc48] ss:$16 sps:$4 sm:$0xff]  }
 0x1a4   : > { %5369 = vmatprep.subr.bf16.mxu0 %v7808_v56  ;;  %5902 = vmatprep.subr.bf16.mxu1 %v7811_v57  ;;  %v7892_v56 = vld [vmem:[%s8722_s8 + $0xc64] ss:$16 sps:$4 sm:$0xff]   ;;  %v7895_v57 = vld [vmem:[%s8722_s8 + $0xc6c] ss:$16 sps:$4 sm:$0xff]  }
 0x1a7   : > { %5370 = vmatpush1.bf16.msra.mxu0 %v7806_v58  ;;  %5903 = vmatpush1.bf16.msra.mxu1 %v7809_v59  ;;  %v7890_v58 = vld [vmem:[%s8722_s8 + $0xc60] ss:$16 sps:$4 sm:$0xff]   ;;  %v7893_v59 = vld [vmem:[%s8722_s8 + $0xc68] ss:$16 sps:$4 sm:$0xff]  }
 0x1a8   : > { %5371 = vmatprep.subr.bf16.mxu0 %v7814_v60  ;;  %5904 = vmatprep.subr.bf16.mxu1 %v7817_v61  ;;  %v7898_v60 = vld [vmem:[%s8722_s8 + $0xc84] ss:$16 sps:$4 sm:$0xff]   ;;  %v7901_v61 = vld [vmem:[%s8722_s8 + $0xc8c] ss:$16 sps:$4 sm:$0xff]  }
 0x1ab   : > { %5372 = vmatpush1.bf16.msra.mxu0 %v7812_v62  ;;  %5905 = vmatpush1.bf16.msra.mxu1 %v7815_v63  ;;  %v7896_v62 = vld [vmem:[%s8722_s8 + $0xc80] ss:$16 sps:$4 sm:$0xff]   ;;  %v7899_v63 = vld [vmem:[%s8722_s8 + $0xc88] ss:$16 sps:$4 sm:$0xff]  }
 0x1ac   : > { %5373 = vmatprep.subr.bf16.mxu0 %v7820_v0  ;;  %5906 = vmatprep.subr.bf16.mxu1 %v7823_v1  ;;  %v7904_v0 = vld [vmem:[%s8722_s8 + $0xca4] ss:$16 sps:$4 sm:$0xff]   ;;  %v7907_v1 = vld [vmem:[%s8722_s8 + $0xcac] ss:$16 sps:$4 sm:$0xff]  }
 0x1af   : > { %5374 = vmatpush1.bf16.msra.mxu0 %v7818_v2  ;;  %5907 = vmatpush1.bf16.msra.mxu1 %v7821_v3  ;;  %v7902_v2 = vld [vmem:[%s8722_s8 + $0xca0] ss:$16 sps:$4 sm:$0xff]   ;;  %v7905_v3 = vld [vmem:[%s8722_s8 + $0xca8] ss:$16 sps:$4 sm:$0xff]  }
 0x1b0   : > { %5375 = vmatprep.subr.bf16.mxu0 %v7826_v4  ;;  %5908 = vmatprep.subr.bf16.mxu1 %v7829_v5  ;;  %v7910_v4 = vld [vmem:[%s8722_s8 + $0xcc4] ss:$16 sps:$4 sm:$0xff]   ;;  %v7913_v5 = vld [vmem:[%s8722_s8 + $0xccc] ss:$16 sps:$4 sm:$0xff]  }
 0x1b3   : > { %5376 = vmatpush1.bf16.msra.mxu0 %v7824_v6  ;;  %5909 = vmatpush1.bf16.msra.mxu1 %v7827_v7  ;;  %v7908_v6 = vld [vmem:[%s8722_s8 + $0xcc0] ss:$16 sps:$4 sm:$0xff]   ;;  %v7911_v7 = vld [vmem:[%s8722_s8 + $0xcc8] ss:$16 sps:$4 sm:$0xff]  }
 0x1b4   : > { %5377 = vmatprep.subr.bf16.mxu0 %v7832_v8  ;;  %5910 = vmatprep.subr.bf16.mxu1 %v7835_v9  ;;  %v7916_v8 = vld [vmem:[%s8722_s8 + $0xce4] ss:$16 sps:$4 sm:$0xff]   ;;  %v7919_v9 = vld [vmem:[%s8722_s8 + $0xcec] ss:$16 sps:$4 sm:$0xff]  }
 0x1b7   : > { %5378 = vmatpush1.bf16.msra.mxu0 %v7830_v10  ;;  %5911 = vmatpush1.bf16.msra.mxu1 %v7833_v11  ;;  %v7914_v10 = vld [vmem:[%s8722_s8 + $0xce0] ss:$16 sps:$4 sm:$0xff]   ;;  %v7917_v11 = vld [vmem:[%s8722_s8 + $0xce8] ss:$16 sps:$4 sm:$0xff]  }
 0x1b8   : > { %5379 = vmatprep.subr.bf16.mxu0 %v7838_v12  ;;  %5912 = vmatprep.subr.bf16.mxu1 %v7841_v14  ;;  %v7922_v12 = vld [vmem:[%s8722_s8 + $0xd04] ss:$16 sps:$4 sm:$0xff]   ;;  %v7925_v14 = vld [vmem:[%s8722_s8 + $0xd0c] ss:$16 sps:$4 sm:$0xff]  }
 0x1bb   : > { %5380 = vmatpush1.bf16.msra.mxu0 %v7836_v16  ;;  %5913 = vmatpush1.bf16.msra.mxu1 %v7839_v52  ;;  %v7920_v16 = vld [vmem:[%s8722_s8 + $0xd00] ss:$16 sps:$4 sm:$0xff]   ;;  %v7923_v52 = vld [vmem:[%s8722_s8 + $0xd08] ss:$16 sps:$4 sm:$0xff]  }
 0x1bc   : > { %5381 = vmatprep.subr.bf16.mxu0 %v7844_v17  ;;  %5914 = vmatprep.subr.bf16.mxu1 %v7847_v18  ;;  %v7928_v17 = vld [vmem:[%s8722_s8 + $0xd24] ss:$16 sps:$4 sm:$0xff]   ;;  %v7931_v18 = vld [vmem:[%s8722_s8 + $0xd2c] ss:$16 sps:$4 sm:$0xff]  }
 0x1bf   : > { %5382 = vmatpush1.bf16.msra.mxu0 %v7842_v19  ;;  %5915 = vmatpush1.bf16.msra.mxu1 %v7845_v20  ;;  %v7926_v19 = vld [vmem:[%s8722_s8 + $0xd20] ss:$16 sps:$4 sm:$0xff]   ;;  %v7929_v20 = vld [vmem:[%s8722_s8 + $0xd28] ss:$16 sps:$4 sm:$0xff]  }
 0x1c0   : > { %5383 = vmatprep.subr.bf16.mxu0 %v7850_v22  ;;  %5916 = vmatprep.subr.bf16.mxu1 %v7853_v23  ;;  %v7934_v22 = vld [vmem:[%s8722_s8 + $0xd44] ss:$16 sps:$4 sm:$0xff]   ;;  %v7937_v23 = vld [vmem:[%s8722_s8 + $0xd4c] ss:$16 sps:$4 sm:$0xff]  }
 0x1c3   : > { %5384 = vmatpush1.bf16.msra.mxu0 %v7848_v24  ;;  %5917 = vmatpush1.bf16.msra.mxu1 %v7851_v26  ;;  %v7932_v24 = vld [vmem:[%s8722_s8 + $0xd40] ss:$16 sps:$4 sm:$0xff]   ;;  %v7935_v26 = vld [vmem:[%s8722_s8 + $0xd48] ss:$16 sps:$4 sm:$0xff]  }
 0x1c4   : > { %5385 = vmatprep.subr.bf16.mxu0 %v7856_v27  ;;  %5918 = vmatprep.subr.bf16.mxu1 %v7859_v28  ;;  %v7940_v27 = vld [vmem:[%s8722_s8 + $0xd64] ss:$16 sps:$4 sm:$0xff]   ;;  %v7943_v28 = vld [vmem:[%s8722_s8 + $0xd6c] ss:$16 sps:$4 sm:$0xff]  }
 0x1c7   : > { %5386 = vmatpush1.bf16.msra.mxu0 %v7854_v29  ;;  %5919 = vmatpush1.bf16.msra.mxu1 %v7857_v30  ;;  %v7938_v29 = vld [vmem:[%s8722_s8 + $0xd60] ss:$16 sps:$4 sm:$0xff]   ;;  %v7941_v30 = vld [vmem:[%s8722_s8 + $0xd68] ss:$16 sps:$4 sm:$0xff]  }
 0x1c8   : > { %5387 = vmatprep.subr.bf16.mxu0 %v7862_v15  ;;  %5920 = vmatprep.subr.bf16.mxu1 %v7865_v31  ;;  %v7946_v15 = vld [vmem:[%s8722_s8 + $0xd84] ss:$16 sps:$4 sm:$0xff]   ;;  %v7949_v31 = vld [vmem:[%s8722_s8 + $0xd8c] ss:$16 sps:$4 sm:$0xff]  }
 0x1cb   : > { %5388 = vmatpush1.bf16.msra.mxu0 %v7860_v25  ;;  %5921 = vmatpush1.bf16.msra.mxu1 %v7863_v34  ;;  %v7952_v25 = vld [vmem:[%s8722_s8 + $0xda4] ss:$16 sps:$4 sm:$0xff]   ;;  %v7955_v34 = vld [vmem:[%s8722_s8 + $0xdac] ss:$16 sps:$4 sm:$0xff]  }
 0x1cc   : > { %5389 = vmatprep.subr.bf16.mxu0 %v7868_v36  ;;  %5922 = vmatprep.subr.bf16.mxu1 %v7871_v37  ;;  %v7950_v36 = vld [vmem:[%s8722_s8 + $0xda0] ss:$16 sps:$4 sm:$0xff]   ;;  %v7953_v37 = vld [vmem:[%s8722_s8 + $0xda8] ss:$16 sps:$4 sm:$0xff]  }
 0x1cf   : > { %5390 = vmatpush1.bf16.msra.mxu0 %v7866_v39  ;;  %5923 = vmatpush1.bf16.msra.mxu1 %v7869_v40  ;;  %v7958_v39 = vld [vmem:[%s8722_s8 + $0xdc4] ss:$16 sps:$4 sm:$0xff]   ;;  %v7961_v40 = vld [vmem:[%s8722_s8 + $0xdcc] ss:$16 sps:$4 sm:$0xff]  }
 0x1d0   : > { %5400 = vmatprep.subr.bf16.mxu0 %v7874_v21  ;;  %5933 = vmatprep.subr.bf16.mxu1 %v7877_v41  ;;  %v7956_v21 = vld [vmem:[%s8722_s8 + $0xdc0] ss:$16 sps:$4 sm:$0xff]   ;;  %v7959_v41 = vld [vmem:[%s8722_s8 + $0xdc8] ss:$16 sps:$4 sm:$0xff]  }
 0x1d2   : > { %5392 = vmatmul.mubr.bf16.vlgmr.msra.gmra.mrb[0].mxu0 %v1139_v44  ;;  %5925 = vmatmul.mubr.bf16.vlgmr.msra.gmra.mrb[0].mxu1 %v1139_v44  ;;  %v7967_v44 = vld [vmem:[%s8722_s8 + $0xdec] ss:$16 sps:$4 sm:$0xff]  }
 0x1d3   : > { %5401 = vmatpush1.bf16.msra.mxu0 %v7872_v35  ;;  %5934 = vmatpush1.bf16.msra.mxu1 %v7875_v45  ;;  %v7962_v35 = vld [vmem:[%s8722_s8 + $0xde0] ss:$16 sps:$4 sm:$0xff]   ;;  %v7965_v45 = vld [vmem:[%s8722_s8 + $0xde8] ss:$16 sps:$4 sm:$0xff]  }
 0x1d4   : > { %5402 = vmatprep.subr.bf16.mxu0 %v7880_v46  ;;  %5935 = vmatprep.subr.bf16.mxu1 %v7883_v47  ;;  %v7971_v46 = vld [vmem:[%s8722_s8 + $0xe04] ss:$16 sps:$4 sm:$0xff]   ;;  %v7974_v47 = vld [vmem:[%s8722_s8 + $0xe0c] ss:$16 sps:$4 sm:$0xff]  }
 0x1d5   : > { %5432 = vmatprep.mubr.bf16.mxu0 %v9197_v48  ;;  %5965 = vmatprep.mubr.bf16.mxu1 %v9197_v48 }
 0x1d7   : > { %5403 = vmatpush1.bf16.msra.mxu0 %v7878_v13  ;;  %5936 = vmatpush1.bf16.msra.mxu1 %v7881_v50  ;;  %v9263_v13 = vrot.slane %v9182_v38, %v8781_v49  ;;  %v7969_v50 = vld [vmem:[%s8722_s8 + $0xe00] ss:$16 sps:$4 sm:$0xff]  }
 0x1d8   : > { %5404 = vmatprep.subr.bf16.mxu0 %v7886_v51  ;;  %5937 = vmatprep.subr.bf16.mxu1 %v7889_v53  ;;  %v7972_v51 = vld [vmem:[%s8722_s8 + $0xe08] ss:$16 sps:$4 sm:$0xff]   ;;  %v7977_v53 = vld [vmem:[%s8722_s8 + $0xe24] ss:$16 sps:$4 sm:$0xff]   ;;  %v7975_v38 = vld [vmem:[%s8722_s8 + $0xe20] ss:$16 sps:$4 sm:$0xff]  }
 0x1db   : > { %5405 = vmatpush1.bf16.msra.mxu0 %v7884_v54  ;;  %5938 = vmatpush1.bf16.msra.mxu1 %v7887_v55  ;;  %v7980_v54 = vld [vmem:[%s8722_s8 + $0xe2c] ss:$16 sps:$4 sm:$0xff]   ;;  %v1142_v55 = vcombine.high %v9197_v48, %v9197_v48  ;;  %v7981_v48 = vld [vmem:[%s8722_s8 + $0xe40] ss:$16 sps:$4 sm:$0xff]  }
 0x1dc   : > { %5406 = vmatprep.subr.bf16.mxu0 %v7892_v56  ;;  %5939 = vmatprep.subr.bf16.mxu1 %v7895_v57  ;;  %v7978_v56 = vld [vmem:[%s8722_s8 + $0xe28] ss:$16 sps:$4 sm:$0xff]   ;;  %v7983_v57 = vld [vmem:[%s8722_s8 + $0xe44] ss:$16 sps:$4 sm:$0xff]  }
 0x1df   : > { %5407 = vmatpush1.bf16.msra.mxu0 %v7890_v58  ;;  %5940 = vmatpush1.bf16.msra.mxu1 %v7893_v59  ;;  %v7986_v58 = vld [vmem:[%s8722_s8 + $0xe4c] ss:$16 sps:$4 sm:$0xff]   ;;  %v7984_v59 = vld [vmem:[%s8722_s8 + $0xe48] ss:$16 sps:$4 sm:$0xff]  }
 0x1e0   : > { %5408 = vmatprep.subr.bf16.mxu0 %v7898_v60  ;;  %5941 = vmatprep.subr.bf16.mxu1 %v7901_v61  ;;  %v7989_v60 = vld [vmem:[%s8722_s8 + $0xe64] ss:$16 sps:$4 sm:$0xff]   ;;  %v7992_v61 = vld [vmem:[%s8722_s8 + $0xe6c] ss:$16 sps:$4 sm:$0xff]  }
 0x1e3   : > { %5409 = vmatpush1.bf16.msra.mxu0 %v7896_v62  ;;  %5942 = vmatpush1.bf16.msra.mxu1 %v7899_v63  ;;  %v7987_v62 = vld [vmem:[%s8722_s8 + $0xe60] ss:$16 sps:$4 sm:$0xff]   ;;  %v7990_v63 = vld [vmem:[%s8722_s8 + $0xe68] ss:$16 sps:$4 sm:$0xff]  }
 0x1e4   : > { %5410 = vmatprep.subr.bf16.mxu0 %v7904_v0  ;;  %5943 = vmatprep.subr.bf16.mxu1 %v7907_v1  ;;  %v7995_v0 = vld [vmem:[%s8722_s8 + $0xe84] ss:$16 sps:$4 sm:$0xff]   ;;  %v7998_v1 = vld [vmem:[%s8722_s8 + $0xe8c] ss:$16 sps:$4 sm:$0xff]  }
 0x1e7   : > { %5411 = vmatpush1.bf16.msra.mxu0 %v7902_v2  ;;  %5944 = vmatpush1.bf16.msra.mxu1 %v7905_v3  ;;  %v7993_v2 = vld [vmem:[%s8722_s8 + $0xe80] ss:$16 sps:$4 sm:$0xff]   ;;  %v7996_v3 = vld [vmem:[%s8722_s8 + $0xe88] ss:$16 sps:$4 sm:$0xff]  }
 0x1e8   : > { %5412 = vmatprep.subr.bf16.mxu0 %v7910_v4  ;;  %5945 = vmatprep.subr.bf16.mxu1 %v7913_v5  ;;  %v8001_v4 = vld [vmem:[%s8722_s8 + $0xea4] ss:$16 sps:$4 sm:$0xff]   ;;  %v8004_v5 = vld [vmem:[%s8722_s8 + $0xeac] ss:$16 sps:$4 sm:$0xff]  }
 0x1eb   : > { %5413 = vmatpush1.bf16.msra.mxu0 %v7908_v6  ;;  %5946 = vmatpush1.bf16.msra.mxu1 %v7911_v7  ;;  %v7999_v6 = vld [vmem:[%s8722_s8 + $0xea0] ss:$16 sps:$4 sm:$0xff]   ;;  %v8002_v7 = vld [vmem:[%s8722_s8 + $0xea8] ss:$16 sps:$4 sm:$0xff]  }
 0x1ec   : > { %5414 = vmatprep.subr.bf16.mxu0 %v7916_v8  ;;  %5947 = vmatprep.subr.bf16.mxu1 %v7919_v9  ;;  %v8007_v8 = vld [vmem:[%s8722_s8 + $0xec4] ss:$16 sps:$4 sm:$0xff]   ;;  %v8010_v9 = vld [vmem:[%s8722_s8 + $0xecc] ss:$16 sps:$4 sm:$0xff]  }
 0x1ef   : > { %5415 = vmatpush1.bf16.msra.mxu0 %v7914_v10  ;;  %5948 = vmatpush1.bf16.msra.mxu1 %v7917_v11  ;;  %v8005_v10 = vld [vmem:[%s8722_s8 + $0xec0] ss:$16 sps:$4 sm:$0xff]   ;;  %v8008_v11 = vld [vmem:[%s8722_s8 + $0xec8] ss:$16 sps:$4 sm:$0xff]  }
 0x1f0   : > { %5416 = vmatprep.subr.bf16.mxu0 %v7922_v12  ;;  %5949 = vmatprep.subr.bf16.mxu1 %v7925_v14  ;;  %v8013_v12 = vld [vmem:[%s8722_s8 + $0xee4] ss:$16 sps:$4 sm:$0xff]   ;;  %v8016_v14 = vld [vmem:[%s8722_s8 + $0xeec] ss:$16 sps:$4 sm:$0xff]  }
 0x1f3   : > { %5417 = vmatpush1.bf16.msra.mxu0 %v7920_v16  ;;  %5950 = vmatpush1.bf16.msra.mxu1 %v7923_v52  ;;  %v8011_v16 = vld [vmem:[%s8722_s8 + $0xee0] ss:$16 sps:$4 sm:$0xff]   ;;  %v8014_v52 = vld [vmem:[%s8722_s8 + $0xee8] ss:$16 sps:$4 sm:$0xff]  }
 0x1f4   : > { %5418 = vmatprep.subr.bf16.mxu0 %v7928_v17  ;;  %5951 = vmatprep.subr.bf16.mxu1 %v7931_v18  ;;  %v8019_v17 = vld [vmem:[%s8722_s8 + $0xf04] ss:$16 sps:$4 sm:$0xff]   ;;  %v8022_v18 = vld [vmem:[%s8722_s8 + $0xf0c] ss:$16 sps:$4 sm:$0xff]  }
 0x1f7   : > { %5419 = vmatpush1.bf16.msra.mxu0 %v7926_v19  ;;  %5952 = vmatpush1.bf16.msra.mxu1 %v7929_v20  ;;  %v8017_v19 = vld [vmem:[%s8722_s8 + $0xf00] ss:$16 sps:$4 sm:$0xff]   ;;  %v8020_v20 = vld [vmem:[%s8722_s8 + $0xf08] ss:$16 sps:$4 sm:$0xff]  }
 0x1f8   : > { %5420 = vmatprep.subr.bf16.mxu0 %v7934_v22  ;;  %5953 = vmatprep.subr.bf16.mxu1 %v7937_v23  ;;  %v8025_v22 = vld [vmem:[%s8722_s8 + $0xf24] ss:$16 sps:$4 sm:$0xff]   ;;  %v8028_v23 = vld [vmem:[%s8722_s8 + $0xf2c] ss:$16 sps:$4 sm:$0xff]  }
 0x1fb   : > { %5421 = vmatpush1.bf16.msra.mxu0 %v7932_v24  ;;  %5954 = vmatpush1.bf16.msra.mxu1 %v7935_v26  ;;  %v8023_v24 = vld [vmem:[%s8722_s8 + $0xf20] ss:$16 sps:$4 sm:$0xff]   ;;  %v8026_v26 = vld [vmem:[%s8722_s8 + $0xf28] ss:$16 sps:$4 sm:$0xff]  }
 0x1fc   : > { %5422 = vmatprep.subr.bf16.mxu0 %v7940_v27  ;;  %5955 = vmatprep.subr.bf16.mxu1 %v7943_v28  ;;  %v8031_v27 = vld [vmem:[%s8722_s8 + $0xf44] ss:$16 sps:$4 sm:$0xff]   ;;  %v8034_v28 = vld [vmem:[%s8722_s8 + $0xf4c] ss:$16 sps:$4 sm:$0xff]  }
 0x1ff   : > { %5423 = vmatpush1.bf16.msra.mxu0 %v7938_v29  ;;  %5956 = vmatpush1.bf16.msra.mxu1 %v7941_v30  ;;  %v8029_v29 = vld [vmem:[%s8722_s8 + $0xf40] ss:$16 sps:$4 sm:$0xff]   ;;  %v8032_v30 = vld [vmem:[%s8722_s8 + $0xf48] ss:$16 sps:$4 sm:$0xff]  }
 0x200   : > { %5424 = vmatprep.subr.bf16.mxu0 %v7946_v15  ;;  %5957 = vmatprep.subr.bf16.mxu1 %v7949_v31  ;;  %v8037_v15 = vld [vmem:[%s8722_s8 + $0xf64] ss:$16 sps:$4 sm:$0xff]   ;;  %v8040_v31 = vld [vmem:[%s8722_s8 + $0xf6c] ss:$16 sps:$4 sm:$0xff]  }
 0x203   : > { %5425 = vmatpush1.bf16.msra.mxu0 %v7944_v32  ;;  %5958 = vmatpush1.bf16.msra.mxu1 %v7947_v33  ;;  %v8035_v32 = vld [vmem:[%s8722_s8 + $0xf60] ss:$16 sps:$4 sm:$0xff]   ;;  %v8038_v33 = vld [vmem:[%s8722_s8 + $0xf68] ss:$16 sps:$4 sm:$0xff]  }
 0x204   : > { %5426 = vmatprep.subr.bf16.mxu0 %v7952_v25  ;;  %5959 = vmatprep.subr.bf16.mxu1 %v7955_v34  ;;  %v8043_v25 = vld [vmem:[%s8722_s8 + $0xf84] ss:$16 sps:$4 sm:$0xff]   ;;  %v8046_v34 = vld [vmem:[%s8722_s8 + $0xf8c] ss:$16 sps:$4 sm:$0xff]  }
 0x207   : > { %5427 = vmatpush1.bf16.msra.mxu0 %v7950_v36  ;;  %5960 = vmatpush1.bf16.msra.mxu1 %v7953_v37  ;;  %v8041_v36 = vld [vmem:[%s8722_s8 + $0xf80] ss:$16 sps:$4 sm:$0xff]   ;;  %v8044_v37 = vld [vmem:[%s8722_s8 + $0xf88] ss:$16 sps:$4 sm:$0xff]  }
 0x208   : > { %5428 = vmatprep.subr.bf16.mxu0 %v7958_v39  ;;  %5961 = vmatprep.subr.bf16.mxu1 %v7961_v40  ;;  %v8049_v39 = vld [vmem:[%s8722_s8 + $0xfa4] ss:$16 sps:$4 sm:$0xff]   ;;  %v8052_v40 = vld [vmem:[%s8722_s8 + $0xfac] ss:$16 sps:$4 sm:$0xff]  }
 0x20b   : > { %5429 = vmatpush1.bf16.msra.mxu0 %v7956_v21  ;;  %5962 = vmatpush1.bf16.msra.mxu1 %v7959_v41  ;;  %v8047_v21 = vld [vmem:[%s8722_s8 + $0xfa0] ss:$16 sps:$4 sm:$0xff]   ;;  %v8050_v41 = vld [vmem:[%s8722_s8 + $0xfa8] ss:$16 sps:$4 sm:$0xff]  }
 0x20c   : > { %5430 = vmatprep.subr.bf16.mxu0 %v7964_v43  ;;  %5963 = vmatprep.subr.bf16.mxu1 %v7967_v44  ;;  %v8055_v43 = vld [vmem:[%s8722_s8 + $0xfc4] ss:$16 sps:$4 sm:$0xff]   ;;  %v8058_v44 = vld [vmem:[%s8722_s8 + $0xfcc] ss:$16 sps:$4 sm:$0xff]  }
 0x20f   : > { %5431 = vmatpush1.bf16.msra.mxu0 %v7962_v35  ;;  %5964 = vmatpush1.bf16.msra.mxu1 %v7965_v45  ;;  %v9328_v35 = vld [vmem:[%s9682_s0 + $0x10] sm:$0xff] }
 0x210   : > { %5441 = vmatprep.subr.bf16.mxu0 %v7971_v46  ;;  %5974 = vmatprep.subr.bf16.mxu1 %v7974_v47  ;;  %v8053_v45 = vld [vmem:[%s8722_s8 + $0xfc0] ss:$16 sps:$4 sm:$0xff]   ;;  %v8056_v46 = vld [vmem:[%s8722_s8 + $0xfc8] ss:$16 sps:$4 sm:$0xff]   ;;  %v8061_v47 = vld [vmem:[%s8722_s8 + $0xfe4] ss:$16 sps:$4 sm:$0xff]  }
 0x212   : > { %5433 = vmatmul.mubr.bf16.vlgmr.msra.gmra.mrb[0].mxu0 %v9263_v13  ;;  %5966 = vmatmul.mubr.bf16.vlgmr.msra.gmra.mrb[0].mxu1 %v9263_v13 }
 0x213   : > { %5442 = vmatpush1.bf16.msra.mxu0 %v7969_v50  ;;  %5975 = vmatpush1.bf16.msra.mxu1 %v7972_v51  ;;  %v8064_v50 = vld [vmem:[%s8722_s8 + $0xfec] ss:$16 sps:$4 sm:$0xff]   ;;  %v9336_v51 = vrot.slane %v9328_v35, %v8781_v49 }
 0x214   : > { %5443 = vmatprep.subr.bf16.mxu0 %v7977_v53  ;;  %5976 = vmatprep.subr.bf16.mxu1 %v7980_v54  ;;  %v8059_v53 = vld [vmem:[%s8722_s8 + $0xfe0] ss:$16 sps:$4 sm:$0xff]   ;;  %v8062_v54 = vld [vmem:[%s8722_s8 + $0xfe8] ss:$16 sps:$4 sm:$0xff]  }
 0x215   : > { %5473 = vmatprep.mubr.bf16.mxu0 %v1142_v55  ;;  %6006 = vmatprep.mubr.bf16.mxu1 %v1142_v55  ;;  %v8067_v55 = vld [vmem:[%s8722_s8 + $0x1004] ss:$16 sps:$4 sm:$0xff]  }
 0x217   : > { %5444 = vmatpush1.bf16.msra.mxu0 %v7975_v38  ;;  %5977 = vmatpush1.bf16.msra.mxu1 %v7978_v56  ;;  %v8070_v38 = vld [vmem:[%s8722_s8 + $0x100c] ss:$16 sps:$4 sm:$0xff]   ;;  %v1158_v56 = vcombine.high %v9336_v51, %v9336_v51 }
 0x218   : > { %5445 = vmatprep.subr.bf16.mxu0 %v7983_v57  ;;  %5978 = vmatprep.subr.bf16.mxu1 %v7986_v58  ;;  %v1140_v57 = vcombine.high %v9263_v13, %v9263_v13  ;;  %v8065_v58 = vld [vmem:[%s8722_s8 + $0x1000] ss:$16 sps:$4 sm:$0xff]  }
 0x219   : > { %v8071_v13 = vld [vmem:[%s8722_s8 + $0x1020] ss:$16 sps:$4 sm:$0xff]  }
 0x21b   : > { %5446 = vmatpush1.bf16.msra.mxu0 %v7981_v48  ;;  %5979 = vmatpush1.bf16.msra.mxu1 %v7984_v59  ;;  %v8068_v48 = vld [vmem:[%s8722_s8 + $0x1008] ss:$16 sps:$4 sm:$0xff]   ;;  %v8073_v59 = vld [vmem:[%s8722_s8 + $0x1024] ss:$16 sps:$4 sm:$0xff]  }
 0x21c   : > { %5447 = vmatprep.subr.bf16.mxu0 %v7989_v60  ;;  %5980 = vmatprep.subr.bf16.mxu1 %v7992_v61  ;;  %v8076_v60 = vld [vmem:[%s8722_s8 + $0x102c] ss:$16 sps:$4 sm:$0xff]   ;;  %v9351_v61 = vrot.slane %v1158_v56, %v8781_v49  ;;  %v8152_v56 = vld [vmem:[%s8722_s8 + $0x11c8] ss:$16 sps:$4 sm:$0xff]  }
 0x21f   : > { %5448 = vmatpush1.bf16.msra.mxu0 %v7987_v62  ;;  %5981 = vmatpush1.bf16.msra.mxu1 %v7990_v63  ;;  %v8074_v62 = vld [vmem:[%s8722_s8 + $0x1028] ss:$16 sps:$4 sm:$0xff]   ;;  %v8079_v63 = vld [vmem:[%s8722_s8 + $0x1044] ss:$16 sps:$4 sm:$0xff]  }
 0x220   : > { %5449 = vmatprep.subr.bf16.mxu0 %v7995_v0  ;;  %5982 = vmatprep.subr.bf16.mxu1 %v7998_v1  ;;  %v8082_v0 = vld [vmem:[%s8722_s8 + $0x104c] ss:$16 sps:$4 sm:$0xff]   ;;  %v8077_v1 = vld [vmem:[%s8722_s8 + $0x1040] ss:$16 sps:$4 sm:$0xff]  }
 0x223   : > { %5450 = vmatpush1.bf16.msra.mxu0 %v7993_v2  ;;  %5983 = vmatpush1.bf16.msra.mxu1 %v7996_v3  ;;  %v8080_v2 = vld [vmem:[%s8722_s8 + $0x1048] ss:$16 sps:$4 sm:$0xff]   ;;  %v8085_v3 = vld [vmem:[%s8722_s8 + $0x1064] ss:$16 sps:$4 sm:$0xff]  }
 0x224   : > { %5451 = vmatprep.subr.bf16.mxu0 %v8001_v4  ;;  %5984 = vmatprep.subr.bf16.mxu1 %v8004_v5  ;;  %v8088_v4 = vld [vmem:[%s8722_s8 + $0x106c] ss:$16 sps:$4 sm:$0xff]   ;;  %v8083_v5 = vld [vmem:[%s8722_s8 + $0x1060] ss:$16 sps:$4 sm:$0xff]  }
 0x227   : > { %5452 = vmatpush1.bf16.msra.mxu0 %v7999_v6  ;;  %5985 = vmatpush1.bf16.msra.mxu1 %v8002_v7  ;;  %v8086_v6 = vld [vmem:[%s8722_s8 + $0x1068] ss:$16 sps:$4 sm:$0xff]   ;;  %v8091_v7 = vld [vmem:[%s8722_s8 + $0x1084] ss:$16 sps:$4 sm:$0xff]  }
 0x228   : > { %5453 = vmatprep.subr.bf16.mxu0 %v8007_v8  ;;  %5986 = vmatprep.subr.bf16.mxu1 %v8010_v9  ;;  %v8094_v8 = vld [vmem:[%s8722_s8 + $0x108c] ss:$16 sps:$4 sm:$0xff]   ;;  %v8089_v9 = vld [vmem:[%s8722_s8 + $0x1080] ss:$16 sps:$4 sm:$0xff]  }
 0x22b   : > { %5454 = vmatpush1.bf16.msra.mxu0 %v8005_v10  ;;  %5987 = vmatpush1.bf16.msra.mxu1 %v8008_v11  ;;  %v8092_v10 = vld [vmem:[%s8722_s8 + $0x1088] ss:$16 sps:$4 sm:$0xff]   ;;  %v8097_v11 = vld [vmem:[%s8722_s8 + $0x10a4] ss:$16 sps:$4 sm:$0xff]  }
 0x22c   : > { %5455 = vmatprep.subr.bf16.mxu0 %v8013_v12  ;;  %5988 = vmatprep.subr.bf16.mxu1 %v8016_v14  ;;  %v8100_v12 = vld [vmem:[%s8722_s8 + $0x10ac] ss:$16 sps:$4 sm:$0xff]   ;;  %v8095_v14 = vld [vmem:[%s8722_s8 + $0x10a0] ss:$16 sps:$4 sm:$0xff]  }
 0x22f   : > { %5456 = vmatpush1.bf16.msra.mxu0 %v8011_v16  ;;  %5989 = vmatpush1.bf16.msra.mxu1 %v8014_v52  ;;  %v8098_v16 = vld [vmem:[%s8722_s8 + $0x10a8] ss:$16 sps:$4 sm:$0xff]   ;;  %v8103_v52 = vld [vmem:[%s8722_s8 + $0x10c4] ss:$16 sps:$4 sm:$0xff]  }
 0x230   : > { %5457 = vmatprep.subr.bf16.mxu0 %v8019_v17  ;;  %5990 = vmatprep.subr.bf16.mxu1 %v8022_v18  ;;  %v8106_v17 = vld [vmem:[%s8722_s8 + $0x10cc] ss:$16 sps:$4 sm:$0xff]   ;;  %v8101_v18 = vld [vmem:[%s8722_s8 + $0x10c0] ss:$16 sps:$4 sm:$0xff]  }
 0x233   : > { %5458 = vmatpush1.bf16.msra.mxu0 %v8017_v19  ;;  %5991 = vmatpush1.bf16.msra.mxu1 %v8020_v20  ;;  %v8104_v19 = vld [vmem:[%s8722_s8 + $0x10c8] ss:$16 sps:$4 sm:$0xff]   ;;  %v8109_v20 = vld [vmem:[%s8722_s8 + $0x10e4] ss:$16 sps:$4 sm:$0xff]  }
 0x234   : > { %5459 = vmatprep.subr.bf16.mxu0 %v8025_v22  ;;  %5992 = vmatprep.subr.bf16.mxu1 %v8028_v23  ;;  %v8112_v22 = vld [vmem:[%s8722_s8 + $0x10ec] ss:$16 sps:$4 sm:$0xff]   ;;  %v8107_v23 = vld [vmem:[%s8722_s8 + $0x10e0] ss:$16 sps:$4 sm:$0xff]  }
 0x237   : > { %5460 = vmatpush1.bf16.msra.mxu0 %v8023_v24  ;;  %5993 = vmatpush1.bf16.msra.mxu1 %v8026_v26  ;;  %v8110_v24 = vld [vmem:[%s8722_s8 + $0x10e8] ss:$16 sps:$4 sm:$0xff]   ;;  %v8115_v26 = vld [vmem:[%s8722_s8 + $0x1104] ss:$16 sps:$4 sm:$0xff]  }
 0x238   : > { %5461 = vmatprep.subr.bf16.mxu0 %v8031_v27  ;;  %5994 = vmatprep.subr.bf16.mxu1 %v8034_v28  ;;  %v8118_v27 = vld [vmem:[%s8722_s8 + $0x110c] ss:$16 sps:$4 sm:$0xff]   ;;  %v8113_v28 = vld [vmem:[%s8722_s8 + $0x1100] ss:$16 sps:$4 sm:$0xff]  }
 0x23b   : > { %5462 = vmatpush1.bf16.msra.mxu0 %v8029_v29  ;;  %5995 = vmatpush1.bf16.msra.mxu1 %v8032_v30  ;;  %v8116_v29 = vld [vmem:[%s8722_s8 + $0x1108] ss:$16 sps:$4 sm:$0xff]   ;;  %v8121_v30 = vld [vmem:[%s8722_s8 + $0x1124] ss:$16 sps:$4 sm:$0xff]  }
 0x23c   : > { %5463 = vmatprep.subr.bf16.mxu0 %v8037_v15  ;;  %5996 = vmatprep.subr.bf16.mxu1 %v8040_v31  ;;  %v8124_v15 = vld [vmem:[%s8722_s8 + $0x112c] ss:$16 sps:$4 sm:$0xff]   ;;  %v8119_v31 = vld [vmem:[%s8722_s8 + $0x1120] ss:$16 sps:$4 sm:$0xff]  }
 0x23f   : > { %5464 = vmatpush1.bf16.msra.mxu0 %v8035_v32  ;;  %5997 = vmatpush1.bf16.msra.mxu1 %v8038_v33  ;;  %v8122_v32 = vld [vmem:[%s8722_s8 + $0x1128] ss:$16 sps:$4 sm:$0xff]   ;;  %v8127_v33 = vld [vmem:[%s8722_s8 + $0x1144] ss:$16 sps:$4 sm:$0xff]  }
 0x240   : > { %5465 = vmatprep.subr.bf16.mxu0 %v8043_v25  ;;  %5998 = vmatprep.subr.bf16.mxu1 %v8046_v34  ;;  %v8130_v25 = vld [vmem:[%s8722_s8 + $0x114c] ss:$16 sps:$4 sm:$0xff]   ;;  %v8125_v34 = vld [vmem:[%s8722_s8 + $0x1140] ss:$16 sps:$4 sm:$0xff]  }
 0x243   : > { %5466 = vmatpush1.bf16.msra.mxu0 %v8041_v36  ;;  %5999 = vmatpush1.bf16.msra.mxu1 %v8044_v37  ;;  %v8128_v36 = vld [vmem:[%s8722_s8 + $0x1148] ss:$16 sps:$4 sm:$0xff]   ;;  %v8133_v37 = vld [vmem:[%s8722_s8 + $0x1164] ss:$16 sps:$4 sm:$0xff]  }
 0x244   : > { %5467 = vmatprep.subr.bf16.mxu0 %v8049_v39  ;;  %6000 = vmatprep.subr.bf16.mxu1 %v8052_v40  ;;  %v8136_v39 = vld [vmem:[%s8722_s8 + $0x116c] ss:$16 sps:$4 sm:$0xff]   ;;  %v8131_v40 = vld [vmem:[%s8722_s8 + $0x1160] ss:$16 sps:$4 sm:$0xff]  }
 0x247   : > { %5468 = vmatpush1.bf16.msra.mxu0 %v8047_v21  ;;  %6001 = vmatpush1.bf16.msra.mxu1 %v8050_v41  ;;  %v8134_v21 = vld [vmem:[%s8722_s8 + $0x1168] ss:$16 sps:$4 sm:$0xff]   ;;  %v8139_v41 = vld [vmem:[%s8722_s8 + $0x1184] ss:$16 sps:$4 sm:$0xff]  }
 0x248   : > { %5469 = vmatprep.subr.bf16.mxu0 %v8055_v43  ;;  %6002 = vmatprep.subr.bf16.mxu1 %v8058_v44  ;;  %v8142_v43 = vld [vmem:[%s8722_s8 + $0x118c] ss:$16 sps:$4 sm:$0xff]   ;;  %v8137_v44 = vld [vmem:[%s8722_s8 + $0x1180] ss:$16 sps:$4 sm:$0xff]  }
 0x24b   : > { %5470 = vmatpush1.bf16.msra.mxu0 %v8053_v45  ;;  %6003 = vmatpush1.bf16.msra.mxu1 %v8056_v46  ;;  %v8140_v45 = vld [vmem:[%s8722_s8 + $0x1188] ss:$16 sps:$4 sm:$0xff]   ;;  %v8145_v46 = vld [vmem:[%s8722_s8 + $0x11a4] ss:$16 sps:$4 sm:$0xff]  }
 0x24c   : > { %5471 = vmatprep.subr.bf16.mxu0 %v8061_v47  ;;  %6004 = vmatprep.subr.bf16.mxu1 %v8064_v50  ;;  %v8148_v47 = vld [vmem:[%s8722_s8 + $0x11ac] ss:$16 sps:$4 sm:$0xff]   ;;  %v8143_v50 = vld [vmem:[%s8722_s8 + $0x11a0] ss:$16 sps:$4 sm:$0xff]  }
 0x24f   : > { %5472 = vmatpush1.bf16.msra.mxu0 %v8059_v53  ;;  %6005 = vmatpush1.bf16.msra.mxu1 %v8062_v54  ;;  %v8146_v53 = vld [vmem:[%s8722_s8 + $0x11a8] ss:$16 sps:$4 sm:$0xff]   ;;  %v8151_v54 = vld [vmem:[%s8722_s8 + $0x11c4] ss:$16 sps:$4 sm:$0xff]  }
 0x250   : > { %5482 = vmatprep.subr.bf16.mxu0 %v8067_v55  ;;  %6015 = vmatprep.subr.bf16.mxu1 %v8070_v38  ;;  %v8154_v55 = vld [vmem:[%s8722_s8 + $0x11cc] ss:$16 sps:$4 sm:$0xff]   ;;  %v8149_v38 = vld [vmem:[%s8722_s8 + $0x11c0] ss:$16 sps:$4 sm:$0xff]  }
 0x252   : > { %5474 = vmatmul.mubr.bf16.vlgmr.msra.gmra.mrb[0].mxu0 %v1140_v57  ;;  %6007 = vmatmul.mubr.bf16.vlgmr.msra.gmra.mrb[0].mxu1 %v1140_v57  ;;  %v8157_v57 = vld [vmem:[%s8722_s8 + $0x11e4] ss:$16 sps:$4 sm:$0xff]  }
 0x253   : > { %5483 = vmatpush1.bf16.msra.mxu0 %v8065_v58  ;;  %6016 = vmatpush1.bf16.msra.mxu1 %v8068_v48  ;;  %v8160_v58 = vld [vmem:[%s8722_s8 + $0x11ec] ss:$16 sps:$4 sm:$0xff]   ;;  %v8155_v48 = vld [vmem:[%s8722_s8 + $0x11e0] ss:$16 sps:$4 sm:$0xff]  }
 0x254   : > { %5484 = vmatprep.subr.bf16.mxu0 %v8073_v59  ;;  %6017 = vmatprep.subr.bf16.mxu1 %v8076_v60  ;;  %v8158_v59 = vld [vmem:[%s8722_s8 + $0x11e8] ss:$16 sps:$4 sm:$0xff]   ;;  %v8163_v60 = vld [vmem:[%s8722_s8 + $0x1204] ss:$16 sps:$4 sm:$0xff]  }
 0x255   : > { %5514 = vmatprep.mubr.bf16.mxu0 %v9351_v61  ;;  %6047 = vmatprep.mubr.bf16.mxu1 %v9351_v61 }
 0x257   : > { %5485 = vmatpush1.bf16.msra.mxu0 %v8071_v13  ;;  %6018 = vmatpush1.bf16.msra.mxu1 %v8074_v62  ;;  %v8166_v13 = vld [vmem:[%s8722_s8 + $0x120c] ss:$16 sps:$4 sm:$0xff]   ;;  %v9417_v62 = vrot.slane %v9336_v51, %v8781_v49  ;;  %v8167_v51 = vld [vmem:[%s8722_s8 + $0x1220] ss:$16 sps:$4 sm:$0xff]  }
 0x258   : > { %5486 = vmatprep.subr.bf16.mxu0 %v8079_v63  ;;  %6019 = vmatprep.subr.bf16.mxu1 %v8082_v0  ;;  %v8161_v63 = vld [vmem:[%s8722_s8 + $0x1200] ss:$16 sps:$4 sm:$0xff]   ;;  %v8164_v0 = vld [vmem:[%s8722_s8 + $0x1208] ss:$16 sps:$4 sm:$0xff]  }
 0x25b   : > { %5487 = vmatpush1.bf16.msra.mxu0 %v8077_v1  ;;  %6020 = vmatpush1.bf16.msra.mxu1 %v8080_v2  ;;  %v8169_v1 = vld [vmem:[%s8722_s8 + $0x1224] ss:$16 sps:$4 sm:$0xff]   ;;  %v8172_v2 = vld [vmem:[%s8722_s8 + $0x122c] ss:$16 sps:$4 sm:$0xff]  }
 0x25c   : > { %5488 = vmatprep.subr.bf16.mxu0 %v8085_v3  ;;  %6021 = vmatprep.subr.bf16.mxu1 %v8088_v4  ;;  %v1190_v3 = vcombine.high %v9351_v61, %v9351_v61  ;;  %v8170_v4 = vld [vmem:[%s8722_s8 + $0x1228] ss:$16 sps:$4 sm:$0xff]   ;;  %v8173_v61 = vld [vmem:[%s8722_s8 + $0x1240] ss:$16 sps:$4 sm:$0xff]  }
 0x25f   : > { %5489 = vmatpush1.bf16.msra.mxu0 %v8083_v5  ;;  %6022 = vmatpush1.bf16.msra.mxu1 %v8086_v6  ;;  %v8175_v5 = vld [vmem:[%s8722_s8 + $0x1244] ss:$16 sps:$4 sm:$0xff]   ;;  %v8178_v6 = vld [vmem:[%s8722_s8 + $0x124c] ss:$16 sps:$4 sm:$0xff]  }
 0x260   : > { %5490 = vmatprep.subr.bf16.mxu0 %v8091_v7  ;;  %6023 = vmatprep.subr.bf16.mxu1 %v8094_v8  ;;  %v8176_v7 = vld [vmem:[%s8722_s8 + $0x1248] ss:$16 sps:$4 sm:$0xff]   ;;  %v8181_v8 = vld [vmem:[%s8722_s8 + $0x1264] ss:$16 sps:$4 sm:$0xff]  }
 0x263   : > { %5491 = vmatpush1.bf16.msra.mxu0 %v8089_v9  ;;  %6024 = vmatpush1.bf16.msra.mxu1 %v8092_v10  ;;  %v8184_v9 = vld [vmem:[%s8722_s8 + $0x126c] ss:$16 sps:$4 sm:$0xff]   ;;  %v8179_v10 = vld [vmem:[%s8722_s8 + $0x1260] ss:$16 sps:$4 sm:$0xff]  }
 0x264   : > { %5492 = vmatprep.subr.bf16.mxu0 %v8097_v11  ;;  %6025 = vmatprep.subr.bf16.mxu1 %v8100_v12  ;;  %v8182_v11 = vld [vmem:[%s8722_s8 + $0x1268] ss:$16 sps:$4 sm:$0xff]   ;;  %v8187_v12 = vld [vmem:[%s8722_s8 + $0x1284] ss:$16 sps:$4 sm:$0xff]  }
 0x267   : > { %5493 = vmatpush1.bf16.msra.mxu0 %v8095_v14  ;;  %6026 = vmatpush1.bf16.msra.mxu1 %v8098_v16  ;;  %v8190_v14 = vld [vmem:[%s8722_s8 + $0x128c] ss:$16 sps:$4 sm:$0xff]   ;;  %v8185_v16 = vld [vmem:[%s8722_s8 + $0x1280] ss:$16 sps:$4 sm:$0xff]  }
 0x268   : > { %5494 = vmatprep.subr.bf16.mxu0 %v8103_v52  ;;  %6027 = vmatprep.subr.bf16.mxu1 %v8106_v17  ;;  %v8188_v52 = vld [vmem:[%s8722_s8 + $0x1288] ss:$16 sps:$4 sm:$0xff]   ;;  %v8193_v17 = vld [vmem:[%s8722_s8 + $0x12a4] ss:$16 sps:$4 sm:$0xff]  }
 0x26b   : > { %5495 = vmatpush1.bf16.msra.mxu0 %v8101_v18  ;;  %6028 = vmatpush1.bf16.msra.mxu1 %v8104_v19  ;;  %v8196_v18 = vld [vmem:[%s8722_s8 + $0x12ac] ss:$16 sps:$4 sm:$0xff]   ;;  %v8191_v19 = vld [vmem:[%s8722_s8 + $0x12a0] ss:$16 sps:$4 sm:$0xff]  }
 0x26c   : > { %5496 = vmatprep.subr.bf16.mxu0 %v8109_v20  ;;  %6029 = vmatprep.subr.bf16.mxu1 %v8112_v22  ;;  %v8194_v20 = vld [vmem:[%s8722_s8 + $0x12a8] ss:$16 sps:$4 sm:$0xff]   ;;  %v8199_v22 = vld [vmem:[%s8722_s8 + $0x12c4] ss:$16 sps:$4 sm:$0xff]  }
 0x26f   : > { %5497 = vmatpush1.bf16.msra.mxu0 %v8107_v23  ;;  %6030 = vmatpush1.bf16.msra.mxu1 %v8110_v24  ;;  %v8202_v23 = vld [vmem:[%s8722_s8 + $0x12cc] ss:$16 sps:$4 sm:$0xff]   ;;  %v8197_v24 = vld [vmem:[%s8722_s8 + $0x12c0] ss:$16 sps:$4 sm:$0xff]  }
 0x270   : > { %5498 = vmatprep.subr.bf16.mxu0 %v8115_v26  ;;  %6031 = vmatprep.subr.bf16.mxu1 %v8118_v27  ;;  %v8200_v26 = vld [vmem:[%s8722_s8 + $0x12c8] ss:$16 sps:$4 sm:$0xff]   ;;  %v8205_v27 = vld [vmem:[%s8722_s8 + $0x12e4] ss:$16 sps:$4 sm:$0xff]  }
 0x273   : > { %5499 = vmatpush1.bf16.msra.mxu0 %v8113_v28  ;;  %6032 = vmatpush1.bf16.msra.mxu1 %v8116_v29  ;;  %v8208_v28 = vld [vmem:[%s8722_s8 + $0x12ec] ss:$16 sps:$4 sm:$0xff]   ;;  %v8203_v29 = vld [vmem:[%s8722_s8 + $0x12e0] ss:$16 sps:$4 sm:$0xff]  }
 0x274   : > { %5500 = vmatprep.subr.bf16.mxu0 %v8121_v30  ;;  %6033 = vmatprep.subr.bf16.mxu1 %v8124_v15  ;;  %v8206_v30 = vld [vmem:[%s8722_s8 + $0x12e8] ss:$16 sps:$4 sm:$0xff]   ;;  %v8211_v15 = vld [vmem:[%s8722_s8 + $0x1304] ss:$16 sps:$4 sm:$0xff]  }
 0x277   : > { %5501 = vmatpush1.bf16.msra.mxu0 %v8119_v31  ;;  %6034 = vmatpush1.bf16.msra.mxu1 %v8122_v32  ;;  %v8214_v31 = vld [vmem:[%s8722_s8 + $0x130c] ss:$16 sps:$4 sm:$0xff]   ;;  %v8209_v32 = vld [vmem:[%s8722_s8 + $0x1300] ss:$16 sps:$4 sm:$0xff]  }
 0x278   : > { %5502 = vmatprep.subr.bf16.mxu0 %v8127_v33  ;;  %6035 = vmatprep.subr.bf16.mxu1 %v8130_v25  ;;  %v8212_v33 = vld [vmem:[%s8722_s8 + $0x1308] ss:$16 sps:$4 sm:$0xff]   ;;  %v8217_v25 = vld [vmem:[%s8722_s8 + $0x1324] ss:$16 sps:$4 sm:$0xff]  }
 0x27b   : > { %5503 = vmatpush1.bf16.msra.mxu0 %v8125_v34  ;;  %6036 = vmatpush1.bf16.msra.mxu1 %v8128_v36  ;;  %v8220_v34 = vld [vmem:[%s8722_s8 + $0x132c] ss:$16 sps:$4 sm:$0xff]   ;;  %v8215_v36 = vld [vmem:[%s8722_s8 + $0x1320] ss:$16 sps:$4 sm:$0xff]  }
 0x27c   : > { %5504 = vmatprep.subr.bf16.mxu0 %v8133_v37  ;;  %6037 = vmatprep.subr.bf16.mxu1 %v8136_v39  ;;  %v8218_v37 = vld [vmem:[%s8722_s8 + $0x1328] ss:$16 sps:$4 sm:$0xff]   ;;  %v8223_v39 = vld [vmem:[%s8722_s8 + $0x1344] ss:$16 sps:$4 sm:$0xff]  }
 0x27f   : > { %5505 = vmatpush1.bf16.msra.mxu0 %v8131_v40  ;;  %6038 = vmatpush1.bf16.msra.mxu1 %v8134_v21  ;;  %v8226_v40 = vld [vmem:[%s8722_s8 + $0x134c] ss:$16 sps:$4 sm:$0xff]   ;;  %v8221_v21 = vld [vmem:[%s8722_s8 + $0x1340] ss:$16 sps:$4 sm:$0xff]  }
 0x280   : > { %5506 = vmatprep.subr.bf16.mxu0 %v8139_v41  ;;  %6039 = vmatprep.subr.bf16.mxu1 %v8142_v43  ;;  %v8224_v41 = vld [vmem:[%s8722_s8 + $0x1348] ss:$16 sps:$4 sm:$0xff]   ;;  %v8229_v43 = vld [vmem:[%s8722_s8 + $0x1364] ss:$16 sps:$4 sm:$0xff]  }
 0x283   : > { %5507 = vmatpush1.bf16.msra.mxu0 %v8137_v44  ;;  %6040 = vmatpush1.bf16.msra.mxu1 %v8140_v45  ;;  %v8232_v44 = vld [vmem:[%s8722_s8 + $0x136c] ss:$16 sps:$4 sm:$0xff]   ;;  %v8227_v45 = vld [vmem:[%s8722_s8 + $0x1360] ss:$16 sps:$4 sm:$0xff]  }
 0x284   : > { %5508 = vmatprep.subr.bf16.mxu0 %v8145_v46  ;;  %6041 = vmatprep.subr.bf16.mxu1 %v8148_v47  ;;  %v8230_v46 = vld [vmem:[%s8722_s8 + $0x1368] ss:$16 sps:$4 sm:$0xff]   ;;  %v8235_v47 = vld [vmem:[%s8722_s8 + $0x1384] ss:$16 sps:$4 sm:$0xff]  }
 0x287   : > { %5509 = vmatpush1.bf16.msra.mxu0 %v8143_v50  ;;  %6042 = vmatpush1.bf16.msra.mxu1 %v8146_v53  ;;  %v8238_v50 = vld [vmem:[%s8722_s8 + $0x138c] ss:$16 sps:$4 sm:$0xff]   ;;  %v8233_v53 = vld [vmem:[%s8722_s8 + $0x1380] ss:$16 sps:$4 sm:$0xff]  }
 0x288   : > { %5510 = vmatprep.subr.bf16.mxu0 %v8151_v54  ;;  %6043 = vmatprep.subr.bf16.mxu1 %v8154_v55  ;;  %v8236_v54 = vld [vmem:[%s8722_s8 + $0x1388] ss:$16 sps:$4 sm:$0xff]   ;;  %v8241_v55 = vld [vmem:[%s8722_s8 + $0x13a4] ss:$16 sps:$4 sm:$0xff]  }
 0x28b   : > { %5511 = vmatpush1.bf16.msra.mxu0 %v8149_v38  ;;  %6044 = vmatpush1.bf16.msra.mxu1 %v8152_v56  ;;  %v8244_v38 = vld [vmem:[%s8722_s8 + $0x13ac] ss:$16 sps:$4 sm:$0xff]   ;;  %v8239_v56 = vld [vmem:[%s8722_s8 + $0x13a0] ss:$16 sps:$4 sm:$0xff]  }
 0x28c   : > { %5512 = vmatprep.subr.bf16.mxu0 %v8157_v57  ;;  %6045 = vmatprep.subr.bf16.mxu1 %v8160_v58  ;;  %v8242_v57 = vld [vmem:[%s8722_s8 + $0x13a8] ss:$16 sps:$4 sm:$0xff]   ;;  %v8247_v58 = vld [vmem:[%s8722_s8 + $0x13c4] ss:$16 sps:$4 sm:$0xff]  }
 0x28f   : > { %5513 = vmatpush1.bf16.msra.mxu0 %v8155_v48  ;;  %6046 = vmatpush1.bf16.msra.mxu1 %v8158_v59  ;;  %v8250_v48 = vld [vmem:[%s8722_s8 + $0x13cc] ss:$16 sps:$4 sm:$0xff]   ;;  %v1143_v59 = vcombine.high %v9328_v35, %v9328_v35  ;;  %v8251_v35 = vld [vmem:[%s8722_s8 + $0x13e0] ss:$16 sps:$4 sm:$0xff]  }
 0x290   : > { %5523 = vmatprep.subr.bf16.mxu0 %v8163_v60  ;;  %6056 = vmatprep.subr.bf16.mxu1 %v8166_v13  ;;  %v8245_v60 = vld [vmem:[%s8722_s8 + $0x13c0] ss:$16 sps:$4 sm:$0xff]   ;;  %v8248_v13 = vld [vmem:[%s8722_s8 + $0x13c8] ss:$16 sps:$4 sm:$0xff]  }
 0x292   : > { %5515 = vmatmul.mubr.bf16.vlgmr.msra.gmra.mrb[0].mxu0 %v9417_v62  ;;  %6048 = vmatmul.mubr.bf16.vlgmr.msra.gmra.mrb[0].mxu1 %v9417_v62 }
 0x293   : > { %5524 = vmatpush1.bf16.msra.mxu0 %v8161_v63  ;;  %6057 = vmatpush1.bf16.msra.mxu1 %v8164_v0  ;;  %v8253_v63 = vld [vmem:[%s8722_s8 + $0x13e4] ss:$16 sps:$4 sm:$0xff]   ;;  %v8256_v0 = vld [vmem:[%s8722_s8 + $0x13ec] ss:$16 sps:$4 sm:$0xff]  }
 0x294   : > { %5525 = vmatprep.subr.bf16.mxu0 %v8169_v1  ;;  %6058 = vmatprep.subr.bf16.mxu1 %v8172_v2  ;;  %v9486_v1 = vrot.slane %v1143_v59, %v8781_v49  ;;  %v8254_v2 = vld [vmem:[%s8722_s8 + $0x13e8] ss:$16 sps:$4 sm:$0xff]  }
 0x295   : > { %5555 = vmatprep.mubr.bf16.mxu0 %v1190_v3  ;;  %6088 = vmatprep.mubr.bf16.mxu1 %v1190_v3  ;;  %v8259_v3 = vld [vmem:[%s8722_s8 + $0x1404] ss:$16 sps:$4 sm:$0xff]   ;;  %v8332_v59 = vld [vmem:[%s8722_s8 + $0x1588] ss:$16 sps:$4 sm:$0xff]  }
 0x297   : > { %5526 = vmatpush1.bf16.msra.mxu0 %v8167_v51  ;;  %6059 = vmatpush1.bf16.msra.mxu1 %v8170_v4  ;;  %v8262_v51 = vld [vmem:[%s8722_s8 + $0x140c] ss:$16 sps:$4 sm:$0xff]   ;;  %v1159_v4 = vcombine.high %v9486_v1, %v9486_v1 }
 0x298   : > { %5527 = vmatprep.subr.bf16.mxu0 %v8175_v5  ;;  %6060 = vmatprep.subr.bf16.mxu1 %v8178_v6  ;;  %v1188_v5 = vcombine.high %v9417_v62, %v9417_v62  ;;  %v8257_v6 = vld [vmem:[%s8722_s8 + $0x1400] ss:$16 sps:$4 sm:$0xff]  }
 0x299   : > { %v8263_v62 = vld [vmem:[%s8722_s8 + $0x1420] ss:$16 sps:$4 sm:$0xff]  }
 0x29b   : > { %5528 = vmatpush1.bf16.msra.mxu0 %v8173_v61  ;;  %6061 = vmatpush1.bf16.msra.mxu1 %v8176_v7  ;;  %v8260_v61 = vld [vmem:[%s8722_s8 + $0x1408] ss:$16 sps:$4 sm:$0xff]   ;;  %v8265_v7 = vld [vmem:[%s8722_s8 + $0x1424] ss:$16 sps:$4 sm:$0xff]  }
 0x29c   : > { %5529 = vmatprep.subr.bf16.mxu0 %v8181_v8  ;;  %6062 = vmatprep.subr.bf16.mxu1 %v8184_v9  ;;  %v8268_v8 = vld [vmem:[%s8722_s8 + $0x142c] ss:$16 sps:$4 sm:$0xff]   ;;  %v9501_v9 = vrot.slane %v1159_v4, %v8781_v49  ;;  %v8349_v4 = vld [vmem:[%s8722_s8 + $0x15e4] ss:$16 sps:$4 sm:$0xff]  }
 0x29f   : > { %5530 = vmatpush1.bf16.msra.mxu0 %v8179_v10  ;;  %6063 = vmatpush1.bf16.msra.mxu1 %v8182_v11  ;;  %v8266_v10 = vld [vmem:[%s8722_s8 + $0x1428] ss:$16 sps:$4 sm:$0xff]   ;;  %v8271_v11 = vld [vmem:[%s8722_s8 + $0x1444] ss:$16 sps:$4 sm:$0xff]  }
 0x2a0   : > { %5531 = vmatprep.subr.bf16.mxu0 %v8187_v12  ;;  %6064 = vmatprep.subr.bf16.mxu1 %v8190_v14  ;;  %v8274_v12 = vld [vmem:[%s8722_s8 + $0x144c] ss:$16 sps:$4 sm:$0xff]   ;;  %v8269_v14 = vld [vmem:[%s8722_s8 + $0x1440] ss:$16 sps:$4 sm:$0xff]  }
 0x2a3   : > { %5532 = vmatpush1.bf16.msra.mxu0 %v8185_v16  ;;  %6065 = vmatpush1.bf16.msra.mxu1 %v8188_v52  ;;  %v8272_v16 = vld [vmem:[%s8722_s8 + $0x1448] ss:$16 sps:$4 sm:$0xff]   ;;  %v8277_v52 = vld [vmem:[%s8722_s8 + $0x1464] ss:$16 sps:$4 sm:$0xff]  }
 0x2a4   : > { %5533 = vmatprep.subr.bf16.mxu0 %v8193_v17  ;;  %6066 = vmatprep.subr.bf16.mxu1 %v8196_v18  ;;  %v8280_v17 = vld [vmem:[%s8722_s8 + $0x146c] ss:$16 sps:$4 sm:$0xff]   ;;  %v8275_v18 = vld [vmem:[%s8722_s8 + $0x1460] ss:$16 sps:$4 sm:$0xff]  }
 0x2a7   : > { %5534 = vmatpush1.bf16.msra.mxu0 %v8191_v19  ;;  %6067 = vmatpush1.bf16.msra.mxu1 %v8194_v20  ;;  %v8278_v19 = vld [vmem:[%s8722_s8 + $0x1468] ss:$16 sps:$4 sm:$0xff]   ;;  %v8283_v20 = vld [vmem:[%s8722_s8 + $0x1484] ss:$16 sps:$4 sm:$0xff]  }
 0x2a8   : > { %5535 = vmatprep.subr.bf16.mxu0 %v8199_v22  ;;  %6068 = vmatprep.subr.bf16.mxu1 %v8202_v23  ;;  %v8286_v22 = vld [vmem:[%s8722_s8 + $0x148c] ss:$16 sps:$4 sm:$0xff]   ;;  %v8281_v23 = vld [vmem:[%s8722_s8 + $0x1480] ss:$16 sps:$4 sm:$0xff]  }
 0x2ab   : > { %5536 = vmatpush1.bf16.msra.mxu0 %v8197_v24  ;;  %6069 = vmatpush1.bf16.msra.mxu1 %v8200_v26  ;;  %v8284_v24 = vld [vmem:[%s8722_s8 + $0x1488] ss:$16 sps:$4 sm:$0xff]   ;;  %v8289_v26 = vld [vmem:[%s8722_s8 + $0x14a4] ss:$16 sps:$4 sm:$0xff]  }
 0x2ac   : > { %5537 = vmatprep.subr.bf16.mxu0 %v8205_v27  ;;  %6070 = vmatprep.subr.bf16.mxu1 %v8208_v28  ;;  %v8292_v27 = vld [vmem:[%s8722_s8 + $0x14ac] ss:$16 sps:$4 sm:$0xff]   ;;  %v8287_v28 = vld [vmem:[%s8722_s8 + $0x14a0] ss:$16 sps:$4 sm:$0xff]  }
 0x2af   : > { %5538 = vmatpush1.bf16.msra.mxu0 %v8203_v29  ;;  %6071 = vmatpush1.bf16.msra.mxu1 %v8206_v30  ;;  %v8290_v29 = vld [vmem:[%s8722_s8 + $0x14a8] ss:$16 sps:$4 sm:$0xff]   ;;  %v8295_v30 = vld [vmem:[%s8722_s8 + $0x14c4] ss:$16 sps:$4 sm:$0xff]  }
 0x2b0   : > { %5539 = vmatprep.subr.bf16.mxu0 %v8211_v15  ;;  %6072 = vmatprep.subr.bf16.mxu1 %v8214_v31  ;;  %v8298_v15 = vld [vmem:[%s8722_s8 + $0x14cc] ss:$16 sps:$4 sm:$0xff]   ;;  %v8293_v31 = vld [vmem:[%s8722_s8 + $0x14c0] ss:$16 sps:$4 sm:$0xff]  }
 0x2b3   : > { %5540 = vmatpush1.bf16.msra.mxu0 %v8209_v32  ;;  %6073 = vmatpush1.bf16.msra.mxu1 %v8212_v33  ;;  %v8296_v32 = vld [vmem:[%s8722_s8 + $0x14c8] ss:$16 sps:$4 sm:$0xff]   ;;  %v8301_v33 = vld [vmem:[%s8722_s8 + $0x14e4] ss:$16 sps:$4 sm:$0xff]  }
 0x2b4   : > { %5541 = vmatprep.subr.bf16.mxu0 %v8217_v25  ;;  %6074 = vmatprep.subr.bf16.mxu1 %v8220_v34  ;;  %v8304_v25 = vld [vmem:[%s8722_s8 + $0x14ec] ss:$16 sps:$4 sm:$0xff]   ;;  %v8299_v34 = vld [vmem:[%s8722_s8 + $0x14e0] ss:$16 sps:$4 sm:$0xff]  }
 0x2b7   : > { %5542 = vmatpush1.bf16.msra.mxu0 %v8215_v36  ;;  %6075 = vmatpush1.bf16.msra.mxu1 %v8218_v37  ;;  %v8302_v36 = vld [vmem:[%s8722_s8 + $0x14e8] ss:$16 sps:$4 sm:$0xff]   ;;  %v8307_v37 = vld [vmem:[%s8722_s8 + $0x1504] ss:$16 sps:$4 sm:$0xff]  }
 0x2b8   : > { %5543 = vmatprep.subr.bf16.mxu0 %v8223_v39  ;;  %6076 = vmatprep.subr.bf16.mxu1 %v8226_v40  ;;  %v8310_v39 = vld [vmem:[%s8722_s8 + $0x150c] ss:$16 sps:$4 sm:$0xff]   ;;  %v8305_v40 = vld [vmem:[%s8722_s8 + $0x1500] ss:$16 sps:$4 sm:$0xff]  }
 0x2bb   : > { %5544 = vmatpush1.bf16.msra.mxu0 %v8221_v21  ;;  %6077 = vmatpush1.bf16.msra.mxu1 %v8224_v41  ;;  %v8308_v21 = vld [vmem:[%s8722_s8 + $0x1508] ss:$16 sps:$4 sm:$0xff]   ;;  %v8313_v41 = vld [vmem:[%s8722_s8 + $0x1524] ss:$16 sps:$4 sm:$0xff]  }
 0x2bc   : > { %5545 = vmatprep.subr.bf16.mxu0 %v8229_v43  ;;  %6078 = vmatprep.subr.bf16.mxu1 %v8232_v44  ;;  %v8316_v43 = vld [vmem:[%s8722_s8 + $0x152c] ss:$16 sps:$4 sm:$0xff]   ;;  %v8311_v44 = vld [vmem:[%s8722_s8 + $0x1520] ss:$16 sps:$4 sm:$0xff]  }
 0x2bf   : > { %5546 = vmatpush1.bf16.msra.mxu0 %v8227_v45  ;;  %6079 = vmatpush1.bf16.msra.mxu1 %v8230_v46  ;;  %v8314_v45 = vld [vmem:[%s8722_s8 + $0x1528] ss:$16 sps:$4 sm:$0xff]   ;;  %v8319_v46 = vld [vmem:[%s8722_s8 + $0x1544] ss:$16 sps:$4 sm:$0xff]  }
 0x2c0   : > { %5547 = vmatprep.subr.bf16.mxu0 %v8235_v47  ;;  %6080 = vmatprep.subr.bf16.mxu1 %v8238_v50  ;;  %v8322_v47 = vld [vmem:[%s8722_s8 + $0x154c] ss:$16 sps:$4 sm:$0xff]   ;;  %v8317_v50 = vld [vmem:[%s8722_s8 + $0x1540] ss:$16 sps:$4 sm:$0xff]  }
 0x2c3   : > { %5548 = vmatpush1.bf16.msra.mxu0 %v8233_v53  ;;  %6081 = vmatpush1.bf16.msra.mxu1 %v8236_v54  ;;  %v8320_v53 = vld [vmem:[%s8722_s8 + $0x1548] ss:$16 sps:$4 sm:$0xff]   ;;  %v8325_v54 = vld [vmem:[%s8722_s8 + $0x1564] ss:$16 sps:$4 sm:$0xff]  }
 0x2c4   : > { %5549 = vmatprep.subr.bf16.mxu0 %v8241_v55  ;;  %6082 = vmatprep.subr.bf16.mxu1 %v8244_v38  ;;  %v8328_v55 = vld [vmem:[%s8722_s8 + $0x156c] ss:$16 sps:$4 sm:$0xff]   ;;  %v8323_v38 = vld [vmem:[%s8722_s8 + $0x1560] ss:$16 sps:$4 sm:$0xff]  }
 0x2c7   : > { %5550 = vmatpush1.bf16.msra.mxu0 %v8239_v56  ;;  %6083 = vmatpush1.bf16.msra.mxu1 %v8242_v57  ;;  %v8326_v56 = vld [vmem:[%s8722_s8 + $0x1568] ss:$16 sps:$4 sm:$0xff]   ;;  %v8331_v57 = vld [vmem:[%s8722_s8 + $0x1584] ss:$16 sps:$4 sm:$0xff]  }
 0x2c8   : > { %5551 = vmatprep.subr.bf16.mxu0 %v8247_v58  ;;  %6084 = vmatprep.subr.bf16.mxu1 %v8250_v48  ;;  %v8334_v58 = vld [vmem:[%s8722_s8 + $0x158c] ss:$16 sps:$4 sm:$0xff]   ;;  %v8329_v48 = vld [vmem:[%s8722_s8 + $0x1580] ss:$16 sps:$4 sm:$0xff]  }
 0x2cb   : > { %5552 = vmatpush1.bf16.msra.mxu0 %v8245_v60  ;;  %6085 = vmatpush1.bf16.msra.mxu1 %v8248_v13  ;;  %v8337_v60 = vld [vmem:[%s8722_s8 + $0x15a4] ss:$16 sps:$4 sm:$0xff]   ;;  %v8340_v13 = vld [vmem:[%s8722_s8 + $0x15ac] ss:$16 sps:$4 sm:$0xff]  }
 0x2cc   : > { %5553 = vmatprep.subr.bf16.mxu0 %v8253_v63  ;;  %6086 = vmatprep.subr.bf16.mxu1 %v8256_v0  ;;  %v8335_v63 = vld [vmem:[%s8722_s8 + $0x15a0] ss:$16 sps:$4 sm:$0xff]   ;;  %v8338_v0 = vld [vmem:[%s8722_s8 + $0x15a8] ss:$16 sps:$4 sm:$0xff]  }
 0x2cf   : > { %5554 = vmatpush1.bf16.msra.mxu0 %v8251_v35  ;;  %6087 = vmatpush1.bf16.msra.mxu1 %v8254_v2  ;;  %v8343_v35 = vld [vmem:[%s8722_s8 + $0x15c4] ss:$16 sps:$4 sm:$0xff]   ;;  %v8346_v2 = vld [vmem:[%s8722_s8 + $0x15cc] ss:$16 sps:$4 sm:$0xff]  }
 0x2d0   : > { %5564 = vmatprep.subr.bf16.mxu0 %v8259_v3  ;;  %6097 = vmatprep.subr.bf16.mxu1 %v8262_v51  ;;  %v8341_v3 = vld [vmem:[%s8722_s8 + $0x15c0] ss:$16 sps:$4 sm:$0xff]   ;;  %v8344_v51 = vld [vmem:[%s8722_s8 + $0x15c8] ss:$16 sps:$4 sm:$0xff]  }
 0x2d2   : > { %5556 = vmatmul.mubr.bf16.vlgmr.msra.gmra.mrb[0].mxu0 %v1188_v5  ;;  %6089 = vmatmul.mubr.bf16.vlgmr.msra.gmra.mrb[0].mxu1 %v1188_v5  ;;  %v8352_v5 = vld [vmem:[%s8722_s8 + $0x15ec] ss:$16 sps:$4 sm:$0xff]  }
 0x2d3   : > { %5565 = vmatpush1.bf16.msra.mxu0 %v8257_v6  ;;  %6098 = vmatpush1.bf16.msra.mxu1 %v8260_v61  ;;  %v8347_v6 = vld [vmem:[%s8722_s8 + $0x15e0] ss:$16 sps:$4 sm:$0xff]   ;;  %v8350_v61 = vld [vmem:[%s8722_s8 + $0x15e8] ss:$16 sps:$4 sm:$0xff]  }
 0x2d4   : > { %5566 = vmatprep.subr.bf16.mxu0 %v8265_v7  ;;  %6099 = vmatprep.subr.bf16.mxu1 %v8268_v8  ;;  %v8356_v7 = vld [vmem:[%s8722_s8 + $0x1604] ss:$16 sps:$4 sm:$0xff]   ;;  %v8359_v8 = vld [vmem:[%s8722_s8 + $0x160c] ss:$16 sps:$4 sm:$0xff]  }
 0x2d5   : > { %5596 = vmatprep.mubr.bf16.mxu0 %v9501_v9  ;;  %6129 = vmatprep.mubr.bf16.mxu1 %v9501_v9 }
 0x2d7   : > { %5567 = vmatpush1.bf16.msra.mxu0 %v8263_v62  ;;  %6100 = vmatpush1.bf16.msra.mxu1 %v8266_v10  ;;  %v9567_v62 = vrot.slane %v9486_v1, %v8781_v49  ;;  %v8354_v10 = vld [vmem:[%s8722_s8 + $0x1600] ss:$16 sps:$4 sm:$0xff]  }
 0x2d8   : > { %5568 = vmatprep.subr.bf16.mxu0 %v8271_v11  ;;  %6101 = vmatprep.subr.bf16.mxu1 %v8274_v12  ;;  %v8357_v11 = vld [vmem:[%s8722_s8 + $0x1608] ss:$16 sps:$4 sm:$0xff]   ;;  %v8362_v12 = vld [vmem:[%s8722_s8 + $0x1624] ss:$16 sps:$4 sm:$0xff]   ;;  %v8360_v1 = vld [vmem:[%s8722_s8 + $0x1620] ss:$16 sps:$4 sm:$0xff]  }
 0x2db   : > { %5569 = vmatpush1.bf16.msra.mxu0 %v8269_v14  ;;  %6102 = vmatpush1.bf16.msra.mxu1 %v8272_v16  ;;  %v8365_v14 = vld [vmem:[%s8722_s8 + $0x162c] ss:$16 sps:$4 sm:$0xff]   ;;  %v1191_v16 = vcombine.high %v9501_v9, %v9501_v9  ;;  %v8366_v9 = vld [vmem:[%s8722_s8 + $0x1640] ss:$16 sps:$4 sm:$0xff]  }
 0x2dc   : > { %5570 = vmatprep.subr.bf16.mxu0 %v8277_v52  ;;  %6103 = vmatprep.subr.bf16.mxu1 %v8280_v17  ;;  %v8363_v52 = vld [vmem:[%s8722_s8 + $0x1628] ss:$16 sps:$4 sm:$0xff]   ;;  %v8368_v17 = vld [vmem:[%s8722_s8 + $0x1644] ss:$16 sps:$4 sm:$0xff]  }
 0x2df   : > { %5571 = vmatpush1.bf16.msra.mxu0 %v8275_v18  ;;  %6104 = vmatpush1.bf16.msra.mxu1 %v8278_v19  ;;  %v8371_v18 = vld [vmem:[%s8722_s8 + $0x164c] ss:$16 sps:$4 sm:$0xff]   ;;  %v8369_v19 = vld [vmem:[%s8722_s8 + $0x1648] ss:$16 sps:$4 sm:$0xff]  }
 0x2e0   : > { %5572 = vmatprep.subr.bf16.mxu0 %v8283_v20  ;;  %6105 = vmatprep.subr.bf16.mxu1 %v8286_v22  ;;  %v8374_v20 = vld [vmem:[%s8722_s8 + $0x1664] ss:$16 sps:$4 sm:$0xff]   ;;  %v8377_v22 = vld [vmem:[%s8722_s8 + $0x166c] ss:$16 sps:$4 sm:$0xff]  }
 0x2e3   : > { %5573 = vmatpush1.bf16.msra.mxu0 %v8281_v23  ;;  %6106 = vmatpush1.bf16.msra.mxu1 %v8284_v24  ;;  %v8372_v23 = vld [vmem:[%s8722_s8 + $0x1660] ss:$16 sps:$4 sm:$0xff]   ;;  %v8375_v24 = vld [vmem:[%s8722_s8 + $0x1668] ss:$16 sps:$4 sm:$0xff]  }
 0x2e4   : > { %5574 = vmatprep.subr.bf16.mxu0 %v8289_v26  ;;  %6107 = vmatprep.subr.bf16.mxu1 %v8292_v27  ;;  %v8380_v26 = vld [vmem:[%s8722_s8 + $0x1684] ss:$16 sps:$4 sm:$0xff]   ;;  %v8383_v27 = vld [vmem:[%s8722_s8 + $0x168c] ss:$16 sps:$4 sm:$0xff]  }
 0x2e7   : > { %5575 = vmatpush1.bf16.msra.mxu0 %v8287_v28  ;;  %6108 = vmatpush1.bf16.msra.mxu1 %v8290_v29  ;;  %v8378_v28 = vld [vmem:[%s8722_s8 + $0x1680] ss:$16 sps:$4 sm:$0xff]   ;;  %v8381_v29 = vld [vmem:[%s8722_s8 + $0x1688] ss:$16 sps:$4 sm:$0xff]  }
 0x2e8   : > { %5576 = vmatprep.subr.bf16.mxu0 %v8295_v30  ;;  %6109 = vmatprep.subr.bf16.mxu1 %v8298_v15  ;;  %v8386_v30 = vld [vmem:[%s8722_s8 + $0x16a4] ss:$16 sps:$4 sm:$0xff]   ;;  %v8389_v15 = vld [vmem:[%s8722_s8 + $0x16ac] ss:$16 sps:$4 sm:$0xff]  }
 0x2eb   : > { %5577 = vmatpush1.bf16.msra.mxu0 %v8293_v31  ;;  %6110 = vmatpush1.bf16.msra.mxu1 %v8296_v32  ;;  %v8384_v31 = vld [vmem:[%s8722_s8 + $0x16a0] ss:$16 sps:$4 sm:$0xff]   ;;  %v8387_v32 = vld [vmem:[%s8722_s8 + $0x16a8] ss:$16 sps:$4 sm:$0xff]  }
 0x2ec   : > { %5578 = vmatprep.subr.bf16.mxu0 %v8301_v33  ;;  %6111 = vmatprep.subr.bf16.mxu1 %v8304_v25  ;;  %v8392_v33 = vld [vmem:[%s8722_s8 + $0x16c4] ss:$16 sps:$4 sm:$0xff]   ;;  %v8395_v25 = vld [vmem:[%s8722_s8 + $0x16cc] ss:$16 sps:$4 sm:$0xff]  }
 0x2ef   : > { %5579 = vmatpush1.bf16.msra.mxu0 %v8299_v34  ;;  %6112 = vmatpush1.bf16.msra.mxu1 %v8302_v36  ;;  %v8390_v34 = vld [vmem:[%s8722_s8 + $0x16c0] ss:$16 sps:$4 sm:$0xff]   ;;  %v8393_v36 = vld [vmem:[%s8722_s8 + $0x16c8] ss:$16 sps:$4 sm:$0xff]  }
 0x2f0   : > { %5580 = vmatprep.subr.bf16.mxu0 %v8307_v37  ;;  %6113 = vmatprep.subr.bf16.mxu1 %v8310_v39  ;;  %v8398_v37 = vld [vmem:[%s8722_s8 + $0x16e4] ss:$16 sps:$4 sm:$0xff]   ;;  %v8401_v39 = vld [vmem:[%s8722_s8 + $0x16ec] ss:$16 sps:$4 sm:$0xff]  }
 0x2f3   : > { %5581 = vmatpush1.bf16.msra.mxu0 %v8305_v40  ;;  %6114 = vmatpush1.bf16.msra.mxu1 %v8308_v21  ;;  %v8396_v40 = vld [vmem:[%s8722_s8 + $0x16e0] ss:$16 sps:$4 sm:$0xff]   ;;  %v8399_v21 = vld [vmem:[%s8722_s8 + $0x16e8] ss:$16 sps:$4 sm:$0xff]  }
 0x2f4   : > { %5582 = vmatprep.subr.bf16.mxu0 %v8313_v41  ;;  %6115 = vmatprep.subr.bf16.mxu1 %v8316_v43  ;;  %v8404_v41 = vld [vmem:[%s8722_s8 + $0x1704] ss:$16 sps:$4 sm:$0xff]   ;;  %v8407_v43 = vld [vmem:[%s8722_s8 + $0x170c] ss:$16 sps:$4 sm:$0xff]  }
 0x2f7   : > { %5583 = vmatpush1.bf16.msra.mxu0 %v8311_v44  ;;  %6116 = vmatpush1.bf16.msra.mxu1 %v8314_v45  ;;  %v8402_v44 = vld [vmem:[%s8722_s8 + $0x1700] ss:$16 sps:$4 sm:$0xff]   ;;  %v8405_v45 = vld [vmem:[%s8722_s8 + $0x1708] ss:$16 sps:$4 sm:$0xff]  }
 0x2f8   : > { %5584 = vmatprep.subr.bf16.mxu0 %v8319_v46  ;;  %6117 = vmatprep.subr.bf16.mxu1 %v8322_v47  ;;  %v8410_v46 = vld [vmem:[%s8722_s8 + $0x1724] ss:$16 sps:$4 sm:$0xff]   ;;  %v8413_v47 = vld [vmem:[%s8722_s8 + $0x172c] ss:$16 sps:$4 sm:$0xff]  }
 0x2fb   : > { %5585 = vmatpush1.bf16.msra.mxu0 %v8317_v50  ;;  %6118 = vmatpush1.bf16.msra.mxu1 %v8320_v53  ;;  %v8408_v50 = vld [vmem:[%s8722_s8 + $0x1720] ss:$16 sps:$4 sm:$0xff]   ;;  %v8411_v53 = vld [vmem:[%s8722_s8 + $0x1728] ss:$16 sps:$4 sm:$0xff]  }
 0x2fc   : > { %5586 = vmatprep.subr.bf16.mxu0 %v8325_v54  ;;  %6119 = vmatprep.subr.bf16.mxu1 %v8328_v55  ;;  %v8416_v54 = vld [vmem:[%s8722_s8 + $0x1744] ss:$16 sps:$4 sm:$0xff]   ;;  %v8419_v55 = vld [vmem:[%s8722_s8 + $0x174c] ss:$16 sps:$4 sm:$0xff]  }
 0x2ff   : > { %5587 = vmatpush1.bf16.msra.mxu0 %v8323_v38  ;;  %6120 = vmatpush1.bf16.msra.mxu1 %v8326_v56  ;;  %v8414_v38 = vld [vmem:[%s8722_s8 + $0x1740] ss:$16 sps:$4 sm:$0xff]   ;;  %v8417_v56 = vld [vmem:[%s8722_s8 + $0x1748] ss:$16 sps:$4 sm:$0xff]  }
 0x300   : > { %5588 = vmatprep.subr.bf16.mxu0 %v8331_v57  ;;  %6121 = vmatprep.subr.bf16.mxu1 %v8334_v58  ;;  %v8422_v57 = vld [vmem:[%s8722_s8 + $0x1764] ss:$16 sps:$4 sm:$0xff]   ;;  %v8425_v58 = vld [vmem:[%s8722_s8 + $0x176c] ss:$16 sps:$4 sm:$0xff]  }
 0x303   : > { %5589 = vmatpush1.bf16.msra.mxu0 %v8329_v48  ;;  %6122 = vmatpush1.bf16.msra.mxu1 %v8332_v59  ;;  %v8420_v48 = vld [vmem:[%s8722_s8 + $0x1760] ss:$16 sps:$4 sm:$0xff]   ;;  %v8423_v59 = vld [vmem:[%s8722_s8 + $0x1768] ss:$16 sps:$4 sm:$0xff]  }
 0x304   : > { %5590 = vmatprep.subr.bf16.mxu0 %v8337_v60  ;;  %6123 = vmatprep.subr.bf16.mxu1 %v8340_v13  ;;  %v8428_v60 = vld [vmem:[%s8722_s8 + $0x1784] ss:$16 sps:$4 sm:$0xff]   ;;  %v8431_v13 = vld [vmem:[%s8722_s8 + $0x178c] ss:$16 sps:$4 sm:$0xff]  }
 0x307   : > { %5591 = vmatpush1.bf16.msra.mxu0 %v8335_v63  ;;  %6124 = vmatpush1.bf16.msra.mxu1 %v8338_v0  ;;  %v8426_v63 = vld [vmem:[%s8722_s8 + $0x1780] ss:$16 sps:$4 sm:$0xff]   ;;  %v8429_v0 = vld [vmem:[%s8722_s8 + $0x1788] ss:$16 sps:$4 sm:$0xff]  }
 0x308   : > { %5592 = vmatprep.subr.bf16.mxu0 %v8343_v35  ;;  %6125 = vmatprep.subr.bf16.mxu1 %v8346_v2  ;;  %v8434_v35 = vld [vmem:[%s8722_s8 + $0x17a4] ss:$16 sps:$4 sm:$0xff]   ;;  %v8437_v2 = vld [vmem:[%s8722_s8 + $0x17ac] ss:$16 sps:$4 sm:$0xff]  }
 0x30b   : > { %5593 = vmatpush1.bf16.msra.mxu0 %v8341_v3  ;;  %6126 = vmatpush1.bf16.msra.mxu1 %v8344_v51  ;;  %v8432_v3 = vld [vmem:[%s8722_s8 + $0x17a0] ss:$16 sps:$4 sm:$0xff]   ;;  %v8435_v51 = vld [vmem:[%s8722_s8 + $0x17a8] ss:$16 sps:$4 sm:$0xff]  }
 0x30c   : > { %5594 = vmatprep.subr.bf16.mxu0 %v8349_v4  ;;  %6127 = vmatprep.subr.bf16.mxu1 %v8352_v5  ;;  %v8440_v4 = vld [vmem:[%s8722_s8 + $0x17c4] ss:$16 sps:$4 sm:$0xff]   ;;  %v8443_v5 = vld [vmem:[%s8722_s8 + $0x17cc] ss:$16 sps:$4 sm:$0xff]  }
 0x30f   : > { %5595 = vmatpush1.bf16.msra.mxu0 %v8347_v6  ;;  %6128 = vmatpush1.bf16.msra.mxu1 %v8350_v61  ;;  %v8438_v6 = vld [vmem:[%s8722_s8 + $0x17c0] ss:$16 sps:$4 sm:$0xff]   ;;  %v8441_v61 = vld [vmem:[%s8722_s8 + $0x17c8] ss:$16 sps:$4 sm:$0xff]  }
 0x310   : > { %5605 = vmatprep.subr.bf16.mxu0 %v8356_v7  ;;  %6138 = vmatprep.subr.bf16.mxu1 %v8359_v8  ;;  %v8446_v7 = vld [vmem:[%s8722_s8 + $0x17e4] ss:$16 sps:$4 sm:$0xff]   ;;  %v8449_v8 = vld [vmem:[%s8722_s8 + $0x17ec] ss:$16 sps:$4 sm:$0xff]  }
 0x312   : > { %5597 = vmatmul.mubr.bf16.vlgmr.msra.gmra.mrb[0].mxu0 %v9567_v62  ;;  %6130 = vmatmul.mubr.bf16.vlgmr.msra.gmra.mrb[0].mxu1 %v9567_v62 }
 0x313   : > { %5606 = vmatpush1.bf16.msra.mxu0 %v8354_v10  ;;  %6139 = vmatpush1.bf16.msra.mxu1 %v8357_v11  ;;  %v8444_v10 = vld [vmem:[%s8722_s8 + $0x17e0] ss:$16 sps:$4 sm:$0xff]   ;;  %v8447_v11 = vld [vmem:[%s8722_s8 + $0x17e8] ss:$16 sps:$4 sm:$0xff]  }
 0x314   : > { %5607 = vmatprep.subr.bf16.mxu0 %v8362_v12  ;;  %6140 = vmatprep.subr.bf16.mxu1 %v8365_v14  ;;  %v8452_v12 = vld [vmem:[%s8722_s8 + $0x1804] ss:$16 sps:$4 sm:$0xff]   ;;  %v8455_v14 = vld [vmem:[%s8722_s8 + $0x180c] ss:$16 sps:$4 sm:$0xff]  }
 0x315   : > { %5637 = vmatprep.mubr.bf16.mxu0 %v1191_v16  ;;  %6170 = vmatprep.mubr.bf16.mxu1 %v1191_v16  ;;  %v1189_v16 = vcombine.high %v9567_v62, %v9567_v62  ;;  %v8459_v62 = vld [vmem:[%s8722_s8 + $0x1828] ss:$16 sps:$4 sm:$0xff]  }
 0x317   : > { %5608 = vmatpush1.bf16.msra.mxu0 %v8360_v1  ;;  %6141 = vmatpush1.bf16.msra.mxu1 %v8363_v52  ;;  %v8450_v1 = vld [vmem:[%s8722_s8 + $0x1800] ss:$16 sps:$4 sm:$0xff]   ;;  %v8453_v52 = vld [vmem:[%s8722_s8 + $0x1808] ss:$16 sps:$4 sm:$0xff]  }
 0x318   : > { %5609 = vmatprep.subr.bf16.mxu0 %v8368_v17  ;;  %6142 = vmatprep.subr.bf16.mxu1 %v8371_v18  ;;  %v8458_v17 = vld [vmem:[%s8722_s8 + $0x1824] ss:$16 sps:$4 sm:$0xff]   ;;  %v8461_v18 = vld [vmem:[%s8722_s8 + $0x182c] ss:$16 sps:$4 sm:$0xff]  }
 0x31b   : > { %5610 = vmatpush1.bf16.msra.mxu0 %v8366_v9  ;;  %6143 = vmatpush1.bf16.msra.mxu1 %v8369_v19  ;;  %v8456_v9 = vld [vmem:[%s8722_s8 + $0x1820] ss:$16 sps:$4 sm:$0xff]   ;;  %v8464_v19 = vld [vmem:[%s8722_s8 + $0x1844] ss:$16 sps:$4 sm:$0xff]  }
 0x31c   : > { %5611 = vmatprep.subr.bf16.mxu0 %v8374_v20  ;;  %6144 = vmatprep.subr.bf16.mxu1 %v8377_v22  ;;  %v8467_v20 = vld [vmem:[%s8722_s8 + $0x184c] ss:$16 sps:$4 sm:$0xff]   ;;  %v8582_v22 = vmov 0  }
 0x31f   : > { %5612 = vmatpush1.bf16.msra.mxu0 %v8372_v23  ;;  %6145 = vmatpush1.bf16.msra.mxu1 %v8375_v24  ;;  %v8462_v23 = vld [vmem:[%s8722_s8 + $0x1840] ss:$16 sps:$4 sm:$0xff]   ;;  %v8465_v24 = vld [vmem:[%s8722_s8 + $0x1848] ss:$16 sps:$4 sm:$0xff]  }
 0x320   : > { %5613 = vmatprep.subr.bf16.mxu0 %v8380_v26  ;;  %6146 = vmatprep.subr.bf16.mxu1 %v8383_v27  ;;  %v8470_v26 = vld [vmem:[%s8722_s8 + $0x1864] ss:$16 sps:$4 sm:$0xff]   ;;  %v8473_v27 = vld [vmem:[%s8722_s8 + $0x186c] ss:$16 sps:$4 sm:$0xff]  }
 0x323   : > { %5614 = vmatpush1.bf16.msra.mxu0 %v8378_v28  ;;  %6147 = vmatpush1.bf16.msra.mxu1 %v8381_v29  ;;  %v8468_v28 = vld [vmem:[%s8722_s8 + $0x1860] ss:$16 sps:$4 sm:$0xff]   ;;  %v8471_v29 = vld [vmem:[%s8722_s8 + $0x1868] ss:$16 sps:$4 sm:$0xff]  }
 0x324   : > { %5615 = vmatprep.subr.bf16.mxu0 %v8386_v30  ;;  %6148 = vmatprep.subr.bf16.mxu1 %v8389_v15  ;;  %v6350_v30 = vld.sshfl [vmem:[%s9682_s0 + $0x18] sm:$0x1 pattern:$0x75316420] }
 0x325   : > { %v1205_v15 = vrot.slane %v6350_v30, %v8781_v49 }
 0x327   : > { %5616 = vmatpush1.bf16.msra.mxu0 %v8384_v31  ;;  %6149 = vmatpush1.bf16.msra.mxu1 %v8387_v32  ;;  %v1023_v31 = vsub.s32 0, %v8773_v42  ;;  %v1031_v32 = vsub.s32 2, %v8773_v42 }
 0x328   : > { %5617 = vmatprep.subr.bf16.mxu0 %v8392_v33  ;;  %6150 = vmatprep.subr.bf16.mxu1 %v8395_v25  ;;  %v1019_v33 = vld [vmem:[%s8728_s30] sm:$0xf]  ;;  %v1027_v25 = vsub.s32 1, %v8773_v42 }
 0x32b   : > { %5618 = vmatpush1.bf16.msra.mxu0 %v8390_v34  ;;  %6151 = vmatpush1.bf16.msra.mxu1 %v8393_v36  ;;  %v1035_v34 = vsub.s32 3, %v8773_v42  ;;  %v1024_v36 = vrot.slane %v1019_v33, %v1023_v31 }
 0x32c   : > { %5619 = vmatprep.subr.bf16.mxu0 %v8398_v37  ;;  %6152 = vmatprep.subr.bf16.mxu1 %v8401_v39  ;;  %v1032_v37 = vrot.slane %v1019_v33, %v1031_v32  ;;  %v1028_v39 = vrot.slane %v1019_v33, %v1027_v25 }
 0x32f   : > { %5620 = vmatpush1.bf16.msra.mxu0 %v8396_v40  ;;  %6153 = vmatpush1.bf16.msra.mxu1 %v8399_v21  ;;  %v1036_v40 = vrot.slane %v1019_v33, %v1035_v34 }
 0x330   : > { %5621 = vmatprep.subr.bf16.mxu0 %v8404_v41  ;;  %6154 = vmatprep.subr.bf16.mxu1 %v8407_v43 }
 0x333   : > { %5622 = vmatpush1.bf16.msra.mxu0 %v8402_v44  ;;  %6155 = vmatpush1.bf16.msra.mxu1 %v8405_v45 }
 0x334   : > { %5623 = vmatprep.subr.bf16.mxu0 %v8410_v46  ;;  %6156 = vmatprep.subr.bf16.mxu1 %v8413_v47 }
 0x337   : > { %5624 = vmatpush1.bf16.msra.mxu0 %v8408_v50  ;;  %6157 = vmatpush1.bf16.msra.mxu1 %v8411_v53 }
 0x338   : > { %5625 = vmatprep.subr.bf16.mxu0 %v8416_v54  ;;  %6158 = vmatprep.subr.bf16.mxu1 %v8419_v55 }
 0x33b   : > { %5626 = vmatpush1.bf16.msra.mxu0 %v8414_v38  ;;  %6159 = vmatpush1.bf16.msra.mxu1 %v8417_v56 }
 0x33c   : > { %5627 = vmatprep.subr.bf16.mxu0 %v8422_v57  ;;  %6160 = vmatprep.subr.bf16.mxu1 %v8425_v58 }
 0x33f   : > { %5628 = vmatpush1.bf16.msra.mxu0 %v8420_v48  ;;  %6161 = vmatpush1.bf16.msra.mxu1 %v8423_v59 }
 0x340   : > { %5629 = vmatprep.subr.bf16.mxu0 %v8428_v60  ;;  %6162 = vmatprep.subr.bf16.mxu1 %v8431_v13 }
 0x343   : > { %5630 = vmatpush1.bf16.msra.mxu0 %v8426_v63  ;;  %6163 = vmatpush1.bf16.msra.mxu1 %v8429_v0 }
 0x344   : > { %5631 = vmatprep.subr.bf16.mxu0 %v8434_v35  ;;  %6164 = vmatprep.subr.bf16.mxu1 %v8437_v2 }
 0x347   : > { %5632 = vmatpush1.bf16.msra.mxu0 %v8432_v3  ;;  %6165 = vmatpush1.bf16.msra.mxu1 %v8435_v51 }
 0x348   : > { %5633 = vmatprep.subr.bf16.mxu0 %v8440_v4  ;;  %6166 = vmatprep.subr.bf16.mxu1 %v8443_v5 }
 0x34b   : > { %5634 = vmatpush1.bf16.msra.mxu0 %v8438_v6  ;;  %6167 = vmatpush1.bf16.msra.mxu1 %v8441_v61 }
 0x34c   : > { %5635 = vmatprep.subr.bf16.mxu0 %v8446_v7  ;;  %6168 = vmatprep.subr.bf16.mxu1 %v8449_v8 }
 0x34f   : > { %5636 = vmatpush1.bf16.msra.mxu0 %v8444_v10  ;;  %6169 = vmatpush1.bf16.msra.mxu1 %v8447_v11 }
 0x350   : > { %5646 = vmatprep.subr.bf16.mxu0 %v8452_v12  ;;  %6179 = vmatprep.subr.bf16.mxu1 %v8455_v14 }
 0x352   : > { %5638 = vmatmul.mubr.bf16.vlgmr.msra.gmra.mrb[0].mxu0 %v1189_v16  ;;  %6171 = vmatmul.mubr.bf16.vlgmr.msra.gmra.mrb[0].mxu1 %v1189_v16 }
 0x353   : > { %5647 = vmatpush1.bf16.msra.mxu0 %v8450_v1  ;;  %6180 = vmatpush1.bf16.msra.mxu1 %v8453_v52 }
 0x354   : > { %5648 = vmatprep.subr.bf16.mxu0 %v8458_v17  ;;  %6181 = vmatprep.subr.bf16.mxu1 %v8461_v18 }
 0x355   : > { %5678 = vmatprep.mubr.bf16.mxu0 %v8582_v22  ;;  %6211 = vmatprep.mubr.bf16.mxu1 %v8582_v22 }
 0x357   : > { %5649 = vmatpush1.bf16.msra.mxu0 %v8456_v9  ;;  %6182 = vmatpush1.bf16.msra.mxu1 %v8459_v62 }
 0x358   : > { %5650 = vmatprep.subr.bf16.mxu0 %v8464_v19  ;;  %6183 = vmatprep.subr.bf16.mxu1 %v8467_v20 }
 0x35b   : > { %5651 = vmatpush1.bf16.msra.mxu0 %v8462_v23  ;;  %6184 = vmatpush1.bf16.msra.mxu1 %v8465_v24 }
 0x35c   : > { %5652 = vmatprep.subr.bf16.mxu0 %v8470_v26  ;;  %6185 = vmatprep.subr.bf16.mxu1 %v8473_v27 }
 0x35f   : > { %5653 = vmatpush1.bf16.msra.mxu0 %v8468_v28  ;;  %6186 = vmatpush1.bf16.msra.mxu1 %v8471_v29 }
 0x362   : > { %7135 = vmatmul.mubr.msk.bf16.vlgmr.msra.gmra.mrb[0].mxu0 %vm5150_vm0, %v1205_v15  ;;  %7136 = vmatmul.mubr.msk.bf16.vlgmr.msra.gmra.mrb[0].mxu1 %vm5150_vm0, %v1205_v15 }
 0x435   : > { %v5680_v21 = vpop.f32.mrb[0].mxu0  ;;  %v6213_v41 = vpop.f32.mrb[0].mxu1 }
 0x436   : > { %v7144_v43 = vadd.f32 %v5680_v21, %v1024_v36  ;;  %v7146_v44 = vadd.f32 %v6213_v41, %v1032_v37  ;;  %v5682_v45 = vpop.f32.mrb[1].mxu0  ;;  %v6215_v46 = vpop.f32.mrb[1].mxu1 }
 0x437   : > { %v7145_v47 = vadd.f32 %v5682_v45, %v1028_v39  ;;  %v7147_v50 = vadd.f32 %v6215_v46, %v1036_v40  ;;  %v5684_v53 = vpop.f32.mrb[2].mxu0  ;;  %v6217_v54 = vpop.f32.mrb[2].mxu1 }
 0x438   : > { %v5685_v55 = vpop.f32.mrb[3].mxu0  ;;  %v6218_v42 = vpop.f32.mrb[3].mxu1 }
 0x439   : > { %v7137_v38 = vpack.c.bf16 %v7145_v47, %v7144_v43  ;;  %v7138_v56 = vpack.c.bf16 %v7147_v50, %v7146_v44 }
 0x43b   : > { %v6236_v57 = vrot.slane %v7137_v38, %v8781_v49  ;;  %v6243_v58 = vrot.slane %v7138_v56, %v8781_v49 }
 0x43d   : > { %v6244_v48 = vcombine.low %v6236_v57, %v6243_v58 }
 0x43f   : > { %7139 = vst.sshfl [vmem:[%s228_s23] sm:$0x55 pattern:$0x73625140] %v6244_v48 }
 0x440 PF: > { %p16_p8 = scmp.ge.s32.totalorder %s8623_s17, 4   ;;  %s9692_s12 = smov %s8566_s13 }
 0x441   : > { %s9693_s13 = smov %s8570_s14  ;;  %s9694_s14 = smov %s8633_s20 }
 0x442   : > { %s9695_s15 = smov %s8623_s17  ;;  %18 = sbr.rel (!%p16_p8) target bundleno = 5 (0x5), region = 85 }
 0x449   :  { %6274 = vsyncpa [#allocation3], 1 }
 0x44a   :  { %6276 = vsyncpa [#allocation3 + $0x1], 1 }
 0x44b   :  { %6277 = vsyncpa [#allocation5], 1 }
 0x44c   :  { %6279 = vsyncpa [#allocation5 + $0x1], 1 }

</bundles_post_ra>
